<compile_context>
chip_gen: v7x
topology: tpu7x:2x2x1
jax: 0.10.0
libtpu: 0.0.40
codegen_flags: <defaults>
</compile_context>

<pallas_src>
import functools

import jax
import jax.numpy as jnp
from jax.experimental import pallas as pl
from jax.experimental.pallas import tpu as pltpu


# ----------------------------------------------------------------------------
# Pallas kernel: one tile of rays through the whole NeRFModule MLP.
# ----------------------------------------------------------------------------
def _nerf_module_kernel(x_pos_ref, x_dir_ref,
                        w_in_ref, w_sq_ref, b_x_ref,
                        w_density_ref, b_density_ref, b_feat_ref,
                        w_d_feat_ref, w_d_dir_ref, b_d_ref,
                        w_color_ref, b_color_ref,
                        out_ref, *, D, skips):
    f32 = jnp.float32
    bf16 = jnp.bfloat16

    x_pos = x_pos_ref[...]                    # (tile_n, input_ch)   bf16
    x_dir = x_dir_ref[...]                    # (tile_n, input_ch_d) bf16

    # ---- hidden layers (unrolled at trace time; MXU matmuls, f32 accum) ----
    acc = jnp.dot(x_pos, w_in_ref[0], preferred_element_type=f32) + b_x_ref[0]
    out_f32 = jnp.maximum(acc, 0.0)           # F.relu in f32
    out = out_f32.astype(bf16)

    skip_slot = 0
    for j in range(1, D):                     # static unroll
        acc = jnp.dot(out, w_sq_ref[j], preferred_element_type=f32)
        if (j - 1) in skips:
            # skip connection cat([input_x, out]) expressed as split-K matmuls
            skip_slot += 1
            acc = acc + jnp.dot(x_pos, w_in_ref[skip_slot],
                                preferred_element_type=f32)
        out_f32 = jnp.maximum(acc + b_x_ref[j], 0.0)
        out = out_f32.astype(bf16)

    # ---- density head: VPU multiply + lane reduction (no (W,1) MXU pass) ----
    density = (jnp.sum(out_f32 * w_density_ref[...], axis=-1, keepdims=True)
               + b_density_ref[...])

    # ---- feature head + view-dir branch; cat([feature, input_d]) as split-K --
    feature = (jnp.dot(out, w_sq_ref[0], preferred_element_type=f32)
               + b_feat_ref[...]).astype(bf16)
    h = (jnp.dot(feature, w_d_feat_ref[...], preferred_element_type=f32)
         + jnp.dot(x_dir, w_d_dir_ref[...], preferred_element_type=f32)
         + b_d_ref[...])
    h = jnp.maximum(h, 0.0).astype(bf16)
    color = (jnp.dot(h, w_color_ref[...], preferred_element_type=f32)
             + b_color_ref[...])

    out_ref[...] = jnp.concatenate([color, density], axis=-1)  # (tile_n, 4)


# ----------------------------------------------------------------------------
# Repack canonical (f32, PyTorch-shaped) params into kernel-friendly arrays:
#   - bf16 matmul weights, f32 biases
#   - skip-layer and view-dir weights pre-split (no in-kernel concat)
#   - all (W, W) weights stacked into one 3-D array (fewer DMA descriptors)
# ----------------------------------------------------------------------------
def prepare_kernel_params(params, *, D, W, input_ch, input_ch_d, skips):
    ws, bs = params[0::2], params[1::2]
    skips = tuple(sorted(skips))

    w_in_list = [ws[0]]                       # slot 0: layer-0 weight (input_ch, W)
    w_sq_list = [ws[D + 1]]                   # slot 0: linear_feat     (W, W)
    for j in range(1, D):                     # slots 1..D-1: hidden layers
        w = ws[j]
        if (j - 1) in skips:                  # rows [:input_ch] <-> input_x
            w_in_list.append(w[:input_ch, :])
            w_sq_list.append(w[input_ch:, :])
        else:
            w_sq_list.append(w)

    w_in = jnp.stack(w_in_list).astype(jnp.bfloat16)      # (1+n_skips, input_ch, W)
    w_sq = jnp.stack(w_sq_list).astype(jnp.bfloat16)      # (D, W, W)
    b_x = jnp.stack([bs[j] for j in range(D)])            # (D, 1, W) f32

    w_density = ws[D].reshape(1, W).astype(jnp.float32)   # (1, W)  (VPU path)
    b_density = bs[D]                                      # (1, 1)
    b_feat = bs[D + 1]                                     # (1, W)

    w_d = ws[D + 2]                                        # (W + input_ch_d, W//2)
    w_d_feat = w_d[:W, :].astype(jnp.bfloat16)             # feature rows
    w_d_dir = w_d[W:, :].astype(jnp.bfloat16)              # view-dir rows
    b_d = bs[D + 2]                                        # (1, W//2)

    w_color = ws[D + 3].astype(jnp.bfloat16)               # (W//2, 3)
    b_color = bs[D + 3]                                     # (1, 3)

    return (w_in, w_sq, b_x, w_density, b_density, b_feat,
            w_d_feat, w_d_dir, b_d, w_color, b_color)


# ----------------------------------------------------------------------------
# Wrapper: pallas_call with ray tiling; weights as full (untiled) blocks.
# ----------------------------------------------------------------------------
def nerf_module_forward(x, params, *, D, W, input_ch, input_ch_d, skips,
                        tile_n=512):
    N, C = x.shape
    assert C == input_ch + input_ch_d
    skips = tuple(sorted(skips))
    assert all(0 <= s < D - 1 for s in skips), "skip must not be the last layer"

    # Separate lane-clean operands; bf16 for the MXU path.
    x_pos = x[:, :input_ch].astype(jnp.bfloat16)
    x_dir = x[:, input_ch:].astype(jnp.bfloat16)

    # Pad ray count to a tile multiple (padded rows are sliced off afterwards).
    n_pad = (-N) % tile_n
    if n_pad:
        x_pos = jnp.pad(x_pos, ((0, n_pad), (0, 0)))
        x_dir = jnp.pad(x_dir, ((0, n_pad), (0, 0)))
    n_total = N + n_pad
    grid = (n_total // tile_n,)

    kparams = prepare_kernel_params(params, D=D, W=W, input_ch=input_ch,
                                    input_ch_d=input_ch_d, skips=skips)

    def _ray_spec(c):
        return pl.BlockSpec((tile_n, c), lambda i: (i, 0))

    def _const_spec(p):
        nd = p.ndim
        return pl.BlockSpec(p.shape, lambda i, _nd=nd: (0,) * _nd)

    in_specs = [_ray_spec(input_ch), _ray_spec(input_ch_d)]
    in_specs += [_const_spec(p) for p in kparams]
    out_spec = pl.BlockSpec((tile_n, 4), lambda i: (i, 0))

    kernel = functools.partial(_nerf_module_kernel, D=D, skips=skips)

    # Advisory cost estimate (helps XLA overlap coarse / fine calls).
    macs = (input_ch * W + (D - 1) * W * W + len(skips) * input_ch * W
            + W               # density
            + W * W           # feature
            + W * (W // 2) + input_ch_d * (W // 2)   # view-dir (split-K)
            + (W // 2) * 3)   # color
    bytes_accessed = (int(x_pos.size) * 2 + int(x_dir.size) * 2
                      + n_total * 4 * 4
                      + sum(int(p.size) * p.dtype.itemsize for p in kparams))
    cost = pl.CostEstimate(flops=2 * n_total * macs, transcendentals=0,
                           bytes_accessed=bytes_accessed)

    out = pl.pallas_call(
        kernel,
        out_shape=jax.ShapeDtypeStruct((n_total, 4), jnp.float32),
        grid_spec=pltpu.PrefetchScalarGridSpec(
            num_scalar_prefetch=0,
            grid=grid,
            in_specs=in_specs,
            out_specs=out_spec,
        ),
        compiler_params=pltpu.CompilerParams(
            dimension_semantics=("parallel",)),
        cost_estimate=cost,
    )(x_pos, x_dir, *kparams)

    return out[:N] if n_pad else out


# ----------------------------------------------------------------------------
# Deterministic parameter init (xavier-uniform weights, uniform biases),
# matching the nn.Linear shapes of NeRFModule.  Weights are stored transposed
# as (in, out) so the math is y = x @ W + b (== PyTorch x @ W.T + b).
# ----------------------------------------------------------------------------
def _xavier_uniform(key, shape):
    fan_in, fan_out = shape
    limit = (6.0 / (fan_in + fan_out)) ** 0.5
    return jax.random.uniform(key, shape, jnp.float32, -limit, limit)


def init_nerf_module_params(key, *, D, W, input_ch, input_ch_d, skips):
    shapes = [(input_ch, W)]
    for i in range(D - 1):
        shapes.append((W + input_ch, W) if i in skips else (W, W))
    # heads: density, feat, d (view-dir), color
    shapes += [(W, 1), (W, W), (input_ch_d + W, W // 2), (W // 2, 3)]

    params = []
    for s in shapes:
        key, kw, kb = jax.random.split(key, 3)
        w = _xavier_uniform(kw, s)
        bound = 1.0 / (s[0] ** 0.5)
        b = jax.random.uniform(kb, (1, s[1]), jnp.float32, -bound, bound)
        params += [w, b]
    return params


def init_nerf_params(key, *, D, W, input_ch, input_ch_d, skips):
    kc, kf = jax.random.split(key)
    coarse = init_nerf_module_params(kc, D=D, W=W, input_ch=input_ch,
                                     input_ch_d=input_ch_d, skips=skips)
    fine = init_nerf_module_params(kf, D=D, W=W, input_ch=input_ch,
                                   input_ch_d=input_ch_d, skips=skips)
    return {"coarse": coarse, "fine": fine}


def nerf_forward(x, nerf_params, *, is_fine=False, D, W, input_ch, input_ch_d,
                 skips, tile_n=512):
    params = nerf_params["fine"] if is_fine else nerf_params["coarse"]
    return nerf_module_forward(x, params, D=D, W=W, input_ch=input_ch,
                               input_ch_d=input_ch_d, skips=skips,
                               tile_n=tile_n)


# ----------------------------------------------------------------------------
# Pure-JAX reference mirroring the PyTorch forward (with the same bf16
# matmul / f32-accumulate mixed precision) for verification.
# ----------------------------------------------------------------------------
def nerf_module_ref(x, params, *, D, input_ch, skips,
                    matmul_dtype=jnp.bfloat16):
    ws, bs = params[0::2], params[1::2]
    input_x = x[:, :input_ch].astype(jnp.float32)
    input_d = x[:, input_ch:].astype(jnp.float32)

    def mm(a, w):
        return jnp.dot(a.astype(matmul_dtype), w.astype(matmul_dtype),
                       preferred_element_type=jnp.float32)

    out = input_x
    for i in range(D):
        out = jnp.maximum(mm(out, ws[i]) + bs[i], 0.0)
        if i in skips:
            out = jnp.concatenate([input_x, out], axis=-1)
    density = jnp.dot(out, ws[D], preferred_element_type=jnp.float32) + bs[D]
    feature = mm(out, ws[D + 1]) + bs[D + 1]
    h = jnp.concatenate([feature, input_d], axis=-1)
    h = jnp.maximum(mm(h, ws[D + 2]) + bs[D + 2], 0.0)
    color = mm(h, ws[D + 3]) + bs[D + 3]
    return jnp.concatenate([color, density], axis=-1)


# ----------------------------------------------------------------------------
if __name__ == "__main__":
    # Real NeRF module shapes (D=8, W=256, pos-enc 63, dir-enc 27) with a
    # small ray count; tile_n=512 keeps the MXU fed and the grid >= 2.
    D, W = 8, 256
    input_ch, input_ch_d = 63, 27
    skips = (4,)
    N, tile_n = 1024, 512

    key = jax.random.PRNGKey(0)
    k_params, k_x = jax.random.split(key)

    nerf_params = init_nerf_params(k_params, D=D, W=W, input_ch=input_ch,
                                   input_ch_d=input_ch_d, skips=skips)

    # Dummy ground-truth camera params (stored-only in the torch module; the
    # forward pass never touches them).
    gt_intrinsic = jnp.eye(3, dtype=jnp.float32)
    gt_extrinsic = jnp.eye(4, dtype=jnp.float32)
    _ = (gt_intrinsic, gt_extrinsic)

    x = jax.random.normal(k_x, (N, input_ch + input_ch_d), dtype=jnp.float32)

    # Coarse network (is_fine=False) and fine network (is_fine=True).
    out_coarse = nerf_forward(x, nerf_params, is_fine=False, D=D, W=W,
                              input_ch=input_ch, input_ch_d=input_ch_d,
                              skips=skips, tile_n=tile_n)
    out_fine = nerf_forward(x, nerf_params, is_fine=True, D=D, W=W,
                            input_ch=input_ch, input_ch_d=input_ch_d,
                            skips=skips, tile_n=tile_n)
    jax.block_until_ready((out_coarse, out_fine))

    ref_coarse = nerf_module_ref(x, nerf_params["coarse"], D=D,
                                 input_ch=input_ch, skips=skips)
    ref_fine = nerf_module_ref(x, nerf_params["fine"], D=D,
                               input_ch=input_ch, skips=skips)

    assert out_coarse.shape == (N, 4) and out_fine.shape == (N, 4)
    assert jnp.allclose(out_coarse, ref_coarse, atol=3e-2, rtol=3e-2), \
        float(jnp.max(jnp.abs(out_coarse - ref_coarse)))
    assert jnp.allclose(out_fine, ref_fine, atol=3e-2, rtol=3e-2), \
        float(jnp.max(jnp.abs(out_fine - ref_fine)))

    print("KERNEL_OK")
</pallas_src>

<mosaic_0001>
module attributes {stable_mosaic.version = 11 : i64} {
  func.func @_nerf_module_kernel(%arg0: i32, %arg1: memref<512x63xbf16, #tpu.memory_space<vmem>>, %arg2: memref<512x27xbf16, #tpu.memory_space<vmem>>, %arg3: memref<2x63x256xbf16, #tpu.memory_space<vmem>>, %arg4: memref<8x256x256xbf16, #tpu.memory_space<vmem>>, %arg5: memref<8x1x256xf32, #tpu.memory_space<vmem>>, %arg6: memref<1x256xf32, #tpu.memory_space<vmem>>, %arg7: memref<1x1xf32, #tpu.memory_space<vmem>>, %arg8: memref<1x256xf32, #tpu.memory_space<vmem>>, %arg9: memref<256x128xbf16, #tpu.memory_space<vmem>>, %arg10: memref<27x128xbf16, #tpu.memory_space<vmem>>, %arg11: memref<1x128xf32, #tpu.memory_space<vmem>>, %arg12: memref<128x3xbf16, #tpu.memory_space<vmem>>, %arg13: memref<1x3xf32, #tpu.memory_space<vmem>>, %arg14: memref<512x4xf32, #tpu.memory_space<vmem>>) attributes {dimension_semantics = [#tpu.dimension_semantics<parallel>], iteration_bounds = array<i64: 2>, scalar_prefetch = 0 : i64, scratch_operands = 0 : i64, tpu.core_type = #tpu.core_type<tc>, window_params = [{transform_indices = @transform_0, window_bounds = array<i64: 512, 63>}, {transform_indices = @transform_1, window_bounds = array<i64: 512, 27>}, {pipeline_mode = #tpu.pipeline_mode<synchronous>, transform_indices = @transform_2, window_bounds = array<i64: 2, 63, 256>}, {pipeline_mode = #tpu.pipeline_mode<synchronous>, transform_indices = @transform_3, window_bounds = array<i64: 8, 256, 256>}, {pipeline_mode = #tpu.pipeline_mode<synchronous>, transform_indices = @transform_4, window_bounds = array<i64: 8, 1, 256>}, {pipeline_mode = #tpu.pipeline_mode<synchronous>, transform_indices = @transform_5, window_bounds = array<i64: 1, 256>}, {pipeline_mode = #tpu.pipeline_mode<synchronous>, transform_indices = @transform_6, window_bounds = array<i64: 1, 1>}, {pipeline_mode = #tpu.pipeline_mode<synchronous>, transform_indices = @transform_7, window_bounds = array<i64: 1, 256>}, {pipeline_mode = #tpu.pipeline_mode<synchronous>, transform_indices = @transform_8, window_bounds = array<i64: 256, 128>}, {pipeline_mode = #tpu.pipeline_mode<synchronous>, transform_indices = @transform_9, window_bounds = array<i64: 27, 128>}, {pipeline_mode = #tpu.pipeline_mode<synchronous>, transform_indices = @transform_10, window_bounds = array<i64: 1, 128>}, {pipeline_mode = #tpu.pipeline_mode<synchronous>, transform_indices = @transform_11, window_bounds = array<i64: 128, 3>}, {pipeline_mode = #tpu.pipeline_mode<synchronous>, transform_indices = @transform_12, window_bounds = array<i64: 1, 3>}, {transform_indices = @transform_13, window_bounds = array<i64: 512, 4>}]} {
    %c0 = arith.constant 0 : index
    %c0_0 = arith.constant 0 : index
    %0 = vector.load %arg1[%c0, %c0_0] : memref<512x63xbf16, #tpu.memory_space<vmem>>, vector<512x63xbf16>
    %c0_1 = arith.constant 0 : index
    %c0_2 = arith.constant 0 : index
    %1 = vector.load %arg2[%c0_1, %c0_2] : memref<512x27xbf16, #tpu.memory_space<vmem>>, vector<512x27xbf16>
    %c0_3 = arith.constant 0 : index
    %c0_4 = arith.constant 0 : index
    %c0_5 = arith.constant 0 : index
    %2 = vector.load %arg3[%c0_3, %c0_4, %c0_5] : memref<2x63x256xbf16, #tpu.memory_space<vmem>>, vector<1x63x256xbf16>
    %3 = vector.shape_cast %2 : vector<1x63x256xbf16> to vector<63x256xbf16>
    %cst = arith.constant dense<0.000000e+00> : vector<512x256xf32>
    %4 = tpu.matmul %0, %3, %cst {dimension_numbers = #tpu.dot_dimension_numbers<[1], [0], [0], [1], [0, 0, 1, 1], [], []>} : vector<512x63xbf16>, vector<63x256xbf16>, vector<512x256xf32> -> vector<512x256xf32>
    %c0_6 = arith.constant 0 : index
    %c0_7 = arith.constant 0 : index
    %c0_8 = arith.constant 0 : index
    %5 = vector.load %arg5[%c0_6, %c0_7, %c0_8] : memref<8x1x256xf32, #tpu.memory_space<vmem>>, vector<1x1x256xf32>
    %6 = vector.shape_cast %5 : vector<1x1x256xf32> to vector<1x256xf32>
    %7 = vector.broadcast %6 : vector<1x256xf32> to vector<512x256xf32>
    %8 = arith.addf %4, %7 : vector<512x256xf32>
    %cst_9 = arith.constant 0.000000e+00 : f32
    %9 = vector.broadcast %cst_9 : f32 to vector<512x256xf32>
    %10 = arith.maximumf %8, %9 : vector<512x256xf32>
    %11 = arith.truncf %10 : vector<512x256xf32> to vector<512x256xbf16>
    %c1 = arith.constant 1 : index
    %c0_10 = arith.constant 0 : index
    %c0_11 = arith.constant 0 : index
    %12 = vector.load %arg4[%c1, %c0_10, %c0_11] : memref<8x256x256xbf16, #tpu.memory_space<vmem>>, vector<1x256x256xbf16>
    %13 = vector.shape_cast %12 : vector<1x256x256xbf16> to vector<256x256xbf16>
    %cst_12 = arith.constant dense<0.000000e+00> : vector<512x256xf32>
    %14 = tpu.matmul %11, %13, %cst_12 {dimension_numbers = #tpu.dot_dimension_numbers<[1], [0], [0], [1], [0, 0, 1, 1], [], []>} : vector<512x256xbf16>, vector<256x256xbf16>, vector<512x256xf32> -> vector<512x256xf32>
    %c1_13 = arith.constant 1 : index
    %c0_14 = arith.constant 0 : index
    %c0_15 = arith.constant 0 : index
    %15 = vector.load %arg5[%c1_13, %c0_14, %c0_15] : memref<8x1x256xf32, #tpu.memory_space<vmem>>, vector<1x1x256xf32>
    %16 = vector.shape_cast %15 : vector<1x1x256xf32> to vector<1x256xf32>
    %17 = vector.broadcast %16 : vector<1x256xf32> to vector<512x256xf32>
    %18 = arith.addf %14, %17 : vector<512x256xf32>
    %cst_16 = arith.constant 0.000000e+00 : f32
    %19 = vector.broadcast %cst_16 : f32 to vector<512x256xf32>
    %20 = arith.maximumf %18, %19 : vector<512x256xf32>
    %21 = arith.truncf %20 : vector<512x256xf32> to vector<512x256xbf16>
    %c2 = arith.constant 2 : index
    %c0_17 = arith.constant 0 : index
    %c0_18 = arith.constant 0 : index
    %22 = vector.load %arg4[%c2, %c0_17, %c0_18] : memref<8x256x256xbf16, #tpu.memory_space<vmem>>, vector<1x256x256xbf16>
    %23 = vector.shape_cast %22 : vector<1x256x256xbf16> to vector<256x256xbf16>
    %cst_19 = arith.constant dense<0.000000e+00> : vector<512x256xf32>
    %24 = tpu.matmul %21, %23, %cst_19 {dimension_numbers = #tpu.dot_dimension_numbers<[1], [0], [0], [1], [0, 0, 1, 1], [], []>} : vector<512x256xbf16>, vector<256x256xbf16>, vector<512x256xf32> -> vector<512x256xf32>
    %c2_20 = arith.constant 2 : index
    %c0_21 = arith.constant 0 : index
    %c0_22 = arith.constant 0 : index
    %25 = vector.load %arg5[%c2_20, %c0_21, %c0_22] : memref<8x1x256xf32, #tpu.memory_space<vmem>>, vector<1x1x256xf32>
    %26 = vector.shape_cast %25 : vector<1x1x256xf32> to vector<1x256xf32>
    %27 = vector.broadcast %26 : vector<1x256xf32> to vector<512x256xf32>
    %28 = arith.addf %24, %27 : vector<512x256xf32>
    %cst_23 = arith.constant 0.000000e+00 : f32
    %29 = vector.broadcast %cst_23 : f32 to vector<512x256xf32>
    %30 = arith.maximumf %28, %29 : vector<512x256xf32>
    %31 = arith.truncf %30 : vector<512x256xf32> to vector<512x256xbf16>
    %c3 = arith.constant 3 : index
    %c0_24 = arith.constant 0 : index
    %c0_25 = arith.constant 0 : index
    %32 = vector.load %arg4[%c3, %c0_24, %c0_25] : memref<8x256x256xbf16, #tpu.memory_space<vmem>>, vector<1x256x256xbf16>
    %33 = vector.shape_cast %32 : vector<1x256x256xbf16> to vector<256x256xbf16>
    %cst_26 = arith.constant dense<0.000000e+00> : vector<512x256xf32>
    %34 = tpu.matmul %31, %33, %cst_26 {dimension_numbers = #tpu.dot_dimension_numbers<[1], [0], [0], [1], [0, 0, 1, 1], [], []>} : vector<512x256xbf16>, vector<256x256xbf16>, vector<512x256xf32> -> vector<512x256xf32>
    %c3_27 = arith.constant 3 : index
    %c0_28 = arith.constant 0 : index
    %c0_29 = arith.constant 0 : index
    %35 = vector.load %arg5[%c3_27, %c0_28, %c0_29] : memref<8x1x256xf32, #tpu.memory_space<vmem>>, vector<1x1x256xf32>
    %36 = vector.shape_cast %35 : vector<1x1x256xf32> to vector<1x256xf32>
    %37 = vector.broadcast %36 : vector<1x256xf32> to vector<512x256xf32>
    %38 = arith.addf %34, %37 : vector<512x256xf32>
    %cst_30 = arith.constant 0.000000e+00 : f32
    %39 = vector.broadcast %cst_30 : f32 to vector<512x256xf32>
    %40 = arith.maximumf %38, %39 : vector<512x256xf32>
    %41 = arith.truncf %40 : vector<512x256xf32> to vector<512x256xbf16>
    %c4 = arith.constant 4 : index
    %c0_31 = arith.constant 0 : index
    %c0_32 = arith.constant 0 : index
    %42 = vector.load %arg4[%c4, %c0_31, %c0_32] : memref<8x256x256xbf16, #tpu.memory_space<vmem>>, vector<1x256x256xbf16>
    %43 = vector.shape_cast %42 : vector<1x256x256xbf16> to vector<256x256xbf16>
    %cst_33 = arith.constant dense<0.000000e+00> : vector<512x256xf32>
    %44 = tpu.matmul %41, %43, %cst_33 {dimension_numbers = #tpu.dot_dimension_numbers<[1], [0], [0], [1], [0, 0, 1, 1], [], []>} : vector<512x256xbf16>, vector<256x256xbf16>, vector<512x256xf32> -> vector<512x256xf32>
    %c4_34 = arith.constant 4 : index
    %c0_35 = arith.constant 0 : index
    %c0_36 = arith.constant 0 : index
    %45 = vector.load %arg5[%c4_34, %c0_35, %c0_36] : memref<8x1x256xf32, #tpu.memory_space<vmem>>, vector<1x1x256xf32>
    %46 = vector.shape_cast %45 : vector<1x1x256xf32> to vector<1x256xf32>
    %47 = vector.broadcast %46 : vector<1x256xf32> to vector<512x256xf32>
    %48 = arith.addf %44, %47 : vector<512x256xf32>
    %cst_37 = arith.constant 0.000000e+00 : f32
    %49 = vector.broadcast %cst_37 : f32 to vector<512x256xf32>
    %50 = arith.maximumf %48, %49 : vector<512x256xf32>
    %51 = arith.truncf %50 : vector<512x256xf32> to vector<512x256xbf16>
    %c5 = arith.constant 5 : index
    %c0_38 = arith.constant 0 : index
    %c0_39 = arith.constant 0 : index
    %52 = vector.load %arg4[%c5, %c0_38, %c0_39] : memref<8x256x256xbf16, #tpu.memory_space<vmem>>, vector<1x256x256xbf16>
    %53 = vector.shape_cast %52 : vector<1x256x256xbf16> to vector<256x256xbf16>
    %cst_40 = arith.constant dense<0.000000e+00> : vector<512x256xf32>
    %54 = tpu.matmul %51, %53, %cst_40 {dimension_numbers = #tpu.dot_dimension_numbers<[1], [0], [0], [1], [0, 0, 1, 1], [], []>} : vector<512x256xbf16>, vector<256x256xbf16>, vector<512x256xf32> -> vector<512x256xf32>
    %c1_41 = arith.constant 1 : index
    %c0_42 = arith.constant 0 : index
    %c0_43 = arith.constant 0 : index
    %55 = vector.load %arg3[%c1_41, %c0_42, %c0_43] : memref<2x63x256xbf16, #tpu.memory_space<vmem>>, vector<1x63x256xbf16>
    %56 = vector.shape_cast %55 : vector<1x63x256xbf16> to vector<63x256xbf16>
    %cst_44 = arith.constant dense<0.000000e+00> : vector<512x256xf32>
    %57 = tpu.matmul %0, %56, %cst_44 {dimension_numbers = #tpu.dot_dimension_numbers<[1], [0], [0], [1], [0, 0, 1, 1], [], []>} : vector<512x63xbf16>, vector<63x256xbf16>, vector<512x256xf32> -> vector<512x256xf32>
    %58 = arith.addf %54, %57 : vector<512x256xf32>
    %c5_45 = arith.constant 5 : index
    %c0_46 = arith.constant 0 : index
    %c0_47 = arith.constant 0 : index
    %59 = vector.load %arg5[%c5_45, %c0_46, %c0_47] : memref<8x1x256xf32, #tpu.memory_space<vmem>>, vector<1x1x256xf32>
    %60 = vector.shape_cast %59 : vector<1x1x256xf32> to vector<1x256xf32>
    %61 = vector.broadcast %60 : vector<1x256xf32> to vector<512x256xf32>
    %62 = arith.addf %58, %61 : vector<512x256xf32>
    %cst_48 = arith.constant 0.000000e+00 : f32
    %63 = vector.broadcast %cst_48 : f32 to vector<512x256xf32>
    %64 = arith.maximumf %62, %63 : vector<512x256xf32>
    %65 = arith.truncf %64 : vector<512x256xf32> to vector<512x256xbf16>
    %c6 = arith.constant 6 : index
    %c0_49 = arith.constant 0 : index
    %c0_50 = arith.constant 0 : index
    %66 = vector.load %arg4[%c6, %c0_49, %c0_50] : memref<8x256x256xbf16, #tpu.memory_space<vmem>>, vector<1x256x256xbf16>
    %67 = vector.shape_cast %66 : vector<1x256x256xbf16> to vector<256x256xbf16>
    %cst_51 = arith.constant dense<0.000000e+00> : vector<512x256xf32>
    %68 = tpu.matmul %65, %67, %cst_51 {dimension_numbers = #tpu.dot_dimension_numbers<[1], [0], [0], [1], [0, 0, 1, 1], [], []>} : vector<512x256xbf16>, vector<256x256xbf16>, vector<512x256xf32> -> vector<512x256xf32>
    %c6_52 = arith.constant 6 : index
    %c0_53 = arith.constant 0 : index
    %c0_54 = arith.constant 0 : index
    %69 = vector.load %arg5[%c6_52, %c0_53, %c0_54] : memref<8x1x256xf32, #tpu.memory_space<vmem>>, vector<1x1x256xf32>
    %70 = vector.shape_cast %69 : vector<1x1x256xf32> to vector<1x256xf32>
    %71 = vector.broadcast %70 : vector<1x256xf32> to vector<512x256xf32>
    %72 = arith.addf %68, %71 : vector<512x256xf32>
    %cst_55 = arith.constant 0.000000e+00 : f32
    %73 = vector.broadcast %cst_55 : f32 to vector<512x256xf32>
    %74 = arith.maximumf %72, %73 : vector<512x256xf32>
    %75 = arith.truncf %74 : vector<512x256xf32> to vector<512x256xbf16>
    %c7 = arith.constant 7 : index
    %c0_56 = arith.constant 0 : index
    %c0_57 = arith.constant 0 : index
    %76 = vector.load %arg4[%c7, %c0_56, %c0_57] : memref<8x256x256xbf16, #tpu.memory_space<vmem>>, vector<1x256x256xbf16>
    %77 = vector.shape_cast %76 : vector<1x256x256xbf16> to vector<256x256xbf16>
    %cst_58 = arith.constant dense<0.000000e+00> : vector<512x256xf32>
    %78 = tpu.matmul %75, %77, %cst_58 {dimension_numbers = #tpu.dot_dimension_numbers<[1], [0], [0], [1], [0, 0, 1, 1], [], []>} : vector<512x256xbf16>, vector<256x256xbf16>, vector<512x256xf32> -> vector<512x256xf32>
    %c7_59 = arith.constant 7 : index
    %c0_60 = arith.constant 0 : index
    %c0_61 = arith.constant 0 : index
    %79 = vector.load %arg5[%c7_59, %c0_60, %c0_61] : memref<8x1x256xf32, #tpu.memory_space<vmem>>, vector<1x1x256xf32>
    %80 = vector.shape_cast %79 : vector<1x1x256xf32> to vector<1x256xf32>
    %81 = vector.broadcast %80 : vector<1x256xf32> to vector<512x256xf32>
    %82 = arith.addf %78, %81 : vector<512x256xf32>
    %cst_62 = arith.constant 0.000000e+00 : f32
    %83 = vector.broadcast %cst_62 : f32 to vector<512x256xf32>
    %84 = arith.maximumf %82, %83 : vector<512x256xf32>
    %85 = arith.truncf %84 : vector<512x256xf32> to vector<512x256xbf16>
    %c0_63 = arith.constant 0 : index
    %c0_64 = arith.constant 0 : index
    %86 = vector.load %arg6[%c0_63, %c0_64] : memref<1x256xf32, #tpu.memory_space<vmem>>, vector<1x256xf32>
    %87 = vector.broadcast %86 : vector<1x256xf32> to vector<512x256xf32>
    %88 = arith.mulf %84, %87 : vector<512x256xf32>
    %cst_65 = arith.constant dense<0.000000e+00> : vector<512xf32>
    %89 = vector.multi_reduction <add>, %88, %cst_65 [1] : vector<512x256xf32> to vector<512xf32>
    %90 = vector.shape_cast %89 : vector<512xf32> to vector<512x1xf32>
    %c0_66 = arith.constant 0 : index
    %c0_67 = arith.constant 0 : index
    %91 = vector.load %arg7[%c0_66, %c0_67] : memref<1x1xf32, #tpu.memory_space<vmem>>, vector<1x1xf32>
    %92 = vector.broadcast %91 : vector<1x1xf32> to vector<512x1xf32>
    %93 = arith.addf %90, %92 : vector<512x1xf32>
    %c0_68 = arith.constant 0 : index
    %c0_69 = arith.constant 0 : index
    %c0_70 = arith.constant 0 : index
    %94 = vector.load %arg4[%c0_68, %c0_69, %c0_70] : memref<8x256x256xbf16, #tpu.memory_space<vmem>>, vector<1x256x256xbf16>
    %95 = vector.shape_cast %94 : vector<1x256x256xbf16> to vector<256x256xbf16>
    %cst_71 = arith.constant dense<0.000000e+00> : vector<512x256xf32>
    %96 = tpu.matmul %85, %95, %cst_71 {dimension_numbers = #tpu.dot_dimension_numbers<[1], [0], [0], [1], [0, 0, 1, 1], [], []>} : vector<512x256xbf16>, vector<256x256xbf16>, vector<512x256xf32> -> vector<512x256xf32>
    %c0_72 = arith.constant 0 : index
    %c0_73 = arith.constant 0 : index
    %97 = vector.load %arg8[%c0_72, %c0_73] : memref<1x256xf32, #tpu.memory_space<vmem>>, vector<1x256xf32>
    %98 = vector.broadcast %97 : vector<1x256xf32> to vector<512x256xf32>
    %99 = arith.addf %96, %98 : vector<512x256xf32>
    %100 = arith.truncf %99 : vector<512x256xf32> to vector<512x256xbf16>
    %c0_74 = arith.constant 0 : index
    %c0_75 = arith.constant 0 : index
    %101 = vector.load %arg9[%c0_74, %c0_75] : memref<256x128xbf16, #tpu.memory_space<vmem>>, vector<256x128xbf16>
    %cst_76 = arith.constant dense<0.000000e+00> : vector<512x128xf32>
    %102 = tpu.matmul %100, %101, %cst_76 {dimension_numbers = #tpu.dot_dimension_numbers<[1], [0], [0], [1], [0, 0, 1, 1], [], []>} : vector<512x256xbf16>, vector<256x128xbf16>, vector<512x128xf32> -> vector<512x128xf32>
    %c0_77 = arith.constant 0 : index
    %c0_78 = arith.constant 0 : index
    %103 = vector.load %arg10[%c0_77, %c0_78] : memref<27x128xbf16, #tpu.memory_space<vmem>>, vector<27x128xbf16>
    %cst_79 = arith.constant dense<0.000000e+00> : vector<512x128xf32>
    %104 = tpu.matmul %1, %103, %cst_79 {dimension_numbers = #tpu.dot_dimension_numbers<[1], [0], [0], [1], [0, 0, 1, 1], [], []>} : vector<512x27xbf16>, vector<27x128xbf16>, vector<512x128xf32> -> vector<512x128xf32>
    %105 = arith.addf %102, %104 : vector<512x128xf32>
    %c0_80 = arith.constant 0 : index
    %c0_81 = arith.constant 0 : index
    %106 = vector.load %arg11[%c0_80, %c0_81] : memref<1x128xf32, #tpu.memory_space<vmem>>, vector<1x128xf32>
    %107 = vector.broadcast %106 : vector<1x128xf32> to vector<512x128xf32>
    %108 = arith.addf %105, %107 : vector<512x128xf32>
    %cst_82 = arith.constant 0.000000e+00 : f32
    %109 = vector.broadcast %cst_82 : f32 to vector<512x128xf32>
    %110 = arith.maximumf %108, %109 : vector<512x128xf32>
    %111 = arith.truncf %110 : vector<512x128xf32> to vector<512x128xbf16>
    %c0_83 = arith.constant 0 : index
    %c0_84 = arith.constant 0 : index
    %112 = vector.load %arg12[%c0_83, %c0_84] : memref<128x3xbf16, #tpu.memory_space<vmem>>, vector<128x3xbf16>
    %cst_85 = arith.constant dense<0.000000e+00> : vector<512x3xf32>
    %113 = tpu.matmul %111, %112, %cst_85 {dimension_numbers = #tpu.dot_dimension_numbers<[1], [0], [0], [1], [0, 0, 1, 1], [], []>} : vector<512x128xbf16>, vector<128x3xbf16>, vector<512x3xf32> -> vector<512x3xf32>
    %c0_86 = arith.constant 0 : index
    %c0_87 = arith.constant 0 : index
    %114 = vector.load %arg13[%c0_86, %c0_87] : memref<1x3xf32, #tpu.memory_space<vmem>>, vector<1x3xf32>
    %115 = vector.broadcast %114 : vector<1x3xf32> to vector<512x3xf32>
    %116 = arith.addf %113, %115 : vector<512x3xf32>
    %117 = tpu.concatenate %116, %93 in 1 : vector<512x3xf32>, vector<512x1xf32> -> vector<512x4xf32>
    %c0_88 = arith.constant 0 : index
    %c0_89 = arith.constant 0 : index
    %118 = vector.load %arg14[%c0_88, %c0_89] : memref<512x4xf32, #tpu.memory_space<vmem>>, vector<512x4xf32>
    tpu.vector_store %arg14[%c0_88, %c0_89], %117 {strides = array<i32>} : memref<512x4xf32, #tpu.memory_space<vmem>>, vector<512x4xf32>,
    return
  }
  func.func @transform_0(%arg0: i32) -> (i32, i32) {
    %c0_i32 = arith.constant 0 : i32
    %c0_i32_0 = arith.constant 0 : i32
    return %arg0, %c0_i32 : i32, i32
  }
  func.func @transform_1(%arg0: i32) -> (i32, i32) {
    %c0_i32 = arith.constant 0 : i32
    %c0_i32_0 = arith.constant 0 : i32
    return %arg0, %c0_i32 : i32, i32
  }
  func.func @transform_2(%arg0: i32) -> (i32, i32, i32) {
    %c0_i32 = arith.constant 0 : i32
    %c0_i32_0 = arith.constant 0 : i32
    %c0_i32_1 = arith.constant 0 : i32
    %c0_i32_2 = arith.constant 0 : i32
    return %c0_i32, %c0_i32_0, %c0_i32_1 : i32, i32, i32
  }
  func.func @transform_3(%arg0: i32) -> (i32, i32, i32) {
    %c0_i32 = arith.constant 0 : i32
    %c0_i32_0 = arith.constant 0 : i32
    %c0_i32_1 = arith.constant 0 : i32
    %c0_i32_2 = arith.constant 0 : i32
    return %c0_i32, %c0_i32_0, %c0_i32_1 : i32, i32, i32
  }
  func.func @transform_4(%arg0: i32) -> (i32, i32, i32) {
    %c0_i32 = arith.constant 0 : i32
    %c0_i32_0 = arith.constant 0 : i32
    %c0_i32_1 = arith.constant 0 : i32
    %c0_i32_2 = arith.constant 0 : i32
    return %c0_i32, %c0_i32_0, %c0_i32_1 : i32, i32, i32
  }
  func.func @transform_5(%arg0: i32) -> (i32, i32) {
    %c0_i32 = arith.constant 0 : i32
    %c0_i32_0 = arith.constant 0 : i32
    %c0_i32_1 = arith.constant 0 : i32
    return %c0_i32, %c0_i32_0 : i32, i32
  }
  func.func @transform_6(%arg0: i32) -> (i32, i32) {
    %c0_i32 = arith.constant 0 : i32
    %c0_i32_0 = arith.constant 0 : i32
    %c0_i32_1 = arith.constant 0 : i32
    return %c0_i32, %c0_i32_0 : i32, i32
  }
  func.func @transform_7(%arg0: i32) -> (i32, i32) {
    %c0_i32 = arith.constant 0 : i32
    %c0_i32_0 = arith.constant 0 : i32
    %c0_i32_1 = arith.constant 0 : i32
    return %c0_i32, %c0_i32_0 : i32, i32
  }
  func.func @transform_8(%arg0: i32) -> (i32, i32) {
    %c0_i32 = arith.constant 0 : i32
    %c0_i32_0 = arith.constant 0 : i32
    %c0_i32_1 = arith.constant 0 : i32
    return %c0_i32, %c0_i32_0 : i32, i32
  }
  func.func @transform_9(%arg0: i32) -> (i32, i32) {
    %c0_i32 = arith.constant 0 : i32
    %c0_i32_0 = arith.constant 0 : i32
    %c0_i32_1 = arith.constant 0 : i32
    return %c0_i32, %c0_i32_0 : i32, i32
  }
  func.func @transform_10(%arg0: i32) -> (i32, i32) {
    %c0_i32 = arith.constant 0 : i32
    %c0_i32_0 = arith.constant 0 : i32
    %c0_i32_1 = arith.constant 0 : i32
    return %c0_i32, %c0_i32_0 : i32, i32
  }
  func.func @transform_11(%arg0: i32) -> (i32, i32) {
    %c0_i32 = arith.constant 0 : i32
    %c0_i32_0 = arith.constant 0 : i32
    %c0_i32_1 = arith.constant 0 : i32
    return %c0_i32, %c0_i32_0 : i32, i32
  }
  func.func @transform_12(%arg0: i32) -> (i32, i32) {
    %c0_i32 = arith.constant 0 : i32
    %c0_i32_0 = arith.constant 0 : i32
    %c0_i32_1 = arith.constant 0 : i32
    return %c0_i32, %c0_i32_0 : i32, i32
  }
  func.func @transform_13(%arg0: i32) -> (i32, i32) {
    %c0_i32 = arith.constant 0 : i32
    %c0_i32_0 = arith.constant 0 : i32
    return %arg0, %c0_i32 : i32, i32
  }
}

</mosaic_0001>

<bundles_post_ra>
// kernel: tpu_custom_call.1
= control target key start
LH: loop header
LB: loop body
LE: loop exit
PB: predicated region body
PF: predicated region fallthrough
CT: control target
= control target key end

     0   :  { %s15525_s0 = inlined_call_operand.vmem [shape: bf16[1024,63], index: 0, kind: input, shape index: {}]   ;;  %s15526_s1 = inlined_call_operand.vmem [shape: bf16[1024,27], index: 1, kind: input, shape index: {}]   ;;  %s15527_s2 = inlined_call_operand.vmem [shape: bf16[2,63,256], index: 2, kind: input, shape index: {}]   ;;  %s15528_s3 = inlined_call_operand.hbm [shape: bf16[8,256,256], index: 3, kind: input, shape index: {}]   ;;  %s15529_s4 = inlined_call_operand.vmem [shape: f32[8,1,256], index: 4, kind: input, shape index: {}]   ;;  %s15530_s5 = inlined_call_operand.vmem [shape: f32[1,256], index: 5, kind: input, shape index: {}]   ;;  %s15531_s6 = inlined_call_operand.<no memory space> [shape: f32[1,1], index: 6, kind: input, shape index: {}]   ;;  %s15532_s7 = inlined_call_operand.vmem [shape: f32[1,256], index: 7, kind: input, shape index: {}]   ;;  %s15533_s8 = inlined_call_operand.vmem [shape: bf16[256,128], index: 8, kind: input, shape index: {}]   ;;  %s15534_s9 = inlined_call_operand.vmem [shape: bf16[27,128], index: 9, kind: input, shape index: {}]   ;;  %s15535_s10 = inlined_call_operand.vmem [shape: f32[1,128], index: 10, kind: input, shape index: {}]   ;;  %s15536_s11 = inlined_call_operand.vmem [shape: bf16[128,3], index: 11, kind: input, shape index: {}]   ;;  %s15537_s12 = inlined_call_operand.vmem [shape: f32[1,3], index: 12, kind: input, shape index: {}]   ;;  %s15538_s13 = inlined_call_operand.vmem [shape: f32[1024,4], index: 13, kind: output, shape index: {}]  }
   0x1   :  { %v18_v0 = vstv %s15531_s6 }
   0x2   :  { %19 = vst [vmem:[#allocation2] sm:$0x1] %v18_v0 }
   0x3   :  { %20 = vsyncpa [#allocation4], 0  ;;  %s11824_s27 = smov 0  }
   0x4 LB: > { %s10275_s28 = sadd.s32 4294967295, %s11743_s27   ;;  %p10277_p0 = scmp.ge.s32.totalorder %s11743_s27, 1  ;;  %s11743_s27 = sphi %s11824_s27, %s26_s27  }
   0x5   : > { %p340_p1 = scmp.lt.s32.totalorder %s11743_s27, 3  ;;  %s11745_s29 = smov [#allocation3]  }
   0x6   : > { %s355_s30 = sshll.u32 %s11745_s29, 4  ;;  %p11838_p3 = scmp.eq.s32.totalorder %s10275_s28, 0  ;;  %s356_s30 = int_to_ptr.vmem [resolvable:$true] %s355_s30 }
   0x7   : > { %p11832_p2 = pnand %p10277_p0, %p340_p1  ;;  %s11705_s18 = scalar_lea.hbm %s15528_s3, 32768 }
   0x8   : > { %s15543_s14 = scalar_select %p11838_p3, 1, 0 }
   0x9   : > { %s15542_s6 = scalar_select %p11832_p2, 1, 0 }
   0xa   : > { %p11152_p4 = pneg %p11832_p2  ;;  %p11706_p6 = scmp.ne.s32.totalorder %s15528_s3, %s11705_s18 }
   0xb   : > { %p11712_p10 = scmp.lt.u32.totalorder %s11705_s18, %s15528_s3 }
   0xc   : > { %p11846_p5 = pnand %p11838_p3, %p11152_p4 }
   0xe   : > { %p11707_p7 = pneg %p11846_p5 }
  0x10   : > { %p11708_p8 = pnand %p11707_p7, %p11706_p6 }
  0x12   : > { %p11709_p9 = pneg %p11708_p8 }
  0x14   : > { %p11714_p11 = pnand %p11712_p10, %p11709_p9 }
  0x16   : > { %11717 = shalt.err (!%p11714_p11)
}
  0x17   : > { %s11718_s23 = scalar_lea.vmem %s356_s30, 32768  ;;  %p11726_p1 = scmp.lt.s32.totalorder %s356_s30, %s356_s30 }
  0x18   : > { %p11719_p12 = scmp.ne.s32.totalorder %s356_s30, %s11718_s23  ;;  %p11727_p4 = scmp.lt.s32.totalorder %s11718_s23, %s11718_s23 }
  0x1a   : > { %p11721_p13 = pnand %p11719_p12, %p11707_p7  ;;  %p11728_p3 = por %p11727_p4, %p11726_p1 }
  0x1c   : > { %p11722_p0 = pneg %p11721_p13 }
  0x1e   : > { %p11729_p2 = pnand %p11728_p3, %p11722_p0 }
  0x20   : > { %11732 = shalt.err (!%p11729_p2)
}
  0x21   : > { %s11746_s24 = smov 128   ;;  %s11747_s25 = smov 8  }
  0x22   : > { %11155 = dma.hbm_to_vmem [thread:$0]  (!%p11846_p5), %s15528_s3, 32768, %s356_s30, [#allocation4], %s11746_s24, %s11746_s24, %s11747_s25  }
  0x23   : > { %p15545_p6 = scmp.ne.s32.totalorder %s15542_s6, 0 }
  0x25   : > { %416 = sbr.rel (%p15545_p6) target bundleno = 3042 (0xbe2), region = 72 }
  0x2c   : > { %p15546_p8 = scmp.ne.s32.totalorder %s15543_s14, 0 }
  0x2e   : > { %11738 = dma.done.wait (%p15546_p8), [#allocation4], 32768  }
  0x2f   : > { %11740 = vsyncadd (%p15546_p8), [#allocation4], 4294934528  ;;  %v11748_v1 = vmov 0   ;;  %s10282_s16 = sshll.u32 %s10275_s28, 6  ;;  %vm927_vm0 = vcmask 1046528   ;;  %vm928_vm1 = vcmask 1047552  }
  0x30   : > { %969 = vmatprep.mubr.bf16.mxu0 %v11748_v1  ;;  %p466_p2 = scmp.lt.s32.totalorder %s10282_s16, 127  ;;  %v11172_v2 = vld [vmem:[%s15527_s2 + $0x4] ss:$8 sps:$4 sm:$0xff]   ;;  %v11174_v3 = vld [vmem:[%s15527_s2] ss:$8 sps:$4 sm:$0xff]   ;;  %v11749_v5 = vmov 65535  }
  0x31   : > { %937 = vmatprep.subr.bf16.mxu0 %v11172_v2  ;;  %v11175_v4 = vld [vmem:[%s15527_s2 + $0x14] ss:$8 sps:$4 sm:$0xff]   ;;  %v929_v6 = vsel %vm927_vm0, 4294967295, %v11749_v5  ;;  %v11177_v7 = vld [vmem:[%s15527_s2 + $0x10] ss:$8 sps:$4 sm:$0xff]   ;;  %vm830_vm2 = vcmask 515072  }
  0x32   : > { %s15612_s16 = smov (!%p466_p2, %s10282_s16), 127  ;;  %938 = vmatpush1.bf16.msra.mxu0 %v11174_v3  ;;  %v11178_v8 = vld [vmem:[%s15527_s2 + $0x24] ss:$8 sps:$4 sm:$0xff]   ;;  %v11181_v9 = vld [vmem:[%s15527_s2 + $0x34] ss:$8 sps:$4 sm:$0xff]   ;;  %v11904_v10 = vsel %vm928_vm1, %v929_v6, 0 }
  0x33   : > { %s10283_s14 = sshll.u32 %s15612_s16, 2  ;;  %939 = vmatprep.subr.bf16.mxu0 %v11175_v4  ;;  %v11180_v11 = vld [vmem:[%s15527_s2 + $0x20] ss:$8 sps:$4 sm:$0xff]   ;;  %v11183_v12 = vld [vmem:[%s15527_s2 + $0x30] ss:$8 sps:$4 sm:$0xff]   ;;  %v935_v13 = vand.u32 %v11181_v9, %v11904_v10  ;;  %vm8601_vm3 = vcmask 1044480  }
  0x34   : > { %s11902_s29 = scalar_lea.vmem %s15525_s0, %s10283_s14  ;;  %v932_v14 = vand.u32 %v11183_v12, %v11904_v10  ;;  %v11204_v19 = vld [vmem:[#allocation3 + $0x104] ss:$8 sps:$4 sm:$0xff]   ;;  %v11206_v20 = vld [vmem:[#allocation3 + $0x100] ss:$8 sps:$4 sm:$0xff]   ;;  %v11208_v22 = vld [vmem:[#allocation3 + $0x114] ss:$8 sps:$4 sm:$0xff]   ;;  %s13701_s15 = scalar_lea.vmem %s15526_s1, %s10283_s14 }
  0x35   : > { %v11184_v15 = vld [vmem:[%s11902_s29] sm:$0xff]   ;;  %v11185_v16 = vld [vmem:[%s11902_s29 + $0x8] sm:$0xff]   ;;  %v11186_v17 = vld [vmem:[%s11902_s29 + $0x10] sm:$0xff]   ;;  %1688 = vmatprep.subr.bf16.mxu1 %v11204_v19  ;;  %vm8602_vm4 = vcmask 1045504   ;;  %vm8504_vm5 = vcmask 220160   ;;  %s11750_s14 = smov 3  }
  0x36   : > { %940 = vmatpush1.bf16.msra.mxu0 %v11177_v7  ;;  %v11187_v18 = vld [vmem:[%s11902_s29 + $0x18] sm:$0xff]   ;;  %v11188_v21 = vld [vmem:[%s11902_s29 + $0x20] sm:$0xff]   ;;  %1689 = vmatpush1.bf16.msra.mxu1 %v11206_v20  ;;  %v11189_v26 = vld [vmem:[%s11902_s29 + $0x28] sm:$0xff]   ;;  %s10287_s21 = sshll.u32 %s15612_s16, 3  ;;  %vm10065_vm6 = vcmask 23552   ;;  %vm10130_vm7 = vcmask 31744  }
  0x37   : > { %941 = vmatprep.subr.bf16.mxu0 %v11178_v8  ;;  %v11210_v23 = vld [vmem:[#allocation3 + $0x110] ss:$8 sps:$4 sm:$0xff]   ;;  %v11211_v24 = vld [vmem:[#allocation3 + $0x124] ss:$8 sps:$4 sm:$0xff]   ;;  %v11213_v25 = vld [vmem:[#allocation3 + $0x120] ss:$8 sps:$4 sm:$0xff]   ;;  %1690 = vmatprep.subr.bf16.mxu1 %v11208_v22  ;;  %s14971_s25 = scalar_lea.vmem %s15538_s13, %s10287_s21 }
  0x38   : > { %v11215_v27 = vld [vmem:[#allocation3 + $0x134] ss:$8 sps:$4 sm:$0xff]   ;;  %v11217_v28 = vld [vmem:[#allocation3 + $0x130] ss:$8 sps:$4 sm:$0xff]   ;;  %v11218_v29 = vld [vmem:[#allocation3 + $0x144] ss:$8 sps:$4 sm:$0xff]  }
  0x39   : > { %v11220_v30 = vld [vmem:[#allocation3 + $0x140] ss:$8 sps:$4 sm:$0xff]   ;;  %v11190_v31 = vld [vmem:[%s11902_s29 + $0x30] sm:$0xff]   ;;  %v11191_v36 = vld [vmem:[%s11902_s29 + $0x38] sm:$0xff]  }
  0x3a   : > { %942 = vmatpush1.bf16.msra.mxu0 %v11180_v11  ;;  %1691 = vmatpush1.bf16.msra.mxu1 %v11210_v23  ;;  %v11222_v32 = vld [vmem:[#allocation3 + $0x154] ss:$8 sps:$4 sm:$0xff]   ;;  %v11224_v33 = vld [vmem:[#allocation3 + $0x150] ss:$8 sps:$4 sm:$0xff]   ;;  %v11225_v34 = vld [vmem:[#allocation3 + $0x164] ss:$8 sps:$4 sm:$0xff]  }
  0x3b   : > { %943 = vmatprep.subr.bf16.mxu0 %v935_v13  ;;  %1692 = vmatprep.subr.bf16.mxu1 %v11211_v24  ;;  %v11227_v35 = vld [vmem:[#allocation3 + $0x160] ss:$8 sps:$4 sm:$0xff]   ;;  %v11229_v37 = vld [vmem:[#allocation3 + $0x174] ss:$8 sps:$4 sm:$0xff]   ;;  %v11231_v38 = vld [vmem:[#allocation3 + $0x170] ss:$8 sps:$4 sm:$0xff]  }
  0x3c   : > { %v11232_v39 = vld [vmem:[#allocation3 + $0x200] ss:$8 sps:$4 sm:$0xff]   ;;  %v11234_v40 = vld [vmem:[#allocation3 + $0x204] ss:$8 sps:$4 sm:$0xff]   ;;  %v11239_v44 = vld [vmem:[#allocation3 + $0x194] ss:$8 sps:$4 sm:$0xff]  }
  0x3d   : > { %v11235_v41 = vld [vmem:[#allocation3 + $0x184] ss:$8 sps:$4 sm:$0xff]   ;;  %v11237_v43 = vld [vmem:[#allocation3 + $0x180] ss:$8 sps:$4 sm:$0xff]   ;;  %v11241_v45 = vld [vmem:[#allocation3 + $0x190] ss:$8 sps:$4 sm:$0xff]  }
  0x3e   : > { %944 = vmatpush1.bf16.msra.mxu0 %v932_v14  ;;  %1693 = vmatpush1.bf16.msra.mxu1 %v11213_v25  ;;  %v11192_v42 = vld [vmem:[%s11902_s29 + $0x40] sm:$0xff]   ;;  %v11193_v48 = vld [vmem:[%s11902_s29 + $0x48] sm:$0xff]   ;;  %v11248_v50 = vld [vmem:[#allocation3 + $0x1b0] ss:$8 sps:$4 sm:$0xff]  }
  0x3f   : > { %1694 = vmatprep.subr.bf16.mxu1 %v11215_v27  ;;  %2439 = vmatprep.subr.bf16.mxu0 %v11234_v40  ;;  %v11242_v46 = vld [vmem:[#allocation3 + $0x1a4] ss:$8 sps:$4 sm:$0xff]   ;;  %v11244_v47 = vld [vmem:[#allocation3 + $0x1a0] ss:$8 sps:$4 sm:$0xff]   ;;  %v11246_v49 = vld [vmem:[#allocation3 + $0x1b4] ss:$8 sps:$4 sm:$0xff]  }
  0x40   : > { %v11249_v51 = vld [vmem:[#allocation3 + $0x210] ss:$8 sps:$4 sm:$0xff]   ;;  %v11251_v52 = vld [vmem:[#allocation3 + $0x214] ss:$8 sps:$4 sm:$0xff]   ;;  %v11252_v53 = vld [vmem:[#allocation3 + $0x1c4] ss:$8 sps:$4 sm:$0xff]  }
  0x41   : > { %10328 = vmatmul.mubr.msk.bf16.vlgmr.msra.gmra.mrb[0].mxu0 %vm830_vm2, %v11184_v15  ;;  %v11194_v54 = vld [vmem:[%s11902_s29 + $0x50] sm:$0xff]   ;;  %v11254_v55 = vld [vmem:[#allocation3 + $0x1c0] ss:$8 sps:$4 sm:$0xff]   ;;  %v11195_v58 = vld [vmem:[%s11902_s29 + $0x58] sm:$0xff]  }
  0x42   : > { %979 = vmatprep.mubr.bf16.mxu0 %v11748_v1  ;;  %1695 = vmatpush1.bf16.msra.mxu1 %v11217_v28  ;;  %v11256_v56 = vld [vmem:[#allocation3 + $0x1d4] ss:$8 sps:$4 sm:$0xff]   ;;  %v11258_v57 = vld [vmem:[#allocation3 + $0x1d0] ss:$8 sps:$4 sm:$0xff]   ;;  %v11259_v59 = vld [vmem:[#allocation3 + $0x1e4] ss:$8 sps:$4 sm:$0xff]  }
  0x43   : > { %1696 = vmatprep.subr.bf16.mxu1 %v11218_v29  ;;  %2440 = vmatpush1.bf16.msra.mxu0 %v11232_v39  ;;  %v11261_v60 = vld [vmem:[#allocation3 + $0x1e0] ss:$8 sps:$4 sm:$0xff]   ;;  %v11263_v61 = vld [vmem:[#allocation3 + $0x1f4] ss:$8 sps:$4 sm:$0xff]   ;;  %v11265_v62 = vld [vmem:[#allocation3 + $0x1f0] ss:$8 sps:$4 sm:$0xff]  }
  0x44   : > { %2441 = vmatprep.subr.bf16.mxu0 %v11251_v52  ;;  %v11196_v63 = vld [vmem:[%s11902_s29 + $0x60] sm:$0xff]   ;;  %v11197_v3 = vld [vmem:[%s11902_s29 + $0x68] sm:$0xff]   ;;  %v11198_v4 = vld [vmem:[%s11902_s29 + $0x70] sm:$0xff]  }
  0x45   : > { %v11266_v0 = vld [vmem:[#allocation3 + $0x220] ss:$8 sps:$4 sm:$0xff]   ;;  %v11268_v2 = vld [vmem:[#allocation3 + $0x224] ss:$8 sps:$4 sm:$0xff]   ;;  %v11271_v6 = vld [vmem:[#allocation3 + $0x230] ss:$8 sps:$4 sm:$0xff]  }
  0x46   : > { %1697 = vmatpush1.bf16.msra.mxu1 %v11220_v30  ;;  %v11273_v7 = vld [vmem:[#allocation3 + $0x234] ss:$8 sps:$4 sm:$0xff]   ;;  %v11276_v11 = vld [vmem:[#allocation3 + $0x240] ss:$8 sps:$4 sm:$0xff]   ;;  %v11278_v12 = vld [vmem:[#allocation3 + $0x244] ss:$8 sps:$4 sm:$0xff]   ;;  %v622_v30 = vlaneseq }
  0x47   : > { %1698 = vmatprep.subr.bf16.mxu1 %v11222_v32  ;;  %2442 = vmatpush1.bf16.msra.mxu0 %v11249_v51  ;;  %v11199_v8 = vld [vmem:[%s11902_s29 + $0x78] sm:$0xff]   ;;  %v11200_v9 = vld [vmem:[%s11902_s29 + $0x80] sm:$0xff]   ;;  %v11201_v13 = vld [vmem:[%s11902_s29 + $0x88] sm:$0xff]  }
  0x48   : > { %2443 = vmatprep.subr.bf16.mxu0 %v11268_v2  ;;  %v11202_v14 = vld [vmem:[%s11902_s29 + $0x90] sm:$0xff]   ;;  %v11282_v19 = vld [vmem:[#allocation3 + $0x260] ss:$8 sps:$4 sm:$0xff]   ;;  %v11228_v25 = vld [vmem:[%s11902_s29 + $0xb8] sm:$0xff]  }
  0x49   : > { %10329 = vmatmul.mubr.msk.bf16.gmra.mrb[4].mxu0 %vm830_vm2, %v11185_v16  ;;  %v11279_v15 = vld [vmem:[#allocation3 + $0x250] ss:$8 sps:$4 sm:$0xff]   ;;  %v11281_v16 = vld [vmem:[#allocation3 + $0x254] ss:$8 sps:$4 sm:$0xff]   ;;  %v11284_v20 = vld [vmem:[#allocation3 + $0x264] ss:$8 sps:$4 sm:$0xff]  }
  0x4a   : > { %989 = vmatprep.mubr.bf16.mxu0 %v11748_v1  ;;  %1699 = vmatpush1.bf16.msra.mxu1 %v11224_v33  ;;  %v11221_v22 = vld [vmem:[%s11902_s29 + $0xb0] sm:$0xff]   ;;  %v11288_v27 = vld [vmem:[#allocation3 + $0x280] ss:$8 sps:$4 sm:$0xff]  }
  0x4b   : > { %1700 = vmatprep.subr.bf16.mxu1 %v11225_v34  ;;  %2444 = vmatpush1.bf16.msra.mxu0 %v11266_v0  ;;  %v11285_v23 = vld [vmem:[#allocation3 + $0x270] ss:$8 sps:$4 sm:$0xff]   ;;  %v11287_v24 = vld [vmem:[#allocation3 + $0x274] ss:$8 sps:$4 sm:$0xff]   ;;  %v11290_v28 = vld [vmem:[#allocation3 + $0x284] ss:$8 sps:$4 sm:$0xff]  }
  0x4c   : > { %2445 = vmatprep.subr.bf16.mxu0 %v11273_v7  ;;  %v11245_v29 = vld [vmem:[%s11902_s29 + $0xc8] sm:$0xff]   ;;  %v11255_v32 = vld [vmem:[%s11902_s29 + $0xd0] sm:$0xff]   ;;  %v620_v34 = vld [vmem:[%s15529_s4] sm:$0x3] }
  0x4d   : > { %v11296_v0 = vld [vmem:[#allocation3 + $0x2a4] ss:$8 sps:$4 sm:$0xff]  }
  0x4e   : > { %1701 = vmatpush1.bf16.msra.mxu1 %v11227_v35 }
  0x4f   : > { %1702 = vmatprep.subr.bf16.mxu1 %v11229_v37  ;;  %2446 = vmatpush1.bf16.msra.mxu0 %v11271_v6  ;;  %v11293_v37 = vld [vmem:[#allocation3 + $0x294] ss:$8 sps:$4 sm:$0xff]  }
  0x50   : > { %2447 = vmatprep.subr.bf16.mxu0 %v11278_v12 }
  0x51   : > { %10330 = vmatmul.mubr.msk.bf16.gmra.mrb[8].mxu0 %vm830_vm2, %v11186_v17  ;;  %v11203_v17 = vld [vmem:[%s11902_s29 + $0x98] sm:$0xff]  }
  0x52   : > { %999 = vmatprep.mubr.bf16.mxu0 %v11748_v1  ;;  %1703 = vmatpush1.bf16.msra.mxu1 %v11231_v38 }
  0x53   : > { %1704 = vmatprep.subr.bf16.mxu1 %v11235_v41  ;;  %2448 = vmatpush1.bf16.msra.mxu0 %v11276_v11 }
  0x54   : > { %2449 = vmatprep.subr.bf16.mxu0 %v11281_v16 }
  0x56   : > { %1705 = vmatpush1.bf16.msra.mxu1 %v11237_v43  ;;  %v11262_v43 = vld [vmem:[%s11902_s29 + $0xd8] sm:$0xff]  }
  0x57   : > { %1706 = vmatprep.subr.bf16.mxu1 %v11239_v44  ;;  %2450 = vmatpush1.bf16.msra.mxu0 %v11279_v15 }
  0x58   : > { %2451 = vmatprep.subr.bf16.mxu0 %v11284_v20 }
  0x59   : > { %10331 = vmatmul.mubr.msk.bf16.gmra.mrb[12].mxu0 %vm830_vm2, %v11187_v18  ;;  %v11207_v18 = vld [vmem:[%s11902_s29 + $0xa0] sm:$0xff]  }
  0x5a   : > { %1009 = vmatprep.mubr.bf16.mxu0 %v11748_v1  ;;  %1707 = vmatpush1.bf16.msra.mxu1 %v11241_v45 }
  0x5b   : > { %1708 = vmatprep.subr.bf16.mxu1 %v11242_v46  ;;  %2452 = vmatpush1.bf16.msra.mxu0 %v11282_v19 }
  0x5c   : > { %2453 = vmatprep.subr.bf16.mxu0 %v11287_v24 }
  0x5e   : > { %1709 = vmatpush1.bf16.msra.mxu1 %v11244_v47 }
  0x5f   : > { %1710 = vmatprep.subr.bf16.mxu1 %v11246_v49  ;;  %2454 = vmatpush1.bf16.msra.mxu0 %v11285_v23 }
  0x60   : > { %2455 = vmatprep.subr.bf16.mxu0 %v11290_v28 }
  0x61   : > { %10332 = vmatmul.mubr.msk.bf16.gmra.mrb[16].mxu0 %vm830_vm2, %v11188_v21  ;;  %v11214_v21 = vld [vmem:[%s11902_s29 + $0xa8] sm:$0xff]  }
  0x62   : > { %1019 = vmatprep.mubr.bf16.mxu0 %v11748_v1  ;;  %1711 = vmatpush1.bf16.msra.mxu1 %v11248_v50 }
  0x63   : > { %1712 = vmatprep.subr.bf16.mxu1 %v11252_v53  ;;  %2456 = vmatpush1.bf16.msra.mxu0 %v11288_v27 }
  0x64   : > { %2457 = vmatprep.subr.bf16.mxu0 %v11293_v37  ;;  %v11299_v37 = vld [vmem:[#allocation3 + $0x2b4] ss:$8 sps:$4 sm:$0xff]  }
  0x66   : > { %1713 = vmatpush1.bf16.msra.mxu1 %v11254_v55 }
  0x67   : > { %1714 = vmatprep.subr.bf16.mxu1 %v11256_v56 }
  0x69   : > { %10333 = vmatmul.mubr.msk.bf16.gmra.mrb[20].mxu0 %vm830_vm2, %v11189_v26  ;;  %v11238_v26 = vld [vmem:[%s11902_s29 + $0xc0] sm:$0xff]  }
  0x6a   : > { %1029 = vmatprep.mubr.bf16.mxu0 %v11748_v1  ;;  %1715 = vmatpush1.bf16.msra.mxu1 %v11258_v57 }
  0x6b   : > { %1716 = vmatprep.subr.bf16.mxu1 %v11259_v59 }
  0x6e   : > { %1717 = vmatpush1.bf16.msra.mxu1 %v11261_v60 }
  0x6f   : > { %1718 = vmatprep.subr.bf16.mxu1 %v11263_v61 }
  0x71   : > { %10334 = vmatmul.mubr.msk.bf16.gmra.mrb[24].mxu0 %vm830_vm2, %v11190_v31  ;;  %v623_v31 = vshrl.u32 %v622_v30, 7 }
  0x72   : > { %1039 = vmatprep.mubr.bf16.mxu0 %v11748_v1  ;;  %1719 = vmatpush1.bf16.msra.mxu1 %v11265_v62 }
  0x73   : > { %v11993_v33 = vsub.s32 0, %v623_v31  ;;  %v11998_v35 = vsub.s32 1, %v623_v31 }
  0x75   : > { %v12002_v38 = vrot.slane %v620_v34, %v11993_v33  ;;  %v12006_v39 = vrot.slane %v620_v34, %v11998_v35 }
  0x79   : > { %10335 = vmatmul.mubr.msk.bf16.gmra.mrb[28].mxu0 %vm830_vm2, %v11191_v36  ;;  %v11291_v36 = vld [vmem:[#allocation3 + $0x290] ss:$8 sps:$4 sm:$0xff]  }
  0x7a   : > { %1049 = vmatprep.mubr.bf16.mxu0 %v11748_v1  ;;  %2458 = vmatpush1.bf16.msra.mxu0 %v11291_v36  ;;  %v11297_v36 = vld [vmem:[#allocation3 + $0x2b0] ss:$8 sps:$4 sm:$0xff]  }
  0x7b   : > { %2459 = vmatprep.subr.bf16.mxu0 %v11296_v0 }
  0x81   : > { %10336 = vmatmul.mubr.msk.bf16.gmra.mrb[32].mxu0 %vm830_vm2, %v11192_v42 }
  0x82   : > { %1059 = vmatprep.mubr.bf16.mxu0 %v11748_v1 }
  0x89   : > { %10337 = vmatmul.mubr.msk.bf16.gmra.mrb[36].mxu0 %vm830_vm2, %v11193_v48 }
  0x8a   : > { %1069 = vmatprep.mubr.bf16.mxu0 %v11748_v1 }
  0x91   : > { %10338 = vmatmul.mubr.msk.bf16.gmra.mrb[40].mxu0 %vm830_vm2, %v11194_v54 }
  0x92   : > { %1079 = vmatprep.mubr.bf16.mxu0 %v11748_v1 }
  0x99   : > { %10339 = vmatmul.mubr.msk.bf16.gmra.mrb[44].mxu0 %vm830_vm2, %v11195_v58  ;;  %v11269_v58 = vld [vmem:[%s11902_s29 + $0xe0] sm:$0xff]  }
  0x9a   : > { %1089 = vmatprep.mubr.bf16.mxu0 %v11748_v1 }
  0xa1   : > { %10340 = vmatmul.mubr.msk.bf16.gmra.mrb[48].mxu0 %vm830_vm2, %v11196_v63  ;;  %v11294_v63 = vld [vmem:[#allocation3 + $0x2a0] ss:$8 sps:$4 sm:$0xff]  }
  0xa2   : > { %1099 = vmatprep.mubr.bf16.mxu0 %v11748_v1  ;;  %2460 = vmatpush1.bf16.msra.mxu0 %v11294_v63 }
  0xa3   : > { %2461 = vmatprep.subr.bf16.mxu0 %v11299_v37 }
  0xa6   : > { %2462 = vmatpush1.bf16.msra.mxu0 %v11297_v36 }
  0xa9   : > { %10341 = vmatmul.mubr.msk.bf16.gmra.mrb[52].mxu0 %vm830_vm2, %v11197_v3 }
  0xaa   : > { %1109 = vmatprep.mubr.bf16.mxu0 %v11748_v1 }
  0xb1   : > { %10342 = vmatmul.mubr.msk.bf16.gmra.mrb[56].mxu0 %vm830_vm2, %v11198_v4 }
  0xb2   : > { %1119 = vmatprep.mubr.bf16.mxu0 %v11748_v1 }
  0xb9   : > { %10343 = vmatmul.mubr.msk.bf16.gmra.mrb[60].mxu0 %vm830_vm2, %v11199_v8 }
  0xba   : > { %1129 = vmatprep.mubr.bf16.mxu0 %v11748_v1 }
  0xc1   : > { %10344 = vmatmul.mubr.msk.bf16.gmra.mrb[64].mxu0 %vm830_vm2, %v11200_v9 }
  0xc2   : > { %1139 = vmatprep.mubr.bf16.mxu0 %v11748_v1 }
  0xc9   : > { %10345 = vmatmul.mubr.msk.bf16.gmra.mrb[68].mxu0 %vm830_vm2, %v11201_v13 }
  0xca   : > { %1149 = vmatprep.mubr.bf16.mxu0 %v11748_v1 }
  0xd1   : > { %10346 = vmatmul.mubr.msk.bf16.gmra.mrb[72].mxu0 %vm830_vm2, %v11202_v14  ;;  %v11270_v14 = vld [vmem:[%s11902_s29 + $0xe8] sm:$0xff]  }
  0xd2   : > { %1159 = vmatprep.mubr.bf16.mxu0 %v11748_v1 }
  0xd9   : > { %10347 = vmatmul.mubr.msk.bf16.gmra.mrb[76].mxu0 %vm830_vm2, %v11203_v17 }
  0xda   : > { %1169 = vmatprep.mubr.bf16.mxu0 %v11748_v1 }
  0xe1   : > { %10348 = vmatmul.mubr.msk.bf16.gmra.mrb[80].mxu0 %vm830_vm2, %v11207_v18 }
  0xe2   : > { %1179 = vmatprep.mubr.bf16.mxu0 %v11748_v1 }
  0xe9   : > { %10349 = vmatmul.mubr.msk.bf16.gmra.mrb[84].mxu0 %vm830_vm2, %v11214_v21 }
  0xea   : > { %1189 = vmatprep.mubr.bf16.mxu0 %v11748_v1 }
  0xf1   : > { %10350 = vmatmul.mubr.msk.bf16.gmra.mrb[88].mxu0 %vm830_vm2, %v11221_v22 }
  0xf2   : > { %1199 = vmatprep.mubr.bf16.mxu0 %v11748_v1 }
  0xf9   : > { %10351 = vmatmul.mubr.msk.bf16.gmra.mrb[92].mxu0 %vm830_vm2, %v11228_v25 }
  0xfa   : > { %1209 = vmatprep.mubr.bf16.mxu0 %v11748_v1 }
 0x101   : > { %10352 = vmatmul.mubr.msk.bf16.gmra.mrb[96].mxu0 %vm830_vm2, %v11238_v26 }
 0x102   : > { %1219 = vmatprep.mubr.bf16.mxu0 %v11748_v1 }
 0x109   : > { %10353 = vmatmul.mubr.msk.bf16.gmra.mrb[100].mxu0 %vm830_vm2, %v11245_v29  ;;  %v11274_v29 = vld [vmem:[%s11902_s29 + $0xf0] sm:$0xff]  }
 0x10a   : > { %1229 = vmatprep.mubr.bf16.mxu0 %v11748_v1 }
 0x111   : > { %10354 = vmatmul.mubr.msk.bf16.gmra.mrb[104].mxu0 %vm830_vm2, %v11255_v32 }
 0x112   : > { %1239 = vmatprep.mubr.bf16.mxu0 %v11748_v1 }
 0x114   : > { %v971_v40 = vpop.f32.mrb[0].mxu0 }
 0x115   : > { %v972_v41 = vadd.f32 %v971_v40, %v12002_v38  ;;  %v973_v42 = vpop.f32.mrb[1].mxu0 }
 0x116   : > { %v975_v44 = vpop.f32.mrb[2].mxu0  ;;  %v974_v45 = vadd.f32 %v973_v42, %v12006_v39 }
 0x117   : > { %v976_v46 = vadd.f32 %v975_v44, %v12002_v38  ;;  %v977_v47 = vpop.f32.mrb[3].mxu0  ;;  %v1290_v49 = vmax.f32 %v972_v41, 0.0 }
 0x118   : > { %v978_v48 = vadd.f32 %v977_v47, %v12006_v39  ;;  %v1291_v51 = vmax.f32 %v974_v45, 0.0 }
 0x119   : > { %v1292_v50 = vmax.f32 %v976_v46, 0.0  ;;  %10355 = vmatmul.mubr.msk.bf16.gmra.mrb[108].mxu0 %vm830_vm2, %v11262_v43 }
 0x11a   : > { %v1293_v52 = vmax.f32 %v978_v48, 0.0  ;;  %1249 = vmatprep.mubr.bf16.mxu0 %v11748_v1 }
 0x11b   : > { %v1418_v53 = vpack.c.bf16 %v1292_v50, %v1290_v49  ;;  %v11275_v50 = vld [vmem:[%s11902_s29 + $0xf8] sm:$0xff]  }
 0x11c   : > { %v981_v54 = vpop.f32.mrb[4].mxu0  ;;  %v1419_v55 = vpack.c.bf16 %v1293_v52, %v1291_v51 }
 0x11d   : > { %v982_v56 = vadd.f32 %v981_v54, %v12002_v38  ;;  %v983_v57 = vpop.f32.mrb[5].mxu0 }
 0x11e   : > { %v984_v59 = vadd.f32 %v983_v57, %v12006_v39  ;;  %v985_v60 = vpop.f32.mrb[6].mxu0  ;;  %1720 = vmatprep.mubr.bf16.mxu1 %v1419_v55 }
 0x11f   : > { %v986_v61 = vadd.f32 %v985_v60, %v12002_v38  ;;  %v987_v62 = vpop.f32.mrb[7].mxu0  ;;  %1721 = vmatmul.mubr.bf16.vlgmr.msra.gmra.mrb[0].mxu1 %v1418_v53  ;;  %v1294_v3 = vmax.f32 %v982_v56, 0.0 }
 0x120   : > { %v988_v2 = vadd.f32 %v987_v62, %v12006_v39  ;;  %v1295_v6 = vmax.f32 %v984_v59, 0.0 }
 0x121   : > { %v1296_v4 = vmax.f32 %v986_v61, 0.0  ;;  %10356 = vmatmul.mubr.msk.bf16.gmra.mrb[112].mxu0 %vm830_vm2, %v11269_v58 }
 0x122   : > { %v1297_v7 = vmax.f32 %v988_v2, 0.0  ;;  %1259 = vmatprep.mubr.bf16.mxu0 %v11748_v1 }
 0x123   : > { %v1420_v8 = vpack.c.bf16 %v1296_v4, %v1294_v3 }
 0x124   : > { %v991_v9 = vpop.f32.mrb[8].mxu0  ;;  %v1421_v11 = vpack.c.bf16 %v1297_v7, %v1295_v6  ;;  %v11300_v7 = vld [vmem:[#allocation3 + $0x2c0] ss:$8 sps:$4 sm:$0xff]  }
 0x125   : > { %v992_v12 = vadd.f32 %v991_v9, %v12002_v38  ;;  %v993_v13 = vpop.f32.mrb[9].mxu0 }
 0x126   : > { %v994_v15 = vadd.f32 %v993_v13, %v12006_v39  ;;  %v995_v16 = vpop.f32.mrb[10].mxu0  ;;  %1730 = vmatprep.mubr.bf16.mxu1 %v1421_v11 }
 0x127   : > { %v996_v17 = vadd.f32 %v995_v16, %v12002_v38  ;;  %v997_v18 = vpop.f32.mrb[11].mxu0  ;;  %1731 = vmatmul.mubr.bf16.gmra.mrb[4].mxu1 %v1420_v8  ;;  %v1298_v20 = vmax.f32 %v992_v12, 0.0  ;;  %v11302_v8 = vld [vmem:[#allocation3 + $0x2c4] ss:$8 sps:$4 sm:$0xff]  }
 0x128   : > { %v998_v19 = vadd.f32 %v997_v18, %v12006_v39  ;;  %v1299_v22 = vmax.f32 %v994_v15, 0.0  ;;  %2463 = vmatprep.subr.bf16.mxu0 %v11302_v8 }
 0x129   : > { %v1300_v21 = vmax.f32 %v996_v17, 0.0  ;;  %10357 = vmatmul.mubr.msk.bf16.gmra.mrb[116].mxu0 %vm830_vm2, %v11270_v14 }
 0x12a   : > { %v1301_v23 = vmax.f32 %v998_v19, 0.0  ;;  %1269 = vmatprep.mubr.bf16.mxu0 %v11748_v1  ;;  %2464 = vmatpush1.bf16.msra.mxu0 %v11300_v7 }
 0x12b   : > { %v1422_v24 = vpack.c.bf16 %v1300_v21, %v1298_v20 }
 0x12c   : > { %v1001_v25 = vpop.f32.mrb[12].mxu0  ;;  %v1423_v26 = vpack.c.bf16 %v1301_v23, %v1299_v22 }
 0x12d   : > { %v1002_v27 = vadd.f32 %v1001_v25, %v12002_v38  ;;  %v1003_v28 = vpop.f32.mrb[13].mxu0 }
 0x12e   : > { %v1004_v30 = vadd.f32 %v1003_v28, %v12006_v39  ;;  %v1005_v31 = vpop.f32.mrb[14].mxu0  ;;  %1740 = vmatprep.mubr.bf16.mxu1 %v1423_v26 }
 0x12f   : > { %v1006_v32 = vadd.f32 %v1005_v31, %v12002_v38  ;;  %v1007_v34 = vpop.f32.mrb[15].mxu0  ;;  %1741 = vmatmul.mubr.bf16.gmra.mrb[8].mxu1 %v1422_v24  ;;  %v1302_v41 = vmax.f32 %v1002_v27, 0.0 }
 0x130   : > { %v1008_v40 = vadd.f32 %v1007_v34, %v12006_v39  ;;  %v1303_v43 = vmax.f32 %v1004_v30, 0.0 }
 0x131   : > { %v1304_v42 = vmax.f32 %v1006_v32, 0.0  ;;  %10358 = vmatmul.mubr.msk.bf16.gmra.mrb[120].mxu0 %vm830_vm2, %v11274_v29 }
 0x132   : > { %v1305_v44 = vmax.f32 %v1008_v40, 0.0  ;;  %1279 = vmatprep.mubr.bf16.mxu0 %v11748_v1 }
 0x133   : > { %v1424_v45 = vpack.c.bf16 %v1304_v42, %v1302_v41  ;;  %v11303_v42 = vld [vmem:[#allocation3 + $0x2d0] ss:$8 sps:$4 sm:$0xff]  }
 0x134   : > { %v1011_v46 = vpop.f32.mrb[16].mxu0  ;;  %v1425_v47 = vpack.c.bf16 %v1305_v44, %v1303_v43  ;;  %v11305_v43 = vld [vmem:[#allocation3 + $0x2d4] ss:$8 sps:$4 sm:$0xff]  }
 0x135   : > { %v1012_v48 = vadd.f32 %v1011_v46, %v12002_v38  ;;  %v1013_v49 = vpop.f32.mrb[17].mxu0  ;;  %2465 = vmatprep.subr.bf16.mxu0 %v11305_v43 }
 0x136   : > { %v1014_v51 = vadd.f32 %v1013_v49, %v12006_v39  ;;  %v1015_v52 = vpop.f32.mrb[18].mxu0  ;;  %1750 = vmatprep.mubr.bf16.mxu1 %v1425_v47  ;;  %2466 = vmatpush1.bf16.msra.mxu0 %v11303_v42 }
 0x137   : > { %v1016_v53 = vadd.f32 %v1015_v52, %v12002_v38  ;;  %v1017_v54 = vpop.f32.mrb[19].mxu0  ;;  %1751 = vmatmul.mubr.bf16.gmra.mrb[12].mxu1 %v1424_v45  ;;  %v1306_v56 = vmax.f32 %v1012_v48, 0.0 }
 0x138   : > { %v1018_v55 = vadd.f32 %v1017_v54, %v12006_v39  ;;  %v1307_v58 = vmax.f32 %v1014_v51, 0.0 }
 0x139   : > { %v1308_v57 = vmax.f32 %v1016_v53, 0.0  ;;  %10359 = vmatmul.mubr.msk.bf16.gmra.mrb[124].mxu0 %vm830_vm2, %v11275_v50 }
 0x13a   : > { %v1309_v59 = vmax.f32 %v1018_v55, 0.0 }
 0x13b   : > { %v1426_v60 = vpack.c.bf16 %v1308_v57, %v1306_v56 }
 0x13c   : > { %v1021_v61 = vpop.f32.mrb[20].mxu0  ;;  %v1427_v62 = vpack.c.bf16 %v1309_v59, %v1307_v58 }
 0x13d   : > { %v1022_v63 = vadd.f32 %v1021_v61, %v12002_v38  ;;  %v1023_v0 = vpop.f32.mrb[21].mxu0 }
 0x13e   : > { %v1024_v2 = vadd.f32 %v1023_v0, %v12006_v39  ;;  %v1025_v3 = vpop.f32.mrb[22].mxu0  ;;  %1760 = vmatprep.mubr.bf16.mxu1 %v1427_v62  ;;  %v11308_v0 = vld [vmem:[#allocation3 + $0x304] ss:$8 sps:$4 sm:$0xff]  }
 0x13f   : > { %v1026_v4 = vadd.f32 %v1025_v3, %v12002_v38  ;;  %v1027_v6 = vpop.f32.mrb[23].mxu0  ;;  %1761 = vmatmul.mubr.bf16.gmra.mrb[16].mxu1 %v1426_v60  ;;  %v1310_v11 = vmax.f32 %v1022_v63, 0.0  ;;  %v11306_v63 = vld [vmem:[#allocation3 + $0x300] ss:$8 sps:$4 sm:$0xff]   ;;  %3190 = vmatprep.subr.bf16.mxu1 %v11308_v0 }
 0x140   : > { %v1028_v9 = vadd.f32 %v1027_v6, %v12006_v39  ;;  %v1311_v13 = vmax.f32 %v1024_v2, 0.0  ;;  %3191 = vmatpush1.bf16.msra.mxu1 %v11306_v63 }
 0x141   : > { %v1312_v12 = vmax.f32 %v1026_v4, 0.0 }
 0x142   : > { %v1313_v14 = vmax.f32 %v1028_v9, 0.0 }
 0x143   : > { %v1428_v15 = vpack.c.bf16 %v1312_v12, %v1310_v11 }
 0x144   : > { %v1031_v16 = vpop.f32.mrb[24].mxu0  ;;  %v1429_v17 = vpack.c.bf16 %v1313_v14, %v1311_v13  ;;  %v11309_v13 = vld [vmem:[#allocation3 + $0x2e0] ss:$8 sps:$4 sm:$0xff]   ;;  %v11311_v14 = vld [vmem:[#allocation3 + $0x2e4] ss:$8 sps:$4 sm:$0xff]  }
 0x145   : > { %v1032_v18 = vadd.f32 %v1031_v16, %v12002_v38  ;;  %v1033_v19 = vpop.f32.mrb[25].mxu0  ;;  %2467 = vmatprep.subr.bf16.mxu0 %v11311_v14 }
 0x146   : > { %v1034_v20 = vadd.f32 %v1033_v19, %v12006_v39  ;;  %v1035_v21 = vpop.f32.mrb[26].mxu0  ;;  %1770 = vmatprep.mubr.bf16.mxu1 %v1429_v17  ;;  %2468 = vmatpush1.bf16.msra.mxu0 %v11309_v13 }
 0x147   : > { %v1036_v22 = vadd.f32 %v1035_v21, %v12002_v38  ;;  %v1037_v23 = vpop.f32.mrb[27].mxu0  ;;  %1771 = vmatmul.mubr.bf16.gmra.mrb[20].mxu1 %v1428_v15  ;;  %v1314_v25 = vmax.f32 %v1032_v18, 0.0 }
 0x148   : > { %v1038_v24 = vadd.f32 %v1037_v23, %v12006_v39  ;;  %v1315_v27 = vmax.f32 %v1034_v20, 0.0 }
 0x149   : > { %v1316_v26 = vmax.f32 %v1036_v22, 0.0 }
 0x14a   : > { %v1317_v28 = vmax.f32 %v1038_v24, 0.0 }
 0x14b   : > { %v1430_v29 = vpack.c.bf16 %v1316_v26, %v1314_v25 }
 0x14c   : > { %v1041_v30 = vpop.f32.mrb[28].mxu0  ;;  %v1431_v31 = vpack.c.bf16 %v1317_v28, %v1315_v27 }
 0x14d   : > { %v1042_v32 = vadd.f32 %v1041_v30, %v12002_v38  ;;  %v1043_v34 = vpop.f32.mrb[29].mxu0 }
 0x14e   : > { %v1044_v36 = vadd.f32 %v1043_v34, %v12006_v39  ;;  %v1045_v37 = vpop.f32.mrb[30].mxu0  ;;  %1780 = vmatprep.mubr.bf16.mxu1 %v1431_v31 }
 0x14f   : > { %v1046_v40 = vadd.f32 %v1045_v37, %v12002_v38  ;;  %v1047_v41 = vpop.f32.mrb[31].mxu0  ;;  %1781 = vmatmul.mubr.bf16.gmra.mrb[24].mxu1 %v1430_v29  ;;  %v1318_v45 = vmax.f32 %v1042_v32, 0.0  ;;  %v11314_v37 = vld [vmem:[#allocation3 + $0x314] ss:$8 sps:$4 sm:$0xff]  }
 0x150   : > { %v1048_v44 = vadd.f32 %v1047_v41, %v12006_v39  ;;  %v1319_v47 = vmax.f32 %v1044_v36, 0.0  ;;  %v11312_v36 = vld [vmem:[#allocation3 + $0x310] ss:$8 sps:$4 sm:$0xff]   ;;  %3192 = vmatprep.subr.bf16.mxu1 %v11314_v37 }
 0x151   : > { %v1320_v46 = vmax.f32 %v1046_v40, 0.0  ;;  %3193 = vmatpush1.bf16.msra.mxu1 %v11312_v36 }
 0x152   : > { %v1321_v48 = vmax.f32 %v1048_v44, 0.0 }
 0x153   : > { %v1432_v49 = vpack.c.bf16 %v1320_v46, %v1318_v45 }
 0x154   : > { %v1051_v50 = vpop.f32.mrb[32].mxu0  ;;  %v1433_v51 = vpack.c.bf16 %v1321_v48, %v1319_v47 }
 0x155   : > { %v1052_v52 = vadd.f32 %v1051_v50, %v12002_v38  ;;  %v1053_v53 = vpop.f32.mrb[33].mxu0  ;;  %v11317_v50 = vld [vmem:[#allocation3 + $0x2f4] ss:$8 sps:$4 sm:$0xff]  }
 0x156   : > { %v1054_v54 = vadd.f32 %v1053_v53, %v12006_v39  ;;  %v1055_v55 = vpop.f32.mrb[34].mxu0  ;;  %1790 = vmatprep.mubr.bf16.mxu1 %v1433_v51  ;;  %2469 = vmatprep.subr.bf16.mxu0 %v11317_v50 }
 0x157   : > { %v1056_v56 = vadd.f32 %v1055_v55, %v12002_v38  ;;  %v1057_v57 = vpop.f32.mrb[35].mxu0  ;;  %1791 = vmatmul.mubr.bf16.gmra.mrb[28].mxu1 %v1432_v49  ;;  %v1322_v59 = vmax.f32 %v1052_v52, 0.0  ;;  %v11315_v49 = vld [vmem:[#allocation3 + $0x2f0] ss:$8 sps:$4 sm:$0xff]  }
 0x158   : > { %v1058_v58 = vadd.f32 %v1057_v57, %v12006_v39  ;;  %v1323_v61 = vmax.f32 %v1054_v54, 0.0  ;;  %2470 = vmatpush1.bf16.msra.mxu0 %v11315_v49 }
 0x159   : > { %v1324_v60 = vmax.f32 %v1056_v56, 0.0 }
 0x15a   : > { %v1325_v62 = vmax.f32 %v1058_v58, 0.0 }
 0x15b   : > { %v1434_v2 = vpack.c.bf16 %v1324_v60, %v1322_v59 }
 0x15c   : > { %v1061_v3 = vpop.f32.mrb[36].mxu0  ;;  %v1435_v4 = vpack.c.bf16 %v1325_v62, %v1323_v61 }
 0x15d   : > { %v1062_v6 = vadd.f32 %v1061_v3, %v12002_v38  ;;  %v1063_v7 = vpop.f32.mrb[37].mxu0 }
 0x15e   : > { %v1064_v8 = vadd.f32 %v1063_v7, %v12006_v39  ;;  %v1065_v9 = vpop.f32.mrb[38].mxu0  ;;  %1800 = vmatprep.mubr.bf16.mxu1 %v1435_v4 }
 0x15f   : > { %v1066_v11 = vadd.f32 %v1065_v9, %v12002_v38  ;;  %v1067_v12 = vpop.f32.mrb[39].mxu0  ;;  %1801 = vmatmul.mubr.bf16.gmra.mrb[32].mxu1 %v1434_v2  ;;  %v1326_v16 = vmax.f32 %v1062_v6, 0.0  ;;  %v11318_v9 = vld [vmem:[#allocation3 + $0x320] ss:$8 sps:$4 sm:$0xff]  }
 0x160   : > { %v1068_v15 = vadd.f32 %v1067_v12, %v12006_v39  ;;  %v1327_v18 = vmax.f32 %v1064_v8, 0.0 }
 0x161   : > { %v1328_v17 = vmax.f32 %v1066_v11, 0.0  ;;  %v11320_v11 = vld [vmem:[#allocation3 + $0x324] ss:$8 sps:$4 sm:$0xff]  }
 0x162   : > { %v1329_v19 = vmax.f32 %v1068_v15, 0.0  ;;  %3194 = vmatprep.subr.bf16.mxu1 %v11320_v11 }
 0x163   : > { %v1436_v20 = vpack.c.bf16 %v1328_v17, %v1326_v16  ;;  %3195 = vmatpush1.bf16.msra.mxu1 %v11318_v9 }
 0x164   : > { %v1071_v21 = vpop.f32.mrb[40].mxu0  ;;  %v1437_v22 = vpack.c.bf16 %v1329_v19, %v1327_v18 }
 0x165   : > { %v1072_v23 = vadd.f32 %v1071_v21, %v12002_v38  ;;  %v1073_v24 = vpop.f32.mrb[41].mxu0 }
 0x166   : > { %v1074_v25 = vadd.f32 %v1073_v24, %v12006_v39  ;;  %v1075_v26 = vpop.f32.mrb[42].mxu0  ;;  %1810 = vmatprep.mubr.bf16.mxu1 %v1437_v22 }
 0x167   : > { %v1076_v27 = vadd.f32 %v1075_v26, %v12002_v38  ;;  %v1077_v28 = vpop.f32.mrb[43].mxu0  ;;  %1811 = vmatmul.mubr.bf16.gmra.mrb[36].mxu1 %v1436_v20  ;;  %v1330_v30 = vmax.f32 %v1072_v23, 0.0 }
 0x168   : > { %v1078_v29 = vadd.f32 %v1077_v28, %v12006_v39  ;;  %v1331_v32 = vmax.f32 %v1074_v25, 0.0 }
 0x169   : > { %v1332_v31 = vmax.f32 %v1076_v27, 0.0 }
 0x16a   : > { %v1333_v34 = vmax.f32 %v1078_v29, 0.0 }
 0x16b   : > { %v1438_v40 = vpack.c.bf16 %v1332_v31, %v1330_v30 }
 0x16c   : > { %v1081_v41 = vpop.f32.mrb[44].mxu0  ;;  %v1439_v42 = vpack.c.bf16 %v1333_v34, %v1331_v32 }
 0x16d   : > { %v1082_v43 = vadd.f32 %v1081_v41, %v12002_v38  ;;  %v1083_v44 = vpop.f32.mrb[45].mxu0 }
 0x16e   : > { %v1084_v45 = vadd.f32 %v1083_v44, %v12006_v39  ;;  %v1085_v46 = vpop.f32.mrb[46].mxu0  ;;  %1820 = vmatprep.mubr.bf16.mxu1 %v1439_v42  ;;  %v11321_v44 = vld [vmem:[#allocation3 + $0x330] ss:$8 sps:$4 sm:$0xff]  }
 0x16f   : > { %v1086_v47 = vadd.f32 %v1085_v46, %v12002_v38  ;;  %v1087_v48 = vpop.f32.mrb[47].mxu0  ;;  %1821 = vmatmul.mubr.bf16.gmra.mrb[40].mxu1 %v1438_v40  ;;  %v1334_v52 = vmax.f32 %v1082_v43, 0.0 }
 0x170   : > { %v1088_v51 = vadd.f32 %v1087_v48, %v12006_v39  ;;  %v1335_v54 = vmax.f32 %v1084_v45, 0.0  ;;  %v11323_v45 = vld [vmem:[#allocation3 + $0x334] ss:$8 sps:$4 sm:$0xff]  }
 0x171   : > { %v1336_v53 = vmax.f32 %v1086_v47, 0.0  ;;  %3196 = vmatprep.subr.bf16.mxu1 %v11323_v45 }
 0x172   : > { %v1337_v55 = vmax.f32 %v1088_v51, 0.0  ;;  %3197 = vmatpush1.bf16.msra.mxu1 %v11321_v44 }
 0x173   : > { %v1440_v56 = vpack.c.bf16 %v1336_v53, %v1334_v52 }
 0x174   : > { %v1091_v57 = vpop.f32.mrb[48].mxu0  ;;  %v1441_v58 = vpack.c.bf16 %v1337_v55, %v1335_v54 }
 0x175   : > { %v1092_v59 = vadd.f32 %v1091_v57, %v12002_v38  ;;  %v1093_v60 = vpop.f32.mrb[49].mxu0 }
 0x176   : > { %v1094_v61 = vadd.f32 %v1093_v60, %v12006_v39  ;;  %v1095_v62 = vpop.f32.mrb[50].mxu0  ;;  %1830 = vmatprep.mubr.bf16.mxu1 %v1441_v58 }
 0x177   : > { %v1096_v63 = vadd.f32 %v1095_v62, %v12002_v38  ;;  %v1097_v0 = vpop.f32.mrb[51].mxu0  ;;  %1831 = vmatmul.mubr.bf16.gmra.mrb[44].mxu1 %v1440_v56  ;;  %v1338_v3 = vmax.f32 %v1092_v59, 0.0 }
 0x178   : > { %v1098_v2 = vadd.f32 %v1097_v0, %v12006_v39  ;;  %v1339_v6 = vmax.f32 %v1094_v61, 0.0 }
 0x179   : > { %v1340_v4 = vmax.f32 %v1096_v63, 0.0 }
 0x17a   : > { %v1341_v7 = vmax.f32 %v1098_v2, 0.0 }
 0x17b   : > { %v1442_v8 = vpack.c.bf16 %v1340_v4, %v1338_v3 }
 0x17c   : > { %v1101_v12 = vpop.f32.mrb[52].mxu0  ;;  %v1443_v13 = vpack.c.bf16 %v1341_v7, %v1339_v6 }
 0x17d   : > { %v1102_v14 = vadd.f32 %v1101_v12, %v12002_v38  ;;  %v1103_v15 = vpop.f32.mrb[53].mxu0 }
 0x17e   : > { %v1104_v16 = vadd.f32 %v1103_v15, %v12006_v39  ;;  %v1105_v17 = vpop.f32.mrb[54].mxu0  ;;  %1840 = vmatprep.mubr.bf16.mxu1 %v1443_v13  ;;  %v11324_v13 = vld [vmem:[#allocation3 + $0x340] ss:$8 sps:$4 sm:$0xff]  }
 0x17f   : > { %v1106_v18 = vadd.f32 %v1105_v17, %v12002_v38  ;;  %v1107_v19 = vpop.f32.mrb[55].mxu0  ;;  %1841 = vmatmul.mubr.bf16.gmra.mrb[48].mxu1 %v1442_v8  ;;  %v1342_v21 = vmax.f32 %v1102_v14, 0.0  ;;  %v11326_v14 = vld [vmem:[#allocation3 + $0x344] ss:$8 sps:$4 sm:$0xff]  }
 0x180   : > { %v1108_v20 = vadd.f32 %v1107_v19, %v12006_v39  ;;  %v1343_v23 = vmax.f32 %v1104_v16, 0.0  ;;  %3198 = vmatprep.subr.bf16.mxu1 %v11326_v14 }
 0x181   : > { %v1344_v22 = vmax.f32 %v1106_v18, 0.0  ;;  %3199 = vmatpush1.bf16.msra.mxu1 %v11324_v13 }
 0x182   : > { %v1345_v24 = vmax.f32 %v1108_v20, 0.0 }
 0x183   : > { %v1444_v25 = vpack.c.bf16 %v1344_v22, %v1342_v21 }
 0x184   : > { %v1111_v26 = vpop.f32.mrb[56].mxu0  ;;  %v1445_v27 = vpack.c.bf16 %v1345_v24, %v1343_v23 }
 0x185   : > { %v1112_v28 = vadd.f32 %v1111_v26, %v12002_v38  ;;  %v1113_v29 = vpop.f32.mrb[57].mxu0 }
 0x186   : > { %v1114_v30 = vadd.f32 %v1113_v29, %v12006_v39  ;;  %v1115_v31 = vpop.f32.mrb[58].mxu0  ;;  %1850 = vmatprep.mubr.bf16.mxu1 %v1445_v27 }
 0x187   : > { %v1116_v32 = vadd.f32 %v1115_v31, %v12002_v38  ;;  %v1117_v34 = vpop.f32.mrb[59].mxu0  ;;  %1851 = vmatmul.mubr.bf16.gmra.mrb[52].mxu1 %v1444_v25  ;;  %v1346_v37 = vmax.f32 %v1112_v28, 0.0 }
 0x188   : > { %v1118_v36 = vadd.f32 %v1117_v34, %v12006_v39  ;;  %v1347_v41 = vmax.f32 %v1114_v30, 0.0 }
 0x189   : > { %v1348_v40 = vmax.f32 %v1116_v32, 0.0 }
 0x18a   : > { %v1349_v42 = vmax.f32 %v1118_v36, 0.0 }
 0x18b   : > { %v1446_v43 = vpack.c.bf16 %v1348_v40, %v1346_v37 }
 0x18c   : > { %v1121_v46 = vpop.f32.mrb[60].mxu0  ;;  %v1447_v47 = vpack.c.bf16 %v1349_v42, %v1347_v41 }
 0x18d   : > { %v1122_v48 = vadd.f32 %v1121_v46, %v12002_v38  ;;  %v1123_v49 = vpop.f32.mrb[61].mxu0 }
 0x18e   : > { %v1124_v50 = vadd.f32 %v1123_v49, %v12006_v39  ;;  %v1125_v51 = vpop.f32.mrb[62].mxu0  ;;  %1860 = vmatprep.mubr.bf16.mxu1 %v1447_v47  ;;  %v11327_v47 = vld [vmem:[#allocation3 + $0x350] ss:$8 sps:$4 sm:$0xff]  }
 0x18f   : > { %v1126_v52 = vadd.f32 %v1125_v51, %v12002_v38  ;;  %v1127_v53 = vpop.f32.mrb[63].mxu0  ;;  %1861 = vmatmul.mubr.bf16.gmra.mrb[56].mxu1 %v1446_v43  ;;  %v1350_v55 = vmax.f32 %v1122_v48, 0.0  ;;  %v11329_v48 = vld [vmem:[#allocation3 + $0x354] ss:$8 sps:$4 sm:$0xff]  }
 0x190   : > { %v1128_v54 = vadd.f32 %v1127_v53, %v12006_v39  ;;  %v1351_v57 = vmax.f32 %v1124_v50, 0.0  ;;  %3200 = vmatprep.subr.bf16.mxu1 %v11329_v48 }
 0x191   : > { %v1352_v56 = vmax.f32 %v1126_v52, 0.0  ;;  %3201 = vmatpush1.bf16.msra.mxu1 %v11327_v47 }
 0x192   : > { %v1353_v58 = vmax.f32 %v1128_v54, 0.0 }
 0x193   : > { %v1448_v59 = vpack.c.bf16 %v1352_v56, %v1350_v55 }
 0x194   : > { %v1131_v60 = vpop.f32.mrb[64].mxu0  ;;  %v1449_v61 = vpack.c.bf16 %v1353_v58, %v1351_v57 }
 0x195   : > { %v1132_v62 = vadd.f32 %v1131_v60, %v12002_v38  ;;  %v1133_v63 = vpop.f32.mrb[65].mxu0 }
 0x196   : > { %v1134_v0 = vadd.f32 %v1133_v63, %v12006_v39  ;;  %v1135_v2 = vpop.f32.mrb[66].mxu0  ;;  %1870 = vmatprep.mubr.bf16.mxu1 %v1449_v61 }
 0x197   : > { %v1136_v3 = vadd.f32 %v1135_v2, %v12002_v38  ;;  %v1137_v4 = vpop.f32.mrb[67].mxu0  ;;  %1871 = vmatmul.mubr.bf16.gmra.mrb[60].mxu1 %v1448_v59  ;;  %v1354_v7 = vmax.f32 %v1132_v62, 0.0 }
 0x198   : > { %v1138_v6 = vadd.f32 %v1137_v4, %v12006_v39  ;;  %v1355_v9 = vmax.f32 %v1134_v0, 0.0 }
 0x199   : > { %v1356_v8 = vmax.f32 %v1136_v3, 0.0 }
 0x19a   : > { %v1357_v11 = vmax.f32 %v1138_v6, 0.0 }
 0x19b   : > { %v1450_v12 = vpack.c.bf16 %v1356_v8, %v1354_v7 }
 0x19c   : > { %v1141_v15 = vpop.f32.mrb[68].mxu0  ;;  %v1451_v16 = vpack.c.bf16 %v1357_v11, %v1355_v9 }
 0x19d   : > { %v1142_v17 = vadd.f32 %v1141_v15, %v12002_v38  ;;  %v1143_v18 = vpop.f32.mrb[69].mxu0 }
 0x19e   : > { %v1144_v19 = vadd.f32 %v1143_v18, %v12006_v39  ;;  %v1145_v20 = vpop.f32.mrb[70].mxu0  ;;  %1880 = vmatprep.mubr.bf16.mxu1 %v1451_v16  ;;  %v11330_v16 = vld [vmem:[#allocation3 + $0x360] ss:$8 sps:$4 sm:$0xff]  }
 0x19f   : > { %v1146_v21 = vadd.f32 %v1145_v20, %v12002_v38  ;;  %v1147_v22 = vpop.f32.mrb[71].mxu0  ;;  %1881 = vmatmul.mubr.bf16.gmra.mrb[64].mxu1 %v1450_v12  ;;  %v1358_v24 = vmax.f32 %v1142_v17, 0.0  ;;  %v11332_v17 = vld [vmem:[#allocation3 + $0x364] ss:$8 sps:$4 sm:$0xff]  }
 0x1a0   : > { %v1148_v23 = vadd.f32 %v1147_v22, %v12006_v39  ;;  %v1359_v26 = vmax.f32 %v1144_v19, 0.0  ;;  %3202 = vmatprep.subr.bf16.mxu1 %v11332_v17 }
 0x1a1   : > { %v1360_v25 = vmax.f32 %v1146_v21, 0.0  ;;  %3203 = vmatpush1.bf16.msra.mxu1 %v11330_v16 }
 0x1a2   : > { %v1361_v27 = vmax.f32 %v1148_v23, 0.0 }
 0x1a3   : > { %v1452_v28 = vpack.c.bf16 %v1360_v25, %v1358_v24 }
 0x1a4   : > { %v1151_v29 = vpop.f32.mrb[72].mxu0  ;;  %v1453_v30 = vpack.c.bf16 %v1361_v27, %v1359_v26 }
 0x1a5   : > { %v1152_v31 = vadd.f32 %v1151_v29, %v12002_v38  ;;  %v1153_v32 = vpop.f32.mrb[73].mxu0 }
 0x1a6   : > { %v1154_v34 = vadd.f32 %v1153_v32, %v12006_v39  ;;  %v1155_v36 = vpop.f32.mrb[74].mxu0  ;;  %1890 = vmatprep.mubr.bf16.mxu1 %v1453_v30 }
 0x1a7   : > { %v1156_v37 = vadd.f32 %v1155_v36, %v12002_v38  ;;  %v1157_v40 = vpop.f32.mrb[75].mxu0  ;;  %1891 = vmatmul.mubr.bf16.gmra.mrb[68].mxu1 %v1452_v28  ;;  %v1362_v42 = vmax.f32 %v1152_v31, 0.0 }
 0x1a8   : > { %v1158_v41 = vadd.f32 %v1157_v40, %v12006_v39  ;;  %v1363_v44 = vmax.f32 %v1154_v34, 0.0 }
 0x1a9   : > { %v1364_v43 = vmax.f32 %v1156_v37, 0.0 }
 0x1aa   : > { %v1365_v45 = vmax.f32 %v1158_v41, 0.0 }
 0x1ab   : > { %v1454_v46 = vpack.c.bf16 %v1364_v43, %v1362_v42 }
 0x1ac   : > { %v1161_v49 = vpop.f32.mrb[76].mxu0  ;;  %v1455_v50 = vpack.c.bf16 %v1365_v45, %v1363_v44 }
 0x1ad   : > { %v1162_v51 = vadd.f32 %v1161_v49, %v12002_v38  ;;  %v1163_v52 = vpop.f32.mrb[77].mxu0 }
 0x1ae   : > { %v1164_v53 = vadd.f32 %v1163_v52, %v12006_v39  ;;  %v1165_v54 = vpop.f32.mrb[78].mxu0  ;;  %1900 = vmatprep.mubr.bf16.mxu1 %v1455_v50  ;;  %v11333_v50 = vld [vmem:[#allocation3 + $0x370] ss:$8 sps:$4 sm:$0xff]  }
 0x1af   : > { %v1166_v55 = vadd.f32 %v1165_v54, %v12002_v38  ;;  %v1167_v56 = vpop.f32.mrb[79].mxu0  ;;  %1901 = vmatmul.mubr.bf16.gmra.mrb[72].mxu1 %v1454_v46  ;;  %v1366_v58 = vmax.f32 %v1162_v51, 0.0  ;;  %v11335_v51 = vld [vmem:[#allocation3 + $0x374] ss:$8 sps:$4 sm:$0xff]  }
 0x1b0   : > { %v1168_v57 = vadd.f32 %v1167_v56, %v12006_v39  ;;  %v1367_v60 = vmax.f32 %v1164_v53, 0.0  ;;  %3204 = vmatprep.subr.bf16.mxu1 %v11335_v51 }
 0x1b1   : > { %v1368_v59 = vmax.f32 %v1166_v55, 0.0  ;;  %3205 = vmatpush1.bf16.msra.mxu1 %v11333_v50 }
 0x1b2   : > { %v1369_v61 = vmax.f32 %v1168_v57, 0.0 }
 0x1b3   : > { %v1456_v62 = vpack.c.bf16 %v1368_v59, %v1366_v58 }
 0x1b4   : > { %v1171_v63 = vpop.f32.mrb[80].mxu0  ;;  %v1457_v0 = vpack.c.bf16 %v1369_v61, %v1367_v60 }
 0x1b5   : > { %v1172_v2 = vadd.f32 %v1171_v63, %v12002_v38  ;;  %v1173_v3 = vpop.f32.mrb[81].mxu0 }
 0x1b6   : > { %v1174_v4 = vadd.f32 %v1173_v3, %v12006_v39  ;;  %v1175_v6 = vpop.f32.mrb[82].mxu0  ;;  %1910 = vmatprep.mubr.bf16.mxu1 %v1457_v0 }
 0x1b7   : > { %v1176_v7 = vadd.f32 %v1175_v6, %v12002_v38  ;;  %v1177_v8 = vpop.f32.mrb[83].mxu0  ;;  %1911 = vmatmul.mubr.bf16.gmra.mrb[76].mxu1 %v1456_v62  ;;  %v1370_v11 = vmax.f32 %v1172_v2, 0.0 }
 0x1b8   : > { %v1178_v9 = vadd.f32 %v1177_v8, %v12006_v39  ;;  %v1371_v13 = vmax.f32 %v1174_v4, 0.0 }
 0x1b9   : > { %v1372_v12 = vmax.f32 %v1176_v7, 0.0 }
 0x1ba   : > { %v1373_v14 = vmax.f32 %v1178_v9, 0.0 }
 0x1bb   : > { %v1458_v15 = vpack.c.bf16 %v1372_v12, %v1370_v11 }
 0x1bc   : > { %v1181_v18 = vpop.f32.mrb[84].mxu0  ;;  %v1459_v19 = vpack.c.bf16 %v1373_v14, %v1371_v13 }
 0x1bd   : > { %v1182_v20 = vadd.f32 %v1181_v18, %v12002_v38  ;;  %v1183_v21 = vpop.f32.mrb[85].mxu0 }
 0x1be   : > { %v1184_v22 = vadd.f32 %v1183_v21, %v12006_v39  ;;  %v1185_v23 = vpop.f32.mrb[86].mxu0  ;;  %1920 = vmatprep.mubr.bf16.mxu1 %v1459_v19  ;;  %v11336_v19 = vld [vmem:[#allocation3 + $0x380] ss:$8 sps:$4 sm:$0xff]  }
 0x1bf   : > { %v1186_v24 = vadd.f32 %v1185_v23, %v12002_v38  ;;  %v1187_v25 = vpop.f32.mrb[87].mxu0  ;;  %1921 = vmatmul.mubr.bf16.gmra.mrb[80].mxu1 %v1458_v15  ;;  %v1374_v27 = vmax.f32 %v1182_v20, 0.0  ;;  %v11338_v20 = vld [vmem:[#allocation3 + $0x384] ss:$8 sps:$4 sm:$0xff]  }
 0x1c0   : > { %v1188_v26 = vadd.f32 %v1187_v25, %v12006_v39  ;;  %v1375_v29 = vmax.f32 %v1184_v22, 0.0  ;;  %3206 = vmatprep.subr.bf16.mxu1 %v11338_v20 }
 0x1c1   : > { %v1376_v28 = vmax.f32 %v1186_v24, 0.0  ;;  %3207 = vmatpush1.bf16.msra.mxu1 %v11336_v19 }
 0x1c2   : > { %v1377_v30 = vmax.f32 %v1188_v26, 0.0 }
 0x1c3   : > { %v1460_v31 = vpack.c.bf16 %v1376_v28, %v1374_v27 }
 0x1c4   : > { %v1191_v32 = vpop.f32.mrb[88].mxu0  ;;  %v1461_v34 = vpack.c.bf16 %v1377_v30, %v1375_v29 }
 0x1c5   : > { %v1192_v36 = vadd.f32 %v1191_v32, %v12002_v38  ;;  %v1193_v37 = vpop.f32.mrb[89].mxu0 }
 0x1c6   : > { %v1194_v40 = vadd.f32 %v1193_v37, %v12006_v39  ;;  %v1195_v41 = vpop.f32.mrb[90].mxu0  ;;  %1930 = vmatprep.mubr.bf16.mxu1 %v1461_v34 }
 0x1c7   : > { %v1196_v42 = vadd.f32 %v1195_v41, %v12002_v38  ;;  %v1197_v43 = vpop.f32.mrb[91].mxu0  ;;  %1931 = vmatmul.mubr.bf16.gmra.mrb[84].mxu1 %v1460_v31  ;;  %v1378_v45 = vmax.f32 %v1192_v36, 0.0 }
 0x1c8   : > { %v1198_v44 = vadd.f32 %v1197_v43, %v12006_v39  ;;  %v1379_v47 = vmax.f32 %v1194_v40, 0.0 }
 0x1c9   : > { %v1380_v46 = vmax.f32 %v1196_v42, 0.0 }
 0x1ca   : > { %v1381_v48 = vmax.f32 %v1198_v44, 0.0 }
 0x1cb   : > { %v1462_v49 = vpack.c.bf16 %v1380_v46, %v1378_v45 }
 0x1cc   : > { %v1201_v52 = vpop.f32.mrb[92].mxu0  ;;  %v1463_v53 = vpack.c.bf16 %v1381_v48, %v1379_v47 }
 0x1cd   : > { %v1202_v54 = vadd.f32 %v1201_v52, %v12002_v38  ;;  %v1203_v55 = vpop.f32.mrb[93].mxu0 }
 0x1ce   : > { %v1204_v56 = vadd.f32 %v1203_v55, %v12006_v39  ;;  %v1205_v57 = vpop.f32.mrb[94].mxu0  ;;  %1940 = vmatprep.mubr.bf16.mxu1 %v1463_v53  ;;  %v11339_v53 = vld [vmem:[#allocation3 + $0x390] ss:$8 sps:$4 sm:$0xff]  }
 0x1cf   : > { %v1206_v58 = vadd.f32 %v1205_v57, %v12002_v38  ;;  %v1207_v59 = vpop.f32.mrb[95].mxu0  ;;  %1941 = vmatmul.mubr.bf16.gmra.mrb[88].mxu1 %v1462_v49  ;;  %v1382_v61 = vmax.f32 %v1202_v54, 0.0  ;;  %v11341_v54 = vld [vmem:[#allocation3 + $0x394] ss:$8 sps:$4 sm:$0xff]   ;;  %v10360_v57 = vld [vmem:[%s15529_s4 + $0x2] sm:$0x3] }
 0x1d0   : > { %v1208_v60 = vadd.f32 %v1207_v59, %v12006_v39  ;;  %v1383_v63 = vmax.f32 %v1204_v56, 0.0  ;;  %3208 = vmatprep.subr.bf16.mxu1 %v11341_v54 }
 0x1d1   : > { %v1384_v62 = vmax.f32 %v1206_v58, 0.0  ;;  %3209 = vmatpush1.bf16.msra.mxu1 %v11339_v53 }
 0x1d2   : > { %v1385_v0 = vmax.f32 %v1208_v60, 0.0 }
 0x1d3   : > { %v1464_v2 = vpack.c.bf16 %v1384_v62, %v1382_v61 }
 0x1d4   : > { %v1211_v3 = vpop.f32.mrb[96].mxu0  ;;  %v1465_v4 = vpack.c.bf16 %v1385_v0, %v1383_v63  ;;  %v12137_v0 = vrot.slane %v10360_v57, %v11993_v33 }
 0x1d5   : > { %v1212_v6 = vadd.f32 %v1211_v3, %v12002_v38  ;;  %v1213_v7 = vpop.f32.mrb[97].mxu0  ;;  %v12141_v3 = vrot.slane %v10360_v57, %v11998_v35 }
 0x1d6   : > { %v1214_v8 = vadd.f32 %v1213_v7, %v12006_v39  ;;  %v1215_v9 = vpop.f32.mrb[98].mxu0  ;;  %1950 = vmatprep.mubr.bf16.mxu1 %v1465_v4 }
 0x1d7   : > { %v1216_v11 = vadd.f32 %v1215_v9, %v12002_v38  ;;  %v1217_v12 = vpop.f32.mrb[99].mxu0  ;;  %1951 = vmatmul.mubr.bf16.gmra.mrb[92].mxu1 %v1464_v2  ;;  %v1386_v14 = vmax.f32 %v1212_v6, 0.0 }
 0x1d8   : > { %v1218_v13 = vadd.f32 %v1217_v12, %v12006_v39  ;;  %v1387_v16 = vmax.f32 %v1214_v8, 0.0 }
 0x1d9   : > { %v1388_v15 = vmax.f32 %v1216_v11, 0.0 }
 0x1da   : > { %v1389_v17 = vmax.f32 %v1218_v13, 0.0 }
 0x1db   : > { %v1466_v18 = vpack.c.bf16 %v1388_v15, %v1386_v14 }
 0x1dc   : > { %v1221_v21 = vpop.f32.mrb[100].mxu0  ;;  %v1467_v22 = vpack.c.bf16 %v1389_v17, %v1387_v16 }
 0x1dd   : > { %v1222_v23 = vadd.f32 %v1221_v21, %v12002_v38  ;;  %v1223_v24 = vpop.f32.mrb[101].mxu0 }
 0x1de   : > { %v1224_v25 = vadd.f32 %v1223_v24, %v12006_v39  ;;  %v1225_v26 = vpop.f32.mrb[102].mxu0  ;;  %1960 = vmatprep.mubr.bf16.mxu1 %v1467_v22 }
 0x1df   : > { %v1226_v27 = vadd.f32 %v1225_v26, %v12002_v38  ;;  %v1227_v28 = vpop.f32.mrb[103].mxu0  ;;  %1961 = vmatmul.mubr.bf16.gmra.mrb[96].mxu1 %v1466_v18  ;;  %v1390_v30 = vmax.f32 %v1222_v23, 0.0 }
 0x1e0   : > { %v1228_v29 = vadd.f32 %v1227_v28, %v12006_v39  ;;  %v1391_v32 = vmax.f32 %v1224_v25, 0.0 }
 0x1e1   : > { %v1392_v31 = vmax.f32 %v1226_v27, 0.0 }
 0x1e2   : > { %v1393_v34 = vmax.f32 %v1228_v29, 0.0 }
 0x1e3   : > { %v1468_v36 = vpack.c.bf16 %v1392_v31, %v1390_v30 }
 0x1e4   : > { %v1231_v37 = vpop.f32.mrb[104].mxu0  ;;  %v1469_v40 = vpack.c.bf16 %v1393_v34, %v1391_v32 }
 0x1e5   : > { %v1232_v41 = vadd.f32 %v1231_v37, %v12002_v38  ;;  %v1233_v42 = vpop.f32.mrb[105].mxu0 }
 0x1e6   : > { %v1234_v43 = vadd.f32 %v1233_v42, %v12006_v39  ;;  %v1235_v44 = vpop.f32.mrb[106].mxu0  ;;  %1970 = vmatprep.mubr.bf16.mxu1 %v1469_v40 }
 0x1e7   : > { %v1236_v45 = vadd.f32 %v1235_v44, %v12002_v38  ;;  %v1237_v46 = vpop.f32.mrb[107].mxu0  ;;  %1971 = vmatmul.mubr.bf16.gmra.mrb[100].mxu1 %v1468_v36  ;;  %v1394_v48 = vmax.f32 %v1232_v41, 0.0 }
 0x1e8   : > { %v1238_v47 = vadd.f32 %v1237_v46, %v12006_v39  ;;  %v1395_v50 = vmax.f32 %v1234_v43, 0.0  ;;  %v11342_v46 = vld [vmem:[#allocation3 + $0x3a0] ss:$8 sps:$4 sm:$0xff]  }
 0x1e9   : > { %v1396_v49 = vmax.f32 %v1236_v45, 0.0 }
 0x1ea   : > { %v1397_v51 = vmax.f32 %v1238_v47, 0.0  ;;  %v11344_v47 = vld [vmem:[#allocation3 + $0x3a4] ss:$8 sps:$4 sm:$0xff]  }
 0x1eb   : > { %v1470_v52 = vpack.c.bf16 %v1396_v49, %v1394_v48  ;;  %3210 = vmatprep.subr.bf16.mxu1 %v11344_v47 }
 0x1ec   : > { %v1241_v55 = vpop.f32.mrb[108].mxu0  ;;  %v1471_v56 = vpack.c.bf16 %v1397_v51, %v1395_v50  ;;  %3211 = vmatpush1.bf16.msra.mxu1 %v11342_v46 }
 0x1ed   : > { %v1242_v58 = vadd.f32 %v1241_v55, %v12002_v38  ;;  %v1243_v59 = vpop.f32.mrb[109].mxu0 }
 0x1ee   : > { %v1244_v60 = vadd.f32 %v1243_v59, %v12006_v39  ;;  %v1245_v61 = vpop.f32.mrb[110].mxu0  ;;  %1980 = vmatprep.mubr.bf16.mxu1 %v1471_v56 }
 0x1ef   : > { %v1246_v62 = vadd.f32 %v1245_v61, %v12002_v38  ;;  %v1247_v63 = vpop.f32.mrb[111].mxu0  ;;  %1981 = vmatmul.mubr.bf16.gmra.mrb[104].mxu1 %v1470_v52  ;;  %v1398_v4 = vmax.f32 %v1242_v58, 0.0 }
 0x1f0   : > { %v1248_v2 = vadd.f32 %v1247_v63, %v12006_v39  ;;  %v1399_v7 = vmax.f32 %v1244_v60, 0.0 }
 0x1f1   : > { %v1400_v6 = vmax.f32 %v1246_v62, 0.0 }
 0x1f2   : > { %v1401_v8 = vmax.f32 %v1248_v2, 0.0  ;;  %v1722_v9 = vpop.f32.mrb[0].mxu1 }
 0x1f3   : > { %v1723_v11 = vadd.f32 %v1722_v9, %v12137_v0  ;;  %v1724_v12 = vpop.f32.mrb[1].mxu1  ;;  %v1472_v13 = vpack.c.bf16 %v1400_v6, %v1398_v4 }
 0x1f4   : > { %v1725_v14 = vadd.f32 %v1724_v12, %v12141_v3  ;;  %v1251_v15 = vpop.f32.mrb[112].mxu0  ;;  %v1726_v16 = vpop.f32.mrb[2].mxu1  ;;  %v1473_v17 = vpack.c.bf16 %v1401_v8, %v1399_v7 }
 0x1f5   : > { %v1252_v18 = vadd.f32 %v1251_v15, %v12002_v38  ;;  %v1727_v19 = vadd.f32 %v1726_v16, %v12137_v0  ;;  %v1253_v20 = vpop.f32.mrb[113].mxu0  ;;  %v1728_v21 = vpop.f32.mrb[3].mxu1  ;;  %v2041_v25 = vmax.f32 %v1723_v11, 0.0 }
 0x1f6   : > { %v1254_v22 = vadd.f32 %v1253_v20, %v12006_v39  ;;  %v1729_v23 = vadd.f32 %v1728_v21, %v12141_v3  ;;  %v1255_v24 = vpop.f32.mrb[114].mxu0  ;;  %1990 = vmatprep.mubr.bf16.mxu1 %v1473_v17  ;;  %v2042_v30 = vmax.f32 %v1725_v14, 0.0 }
 0x1f7   : > { %v2043_v26 = vmax.f32 %v1727_v19, 0.0  ;;  %v1256_v27 = vadd.f32 %v1255_v24, %v12002_v38  ;;  %v1257_v28 = vpop.f32.mrb[115].mxu0  ;;  %1991 = vmatmul.mubr.bf16.gmra.mrb[108].mxu1 %v1472_v13  ;;  %v1402_v32 = vmax.f32 %v1252_v18, 0.0 }
 0x1f8   : > { %v1258_v29 = vadd.f32 %v1257_v28, %v12006_v39  ;;  %v2044_v31 = vmax.f32 %v1729_v23, 0.0  ;;  %v1403_v37 = vmax.f32 %v1254_v22, 0.0 }
 0x1f9   : > { %v2169_v34 = vpack.c.bf16 %v2043_v26, %v2041_v25  ;;  %v1404_v36 = vmax.f32 %v1256_v27, 0.0 }
 0x1fa   : > { %v1405_v40 = vmax.f32 %v1258_v29, 0.0  ;;  %v1732_v41 = vpop.f32.mrb[4].mxu1  ;;  %v2170_v42 = vpack.c.bf16 %v2044_v31, %v2042_v30 }
 0x1fb   : > { %v1733_v43 = vadd.f32 %v1732_v41, %v12137_v0  ;;  %v1734_v44 = vpop.f32.mrb[5].mxu1  ;;  %v1474_v45 = vpack.c.bf16 %v1404_v36, %v1402_v32 }
 0x1fc   : > { %v1735_v48 = vadd.f32 %v1734_v44, %v12141_v3  ;;  %v1261_v49 = vpop.f32.mrb[116].mxu0  ;;  %v1736_v50 = vpop.f32.mrb[6].mxu1  ;;  %2471 = vmatprep.mubr.bf16.mxu0 %v2170_v42  ;;  %v1475_v51 = vpack.c.bf16 %v1405_v40, %v1403_v37 }
 0x1fd   : > { %v1262_v52 = vadd.f32 %v1261_v49, %v12002_v38  ;;  %v1737_v53 = vadd.f32 %v1736_v50, %v12137_v0  ;;  %v1263_v54 = vpop.f32.mrb[117].mxu0  ;;  %v1738_v55 = vpop.f32.mrb[7].mxu1  ;;  %2472 = vmatmul.mubr.bf16.vlgmr.msra.gmra.mrb[128].mxu0 %v2169_v34  ;;  %v2045_v61 = vmax.f32 %v1733_v43, 0.0  ;;  %v11345_v49 = vld [vmem:[#allocation3 + $0x3b0] ss:$8 sps:$4 sm:$0xff]  }
 0x1fe   : > { %v1264_v56 = vadd.f32 %v1263_v54, %v12006_v39  ;;  %v1739_v57 = vadd.f32 %v1738_v55, %v12141_v3  ;;  %v1265_v58 = vpop.f32.mrb[118].mxu0  ;;  %2000 = vmatprep.mubr.bf16.mxu1 %v1475_v51  ;;  %v2046_v2 = vmax.f32 %v1735_v48, 0.0  ;;  %v11347_v50 = vld [vmem:[#allocation3 + $0x3b4] ss:$8 sps:$4 sm:$0xff]  }
 0x1ff   : > { %v1266_v59 = vadd.f32 %v1265_v58, %v12002_v38  ;;  %v1267_v60 = vpop.f32.mrb[119].mxu0  ;;  %2001 = vmatmul.mubr.bf16.gmra.mrb[112].mxu1 %v1474_v45  ;;  %v2047_v62 = vmax.f32 %v1737_v53, 0.0  ;;  %v1406_v6 = vmax.f32 %v1262_v52, 0.0  ;;  %3212 = vmatprep.subr.bf16.mxu1 %v11347_v50 }
 0x200   : > { %v1268_v63 = vadd.f32 %v1267_v60, %v12006_v39  ;;  %v2048_v4 = vmax.f32 %v1739_v57, 0.0  ;;  %v1407_v9 = vmax.f32 %v1264_v56, 0.0  ;;  %3213 = vmatpush1.bf16.msra.mxu1 %v11345_v49 }
 0x201   : > { %v1408_v7 = vmax.f32 %v1266_v59, 0.0  ;;  %v2171_v8 = vpack.c.bf16 %v2047_v62, %v2045_v61 }
 0x202   : > { %v1409_v11 = vmax.f32 %v1268_v63, 0.0  ;;  %v1742_v12 = vpop.f32.mrb[8].mxu1  ;;  %v2172_v13 = vpack.c.bf16 %v2048_v4, %v2046_v2 }
 0x203   : > { %v1743_v14 = vadd.f32 %v1742_v12, %v12137_v0  ;;  %v1744_v15 = vpop.f32.mrb[9].mxu1  ;;  %v1476_v16 = vpack.c.bf16 %v1408_v7, %v1406_v6 }
 0x204   : > { %v1745_v17 = vadd.f32 %v1744_v15, %v12141_v3  ;;  %v1271_v18 = vpop.f32.mrb[120].mxu0  ;;  %v1746_v19 = vpop.f32.mrb[10].mxu1  ;;  %2481 = vmatprep.mubr.bf16.mxu0 %v2172_v13  ;;  %v1477_v20 = vpack.c.bf16 %v1409_v11, %v1407_v9 }
 0x205   : > { %v1272_v21 = vadd.f32 %v1271_v18, %v12002_v38  ;;  %v1747_v22 = vadd.f32 %v1746_v19, %v12137_v0  ;;  %v1273_v23 = vpop.f32.mrb[121].mxu0  ;;  %v1748_v24 = vpop.f32.mrb[11].mxu1  ;;  %2482 = vmatmul.mubr.bf16.gmra.mrb[132].mxu0 %v2171_v8  ;;  %v2049_v30 = vmax.f32 %v1743_v14, 0.0 }
 0x206   : > { %v1274_v25 = vadd.f32 %v1273_v23, %v12006_v39  ;;  %v1749_v26 = vadd.f32 %v1748_v24, %v12141_v3  ;;  %v1275_v27 = vpop.f32.mrb[122].mxu0  ;;  %2010 = vmatprep.mubr.bf16.mxu1 %v1477_v20  ;;  %v2050_v34 = vmax.f32 %v1745_v17, 0.0 }
 0x207   : > { %v1276_v28 = vadd.f32 %v1275_v27, %v12002_v38  ;;  %v1277_v29 = vpop.f32.mrb[123].mxu0  ;;  %2011 = vmatmul.mubr.bf16.gmra.mrb[116].mxu1 %v1476_v16  ;;  %v2051_v31 = vmax.f32 %v1747_v22, 0.0  ;;  %v1410_v37 = vmax.f32 %v1272_v21, 0.0 }
 0x208   : > { %v1278_v32 = vadd.f32 %v1277_v29, %v12006_v39  ;;  %v2052_v36 = vmax.f32 %v1749_v26, 0.0  ;;  %v1411_v42 = vmax.f32 %v1274_v25, 0.0 }
 0x209   : > { %v1412_v40 = vmax.f32 %v1276_v28, 0.0  ;;  %v2173_v41 = vpack.c.bf16 %v2051_v31, %v2049_v30 }
 0x20a   : > { %v1413_v43 = vmax.f32 %v1278_v32, 0.0  ;;  %v1752_v44 = vpop.f32.mrb[12].mxu1  ;;  %v2174_v45 = vpack.c.bf16 %v2052_v36, %v2050_v34  ;;  %v11348_v34 = vld [vmem:[#allocation3 + $0x3c0] ss:$8 sps:$4 sm:$0xff]   ;;  %v11350_v36 = vld [vmem:[#allocation3 + $0x3c4] ss:$8 sps:$4 sm:$0xff]  }
 0x20b   : > { %v1753_v46 = vadd.f32 %v1752_v44, %v12137_v0  ;;  %v1754_v47 = vpop.f32.mrb[13].mxu1  ;;  %v1478_v48 = vpack.c.bf16 %v1412_v40, %v1410_v37  ;;  %3214 = vmatprep.subr.bf16.mxu1 %v11350_v36 }
 0x20c   : > { %v1755_v51 = vadd.f32 %v1754_v47, %v12141_v3  ;;  %v1281_v52 = vpop.f32.mrb[124].mxu0  ;;  %v1756_v53 = vpop.f32.mrb[14].mxu1  ;;  %2491 = vmatprep.mubr.bf16.mxu0 %v2174_v45  ;;  %v1479_v54 = vpack.c.bf16 %v1413_v43, %v1411_v42  ;;  %3215 = vmatpush1.bf16.msra.mxu1 %v11348_v34 }
 0x20d   : > { %v1282_v55 = vadd.f32 %v1281_v52, %v12002_v38  ;;  %v1757_v56 = vadd.f32 %v1756_v53, %v12137_v0  ;;  %v1283_v57 = vpop.f32.mrb[125].mxu0  ;;  %v1758_v58 = vpop.f32.mrb[15].mxu1  ;;  %2492 = vmatmul.mubr.bf16.gmra.mrb[136].mxu0 %v2173_v41  ;;  %v2053_v2 = vmax.f32 %v1753_v46, 0.0 }
 0x20e   : > { %v1284_v59 = vadd.f32 %v1283_v57, %v12006_v39  ;;  %v1759_v60 = vadd.f32 %v1758_v58, %v12141_v3  ;;  %v1285_v61 = vpop.f32.mrb[126].mxu0  ;;  %2020 = vmatprep.mubr.bf16.mxu1 %v1479_v54  ;;  %v2054_v7 = vmax.f32 %v1755_v51, 0.0 }
 0x20f   : > { %v1286_v62 = vadd.f32 %v1285_v61, %v12002_v38  ;;  %v1287_v63 = vpop.f32.mrb[127].mxu0  ;;  %2021 = vmatmul.mubr.bf16.gmra.mrb[120].mxu1 %v1478_v48  ;;  %v2055_v4 = vmax.f32 %v1757_v56, 0.0  ;;  %v1414_v9 = vmax.f32 %v1282_v55, 0.0 }
 0x210   : > { %v1288_v6 = vadd.f32 %v1287_v63, %v12006_v39  ;;  %v2056_v8 = vmax.f32 %v1759_v60, 0.0  ;;  %v1415_v13 = vmax.f32 %v1284_v59, 0.0 }
 0x211   : > { %v1416_v11 = vmax.f32 %v1286_v62, 0.0  ;;  %v2175_v12 = vpack.c.bf16 %v2055_v4, %v2053_v2 }
 0x212   : > { %v1417_v14 = vmax.f32 %v1288_v6, 0.0  ;;  %v1762_v15 = vpop.f32.mrb[16].mxu1  ;;  %v2176_v16 = vpack.c.bf16 %v2056_v8, %v2054_v7  ;;  %v11351_v7 = vld [vmem:[#allocation3 + $0x3d0] ss:$8 sps:$4 sm:$0xff]   ;;  %v11353_v8 = vld [vmem:[#allocation3 + $0x3d4] ss:$8 sps:$4 sm:$0xff]  }
 0x213   : > { %v1763_v17 = vadd.f32 %v1762_v15, %v12137_v0  ;;  %v1764_v18 = vpop.f32.mrb[17].mxu1  ;;  %v1480_v19 = vpack.c.bf16 %v1416_v11, %v1414_v9  ;;  %3216 = vmatprep.subr.bf16.mxu1 %v11353_v8 }
 0x214   : > { %v1765_v38 = vadd.f32 %v1764_v18, %v12141_v3  ;;  %v1766_v20 = vpop.f32.mrb[18].mxu1  ;;  %2501 = vmatprep.mubr.bf16.mxu0 %v2176_v16  ;;  %v1481_v21 = vpack.c.bf16 %v1417_v14, %v1415_v13  ;;  %3217 = vmatpush1.bf16.msra.mxu1 %v11351_v7 }
 0x215   : > { %v1767_v39 = vadd.f32 %v1766_v20, %v12137_v0  ;;  %v1768_v22 = vpop.f32.mrb[19].mxu1  ;;  %2502 = vmatmul.mubr.bf16.gmra.mrb[140].mxu0 %v2175_v12  ;;  %v2057_v24 = vmax.f32 %v1763_v17, 0.0 }
 0x216   : > { %v1769_v23 = vadd.f32 %v1768_v22, %v12141_v3  ;;  %2030 = vmatprep.mubr.bf16.mxu1 %v1481_v21  ;;  %v2058_v26 = vmax.f32 %v1765_v38, 0.0 }
 0x217   : > { %2031 = vmatmul.mubr.bf16.gmra.mrb[124].mxu1 %v1480_v19  ;;  %v2059_v25 = vmax.f32 %v1767_v39, 0.0 }
 0x218   : > { %v2060_v27 = vmax.f32 %v1769_v23, 0.0 }
 0x219   : > { %v2177_v28 = vpack.c.bf16 %v2059_v25, %v2057_v24 }
 0x21a   : > { %v1772_v29 = vpop.f32.mrb[20].mxu1  ;;  %v2178_v30 = vpack.c.bf16 %v2060_v27, %v2058_v26 }
 0x21b   : > { %v1773_v31 = vadd.f32 %v1772_v29, %v12137_v0  ;;  %v1774_v32 = vpop.f32.mrb[21].mxu1 }
 0x21c   : > { %v1775_v37 = vadd.f32 %v1774_v32, %v12141_v3  ;;  %v1776_v40 = vpop.f32.mrb[22].mxu1  ;;  %2511 = vmatprep.mubr.bf16.mxu0 %v2178_v30 }
 0x21d   : > { %v1777_v41 = vadd.f32 %v1776_v40, %v12137_v0  ;;  %v1778_v42 = vpop.f32.mrb[23].mxu1  ;;  %2512 = vmatmul.mubr.bf16.gmra.mrb[144].mxu0 %v2177_v28  ;;  %v2061_v44 = vmax.f32 %v1773_v31, 0.0  ;;  %v11354_v40 = vld [vmem:[#allocation3 + $0x3e0] ss:$8 sps:$4 sm:$0xff]  }
 0x21e   : > { %v1779_v43 = vadd.f32 %v1778_v42, %v12141_v3  ;;  %v2062_v46 = vmax.f32 %v1775_v37, 0.0 }
 0x21f   : > { %v2063_v45 = vmax.f32 %v1777_v41, 0.0  ;;  %v11356_v41 = vld [vmem:[#allocation3 + $0x3e4] ss:$8 sps:$4 sm:$0xff]  }
 0x220   : > { %v2064_v47 = vmax.f32 %v1779_v43, 0.0  ;;  %3218 = vmatprep.subr.bf16.mxu1 %v11356_v41 }
 0x221   : > { %v2179_v48 = vpack.c.bf16 %v2063_v45, %v2061_v44  ;;  %3219 = vmatpush1.bf16.msra.mxu1 %v11354_v40 }
 0x222   : > { %v1782_v49 = vpop.f32.mrb[24].mxu1  ;;  %v2180_v50 = vpack.c.bf16 %v2064_v47, %v2062_v46 }
 0x223   : > { %v1783_v51 = vadd.f32 %v1782_v49, %v12137_v0  ;;  %v1784_v52 = vpop.f32.mrb[25].mxu1 }
 0x224   : > { %v1785_v53 = vadd.f32 %v1784_v52, %v12141_v3  ;;  %v1786_v54 = vpop.f32.mrb[26].mxu1  ;;  %2521 = vmatprep.mubr.bf16.mxu0 %v2180_v50 }
 0x225   : > { %v1787_v55 = vadd.f32 %v1786_v54, %v12137_v0  ;;  %v1788_v56 = vpop.f32.mrb[27].mxu1  ;;  %2522 = vmatmul.mubr.bf16.gmra.mrb[148].mxu0 %v2179_v48  ;;  %v2065_v58 = vmax.f32 %v1783_v51, 0.0 }
 0x226   : > { %v1789_v57 = vadd.f32 %v1788_v56, %v12141_v3  ;;  %v2066_v60 = vmax.f32 %v1785_v53, 0.0 }
 0x227   : > { %v2067_v59 = vmax.f32 %v1787_v55, 0.0 }
 0x228   : > { %v2068_v61 = vmax.f32 %v1789_v57, 0.0 }
 0x229   : > { %v2181_v62 = vpack.c.bf16 %v2067_v59, %v2065_v58 }
 0x22a   : > { %v1792_v63 = vpop.f32.mrb[28].mxu1  ;;  %v2182_v2 = vpack.c.bf16 %v2068_v61, %v2066_v60 }
 0x22b   : > { %v1793_v4 = vadd.f32 %v1792_v63, %v12137_v0  ;;  %v1794_v6 = vpop.f32.mrb[29].mxu1 }
 0x22c   : > { %v1795_v9 = vadd.f32 %v1794_v6, %v12141_v3  ;;  %v1796_v11 = vpop.f32.mrb[30].mxu1  ;;  %2531 = vmatprep.mubr.bf16.mxu0 %v2182_v2 }
 0x22d   : > { %v1797_v12 = vadd.f32 %v1796_v11, %v12137_v0  ;;  %v1798_v13 = vpop.f32.mrb[31].mxu1  ;;  %2532 = vmatmul.mubr.bf16.gmra.mrb[152].mxu0 %v2181_v62  ;;  %v2069_v15 = vmax.f32 %v1793_v4, 0.0  ;;  %v11357_v11 = vld [vmem:[#allocation3 + $0x3f0] ss:$8 sps:$4 sm:$0xff]  }
 0x22e   : > { %v1799_v14 = vadd.f32 %v1798_v13, %v12141_v3  ;;  %v2070_v17 = vmax.f32 %v1795_v9, 0.0 }
 0x22f   : > { %v2071_v16 = vmax.f32 %v1797_v12, 0.0  ;;  %v11359_v12 = vld [vmem:[#allocation3 + $0x3f4] ss:$8 sps:$4 sm:$0xff]  }
 0x230   : > { %v2072_v18 = vmax.f32 %v1799_v14, 0.0  ;;  %3220 = vmatprep.subr.bf16.mxu1 %v11359_v12 }
 0x231   : > { %v2183_v19 = vpack.c.bf16 %v2071_v16, %v2069_v15  ;;  %3221 = vmatpush1.bf16.msra.mxu1 %v11357_v11 }
 0x232   : > { %v1802_v38 = vpop.f32.mrb[32].mxu1  ;;  %v2184_v20 = vpack.c.bf16 %v2072_v18, %v2070_v17 }
 0x233   : > { %v1803_v21 = vadd.f32 %v1802_v38, %v12137_v0  ;;  %v1804_v39 = vpop.f32.mrb[33].mxu1 }
 0x234   : > { %v1805_v22 = vadd.f32 %v1804_v39, %v12141_v3  ;;  %v1806_v23 = vpop.f32.mrb[34].mxu1  ;;  %2541 = vmatprep.mubr.bf16.mxu0 %v2184_v20 }
 0x235   : > { %v1807_v24 = vadd.f32 %v1806_v23, %v12137_v0  ;;  %v1808_v25 = vpop.f32.mrb[35].mxu1  ;;  %2542 = vmatmul.mubr.bf16.gmra.mrb[156].mxu0 %v2183_v19  ;;  %v2073_v27 = vmax.f32 %v1803_v21, 0.0 }
 0x236   : > { %v1809_v26 = vadd.f32 %v1808_v25, %v12141_v3  ;;  %v2074_v29 = vmax.f32 %v1805_v22, 0.0 }
 0x237   : > { %v2075_v28 = vmax.f32 %v1807_v24, 0.0 }
 0x238   : > { %v2076_v30 = vmax.f32 %v1809_v26, 0.0 }
 0x239   : > { %v2185_v31 = vpack.c.bf16 %v2075_v28, %v2073_v27 }
 0x23a   : > { %v1812_v32 = vpop.f32.mrb[36].mxu1  ;;  %v2186_v34 = vpack.c.bf16 %v2076_v30, %v2074_v29 }
 0x23b   : > { %v1813_v36 = vadd.f32 %v1812_v32, %v12137_v0  ;;  %v1814_v37 = vpop.f32.mrb[37].mxu1 }
 0x23c   : > { %v1815_v42 = vadd.f32 %v1814_v37, %v12141_v3  ;;  %v1816_v43 = vpop.f32.mrb[38].mxu1  ;;  %2551 = vmatprep.mubr.bf16.mxu0 %v2186_v34 }
 0x23d   : > { %v1817_v44 = vadd.f32 %v1816_v43, %v12137_v0  ;;  %v1818_v45 = vpop.f32.mrb[39].mxu1  ;;  %2552 = vmatmul.mubr.bf16.gmra.mrb[160].mxu0 %v2185_v31  ;;  %v2077_v47 = vmax.f32 %v1813_v36, 0.0 }
 0x23e   : > { %v1819_v46 = vadd.f32 %v1818_v45, %v12141_v3  ;;  %v2078_v49 = vmax.f32 %v1815_v42, 0.0 }
 0x23f   : > { %v2079_v48 = vmax.f32 %v1817_v44, 0.0 }
 0x240   : > { %v2080_v50 = vmax.f32 %v1819_v46, 0.0 }
 0x241   : > { %v2187_v51 = vpack.c.bf16 %v2079_v48, %v2077_v47  ;;  %v11362_v47 = vld [vmem:[%s15527_s2 + $0x44] ss:$8 sps:$4 sm:$0xff]  }
 0x242   : > { %v1822_v52 = vpop.f32.mrb[40].mxu1  ;;  %v2188_v53 = vpack.c.bf16 %v2080_v50, %v2078_v49  ;;  %4572 = vmatprep.subr.bf16.mxu1 %v11362_v47 }
 0x243   : > { %v1823_v54 = vadd.f32 %v1822_v52, %v12137_v0  ;;  %v1824_v55 = vpop.f32.mrb[41].mxu1 }
 0x244   : > { %v1825_v56 = vadd.f32 %v1824_v55, %v12141_v3  ;;  %v1826_v57 = vpop.f32.mrb[42].mxu1  ;;  %2561 = vmatprep.mubr.bf16.mxu0 %v2188_v53 }
 0x245   : > { %v1827_v58 = vadd.f32 %v1826_v57, %v12137_v0  ;;  %v1828_v59 = vpop.f32.mrb[43].mxu1  ;;  %2562 = vmatmul.mubr.bf16.gmra.mrb[164].mxu0 %v2187_v51  ;;  %v2081_v61 = vmax.f32 %v1823_v54, 0.0 }
 0x246   : > { %v1829_v60 = vadd.f32 %v1828_v59, %v12141_v3  ;;  %v2082_v63 = vmax.f32 %v1825_v56, 0.0 }
 0x247   : > { %v2083_v62 = vmax.f32 %v1827_v58, 0.0 }
 0x248   : > { %v2084_v2 = vmax.f32 %v1829_v60, 0.0 }
 0x249   : > { %v2189_v4 = vpack.c.bf16 %v2083_v62, %v2081_v61 }
 0x24a   : > { %v1832_v6 = vpop.f32.mrb[44].mxu1  ;;  %v2190_v7 = vpack.c.bf16 %v2084_v2, %v2082_v63 }
 0x24b   : > { %v1833_v8 = vadd.f32 %v1832_v6, %v12137_v0  ;;  %v1834_v9 = vpop.f32.mrb[45].mxu1 }
 0x24c   : > { %v1835_v13 = vadd.f32 %v1834_v9, %v12141_v3  ;;  %v1836_v14 = vpop.f32.mrb[46].mxu1  ;;  %2571 = vmatprep.mubr.bf16.mxu0 %v2190_v7 }
 0x24d   : > { %v1837_v15 = vadd.f32 %v1836_v14, %v12137_v0  ;;  %v1838_v16 = vpop.f32.mrb[47].mxu1  ;;  %2572 = vmatmul.mubr.bf16.gmra.mrb[168].mxu0 %v2189_v4  ;;  %v2085_v18 = vmax.f32 %v1833_v8, 0.0 }
 0x24e   : > { %v1839_v17 = vadd.f32 %v1838_v16, %v12141_v3  ;;  %v2086_v38 = vmax.f32 %v1835_v13, 0.0 }
 0x24f   : > { %v2087_v19 = vmax.f32 %v1837_v15, 0.0 }
 0x250   : > { %v2088_v20 = vmax.f32 %v1839_v17, 0.0 }
 0x251   : > { %v2191_v21 = vpack.c.bf16 %v2087_v19, %v2085_v18 }
 0x252   : > { %v1842_v39 = vpop.f32.mrb[48].mxu1  ;;  %v2192_v22 = vpack.c.bf16 %v2088_v20, %v2086_v38 }
 0x253   : > { %v1843_v23 = vadd.f32 %v1842_v39, %v12137_v0  ;;  %v1844_v24 = vpop.f32.mrb[49].mxu1 }
 0x254   : > { %v1845_v25 = vadd.f32 %v1844_v24, %v12141_v3  ;;  %v1846_v26 = vpop.f32.mrb[50].mxu1  ;;  %2581 = vmatprep.mubr.bf16.mxu0 %v2192_v22 }
 0x255   : > { %v1847_v27 = vadd.f32 %v1846_v26, %v12137_v0  ;;  %v1848_v28 = vpop.f32.mrb[51].mxu1  ;;  %2582 = vmatmul.mubr.bf16.gmra.mrb[172].mxu0 %v2191_v21  ;;  %v2089_v30 = vmax.f32 %v1843_v23, 0.0 }
 0x256   : > { %v1849_v29 = vadd.f32 %v1848_v28, %v12141_v3  ;;  %v2090_v32 = vmax.f32 %v1845_v25, 0.0 }
 0x257   : > { %v2091_v31 = vmax.f32 %v1847_v27, 0.0 }
 0x258   : > { %v2092_v34 = vmax.f32 %v1849_v29, 0.0 }
 0x259   : > { %v2193_v36 = vpack.c.bf16 %v2091_v31, %v2089_v30 }
 0x25a   : > { %v1852_v37 = vpop.f32.mrb[52].mxu1  ;;  %v2194_v40 = vpack.c.bf16 %v2092_v34, %v2090_v32 }
 0x25b   : > { %v1853_v41 = vadd.f32 %v1852_v37, %v12137_v0  ;;  %v1854_v42 = vpop.f32.mrb[53].mxu1 }
 0x25c   : > { %v1855_v43 = vadd.f32 %v1854_v42, %v12141_v3  ;;  %v1856_v44 = vpop.f32.mrb[54].mxu1  ;;  %2591 = vmatprep.mubr.bf16.mxu0 %v2194_v40 }
 0x25d   : > { %v1857_v45 = vadd.f32 %v1856_v44, %v12137_v0  ;;  %v1858_v46 = vpop.f32.mrb[55].mxu1  ;;  %2592 = vmatmul.mubr.bf16.gmra.mrb[176].mxu0 %v2193_v36  ;;  %v2093_v49 = vmax.f32 %v1853_v41, 0.0 }
 0x25e   : > { %v1859_v48 = vadd.f32 %v1858_v46, %v12141_v3  ;;  %v2094_v51 = vmax.f32 %v1855_v43, 0.0 }
 0x25f   : > { %v2095_v50 = vmax.f32 %v1857_v45, 0.0 }
 0x260   : > { %v2096_v52 = vmax.f32 %v1859_v48, 0.0  ;;  %v11363_v48 = vld [vmem:[#allocation3 + $0x400] ss:$8 sps:$4 sm:$0xff]  }
 0x261   : > { %v2195_v53 = vpack.c.bf16 %v2095_v50, %v2093_v49  ;;  %v11365_v49 = vld [vmem:[#allocation3 + $0x404] ss:$8 sps:$4 sm:$0xff]  }
 0x262   : > { %v1862_v54 = vpop.f32.mrb[56].mxu1  ;;  %v2196_v55 = vpack.c.bf16 %v2096_v52, %v2094_v51  ;;  %3941 = vmatprep.subr.bf16.mxu0 %v11365_v49 }
 0x263   : > { %v1863_v56 = vadd.f32 %v1862_v54, %v12137_v0  ;;  %v1864_v57 = vpop.f32.mrb[57].mxu1  ;;  %3942 = vmatpush1.bf16.msra.mxu0 %v11363_v48 }
 0x264   : > { %v1865_v58 = vadd.f32 %v1864_v57, %v12141_v3  ;;  %v1866_v59 = vpop.f32.mrb[58].mxu1  ;;  %2601 = vmatprep.mubr.bf16.mxu0 %v2196_v55 }
 0x265   : > { %v1867_v60 = vadd.f32 %v1866_v59, %v12137_v0  ;;  %v1868_v61 = vpop.f32.mrb[59].mxu1  ;;  %2602 = vmatmul.mubr.bf16.gmra.mrb[180].mxu0 %v2195_v53  ;;  %v2097_v63 = vmax.f32 %v1863_v56, 0.0 }
 0x266   : > { %v1869_v62 = vadd.f32 %v1868_v61, %v12141_v3  ;;  %v2098_v4 = vmax.f32 %v1865_v58, 0.0 }
 0x267   : > { %v2099_v2 = vmax.f32 %v1867_v60, 0.0 }
 0x268   : > { %v2100_v6 = vmax.f32 %v1869_v62, 0.0 }
 0x269   : > { %v2197_v7 = vpack.c.bf16 %v2099_v2, %v2097_v63 }
 0x26a   : > { %v1872_v8 = vpop.f32.mrb[60].mxu1  ;;  %v2198_v9 = vpack.c.bf16 %v2100_v6, %v2098_v4 }
 0x26b   : > { %v1873_v11 = vadd.f32 %v1872_v8, %v12137_v0  ;;  %v1874_v12 = vpop.f32.mrb[61].mxu1 }
 0x26c   : > { %v1875_v13 = vadd.f32 %v1874_v12, %v12141_v3  ;;  %v1876_v14 = vpop.f32.mrb[62].mxu1  ;;  %2611 = vmatprep.mubr.bf16.mxu0 %v2198_v9 }
 0x26d   : > { %v1877_v15 = vadd.f32 %v1876_v14, %v12137_v0  ;;  %v1878_v16 = vpop.f32.mrb[63].mxu1  ;;  %2612 = vmatmul.mubr.bf16.gmra.mrb[184].mxu0 %v2197_v7  ;;  %v2101_v18 = vmax.f32 %v1873_v11, 0.0 }
 0x26e   : > { %v1879_v17 = vadd.f32 %v1878_v16, %v12141_v3  ;;  %v2102_v38 = vmax.f32 %v1875_v13, 0.0 }
 0x26f   : > { %v2103_v19 = vmax.f32 %v1877_v15, 0.0 }
 0x270   : > { %v2104_v20 = vmax.f32 %v1879_v17, 0.0 }
 0x271   : > { %v2199_v21 = vpack.c.bf16 %v2103_v19, %v2101_v18  ;;  %v11366_v19 = vld [vmem:[#allocation3 + $0x410] ss:$8 sps:$4 sm:$0xff]  }
 0x272   : > { %v1882_v39 = vpop.f32.mrb[64].mxu1  ;;  %v2200_v22 = vpack.c.bf16 %v2104_v20, %v2102_v38  ;;  %v11368_v38 = vld [vmem:[#allocation3 + $0x414] ss:$8 sps:$4 sm:$0xff]  }
 0x273   : > { %v1883_v23 = vadd.f32 %v1882_v39, %v12137_v0  ;;  %v1884_v24 = vpop.f32.mrb[65].mxu1  ;;  %3943 = vmatprep.subr.bf16.mxu0 %v11368_v38 }
 0x274   : > { %v1885_v25 = vadd.f32 %v1884_v24, %v12141_v3  ;;  %v1886_v26 = vpop.f32.mrb[66].mxu1  ;;  %2621 = vmatprep.mubr.bf16.mxu0 %v2200_v22  ;;  %3944 = vmatpush1.bf16.msra.mxu0 %v11366_v19 }
 0x275   : > { %v1887_v27 = vadd.f32 %v1886_v26, %v12137_v0  ;;  %v1888_v28 = vpop.f32.mrb[67].mxu1  ;;  %2622 = vmatmul.mubr.bf16.gmra.mrb[188].mxu0 %v2199_v21  ;;  %v2105_v30 = vmax.f32 %v1883_v23, 0.0 }
 0x276   : > { %v1889_v29 = vadd.f32 %v1888_v28, %v12141_v3  ;;  %v2106_v32 = vmax.f32 %v1885_v25, 0.0 }
 0x277   : > { %v2107_v31 = vmax.f32 %v1887_v27, 0.0 }
 0x278   : > { %v2108_v34 = vmax.f32 %v1889_v29, 0.0 }
 0x279   : > { %v2201_v36 = vpack.c.bf16 %v2107_v31, %v2105_v30 }
 0x27a   : > { %v1892_v37 = vpop.f32.mrb[68].mxu1  ;;  %v2202_v40 = vpack.c.bf16 %v2108_v34, %v2106_v32 }
 0x27b   : > { %v1893_v41 = vadd.f32 %v1892_v37, %v12137_v0  ;;  %v1894_v42 = vpop.f32.mrb[69].mxu1 }
 0x27c   : > { %v1895_v43 = vadd.f32 %v1894_v42, %v12141_v3  ;;  %v1896_v44 = vpop.f32.mrb[70].mxu1  ;;  %2631 = vmatprep.mubr.bf16.mxu0 %v2202_v40 }
 0x27d   : > { %v1897_v45 = vadd.f32 %v1896_v44, %v12137_v0  ;;  %v1898_v46 = vpop.f32.mrb[71].mxu1  ;;  %2632 = vmatmul.mubr.bf16.gmra.mrb[192].mxu0 %v2201_v36  ;;  %v2109_v50 = vmax.f32 %v1893_v41, 0.0 }
 0x27e   : > { %v1899_v47 = vadd.f32 %v1898_v46, %v12141_v3  ;;  %v2110_v52 = vmax.f32 %v1895_v43, 0.0 }
 0x27f   : > { %v2111_v51 = vmax.f32 %v1897_v45, 0.0 }
 0x280   : > { %v2112_v53 = vmax.f32 %v1899_v47, 0.0 }
 0x281   : > { %v2203_v54 = vpack.c.bf16 %v2111_v51, %v2109_v50  ;;  %v11372_v51 = vld [vmem:[#allocation3 + $0x420] ss:$8 sps:$4 sm:$0xff]  }
 0x282   : > { %v1902_v55 = vpop.f32.mrb[72].mxu1  ;;  %v2204_v56 = vpack.c.bf16 %v2112_v53, %v2110_v52  ;;  %v11374_v52 = vld [vmem:[#allocation3 + $0x424] ss:$8 sps:$4 sm:$0xff]  }
 0x283   : > { %v1903_v57 = vadd.f32 %v1902_v55, %v12137_v0  ;;  %v1904_v58 = vpop.f32.mrb[73].mxu1  ;;  %3945 = vmatprep.subr.bf16.mxu0 %v11374_v52 }
 0x284   : > { %v1905_v59 = vadd.f32 %v1904_v58, %v12141_v3  ;;  %v1906_v60 = vpop.f32.mrb[74].mxu1  ;;  %2641 = vmatprep.mubr.bf16.mxu0 %v2204_v56  ;;  %3946 = vmatpush1.bf16.msra.mxu0 %v11372_v51 }
 0x285   : > { %v1907_v61 = vadd.f32 %v1906_v60, %v12137_v0  ;;  %v1908_v62 = vpop.f32.mrb[75].mxu1  ;;  %2642 = vmatmul.mubr.bf16.gmra.mrb[196].mxu0 %v2203_v54  ;;  %v2113_v2 = vmax.f32 %v1903_v57, 0.0 }
 0x286   : > { %v1909_v63 = vadd.f32 %v1908_v62, %v12141_v3  ;;  %v2114_v6 = vmax.f32 %v1905_v59, 0.0 }
 0x287   : > { %v2115_v4 = vmax.f32 %v1907_v61, 0.0 }
 0x288   : > { %v2116_v7 = vmax.f32 %v1909_v63, 0.0 }
 0x289   : > { %v2205_v8 = vpack.c.bf16 %v2115_v4, %v2113_v2 }
 0x28a   : > { %v1912_v9 = vpop.f32.mrb[76].mxu1  ;;  %v2206_v11 = vpack.c.bf16 %v2116_v7, %v2114_v6 }
 0x28b   : > { %v1913_v12 = vadd.f32 %v1912_v9, %v12137_v0  ;;  %v1914_v13 = vpop.f32.mrb[77].mxu1 }
 0x28c   : > { %v1915_v14 = vadd.f32 %v1914_v13, %v12141_v3  ;;  %v1916_v15 = vpop.f32.mrb[78].mxu1  ;;  %2651 = vmatprep.mubr.bf16.mxu0 %v2206_v11 }
 0x28d   : > { %v1917_v16 = vadd.f32 %v1916_v15, %v12137_v0  ;;  %v1918_v17 = vpop.f32.mrb[79].mxu1  ;;  %2652 = vmatmul.mubr.bf16.gmra.mrb[200].mxu0 %v2205_v8  ;;  %v2117_v20 = vmax.f32 %v1913_v12, 0.0 }
 0x28e   : > { %v1919_v18 = vadd.f32 %v1918_v17, %v12141_v3  ;;  %v2118_v39 = vmax.f32 %v1915_v14, 0.0 }
 0x28f   : > { %v2119_v21 = vmax.f32 %v1917_v16, 0.0 }
 0x290   : > { %v2120_v22 = vmax.f32 %v1919_v18, 0.0 }
 0x291   : > { %v2207_v23 = vpack.c.bf16 %v2119_v21, %v2117_v20  ;;  %v11375_v21 = vld [vmem:[#allocation3 + $0x430] ss:$8 sps:$4 sm:$0xff]  }
 0x292   : > { %v1922_v24 = vpop.f32.mrb[80].mxu1  ;;  %v2208_v25 = vpack.c.bf16 %v2120_v22, %v2118_v39  ;;  %v11377_v39 = vld [vmem:[#allocation3 + $0x434] ss:$8 sps:$4 sm:$0xff]  }
 0x293   : > { %v1923_v26 = vadd.f32 %v1922_v24, %v12137_v0  ;;  %v1924_v27 = vpop.f32.mrb[81].mxu1  ;;  %3947 = vmatprep.subr.bf16.mxu0 %v11377_v39 }
 0x294   : > { %v1925_v28 = vadd.f32 %v1924_v27, %v12141_v3  ;;  %v1926_v29 = vpop.f32.mrb[82].mxu1  ;;  %2661 = vmatprep.mubr.bf16.mxu0 %v2208_v25  ;;  %3948 = vmatpush1.bf16.msra.mxu0 %v11375_v21 }
 0x295   : > { %v1927_v30 = vadd.f32 %v1926_v29, %v12137_v0  ;;  %v1928_v31 = vpop.f32.mrb[83].mxu1  ;;  %2662 = vmatmul.mubr.bf16.gmra.mrb[204].mxu0 %v2207_v23  ;;  %v2121_v34 = vmax.f32 %v1923_v26, 0.0 }
 0x296   : > { %v1929_v32 = vadd.f32 %v1928_v31, %v12141_v3  ;;  %v2122_v37 = vmax.f32 %v1925_v28, 0.0 }
 0x297   : > { %v2123_v36 = vmax.f32 %v1927_v30, 0.0 }
 0x298   : > { %v2124_v40 = vmax.f32 %v1929_v32, 0.0 }
 0x299   : > { %v2209_v41 = vpack.c.bf16 %v2123_v36, %v2121_v34 }
 0x29a   : > { %v1932_v42 = vpop.f32.mrb[84].mxu1  ;;  %v2210_v43 = vpack.c.bf16 %v2124_v40, %v2122_v37 }
 0x29b   : > { %v1933_v44 = vadd.f32 %v1932_v42, %v12137_v0  ;;  %v1934_v45 = vpop.f32.mrb[85].mxu1 }
 0x29c   : > { %v1935_v46 = vadd.f32 %v1934_v45, %v12141_v3  ;;  %v1936_v47 = vpop.f32.mrb[86].mxu1  ;;  %2671 = vmatprep.mubr.bf16.mxu0 %v2210_v43 }
 0x29d   : > { %v1937_v48 = vadd.f32 %v1936_v47, %v12137_v0  ;;  %v1938_v49 = vpop.f32.mrb[87].mxu1  ;;  %2672 = vmatmul.mubr.bf16.gmra.mrb[208].mxu0 %v2209_v41  ;;  %v2125_v53 = vmax.f32 %v1933_v44, 0.0 }
 0x29e   : > { %v1939_v50 = vadd.f32 %v1938_v49, %v12141_v3  ;;  %v2126_v55 = vmax.f32 %v1935_v46, 0.0 }
 0x29f   : > { %v2127_v54 = vmax.f32 %v1937_v48, 0.0 }
 0x2a0   : > { %v2128_v56 = vmax.f32 %v1939_v50, 0.0 }
 0x2a1   : > { %v2211_v57 = vpack.c.bf16 %v2127_v54, %v2125_v53  ;;  %v11378_v54 = vld [vmem:[#allocation3 + $0x440] ss:$8 sps:$4 sm:$0xff]  }
 0x2a2   : > { %v1942_v58 = vpop.f32.mrb[88].mxu1  ;;  %v2212_v59 = vpack.c.bf16 %v2128_v56, %v2126_v55  ;;  %v11380_v55 = vld [vmem:[#allocation3 + $0x444] ss:$8 sps:$4 sm:$0xff]  }
 0x2a3   : > { %v1943_v60 = vadd.f32 %v1942_v58, %v12137_v0  ;;  %v1944_v61 = vpop.f32.mrb[89].mxu1  ;;  %3949 = vmatprep.subr.bf16.mxu0 %v11380_v55 }
 0x2a4   : > { %v1945_v62 = vadd.f32 %v1944_v61, %v12141_v3  ;;  %v1946_v63 = vpop.f32.mrb[90].mxu1  ;;  %2681 = vmatprep.mubr.bf16.mxu0 %v2212_v59  ;;  %3950 = vmatpush1.bf16.msra.mxu0 %v11378_v54 }
 0x2a5   : > { %v1947_v2 = vadd.f32 %v1946_v63, %v12137_v0  ;;  %v1948_v4 = vpop.f32.mrb[91].mxu1  ;;  %2682 = vmatmul.mubr.bf16.gmra.mrb[212].mxu0 %v2211_v57  ;;  %v2129_v7 = vmax.f32 %v1943_v60, 0.0 }
 0x2a6   : > { %v1949_v6 = vadd.f32 %v1948_v4, %v12141_v3  ;;  %v2130_v9 = vmax.f32 %v1945_v62, 0.0 }
 0x2a7   : > { %v2131_v8 = vmax.f32 %v1947_v2, 0.0 }
 0x2a8   : > { %v2132_v11 = vmax.f32 %v1949_v6, 0.0 }
 0x2a9   : > { %v2213_v12 = vpack.c.bf16 %v2131_v8, %v2129_v7 }
 0x2aa   : > { %v1952_v13 = vpop.f32.mrb[92].mxu1  ;;  %v2214_v14 = vpack.c.bf16 %v2132_v11, %v2130_v9 }
 0x2ab   : > { %v1953_v15 = vadd.f32 %v1952_v13, %v12137_v0  ;;  %v1954_v16 = vpop.f32.mrb[93].mxu1 }
 0x2ac   : > { %v1955_v17 = vadd.f32 %v1954_v16, %v12141_v3  ;;  %v1956_v18 = vpop.f32.mrb[94].mxu1  ;;  %2691 = vmatprep.mubr.bf16.mxu0 %v2214_v14 }
 0x2ad   : > { %v1957_v19 = vadd.f32 %v1956_v18, %v12137_v0  ;;  %v1958_v38 = vpop.f32.mrb[95].mxu1  ;;  %2692 = vmatmul.mubr.bf16.gmra.mrb[216].mxu0 %v2213_v12  ;;  %v2133_v22 = vmax.f32 %v1953_v15, 0.0  ;;  %v10393_v18 = vld [vmem:[%s15529_s4 + $0x4] sm:$0x3] }
 0x2ae   : > { %v1959_v20 = vadd.f32 %v1958_v38, %v12141_v3  ;;  %v2134_v24 = vmax.f32 %v1955_v17, 0.0 }
 0x2af   : > { %v2135_v23 = vmax.f32 %v1957_v19, 0.0 }
 0x2b0   : > { %v2136_v25 = vmax.f32 %v1959_v20, 0.0 }
 0x2b1   : > { %v2215_v26 = vpack.c.bf16 %v2135_v23, %v2133_v22  ;;  %v12277_v23 = vrot.slane %v10393_v18, %v11993_v33 }
 0x2b2   : > { %v1962_v27 = vpop.f32.mrb[96].mxu1  ;;  %v2216_v28 = vpack.c.bf16 %v2136_v25, %v2134_v24  ;;  %v12281_v25 = vrot.slane %v10393_v18, %v11998_v35 }
 0x2b3   : > { %v1963_v29 = vadd.f32 %v1962_v27, %v12137_v0  ;;  %v1964_v30 = vpop.f32.mrb[97].mxu1  ;;  %v11383_v27 = vld [vmem:[#allocation3 + $0x454] ss:$8 sps:$4 sm:$0xff]  }
 0x2b4   : > { %v1965_v31 = vadd.f32 %v1964_v30, %v12141_v3  ;;  %v1966_v32 = vpop.f32.mrb[98].mxu1  ;;  %2701 = vmatprep.mubr.bf16.mxu0 %v2216_v28  ;;  %3951 = vmatprep.subr.bf16.mxu0 %v11383_v27 }
 0x2b5   : > { %v1967_v34 = vadd.f32 %v1966_v32, %v12137_v0  ;;  %v1968_v36 = vpop.f32.mrb[99].mxu1  ;;  %2702 = vmatmul.mubr.bf16.gmra.mrb[220].mxu0 %v2215_v26  ;;  %v2137_v40 = vmax.f32 %v1963_v29, 0.0  ;;  %v11381_v26 = vld [vmem:[#allocation3 + $0x450] ss:$8 sps:$4 sm:$0xff]  }
 0x2b6   : > { %v1969_v37 = vadd.f32 %v1968_v36, %v12141_v3  ;;  %v2138_v42 = vmax.f32 %v1965_v31, 0.0  ;;  %3952 = vmatpush1.bf16.msra.mxu0 %v11381_v26 }
 0x2b7   : > { %v2139_v41 = vmax.f32 %v1967_v34, 0.0 }
 0x2b8   : > { %v2140_v43 = vmax.f32 %v1969_v37, 0.0 }
 0x2b9   : > { %v2217_v44 = vpack.c.bf16 %v2139_v41, %v2137_v40 }
 0x2ba   : > { %v1972_v45 = vpop.f32.mrb[100].mxu1  ;;  %v2218_v46 = vpack.c.bf16 %v2140_v43, %v2138_v42 }
 0x2bb   : > { %v1973_v47 = vadd.f32 %v1972_v45, %v12137_v0  ;;  %v1974_v48 = vpop.f32.mrb[101].mxu1 }
 0x2bc   : > { %v1975_v49 = vadd.f32 %v1974_v48, %v12141_v3  ;;  %v1976_v50 = vpop.f32.mrb[102].mxu1  ;;  %2711 = vmatprep.mubr.bf16.mxu0 %v2218_v46 }
 0x2bd   : > { %v1977_v51 = vadd.f32 %v1976_v50, %v12137_v0  ;;  %v1978_v52 = vpop.f32.mrb[103].mxu1  ;;  %2712 = vmatmul.mubr.bf16.gmra.mrb[224].mxu0 %v2217_v44  ;;  %v2141_v56 = vmax.f32 %v1973_v47, 0.0 }
 0x2be   : > { %v1979_v53 = vadd.f32 %v1978_v52, %v12141_v3  ;;  %v2142_v58 = vmax.f32 %v1975_v49, 0.0 }
 0x2bf   : > { %v2143_v57 = vmax.f32 %v1977_v51, 0.0 }
 0x2c0   : > { %v2144_v59 = vmax.f32 %v1979_v53, 0.0 }
 0x2c1   : > { %v2219_v60 = vpack.c.bf16 %v2143_v57, %v2141_v56 }
 0x2c2   : > { %v1982_v61 = vpop.f32.mrb[104].mxu1  ;;  %v2220_v62 = vpack.c.bf16 %v2144_v59, %v2142_v58 }
 0x2c3   : > { %v1983_v63 = vadd.f32 %v1982_v61, %v12137_v0  ;;  %v1984_v2 = vpop.f32.mrb[105].mxu1 }
 0x2c4   : > { %v1985_v4 = vadd.f32 %v1984_v2, %v12141_v3  ;;  %v1986_v6 = vpop.f32.mrb[106].mxu1  ;;  %2721 = vmatprep.mubr.bf16.mxu0 %v2220_v62 }
 0x2c5   : > { %v1987_v7 = vadd.f32 %v1986_v6, %v12137_v0  ;;  %v1988_v8 = vpop.f32.mrb[107].mxu1  ;;  %2722 = vmatmul.mubr.bf16.gmra.mrb[228].mxu0 %v2219_v60  ;;  %v2145_v11 = vmax.f32 %v1983_v63, 0.0  ;;  %v11360_v63 = vld [vmem:[%s15527_s2 + $0x40] ss:$8 sps:$4 sm:$0xff]  }
 0x2c6   : > { %v1989_v9 = vadd.f32 %v1988_v8, %v12141_v3  ;;  %v2146_v13 = vmax.f32 %v1985_v4, 0.0 }
 0x2c7   : > { %v2147_v12 = vmax.f32 %v1987_v7, 0.0 }
 0x2c8   : > { %v2148_v14 = vmax.f32 %v1989_v9, 0.0  ;;  %v11371_v9 = vld [vmem:[%s15527_s2 + $0x54] ss:$8 sps:$4 sm:$0xff]  }
 0x2c9   : > { %v2221_v15 = vpack.c.bf16 %v2147_v12, %v2145_v11 }
 0x2ca   : > { %v1992_v16 = vpop.f32.mrb[108].mxu1  ;;  %v2222_v17 = vpack.c.bf16 %v2148_v14, %v2146_v13 }
 0x2cb   : > { %v1993_v19 = vadd.f32 %v1992_v16, %v12137_v0  ;;  %v1994_v38 = vpop.f32.mrb[109].mxu1 }
 0x2cc   : > { %v1995_v20 = vadd.f32 %v1994_v38, %v12141_v3  ;;  %v1996_v21 = vpop.f32.mrb[110].mxu1  ;;  %2731 = vmatprep.mubr.bf16.mxu0 %v2222_v17 }
 0x2cd   : > { %v1997_v39 = vadd.f32 %v1996_v21, %v12137_v0  ;;  %v1998_v22 = vpop.f32.mrb[111].mxu1  ;;  %2732 = vmatmul.mubr.bf16.gmra.mrb[232].mxu0 %v2221_v15  ;;  %v2149_v28 = vmax.f32 %v1993_v19, 0.0  ;;  %v11369_v21 = vld [vmem:[%s15527_s2 + $0x50] ss:$8 sps:$4 sm:$0xff]  }
 0x2ce   : > { %v1999_v24 = vadd.f32 %v1998_v22, %v12141_v3  ;;  %v2150_v31 = vmax.f32 %v1995_v20, 0.0 }
 0x2cf   : > { %v2151_v29 = vmax.f32 %v1997_v39, 0.0 }
 0x2d0   : > { %v2473_v30 = vpop.f32.mrb[128].mxu0  ;;  %v2152_v32 = vmax.f32 %v1999_v24, 0.0 }
 0x2d1   : > { %v2474_v34 = vadd.f32 %v2473_v30, %v12277_v23  ;;  %v2475_v36 = vpop.f32.mrb[129].mxu0  ;;  %v2223_v37 = vpack.c.bf16 %v2151_v29, %v2149_v28  ;;  %v11386_v30 = vld [vmem:[%s15527_s2 + $0x64] ss:$8 sps:$4 sm:$0xff]  }
 0x2d2   : > { %v2476_v40 = vadd.f32 %v2475_v36, %v12281_v25  ;;  %v2002_v41 = vpop.f32.mrb[112].mxu1  ;;  %v2477_v42 = vpop.f32.mrb[130].mxu0  ;;  %v2224_v43 = vpack.c.bf16 %v2152_v32, %v2150_v31  ;;  %v11387_v31 = vld [vmem:[#allocation3 + $0x460] ss:$8 sps:$4 sm:$0xff]  }
 0x2d3   : > { %v2003_v44 = vadd.f32 %v2002_v41, %v12137_v0  ;;  %v2478_v45 = vadd.f32 %v2477_v42, %v12277_v23  ;;  %v2004_v46 = vpop.f32.mrb[113].mxu1  ;;  %v2479_v47 = vpop.f32.mrb[131].mxu0  ;;  %v2792_v51 = vmax.f32 %v2474_v34, 0.0 }
 0x2d4   : > { %v2005_v48 = vadd.f32 %v2004_v46, %v12141_v3  ;;  %v2480_v49 = vadd.f32 %v2479_v47, %v12281_v25  ;;  %v2006_v50 = vpop.f32.mrb[114].mxu1  ;;  %2741 = vmatprep.mubr.bf16.mxu0 %v2224_v43  ;;  %v2793_v55 = vmax.f32 %v2476_v40, 0.0 }
 0x2d5   : > { %v2794_v52 = vmax.f32 %v2478_v45, 0.0  ;;  %v2007_v53 = vadd.f32 %v2006_v50, %v12137_v0  ;;  %v2008_v54 = vpop.f32.mrb[115].mxu1  ;;  %2742 = vmatmul.mubr.bf16.gmra.mrb[236].mxu0 %v2223_v37  ;;  %v2153_v59 = vmax.f32 %v2003_v44, 0.0  ;;  %v11389_v37 = vld [vmem:[#allocation3 + $0x464] ss:$8 sps:$4 sm:$0xff]  }
 0x2d6   : > { %v2795_v56 = vmax.f32 %v2480_v49, 0.0  ;;  %v2009_v57 = vadd.f32 %v2008_v54, %v12141_v3  ;;  %v2154_v2 = vmax.f32 %v2005_v48, 0.0  ;;  %v11384_v44 = vld [vmem:[%s15527_s2 + $0x60] ss:$8 sps:$4 sm:$0xff]   ;;  %3953 = vmatprep.subr.bf16.mxu0 %v11389_v37  ;;  %v11390_v37 = vld [vmem:[#allocation3 + $0x470] ss:$8 sps:$4 sm:$0xff]  }
 0x2d7   : > { %v2920_v58 = vpack.c.bf16 %v2794_v52, %v2792_v51  ;;  %v2155_v60 = vmax.f32 %v2007_v53, 0.0  ;;  %3954 = vmatpush1.bf16.msra.mxu0 %v11387_v31 }
 0x2d8   : > { %v2483_v61 = vpop.f32.mrb[132].mxu0  ;;  %v2921_v62 = vpack.c.bf16 %v2795_v56, %v2793_v55  ;;  %v2156_v4 = vmax.f32 %v2009_v57, 0.0 }
 0x2d9   : > { %v2484_v6 = vadd.f32 %v2483_v61, %v12277_v23  ;;  %v2485_v7 = vpop.f32.mrb[133].mxu0  ;;  %v2225_v8 = vpack.c.bf16 %v2155_v60, %v2153_v59 }
 0x2da   : > { %v2486_v11 = vadd.f32 %v2485_v7, %v12281_v25  ;;  %v2012_v12 = vpop.f32.mrb[116].mxu1  ;;  %v2487_v13 = vpop.f32.mrb[134].mxu0  ;;  %3222 = vmatprep.mubr.bf16.mxu1 %v2921_v62  ;;  %v2226_v14 = vpack.c.bf16 %v2156_v4, %v2154_v2 }
 0x2db   : > { %v2013_v15 = vadd.f32 %v2012_v12, %v12137_v0  ;;  %v2488_v16 = vadd.f32 %v2487_v13, %v12277_v23  ;;  %v2014_v17 = vpop.f32.mrb[117].mxu1  ;;  %v2489_v18 = vpop.f32.mrb[135].mxu0  ;;  %3223 = vmatmul.mubr.bf16.vlgmr.msra.gmra.mrb[128].mxu1 %v2920_v58  ;;  %v2796_v39 = vmax.f32 %v2484_v6, 0.0 }
 0x2dc   : > { %v2015_v19 = vadd.f32 %v2014_v17, %v12141_v3  ;;  %v2490_v38 = vadd.f32 %v2489_v18, %v12281_v25  ;;  %4573 = vmatpush1.bf16.msra.mxu1 %v11360_v63  ;;  %v2016_v20 = vpop.f32.mrb[118].mxu1  ;;  %2751 = vmatprep.mubr.bf16.mxu0 %v2226_v14  ;;  %v2797_v27 = vmax.f32 %v2486_v11, 0.0 }
 0x2dd   : > { %v2798_v22 = vmax.f32 %v2488_v16, 0.0  ;;  %v2017_v24 = vadd.f32 %v2016_v20, %v12137_v0  ;;  %v2018_v26 = vpop.f32.mrb[119].mxu1  ;;  %2752 = vmatmul.mubr.bf16.gmra.mrb[240].mxu0 %v2225_v8  ;;  %4574 = vmatprep.subr.bf16.mxu1 %v11371_v9  ;;  %v2157_v34 = vmax.f32 %v2013_v15, 0.0 }
 0x2de   : > { %v2799_v28 = vmax.f32 %v2490_v38, 0.0  ;;  %v2019_v29 = vadd.f32 %v2018_v26, %v12141_v3  ;;  %v2158_v42 = vmax.f32 %v2015_v19, 0.0 }
 0x2df   : > { %v2922_v32 = vpack.c.bf16 %v2798_v22, %v2796_v39  ;;  %v2159_v36 = vmax.f32 %v2017_v24, 0.0 }
 0x2e0   : > { %v2493_v40 = vpop.f32.mrb[136].mxu0  ;;  %v2923_v41 = vpack.c.bf16 %v2799_v28, %v2797_v27  ;;  %v2160_v43 = vmax.f32 %v2019_v29, 0.0  ;;  %4575 = vmatpush1.bf16.msra.mxu1 %v11369_v21 }
 0x2e1   : > { %v2494_v45 = vadd.f32 %v2493_v40, %v12277_v23  ;;  %v2495_v46 = vpop.f32.mrb[137].mxu0  ;;  %v2227_v47 = vpack.c.bf16 %v2159_v36, %v2157_v34  ;;  %4576 = vmatprep.subr.bf16.mxu1 %v11386_v30  ;;  %v11392_v40 = vld [vmem:[#allocation3 + $0x474] ss:$8 sps:$4 sm:$0xff]  }
 0x2e2   : > { %v2496_v48 = vadd.f32 %v2495_v46, %v12281_v25  ;;  %v2022_v49 = vpop.f32.mrb[120].mxu1  ;;  %v2497_v50 = vpop.f32.mrb[138].mxu0  ;;  %3232 = vmatprep.mubr.bf16.mxu1 %v2923_v41  ;;  %v2228_v51 = vpack.c.bf16 %v2160_v43, %v2158_v42  ;;  %3955 = vmatprep.subr.bf16.mxu0 %v11392_v40 }
 0x2e3   : > { %v2023_v52 = vadd.f32 %v2022_v49, %v12137_v0  ;;  %v2498_v53 = vadd.f32 %v2497_v50, %v12277_v23  ;;  %v2024_v54 = vpop.f32.mrb[121].mxu1  ;;  %v2499_v55 = vpop.f32.mrb[139].mxu0  ;;  %3233 = vmatmul.mubr.bf16.gmra.mrb[132].mxu1 %v2922_v32  ;;  %v2800_v59 = vmax.f32 %v2494_v45, 0.0  ;;  %3956 = vmatpush1.bf16.msra.mxu0 %v11390_v37 }
 0x2e4   : > { %v2025_v56 = vadd.f32 %v2024_v54, %v12141_v3  ;;  %v2500_v57 = vadd.f32 %v2499_v55, %v12281_v25  ;;  %v2026_v58 = vpop.f32.mrb[122].mxu1  ;;  %2761 = vmatprep.mubr.bf16.mxu0 %v2228_v51  ;;  %4577 = vmatpush1.bf16.msra.mxu1 %v11384_v44  ;;  %v2801_v63 = vmax.f32 %v2496_v48, 0.0 }
 0x2e5   : > { %v2802_v60 = vmax.f32 %v2498_v53, 0.0  ;;  %v2027_v61 = vadd.f32 %v2026_v58, %v12137_v0  ;;  %v2028_v62 = vpop.f32.mrb[123].mxu1  ;;  %2762 = vmatmul.mubr.bf16.gmra.mrb[244].mxu0 %v2227_v47  ;;  %v2161_v7 = vmax.f32 %v2023_v52, 0.0 }
 0x2e6   : > { %v2803_v2 = vmax.f32 %v2500_v57, 0.0  ;;  %v2029_v4 = vadd.f32 %v2028_v62, %v12141_v3  ;;  %v2162_v12 = vmax.f32 %v2025_v56, 0.0 }
 0x2e7   : > { %v2924_v6 = vpack.c.bf16 %v2802_v60, %v2800_v59  ;;  %v2163_v8 = vmax.f32 %v2027_v61, 0.0 }
 0x2e8   : > { %v2503_v9 = vpop.f32.mrb[140].mxu0  ;;  %v2925_v11 = vpack.c.bf16 %v2803_v2, %v2801_v63  ;;  %v2164_v13 = vmax.f32 %v2029_v4, 0.0 }
 0x2e9   : > { %v2504_v14 = vadd.f32 %v2503_v9, %v12277_v23  ;;  %v2505_v15 = vpop.f32.mrb[141].mxu0  ;;  %v2229_v16 = vpack.c.bf16 %v2163_v8, %v2161_v7 }
 0x2ea   : > { %v2506_v17 = vadd.f32 %v2505_v15, %v12281_v25  ;;  %v2032_v18 = vpop.f32.mrb[124].mxu1  ;;  %v2507_v19 = vpop.f32.mrb[142].mxu0  ;;  %3242 = vmatprep.mubr.bf16.mxu1 %v2925_v11  ;;  %v2230_v38 = vpack.c.bf16 %v2164_v13, %v2162_v12  ;;  %v11395_v15 = vld [vmem:[#allocation3 + $0x484] ss:$8 sps:$4 sm:$0xff]  }
 0x2eb   : > { %v2033_v20 = vadd.f32 %v2032_v18, %v12137_v0  ;;  %v2508_v21 = vadd.f32 %v2507_v19, %v12277_v23  ;;  %v2034_v39 = vpop.f32.mrb[125].mxu1  ;;  %v2509_v22 = vpop.f32.mrb[143].mxu0  ;;  %3243 = vmatmul.mubr.bf16.gmra.mrb[136].mxu1 %v2924_v6  ;;  %v2804_v28 = vmax.f32 %v2504_v14, 0.0  ;;  %v11393_v14 = vld [vmem:[#allocation3 + $0x480] ss:$8 sps:$4 sm:$0xff]   ;;  %3957 = vmatprep.subr.bf16.mxu0 %v11395_v15 }
 0x2ec   : > { %v2035_v24 = vadd.f32 %v2034_v39, %v12141_v3  ;;  %v2510_v26 = vadd.f32 %v2509_v22, %v12281_v25  ;;  %v2036_v27 = vpop.f32.mrb[126].mxu1  ;;  %2771 = vmatprep.mubr.bf16.mxu0 %v2230_v38  ;;  %v2805_v32 = vmax.f32 %v2506_v17, 0.0  ;;  %3958 = vmatpush1.bf16.msra.mxu0 %v11393_v14  ;;  %v11399_v15 = vld [vmem:[%s15527_s2 + $0x70] ss:$8 sps:$4 sm:$0xff]  }
 0x2ed   : > { %v2806_v29 = vmax.f32 %v2508_v21, 0.0  ;;  %v2037_v30 = vadd.f32 %v2036_v27, %v12137_v0  ;;  %v2038_v31 = vpop.f32.mrb[127].mxu1  ;;  %2772 = vmatmul.mubr.bf16.gmra.mrb[248].mxu0 %v2229_v16  ;;  %v2165_v42 = vmax.f32 %v2033_v20, 0.0 }
 0x2ee   : > { %v2807_v34 = vmax.f32 %v2510_v26, 0.0  ;;  %v2039_v36 = vadd.f32 %v2038_v31, %v12141_v3  ;;  %v2166_v46 = vmax.f32 %v2035_v24, 0.0 }
 0x2ef   : > { %v2926_v41 = vpack.c.bf16 %v2806_v29, %v2804_v28  ;;  %v2167_v43 = vmax.f32 %v2037_v30, 0.0 }
 0x2f0   : > { %v2513_v44 = vpop.f32.mrb[144].mxu0  ;;  %v2927_v45 = vpack.c.bf16 %v2807_v34, %v2805_v32  ;;  %v2168_v47 = vmax.f32 %v2039_v36, 0.0 }
 0x2f1   : > { %v2514_v48 = vadd.f32 %v2513_v44, %v12277_v23  ;;  %v2515_v49 = vpop.f32.mrb[145].mxu0  ;;  %v2231_v0 = vpack.c.bf16 %v2167_v43, %v2165_v42 }
 0x2f2   : > { %v2516_v50 = vadd.f32 %v2515_v49, %v12281_v25  ;;  %v2517_v51 = vpop.f32.mrb[146].mxu0  ;;  %3252 = vmatprep.mubr.bf16.mxu1 %v2927_v45  ;;  %v2232_v3 = vpack.c.bf16 %v2168_v47, %v2166_v46  ;;  %v11398_v49 = vld [vmem:[#allocation3 + $0x494] ss:$8 sps:$4 sm:$0xff]  }
 0x2f3   : > { %v2518_v52 = vadd.f32 %v2517_v51, %v12277_v23  ;;  %v2519_v53 = vpop.f32.mrb[147].mxu0  ;;  %3253 = vmatmul.mubr.bf16.gmra.mrb[140].mxu1 %v2926_v41  ;;  %v2808_v55 = vmax.f32 %v2514_v48, 0.0  ;;  %v11396_v48 = vld [vmem:[#allocation3 + $0x490] ss:$8 sps:$4 sm:$0xff]   ;;  %3959 = vmatprep.subr.bf16.mxu0 %v11398_v49 }
 0x2f4   : > { %v2520_v54 = vadd.f32 %v2519_v53, %v12281_v25  ;;  %2781 = vmatprep.mubr.bf16.mxu0 %v2232_v3  ;;  %v2809_v57 = vmax.f32 %v2516_v50, 0.0  ;;  %3960 = vmatpush1.bf16.msra.mxu0 %v11396_v48 }
 0x2f5   : > { %v2810_v56 = vmax.f32 %v2518_v52, 0.0  ;;  %2782 = vmatmul.mubr.bf16.gmra.mrb[252].mxu0 %v2231_v0 }
 0x2f6   : > { %v2811_v58 = vmax.f32 %v2520_v54, 0.0 }
 0x2f7   : > { %v2928_v59 = vpack.c.bf16 %v2810_v56, %v2808_v55 }
 0x2f8   : > { %v2523_v60 = vpop.f32.mrb[148].mxu0  ;;  %v2929_v61 = vpack.c.bf16 %v2811_v58, %v2809_v57 }
 0x2f9   : > { %v2524_v62 = vadd.f32 %v2523_v60, %v12277_v23  ;;  %v2525_v63 = vpop.f32.mrb[149].mxu0 }
 0x2fa   : > { %v2526_v2 = vadd.f32 %v2525_v63, %v12281_v25  ;;  %v2527_v4 = vpop.f32.mrb[150].mxu0  ;;  %3262 = vmatprep.mubr.bf16.mxu1 %v2929_v61 }
 0x2fb   : > { %v2528_v6 = vadd.f32 %v2527_v4, %v12277_v23  ;;  %v2529_v7 = vpop.f32.mrb[151].mxu0  ;;  %3263 = vmatmul.mubr.bf16.gmra.mrb[144].mxu1 %v2928_v59  ;;  %v2812_v9 = vmax.f32 %v2524_v62, 0.0 }
 0x2fc   : > { %v2530_v8 = vadd.f32 %v2529_v7, %v12281_v25  ;;  %v2813_v12 = vmax.f32 %v2526_v2, 0.0 }
 0x2fd   : > { %v2814_v11 = vmax.f32 %v2528_v6, 0.0 }
 0x2fe   : > { %v2815_v13 = vmax.f32 %v2530_v8, 0.0 }
 0x2ff   : > { %v2930_v16 = vpack.c.bf16 %v2814_v11, %v2812_v9 }
 0x300   : > { %v2533_v17 = vpop.f32.mrb[152].mxu0  ;;  %v2931_v18 = vpack.c.bf16 %v2815_v13, %v2813_v12 }
 0x301   : > { %v2534_v19 = vadd.f32 %v2533_v17, %v12277_v23  ;;  %v2535_v38 = vpop.f32.mrb[153].mxu0 }
 0x302   : > { %v2536_v20 = vadd.f32 %v2535_v38, %v12281_v25  ;;  %v2537_v21 = vpop.f32.mrb[154].mxu0  ;;  %3272 = vmatprep.mubr.bf16.mxu1 %v2931_v18  ;;  %v11404_v38 = vld [vmem:[#allocation3 + $0x4a4] ss:$8 sps:$4 sm:$0xff]  }
 0x303   : > { %v2538_v39 = vadd.f32 %v2537_v21, %v12277_v23  ;;  %v2539_v22 = vpop.f32.mrb[155].mxu0  ;;  %3273 = vmatmul.mubr.bf16.gmra.mrb[148].mxu1 %v2930_v16  ;;  %v2816_v26 = vmax.f32 %v2534_v19, 0.0  ;;  %v11401_v16 = vld [vmem:[%s15527_s2 + $0x74] ss:$8 sps:$4 sm:$0xff]   ;;  %v11402_v19 = vld [vmem:[#allocation3 + $0x4a0] ss:$8 sps:$4 sm:$0xff]   ;;  %3961 = vmatprep.subr.bf16.mxu0 %v11404_v38 }
 0x304   : > { %v2540_v24 = vadd.f32 %v2539_v22, %v12281_v25  ;;  %v2817_v28 = vmax.f32 %v2536_v20, 0.0  ;;  %v4570_v21 = vand.u32 %v11401_v16, %v11904_v10  ;;  %3962 = vmatpush1.bf16.msra.mxu0 %v11402_v19 }
 0x305   : > { %v2818_v27 = vmax.f32 %v2538_v39, 0.0  ;;  %v4567_v39 = vand.u32 %v11399_v15, %v11904_v10 }
 0x306   : > { %v2819_v29 = vmax.f32 %v2540_v24, 0.0  ;;  %4578 = vmatprep.subr.bf16.mxu1 %v4570_v21 }
 0x307   : > { %v2932_v30 = vpack.c.bf16 %v2818_v27, %v2816_v26  ;;  %4579 = vmatpush1.bf16.msra.mxu1 %v4567_v39 }
 0x308   : > { %v2543_v31 = vpop.f32.mrb[156].mxu0  ;;  %v2933_v32 = vpack.c.bf16 %v2819_v29, %v2817_v28 }
 0x309   : > { %v2544_v34 = vadd.f32 %v2543_v31, %v12277_v23  ;;  %v2545_v36 = vpop.f32.mrb[157].mxu0 }
 0x30a   : > { %v2546_v37 = vadd.f32 %v2545_v36, %v12281_v25  ;;  %v2547_v40 = vpop.f32.mrb[158].mxu0  ;;  %3282 = vmatprep.mubr.bf16.mxu1 %v2933_v32  ;;  %v11407_v32 = vld [vmem:[#allocation3 + $0x4b4] ss:$8 sps:$4 sm:$0xff]  }
 0x30b   : > { %v2548_v41 = vadd.f32 %v2547_v40, %v12277_v23  ;;  %v2549_v42 = vpop.f32.mrb[159].mxu0  ;;  %3283 = vmatmul.mubr.bf16.gmra.mrb[152].mxu1 %v2932_v30  ;;  %v2820_v44 = vmax.f32 %v2544_v34, 0.0  ;;  %v11405_v34 = vld [vmem:[#allocation3 + $0x4b0] ss:$8 sps:$4 sm:$0xff]   ;;  %3963 = vmatprep.subr.bf16.mxu0 %v11407_v32 }
 0x30c   : > { %v2550_v43 = vadd.f32 %v2549_v42, %v12281_v25  ;;  %v2821_v46 = vmax.f32 %v2546_v37, 0.0  ;;  %3964 = vmatpush1.bf16.msra.mxu0 %v11405_v34 }
 0x30d   : > { %v2822_v45 = vmax.f32 %v2548_v41, 0.0 }
 0x30e   : > { %v2823_v47 = vmax.f32 %v2550_v43, 0.0  ;;  %v11410_v43 = vld [vmem:[#allocation3 + $0x4c4] ss:$8 sps:$4 sm:$0xff]  }
 0x30f   : > { %v2934_v0 = vpack.c.bf16 %v2822_v45, %v2820_v44  ;;  %3965 = vmatprep.subr.bf16.mxu0 %v11410_v43 }
 0x310   : > { %v2553_v50 = vpop.f32.mrb[160].mxu0  ;;  %v2935_v51 = vpack.c.bf16 %v2823_v47, %v2821_v46  ;;  %v11408_v46 = vld [vmem:[#allocation3 + $0x4c0] ss:$8 sps:$4 sm:$0xff]  }
 0x311   : > { %v2554_v3 = vadd.f32 %v2553_v50, %v12277_v23  ;;  %v2555_v52 = vpop.f32.mrb[161].mxu0  ;;  %3966 = vmatpush1.bf16.msra.mxu0 %v11408_v46 }
 0x312   : > { %v2556_v53 = vadd.f32 %v2555_v52, %v12281_v25  ;;  %v2557_v54 = vpop.f32.mrb[162].mxu0  ;;  %3292 = vmatprep.mubr.bf16.mxu1 %v2935_v51 }
 0x313   : > { %v2558_v55 = vadd.f32 %v2557_v54, %v12277_v23  ;;  %v2559_v56 = vpop.f32.mrb[163].mxu0  ;;  %3293 = vmatmul.mubr.bf16.gmra.mrb[156].mxu1 %v2934_v0  ;;  %v2824_v58 = vmax.f32 %v2554_v3, 0.0  ;;  %v11413_v3 = vld [vmem:[#allocation3 + $0x4d4] ss:$8 sps:$4 sm:$0xff]  }
 0x314   : > { %v2560_v57 = vadd.f32 %v2559_v56, %v12281_v25  ;;  %v2825_v60 = vmax.f32 %v2556_v53, 0.0  ;;  %v11411_v53 = vld [vmem:[#allocation3 + $0x4d0] ss:$8 sps:$4 sm:$0xff]   ;;  %3967 = vmatprep.subr.bf16.mxu0 %v11413_v3 }
 0x315   : > { %v2826_v59 = vmax.f32 %v2558_v55, 0.0  ;;  %3968 = vmatpush1.bf16.msra.mxu0 %v11411_v53 }
 0x316   : > { %v2827_v61 = vmax.f32 %v2560_v57, 0.0 }
 0x317   : > { %v2936_v62 = vpack.c.bf16 %v2826_v59, %v2824_v58  ;;  %v11416_v59 = vld [vmem:[#allocation3 + $0x4e4] ss:$8 sps:$4 sm:$0xff]  }
 0x318   : > { %v2563_v63 = vpop.f32.mrb[164].mxu0  ;;  %v2937_v2 = vpack.c.bf16 %v2827_v61, %v2825_v60  ;;  %3969 = vmatprep.subr.bf16.mxu0 %v11416_v59 }
 0x319   : > { %v2564_v4 = vadd.f32 %v2563_v63, %v12277_v23  ;;  %v2565_v6 = vpop.f32.mrb[165].mxu0 }
 0x31a   : > { %v2566_v7 = vadd.f32 %v2565_v6, %v12281_v25  ;;  %v2567_v8 = vpop.f32.mrb[166].mxu0  ;;  %3302 = vmatprep.mubr.bf16.mxu1 %v2937_v2 }
 0x31b   : > { %v2568_v9 = vadd.f32 %v2567_v8, %v12277_v23  ;;  %v2569_v11 = vpop.f32.mrb[167].mxu0  ;;  %3303 = vmatmul.mubr.bf16.gmra.mrb[160].mxu1 %v2936_v62  ;;  %v2828_v13 = vmax.f32 %v2564_v4, 0.0  ;;  %v11414_v62 = vld [vmem:[#allocation3 + $0x4e0] ss:$8 sps:$4 sm:$0xff]  }
 0x31c   : > { %v2570_v12 = vadd.f32 %v2569_v11, %v12281_v25  ;;  %v2829_v17 = vmax.f32 %v2566_v7, 0.0  ;;  %3970 = vmatpush1.bf16.msra.mxu0 %v11414_v62 }
 0x31d   : > { %v2830_v14 = vmax.f32 %v2568_v9, 0.0  ;;  %v11419_v9 = vld [vmem:[#allocation3 + $0x4f4] ss:$8 sps:$4 sm:$0xff]  }
 0x31e   : > { %v2831_v18 = vmax.f32 %v2570_v12, 0.0  ;;  %v11417_v12 = vld [vmem:[#allocation3 + $0x4f0] ss:$8 sps:$4 sm:$0xff]   ;;  %3971 = vmatprep.subr.bf16.mxu0 %v11419_v9 }
 0x31f   : > { %v2938_v20 = vpack.c.bf16 %v2830_v14, %v2828_v13 }
 0x320   : > { %v2573_v22 = vpop.f32.mrb[168].mxu0  ;;  %v2939_v24 = vpack.c.bf16 %v2831_v18, %v2829_v17  ;;  %3972 = vmatpush1.bf16.msra.mxu0 %v11417_v12 }
 0x321   : > { %v2574_v26 = vadd.f32 %v2573_v22, %v12277_v23  ;;  %v2575_v27 = vpop.f32.mrb[169].mxu0 }
 0x322   : > { %v2576_v28 = vadd.f32 %v2575_v27, %v12281_v25  ;;  %v2577_v29 = vpop.f32.mrb[170].mxu0  ;;  %3312 = vmatprep.mubr.bf16.mxu1 %v2939_v24 }
 0x323   : > { %v2578_v30 = vadd.f32 %v2577_v29, %v12277_v23  ;;  %v2579_v31 = vpop.f32.mrb[171].mxu0  ;;  %3313 = vmatmul.mubr.bf16.gmra.mrb[164].mxu1 %v2938_v20  ;;  %v2832_v36 = vmax.f32 %v2574_v26, 0.0 }
 0x324   : > { %v2580_v10 = vadd.f32 %v2579_v31, %v12281_v25  ;;  %v2833_v40 = vmax.f32 %v2576_v28, 0.0 }
 0x325   : > { %v2834_v37 = vmax.f32 %v2578_v30, 0.0 }
 0x326   : > { %v2835_v41 = vmax.f32 %v2580_v10, 0.0 }
 0x327   : > { %v2940_v42 = vpack.c.bf16 %v2834_v37, %v2832_v36 }
 0x328   : > { %v2583_v44 = vpop.f32.mrb[172].mxu0  ;;  %v2941_v45 = vpack.c.bf16 %v2835_v41, %v2833_v40 }
 0x329   : > { %v2584_v47 = vadd.f32 %v2583_v44, %v12277_v23  ;;  %v2585_v48 = vpop.f32.mrb[173].mxu0 }
 0x32a   : > { %v2586_v49 = vadd.f32 %v2585_v48, %v12281_v25  ;;  %v2587_v0 = vpop.f32.mrb[174].mxu0  ;;  %3322 = vmatprep.mubr.bf16.mxu1 %v2941_v45 }
 0x32b   : > { %v2588_v50 = vadd.f32 %v2587_v0, %v12277_v23  ;;  %v2589_v51 = vpop.f32.mrb[175].mxu0  ;;  %3323 = vmatmul.mubr.bf16.gmra.mrb[168].mxu1 %v2940_v42  ;;  %v2836_v54 = vmax.f32 %v2584_v47, 0.0 }
 0x32c   : > { %v2590_v52 = vadd.f32 %v2589_v51, %v12281_v25  ;;  %v2837_v56 = vmax.f32 %v2586_v49, 0.0 }
 0x32d   : > { %v2838_v55 = vmax.f32 %v2588_v50, 0.0 }
 0x32e   : > { %v2839_v57 = vmax.f32 %v2590_v52, 0.0 }
 0x32f   : > { %v2942_v58 = vpack.c.bf16 %v2838_v55, %v2836_v54 }
 0x330   : > { %v2593_v60 = vpop.f32.mrb[176].mxu0  ;;  %v2943_v61 = vpack.c.bf16 %v2839_v57, %v2837_v56 }
 0x331   : > { %v2594_v63 = vadd.f32 %v2593_v60, %v12277_v23  ;;  %v2595_v2 = vpop.f32.mrb[177].mxu0 }
 0x332   : > { %v2596_v4 = vadd.f32 %v2595_v2, %v12281_v25  ;;  %v2597_v6 = vpop.f32.mrb[178].mxu0  ;;  %3332 = vmatprep.mubr.bf16.mxu1 %v2943_v61 }
 0x333   : > { %v2598_v7 = vadd.f32 %v2597_v6, %v12277_v23  ;;  %v2599_v8 = vpop.f32.mrb[179].mxu0  ;;  %3333 = vmatmul.mubr.bf16.gmra.mrb[172].mxu1 %v2942_v58  ;;  %v2840_v13 = vmax.f32 %v2594_v63, 0.0 }
 0x334   : > { %v2600_v11 = vadd.f32 %v2599_v8, %v12281_v25  ;;  %v2841_v15 = vmax.f32 %v2596_v4, 0.0 }
 0x335   : > { %v2842_v14 = vmax.f32 %v2598_v7, 0.0 }
 0x336   : > { %v2843_v16 = vmax.f32 %v2600_v11, 0.0 }
 0x337   : > { %v2944_v17 = vpack.c.bf16 %v2842_v14, %v2840_v13 }
 0x338   : > { %v2603_v18 = vpop.f32.mrb[180].mxu0  ;;  %v2945_v19 = vpack.c.bf16 %v2843_v16, %v2841_v15 }
 0x339   : > { %v2604_v38 = vadd.f32 %v2603_v18, %v12277_v23  ;;  %v2605_v20 = vpop.f32.mrb[181].mxu0 }
 0x33a   : > { %v2606_v21 = vadd.f32 %v2605_v20, %v12281_v25  ;;  %v2607_v39 = vpop.f32.mrb[182].mxu0  ;;  %3342 = vmatprep.mubr.bf16.mxu1 %v2945_v19 }
 0x33b   : > { %v2608_v22 = vadd.f32 %v2607_v39, %v12277_v23  ;;  %v2609_v24 = vpop.f32.mrb[183].mxu0  ;;  %3343 = vmatmul.mubr.bf16.gmra.mrb[176].mxu1 %v2944_v17  ;;  %v2844_v27 = vmax.f32 %v2604_v38, 0.0 }
 0x33c   : > { %v2610_v26 = vadd.f32 %v2609_v24, %v12281_v25  ;;  %v2845_v29 = vmax.f32 %v2606_v21, 0.0 }
 0x33d   : > { %v2846_v28 = vmax.f32 %v2608_v22, 0.0 }
 0x33e   : > { %v2847_v30 = vmax.f32 %v2610_v26, 0.0 }
 0x33f   : > { %v2946_v31 = vpack.c.bf16 %v2846_v28, %v2844_v27  ;;  %v11422_v27 = vld [vmem:[#allocation3 + $0x504] ss:$8 sps:$4 sm:$0xff]  }
 0x340   : > { %v2613_v32 = vpop.f32.mrb[184].mxu0  ;;  %v2947_v10 = vpack.c.bf16 %v2847_v30, %v2845_v29  ;;  %5085 = vmatprep.subr.bf16.mxu1 %v11422_v27 }
 0x341   : > { %v2614_v34 = vadd.f32 %v2613_v32, %v12277_v23  ;;  %v2615_v36 = vpop.f32.mrb[185].mxu0 }
 0x342   : > { %v2616_v37 = vadd.f32 %v2615_v36, %v12281_v25  ;;  %v2617_v40 = vpop.f32.mrb[186].mxu0  ;;  %3352 = vmatprep.mubr.bf16.mxu1 %v2947_v10 }
 0x343   : > { %v2618_v41 = vadd.f32 %v2617_v40, %v12277_v23  ;;  %v2619_v42 = vpop.f32.mrb[187].mxu0  ;;  %3353 = vmatmul.mubr.bf16.gmra.mrb[180].mxu1 %v2946_v31  ;;  %v2848_v44 = vmax.f32 %v2614_v34, 0.0 }
 0x344   : > { %v2620_v43 = vadd.f32 %v2619_v42, %v12281_v25  ;;  %v2849_v46 = vmax.f32 %v2616_v37, 0.0 }
 0x345   : > { %v2850_v45 = vmax.f32 %v2618_v41, 0.0 }
 0x346   : > { %v2851_v47 = vmax.f32 %v2620_v43, 0.0 }
 0x347   : > { %v2948_v48 = vpack.c.bf16 %v2850_v45, %v2848_v44 }
 0x348   : > { %v2623_v49 = vpop.f32.mrb[188].mxu0  ;;  %v2949_v0 = vpack.c.bf16 %v2851_v47, %v2849_v46 }
 0x349   : > { %v2624_v50 = vadd.f32 %v2623_v49, %v12277_v23  ;;  %v2625_v51 = vpop.f32.mrb[189].mxu0 }
 0x34a   : > { %v2626_v3 = vadd.f32 %v2625_v51, %v12281_v25  ;;  %v2627_v52 = vpop.f32.mrb[190].mxu0  ;;  %3362 = vmatprep.mubr.bf16.mxu1 %v2949_v0 }
 0x34b   : > { %v2628_v53 = vadd.f32 %v2627_v52, %v12277_v23  ;;  %v2629_v54 = vpop.f32.mrb[191].mxu0  ;;  %3363 = vmatmul.mubr.bf16.gmra.mrb[184].mxu1 %v2948_v48  ;;  %v2852_v56 = vmax.f32 %v2624_v50, 0.0 }
 0x34c   : > { %v2630_v55 = vadd.f32 %v2629_v54, %v12281_v25  ;;  %v2853_v58 = vmax.f32 %v2626_v3, 0.0 }
 0x34d   : > { %v2854_v57 = vmax.f32 %v2628_v53, 0.0 }
 0x34e   : > { %v2855_v59 = vmax.f32 %v2630_v55, 0.0 }
 0x34f   : > { %v2950_v60 = vpack.c.bf16 %v2854_v57, %v2852_v56 }
 0x350   : > { %v2633_v61 = vpop.f32.mrb[192].mxu0  ;;  %v2951_v62 = vpack.c.bf16 %v2855_v59, %v2853_v58 }
 0x351   : > { %v2634_v63 = vadd.f32 %v2633_v61, %v12277_v23  ;;  %v2635_v2 = vpop.f32.mrb[193].mxu0 }
 0x352   : > { %v2636_v4 = vadd.f32 %v2635_v2, %v12281_v25  ;;  %v2637_v6 = vpop.f32.mrb[194].mxu0  ;;  %3372 = vmatprep.mubr.bf16.mxu1 %v2951_v62 }
 0x353   : > { %v2638_v7 = vadd.f32 %v2637_v6, %v12277_v23  ;;  %v2639_v8 = vpop.f32.mrb[195].mxu0  ;;  %3373 = vmatmul.mubr.bf16.gmra.mrb[188].mxu1 %v2950_v60  ;;  %v2856_v11 = vmax.f32 %v2634_v63, 0.0 }
 0x354   : > { %v2640_v9 = vadd.f32 %v2639_v8, %v12281_v25  ;;  %v2857_v13 = vmax.f32 %v2636_v4, 0.0 }
 0x355   : > { %v2858_v12 = vmax.f32 %v2638_v7, 0.0 }
 0x356   : > { %v2859_v14 = vmax.f32 %v2640_v9, 0.0 }
 0x357   : > { %v2952_v15 = vpack.c.bf16 %v2858_v12, %v2856_v11 }
 0x358   : > { %v2643_v16 = vpop.f32.mrb[196].mxu0  ;;  %v2953_v17 = vpack.c.bf16 %v2859_v14, %v2857_v13 }
 0x359   : > { %v2644_v18 = vadd.f32 %v2643_v16, %v12277_v23  ;;  %v2645_v19 = vpop.f32.mrb[197].mxu0 }
 0x35a   : > { %v2646_v38 = vadd.f32 %v2645_v19, %v12281_v25  ;;  %v2647_v20 = vpop.f32.mrb[198].mxu0  ;;  %3382 = vmatprep.mubr.bf16.mxu1 %v2953_v17 }
 0x35b   : > { %v2648_v21 = vadd.f32 %v2647_v20, %v12277_v23  ;;  %v2649_v39 = vpop.f32.mrb[199].mxu0  ;;  %3383 = vmatmul.mubr.bf16.gmra.mrb[192].mxu1 %v2952_v15  ;;  %v2860_v24 = vmax.f32 %v2644_v18, 0.0 }
 0x35c   : > { %v2650_v22 = vadd.f32 %v2649_v39, %v12281_v25  ;;  %v2861_v28 = vmax.f32 %v2646_v38, 0.0 }
 0x35d   : > { %v2862_v26 = vmax.f32 %v2648_v21, 0.0 }
 0x35e   : > { %v2863_v29 = vmax.f32 %v2650_v22, 0.0 }
 0x35f   : > { %v2954_v30 = vpack.c.bf16 %v2862_v26, %v2860_v24 }
 0x360   : > { %v2653_v31 = vpop.f32.mrb[200].mxu0  ;;  %v2955_v32 = vpack.c.bf16 %v2863_v29, %v2861_v28 }
 0x361   : > { %v2654_v10 = vadd.f32 %v2653_v31, %v12277_v23  ;;  %v2655_v34 = vpop.f32.mrb[201].mxu0 }
 0x362   : > { %v2656_v36 = vadd.f32 %v2655_v34, %v12281_v25  ;;  %v2657_v37 = vpop.f32.mrb[202].mxu0  ;;  %3392 = vmatprep.mubr.bf16.mxu1 %v2955_v32 }
 0x363   : > { %v2658_v40 = vadd.f32 %v2657_v37, %v12277_v23  ;;  %v2659_v41 = vpop.f32.mrb[203].mxu0  ;;  %3393 = vmatmul.mubr.bf16.gmra.mrb[196].mxu1 %v2954_v30  ;;  %v2864_v43 = vmax.f32 %v2654_v10, 0.0 }
 0x364   : > { %v2660_v42 = vadd.f32 %v2659_v41, %v12281_v25  ;;  %v2865_v45 = vmax.f32 %v2656_v36, 0.0 }
 0x365   : > { %v2866_v44 = vmax.f32 %v2658_v40, 0.0 }
 0x366   : > { %v2867_v46 = vmax.f32 %v2660_v42, 0.0 }
 0x367   : > { %v2956_v47 = vpack.c.bf16 %v2866_v44, %v2864_v43 }
 0x368   : > { %v2663_v48 = vpop.f32.mrb[204].mxu0  ;;  %v2957_v49 = vpack.c.bf16 %v2867_v46, %v2865_v45 }
 0x369   : > { %v2664_v0 = vadd.f32 %v2663_v48, %v12277_v23  ;;  %v2665_v50 = vpop.f32.mrb[205].mxu0 }
 0x36a   : > { %v2666_v51 = vadd.f32 %v2665_v50, %v12281_v25  ;;  %v2667_v3 = vpop.f32.mrb[206].mxu0  ;;  %3402 = vmatprep.mubr.bf16.mxu1 %v2957_v49 }
 0x36b   : > { %v2668_v52 = vadd.f32 %v2667_v3, %v12277_v23  ;;  %v2669_v53 = vpop.f32.mrb[207].mxu0  ;;  %3403 = vmatmul.mubr.bf16.gmra.mrb[200].mxu1 %v2956_v47  ;;  %v2868_v55 = vmax.f32 %v2664_v0, 0.0 }
 0x36c   : > { %v2670_v54 = vadd.f32 %v2669_v53, %v12281_v25  ;;  %v2869_v57 = vmax.f32 %v2666_v51, 0.0 }
 0x36d   : > { %v2870_v56 = vmax.f32 %v2668_v52, 0.0 }
 0x36e   : > { %v2871_v58 = vmax.f32 %v2670_v54, 0.0 }
 0x36f   : > { %v2958_v59 = vpack.c.bf16 %v2870_v56, %v2868_v55 }
 0x370   : > { %v2673_v60 = vpop.f32.mrb[208].mxu0  ;;  %v2959_v61 = vpack.c.bf16 %v2871_v58, %v2869_v57 }
 0x371   : > { %v2674_v62 = vadd.f32 %v2673_v60, %v12277_v23  ;;  %v2675_v63 = vpop.f32.mrb[209].mxu0 }
 0x372   : > { %v2676_v2 = vadd.f32 %v2675_v63, %v12281_v25  ;;  %v2677_v4 = vpop.f32.mrb[210].mxu0  ;;  %3412 = vmatprep.mubr.bf16.mxu1 %v2959_v61 }
 0x373   : > { %v2678_v6 = vadd.f32 %v2677_v4, %v12277_v23  ;;  %v2679_v7 = vpop.f32.mrb[211].mxu0  ;;  %3413 = vmatmul.mubr.bf16.gmra.mrb[204].mxu1 %v2958_v59  ;;  %v2872_v9 = vmax.f32 %v2674_v62, 0.0 }
 0x374   : > { %v2680_v8 = vadd.f32 %v2679_v7, %v12281_v25  ;;  %v2873_v12 = vmax.f32 %v2676_v2, 0.0 }
 0x375   : > { %v2874_v11 = vmax.f32 %v2678_v6, 0.0 }
 0x376   : > { %v2875_v13 = vmax.f32 %v2680_v8, 0.0 }
 0x377   : > { %v2960_v14 = vpack.c.bf16 %v2874_v11, %v2872_v9 }
 0x378   : > { %v2683_v15 = vpop.f32.mrb[212].mxu0  ;;  %v2961_v16 = vpack.c.bf16 %v2875_v13, %v2873_v12 }
 0x379   : > { %v2684_v17 = vadd.f32 %v2683_v15, %v12277_v23  ;;  %v2685_v18 = vpop.f32.mrb[213].mxu0 }
 0x37a   : > { %v2686_v19 = vadd.f32 %v2685_v18, %v12281_v25  ;;  %v2687_v38 = vpop.f32.mrb[214].mxu0  ;;  %3422 = vmatprep.mubr.bf16.mxu1 %v2961_v16 }
 0x37b   : > { %v2688_v20 = vadd.f32 %v2687_v38, %v12277_v23  ;;  %v2689_v21 = vpop.f32.mrb[215].mxu0  ;;  %3423 = vmatmul.mubr.bf16.gmra.mrb[208].mxu1 %v2960_v14  ;;  %v2876_v22 = vmax.f32 %v2684_v17, 0.0 }
 0x37c   : > { %v2690_v39 = vadd.f32 %v2689_v21, %v12281_v25  ;;  %v2877_v26 = vmax.f32 %v2686_v19, 0.0 }
 0x37d   : > { %v2878_v24 = vmax.f32 %v2688_v20, 0.0 }
 0x37e   : > { %v2879_v27 = vmax.f32 %v2690_v39, 0.0 }
 0x37f   : > { %v2962_v28 = vpack.c.bf16 %v2878_v24, %v2876_v22 }
 0x380   : > { %v2693_v29 = vpop.f32.mrb[216].mxu0  ;;  %v2963_v30 = vpack.c.bf16 %v2879_v27, %v2877_v26 }
 0x381   : > { %v2694_v31 = vadd.f32 %v2693_v29, %v12277_v23  ;;  %v2695_v32 = vpop.f32.mrb[217].mxu0 }
 0x382   : > { %v2696_v10 = vadd.f32 %v2695_v32, %v12281_v25  ;;  %v2697_v34 = vpop.f32.mrb[218].mxu0  ;;  %3432 = vmatprep.mubr.bf16.mxu1 %v2963_v30 }
 0x383   : > { %v2698_v36 = vadd.f32 %v2697_v34, %v12277_v23  ;;  %v2699_v37 = vpop.f32.mrb[219].mxu0  ;;  %3433 = vmatmul.mubr.bf16.gmra.mrb[212].mxu1 %v2962_v28  ;;  %v2880_v41 = vmax.f32 %v2694_v31, 0.0 }
 0x384   : > { %v2700_v40 = vadd.f32 %v2699_v37, %v12281_v25  ;;  %v2881_v43 = vmax.f32 %v2696_v10, 0.0 }
 0x385   : > { %v2882_v42 = vmax.f32 %v2698_v36, 0.0 }
 0x386   : > { %v2883_v44 = vmax.f32 %v2700_v40, 0.0 }
 0x387   : > { %v2964_v45 = vpack.c.bf16 %v2882_v42, %v2880_v41 }
 0x388   : > { %v2703_v46 = vpop.f32.mrb[220].mxu0  ;;  %v2965_v47 = vpack.c.bf16 %v2883_v44, %v2881_v43 }
 0x389   : > { %v2704_v48 = vadd.f32 %v2703_v46, %v12277_v23  ;;  %v2705_v49 = vpop.f32.mrb[221].mxu0  ;;  %v10426_v46 = vld [vmem:[%s15529_s4 + $0x6] sm:$0x3] }
 0x38a   : > { %v2706_v0 = vadd.f32 %v2705_v49, %v12281_v25  ;;  %v2707_v50 = vpop.f32.mrb[222].mxu0  ;;  %3442 = vmatprep.mubr.bf16.mxu1 %v2965_v47 }
 0x38b   : > { %v2708_v51 = vadd.f32 %v2707_v50, %v12277_v23  ;;  %v2709_v3 = vpop.f32.mrb[223].mxu0  ;;  %3443 = vmatmul.mubr.bf16.gmra.mrb[216].mxu1 %v2964_v45  ;;  %v2884_v53 = vmax.f32 %v2704_v48, 0.0 }
 0x38c   : > { %v2710_v52 = vadd.f32 %v2709_v3, %v12281_v25  ;;  %v2885_v55 = vmax.f32 %v2706_v0, 0.0  ;;  %v12437_v3 = vrot.slane %v10426_v46, %v11993_v33 }
 0x38d   : > { %v2886_v54 = vmax.f32 %v2708_v51, 0.0 }
 0x38e   : > { %v2887_v56 = vmax.f32 %v2710_v52, 0.0 }
 0x38f   : > { %v2966_v57 = vpack.c.bf16 %v2886_v54, %v2884_v53  ;;  %v12441_v53 = vrot.slane %v10426_v46, %v11998_v35 }
 0x390   : > { %v2713_v58 = vpop.f32.mrb[224].mxu0  ;;  %v2967_v59 = vpack.c.bf16 %v2887_v56, %v2885_v55 }
 0x391   : > { %v2714_v60 = vadd.f32 %v2713_v58, %v12277_v23  ;;  %v2715_v61 = vpop.f32.mrb[225].mxu0 }
 0x392   : > { %v2716_v62 = vadd.f32 %v2715_v61, %v12281_v25  ;;  %v2717_v63 = vpop.f32.mrb[226].mxu0  ;;  %3452 = vmatprep.mubr.bf16.mxu1 %v2967_v59 }
 0x393   : > { %v2718_v2 = vadd.f32 %v2717_v63, %v12277_v23  ;;  %v2719_v4 = vpop.f32.mrb[227].mxu0  ;;  %3453 = vmatmul.mubr.bf16.gmra.mrb[220].mxu1 %v2966_v57  ;;  %v2888_v7 = vmax.f32 %v2714_v60, 0.0 }
 0x394   : > { %v2720_v6 = vadd.f32 %v2719_v4, %v12281_v25  ;;  %v2889_v9 = vmax.f32 %v2716_v62, 0.0 }
 0x395   : > { %v2890_v8 = vmax.f32 %v2718_v2, 0.0 }
 0x396   : > { %v2891_v11 = vmax.f32 %v2720_v6, 0.0 }
 0x397   : > { %v2968_v12 = vpack.c.bf16 %v2890_v8, %v2888_v7 }
 0x398   : > { %v2723_v13 = vpop.f32.mrb[228].mxu0  ;;  %v2969_v14 = vpack.c.bf16 %v2891_v11, %v2889_v9 }
 0x399   : > { %v2724_v15 = vadd.f32 %v2723_v13, %v12277_v23  ;;  %v2725_v16 = vpop.f32.mrb[229].mxu0 }
 0x39a   : > { %v2726_v17 = vadd.f32 %v2725_v16, %v12281_v25  ;;  %v2727_v18 = vpop.f32.mrb[230].mxu0  ;;  %3462 = vmatprep.mubr.bf16.mxu1 %v2969_v14 }
 0x39b   : > { %v2728_v19 = vadd.f32 %v2727_v18, %v12277_v23  ;;  %v2729_v38 = vpop.f32.mrb[231].mxu0  ;;  %3463 = vmatmul.mubr.bf16.gmra.mrb[224].mxu1 %v2968_v12  ;;  %v2892_v21 = vmax.f32 %v2724_v15, 0.0 }
 0x39c   : > { %v2730_v20 = vadd.f32 %v2729_v38, %v12281_v25  ;;  %v2893_v22 = vmax.f32 %v2726_v17, 0.0 }
 0x39d   : > { %v2894_v39 = vmax.f32 %v2728_v19, 0.0 }
 0x39e   : > { %v2895_v24 = vmax.f32 %v2730_v20, 0.0 }
 0x39f   : > { %v2970_v26 = vpack.c.bf16 %v2894_v39, %v2892_v21 }
 0x3a0   : > { %v2733_v27 = vpop.f32.mrb[232].mxu0  ;;  %v2971_v28 = vpack.c.bf16 %v2895_v24, %v2893_v22 }
 0x3a1   : > { %v2734_v29 = vadd.f32 %v2733_v27, %v12277_v23  ;;  %v2735_v30 = vpop.f32.mrb[233].mxu0 }
 0x3a2   : > { %v2736_v31 = vadd.f32 %v2735_v30, %v12281_v25  ;;  %v2737_v32 = vpop.f32.mrb[234].mxu0  ;;  %3472 = vmatprep.mubr.bf16.mxu1 %v2971_v28 }
 0x3a3   : > { %v2738_v10 = vadd.f32 %v2737_v32, %v12277_v23  ;;  %v2739_v34 = vpop.f32.mrb[235].mxu0  ;;  %3473 = vmatmul.mubr.bf16.gmra.mrb[228].mxu1 %v2970_v26  ;;  %v2896_v37 = vmax.f32 %v2734_v29, 0.0 }
 0x3a4   : > { %v2740_v36 = vadd.f32 %v2739_v34, %v12281_v25  ;;  %v2897_v41 = vmax.f32 %v2736_v31, 0.0 }
 0x3a5   : > { %v2898_v40 = vmax.f32 %v2738_v10, 0.0 }
 0x3a6   : > { %v2899_v42 = vmax.f32 %v2740_v36, 0.0 }
 0x3a7   : > { %v2972_v43 = vpack.c.bf16 %v2898_v40, %v2896_v37 }
 0x3a8   : > { %v2743_v44 = vpop.f32.mrb[236].mxu0  ;;  %v2973_v45 = vpack.c.bf16 %v2899_v42, %v2897_v41 }
 0x3a9   : > { %v2744_v47 = vadd.f32 %v2743_v44, %v12277_v23  ;;  %v2745_v48 = vpop.f32.mrb[237].mxu0 }
 0x3aa   : > { %v2746_v49 = vadd.f32 %v2745_v48, %v12281_v25  ;;  %v2747_v0 = vpop.f32.mrb[238].mxu0  ;;  %3482 = vmatprep.mubr.bf16.mxu1 %v2973_v45 }
 0x3ab   : > { %v2748_v50 = vadd.f32 %v2747_v0, %v12277_v23  ;;  %v2749_v51 = vpop.f32.mrb[239].mxu0  ;;  %3483 = vmatmul.mubr.bf16.gmra.mrb[232].mxu1 %v2972_v43  ;;  %v2900_v54 = vmax.f32 %v2744_v47, 0.0 }
 0x3ac   : > { %v2750_v52 = vadd.f32 %v2749_v51, %v12281_v25  ;;  %v2901_v56 = vmax.f32 %v2746_v49, 0.0 }
 0x3ad   : > { %v2902_v55 = vmax.f32 %v2748_v50, 0.0 }
 0x3ae   : > { %v2903_v57 = vmax.f32 %v2750_v52, 0.0  ;;  %v3224_v58 = vpop.f32.mrb[128].mxu1 }
 0x3af   : > { %v3225_v59 = vadd.f32 %v3224_v58, %v12437_v3  ;;  %v3226_v60 = vpop.f32.mrb[129].mxu1  ;;  %v2974_v61 = vpack.c.bf16 %v2902_v55, %v2900_v54 }
 0x3b0   : > { %v3227_v62 = vadd.f32 %v3226_v60, %v12441_v53  ;;  %v2753_v63 = vpop.f32.mrb[240].mxu0  ;;  %v3228_v2 = vpop.f32.mrb[130].mxu1  ;;  %v2975_v4 = vpack.c.bf16 %v2903_v57, %v2901_v56 }
 0x3b1   : > { %v2754_v6 = vadd.f32 %v2753_v63, %v12277_v23  ;;  %v3229_v7 = vadd.f32 %v3228_v2, %v12437_v3  ;;  %v2755_v8 = vpop.f32.mrb[241].mxu0  ;;  %v3230_v9 = vpop.f32.mrb[131].mxu1  ;;  %v3543_v14 = vmax.f32 %v3225_v59, 0.0 }
 0x3b2   : > { %v2756_v11 = vadd.f32 %v2755_v8, %v12281_v25  ;;  %v3231_v12 = vadd.f32 %v3230_v9, %v12441_v53  ;;  %v2757_v13 = vpop.f32.mrb[242].mxu0  ;;  %3492 = vmatprep.mubr.bf16.mxu1 %v2975_v4  ;;  %v3544_v18 = vmax.f32 %v3227_v62, 0.0 }
 0x3b3   : > { %v3545_v15 = vmax.f32 %v3229_v7, 0.0  ;;  %v2758_v16 = vadd.f32 %v2757_v13, %v12277_v23  ;;  %v2759_v17 = vpop.f32.mrb[243].mxu0  ;;  %3493 = vmatmul.mubr.bf16.gmra.mrb[236].mxu1 %v2974_v61  ;;  %v2904_v20 = vmax.f32 %v2754_v6, 0.0 }
 0x3b4   : > { %v3546_v19 = vmax.f32 %v3231_v12, 0.0  ;;  %v2760_v38 = vadd.f32 %v2759_v17, %v12281_v25  ;;  %v2905_v22 = vmax.f32 %v2756_v11, 0.0 }
 0x3b5   : > { %v3671_v21 = vpack.c.bf16 %v3545_v15, %v3543_v14  ;;  %v2906_v39 = vmax.f32 %v2758_v16, 0.0 }
 0x3b6   : > { %v2907_v24 = vmax.f32 %v2760_v38, 0.0  ;;  %v3234_v26 = vpop.f32.mrb[132].mxu1  ;;  %v3672_v27 = vpack.c.bf16 %v3546_v19, %v3544_v18 }
 0x3b7   : > { %v3235_v28 = vadd.f32 %v3234_v26, %v12437_v3  ;;  %v3236_v29 = vpop.f32.mrb[133].mxu1  ;;  %v2976_v30 = vpack.c.bf16 %v2906_v39, %v2904_v20 }
 0x3b8   : > { %v3237_v31 = vadd.f32 %v3236_v29, %v12441_v53  ;;  %v2763_v32 = vpop.f32.mrb[244].mxu0  ;;  %v3238_v10 = vpop.f32.mrb[134].mxu1  ;;  %3973 = vmatprep.mubr.bf16.mxu0 %v3672_v27  ;;  %v2977_v34 = vpack.c.bf16 %v2907_v24, %v2905_v22 }
 0x3b9   : > { %v2764_v36 = vadd.f32 %v2763_v32, %v12277_v23  ;;  %v3239_v37 = vadd.f32 %v3238_v10, %v12437_v3  ;;  %v2765_v40 = vpop.f32.mrb[245].mxu0  ;;  %v3240_v41 = vpop.f32.mrb[135].mxu1  ;;  %3974 = vmatmul.mubr.bf16.vlgmr.msra.gmra.mrb[0].mxu0 %v3671_v21  ;;  %v3547_v45 = vmax.f32 %v3235_v28, 0.0 }
 0x3ba   : > { %v2766_v42 = vadd.f32 %v2765_v40, %v12281_v25  ;;  %v3241_v43 = vadd.f32 %v3240_v41, %v12441_v53  ;;  %v2767_v44 = vpop.f32.mrb[246].mxu0  ;;  %3502 = vmatprep.mubr.bf16.mxu1 %v2977_v34  ;;  %v3548_v49 = vmax.f32 %v3237_v31, 0.0 }
 0x3bb   : > { %v3549_v46 = vmax.f32 %v3239_v37, 0.0  ;;  %v2768_v47 = vadd.f32 %v2767_v44, %v12277_v23  ;;  %v2769_v48 = vpop.f32.mrb[247].mxu0  ;;  %3503 = vmatmul.mubr.bf16.gmra.mrb[240].mxu1 %v2976_v30  ;;  %v2908_v51 = vmax.f32 %v2764_v36, 0.0 }
 0x3bc   : > { %v3550_v0 = vmax.f32 %v3241_v43, 0.0  ;;  %v2770_v50 = vadd.f32 %v2769_v48, %v12281_v25  ;;  %v2909_v55 = vmax.f32 %v2766_v42, 0.0 }
 0x3bd   : > { %v3673_v52 = vpack.c.bf16 %v3549_v46, %v3547_v45  ;;  %v2910_v54 = vmax.f32 %v2768_v47, 0.0 }
 0x3be   : > { %v2911_v56 = vmax.f32 %v2770_v50, 0.0  ;;  %v3244_v57 = vpop.f32.mrb[136].mxu1  ;;  %v3674_v58 = vpack.c.bf16 %v3550_v0, %v3548_v49 }
 0x3bf   : > { %v3245_v59 = vadd.f32 %v3244_v57, %v12437_v3  ;;  %v3246_v60 = vpop.f32.mrb[137].mxu1  ;;  %v2978_v61 = vpack.c.bf16 %v2910_v54, %v2908_v51 }
 0x3c0   : > { %v3247_v62 = vadd.f32 %v3246_v60, %v12441_v53  ;;  %v2773_v63 = vpop.f32.mrb[248].mxu0  ;;  %v3248_v2 = vpop.f32.mrb[138].mxu1  ;;  %3983 = vmatprep.mubr.bf16.mxu0 %v3674_v58  ;;  %v2979_v4 = vpack.c.bf16 %v2911_v56, %v2909_v55 }
 0x3c1   : > { %v2774_v6 = vadd.f32 %v2773_v63, %v12277_v23  ;;  %v3249_v7 = vadd.f32 %v3248_v2, %v12437_v3  ;;  %v2775_v8 = vpop.f32.mrb[249].mxu0  ;;  %v3250_v9 = vpop.f32.mrb[139].mxu1  ;;  %3984 = vmatmul.mubr.bf16.gmra.mrb[4].mxu0 %v3673_v52  ;;  %v3551_v14 = vmax.f32 %v3245_v59, 0.0 }
 0x3c2   : > { %v2776_v11 = vadd.f32 %v2775_v8, %v12281_v25  ;;  %v3251_v12 = vadd.f32 %v3250_v9, %v12441_v53  ;;  %v2777_v13 = vpop.f32.mrb[250].mxu0  ;;  %3512 = vmatprep.mubr.bf16.mxu1 %v2979_v4  ;;  %v3552_v18 = vmax.f32 %v3247_v62, 0.0 }
 0x3c3   : > { %v3553_v15 = vmax.f32 %v3249_v7, 0.0  ;;  %v2778_v16 = vadd.f32 %v2777_v13, %v12277_v23  ;;  %v2779_v17 = vpop.f32.mrb[251].mxu0  ;;  %3513 = vmatmul.mubr.bf16.gmra.mrb[244].mxu1 %v2978_v61  ;;  %v2912_v20 = vmax.f32 %v2774_v6, 0.0 }
 0x3c4   : > { %v3554_v19 = vmax.f32 %v3251_v12, 0.0  ;;  %v2780_v38 = vadd.f32 %v2779_v17, %v12281_v25  ;;  %v2913_v22 = vmax.f32 %v2776_v11, 0.0 }
 0x3c5   : > { %v3675_v21 = vpack.c.bf16 %v3553_v15, %v3551_v14  ;;  %v2914_v39 = vmax.f32 %v2778_v16, 0.0 }
 0x3c6   : > { %v2915_v24 = vmax.f32 %v2780_v38, 0.0  ;;  %v3254_v26 = vpop.f32.mrb[140].mxu1  ;;  %v3676_v27 = vpack.c.bf16 %v3554_v19, %v3552_v18  ;;  %v11420_v18 = vld [vmem:[#allocation3 + $0x500] ss:$8 sps:$4 sm:$0xff]  }
 0x3c7   : > { %v3255_v28 = vadd.f32 %v3254_v26, %v12437_v3  ;;  %v3256_v29 = vpop.f32.mrb[141].mxu1  ;;  %v2980_v30 = vpack.c.bf16 %v2914_v39, %v2912_v20  ;;  %v11425_v20 = vld [vmem:[#allocation3 + $0x514] ss:$8 sps:$4 sm:$0xff]  }
 0x3c8   : > { %v3257_v31 = vadd.f32 %v3256_v29, %v12441_v53  ;;  %v2783_v32 = vpop.f32.mrb[252].mxu0  ;;  %v3258_v10 = vpop.f32.mrb[142].mxu1  ;;  %3993 = vmatprep.mubr.bf16.mxu0 %v3676_v27  ;;  %v2981_v34 = vpack.c.bf16 %v2915_v24, %v2913_v22  ;;  %v11670_v24 = vld [vmem:[%s11902_s29] sm:$0xff]  }
 0x3c9   : > { %v2784_v36 = vadd.f32 %v2783_v32, %v12277_v23  ;;  %v3259_v37 = vadd.f32 %v3258_v10, %v12437_v3  ;;  %v2785_v40 = vpop.f32.mrb[253].mxu0  ;;  %v3260_v41 = vpop.f32.mrb[143].mxu1  ;;  %3994 = vmatmul.mubr.bf16.gmra.mrb[8].mxu0 %v3675_v21  ;;  %v3555_v45 = vmax.f32 %v3255_v28, 0.0  ;;  %v11423_v28 = vld [vmem:[#allocation3 + $0x510] ss:$8 sps:$4 sm:$0xff]  }
 0x3ca   : > { %v2786_v42 = vadd.f32 %v2785_v40, %v12281_v25  ;;  %v3261_v43 = vadd.f32 %v3260_v41, %v12441_v53  ;;  %v2787_v44 = vpop.f32.mrb[254].mxu0  ;;  %3522 = vmatprep.mubr.bf16.mxu1 %v2981_v34  ;;  %v3556_v49 = vmax.f32 %v3257_v31, 0.0  ;;  %v11426_v40 = vld [vmem:[#allocation3 + $0x520] ss:$8 sps:$4 sm:$0xff]  }
 0x3cb   : > { %v3557_v46 = vmax.f32 %v3259_v37, 0.0  ;;  %v2788_v47 = vadd.f32 %v2787_v44, %v12277_v23  ;;  %v2789_v48 = vpop.f32.mrb[255].mxu0  ;;  %3523 = vmatmul.mubr.bf16.gmra.mrb[248].mxu1 %v2980_v30  ;;  %v2916_v51 = vmax.f32 %v2784_v36, 0.0  ;;  %v11428_v30 = vld [vmem:[#allocation3 + $0x524] ss:$8 sps:$4 sm:$0xff]  }
 0x3cc   : > { %v3558_v0 = vmax.f32 %v3261_v43, 0.0  ;;  %v2790_v50 = vadd.f32 %v2789_v48, %v12281_v25  ;;  %v2917_v55 = vmax.f32 %v2786_v42, 0.0  ;;  %v11431_v43 = vld [vmem:[#allocation3 + $0x534] ss:$8 sps:$4 sm:$0xff]  }
 0x3cd   : > { %v3677_v52 = vpack.c.bf16 %v3557_v46, %v3555_v45  ;;  %v2918_v54 = vmax.f32 %v2788_v47, 0.0  ;;  %v11671_v47 = vld [vmem:[%s11902_s29 + $0x8] sm:$0xff]  }
 0x3ce   : > { %v2919_v56 = vmax.f32 %v2790_v50, 0.0  ;;  %v3264_v57 = vpop.f32.mrb[144].mxu1  ;;  %v3678_v58 = vpack.c.bf16 %v3558_v0, %v3556_v49  ;;  %v11429_v0 = vld [vmem:[#allocation3 + $0x530] ss:$8 sps:$4 sm:$0xff]  }
 0x3cf   : > { %v3265_v59 = vadd.f32 %v3264_v57, %v12437_v3  ;;  %v3266_v60 = vpop.f32.mrb[145].mxu1  ;;  %v2982_v61 = vpack.c.bf16 %v2918_v54, %v2916_v51  ;;  %v11434_v51 = vld [vmem:[#allocation3 + $0x544] ss:$8 sps:$4 sm:$0xff]  }
 0x3d0   : > { %v3267_v62 = vadd.f32 %v3266_v60, %v12441_v53  ;;  %v3268_v23 = vpop.f32.mrb[146].mxu1  ;;  %4003 = vmatprep.mubr.bf16.mxu0 %v3678_v58  ;;  %v2983_v63 = vpack.c.bf16 %v2919_v56, %v2917_v55 }
 0x3d1   : > { %v3269_v2 = vadd.f32 %v3268_v23, %v12437_v3  ;;  %v3270_v4 = vpop.f32.mrb[147].mxu1  ;;  %4004 = vmatmul.mubr.bf16.gmra.mrb[12].mxu0 %v3677_v52  ;;  %v3559_v6 = vmax.f32 %v3265_v59, 0.0  ;;  %v11432_v59 = vld [vmem:[#allocation3 + $0x540] ss:$8 sps:$4 sm:$0xff]  }
 0x3d2   : > { %v3271_v25 = vadd.f32 %v3270_v4, %v12441_v53  ;;  %3532 = vmatprep.mubr.bf16.mxu1 %v2983_v63  ;;  %v3560_v8 = vmax.f32 %v3267_v62, 0.0  ;;  %v11437_v62 = vld [vmem:[#allocation3 + $0x554] ss:$8 sps:$4 sm:$0xff]  }
 0x3d3   : > { %v3561_v7 = vmax.f32 %v3269_v2, 0.0  ;;  %3533 = vmatmul.mubr.bf16.gmra.mrb[252].mxu1 %v2982_v61  ;;  %v11672_v4 = vld [vmem:[%s11902_s29 + $0x10] sm:$0xff]  }
 0x3d4   : > { %v3562_v9 = vmax.f32 %v3271_v25, 0.0  ;;  %4604 = vmatprep.mubr.bf16.mxu1 %v11748_v1 }
 0x3d5   : > { %v3679_v11 = vpack.c.bf16 %v3561_v7, %v3559_v6  ;;  %v11435_v7 = vld [vmem:[#allocation3 + $0x550] ss:$8 sps:$4 sm:$0xff]  }
 0x3d6   : > { %v3274_v12 = vpop.f32.mrb[148].mxu1  ;;  %v3680_v13 = vpack.c.bf16 %v3562_v9, %v3560_v8  ;;  %v11440_v9 = vld [vmem:[#allocation3 + $0x564] ss:$8 sps:$4 sm:$0xff]  }
 0x3d7   : > { %v3275_v14 = vadd.f32 %v3274_v12, %v12437_v3  ;;  %v3276_v15 = vpop.f32.mrb[149].mxu1 }
 0x3d8   : > { %v3277_v16 = vadd.f32 %v3276_v15, %v12441_v53  ;;  %v3278_v17 = vpop.f32.mrb[150].mxu1  ;;  %4013 = vmatprep.mubr.bf16.mxu0 %v3680_v13 }
 0x3d9   : > { %v3279_v19 = vadd.f32 %v3278_v17, %v12437_v3  ;;  %v3280_v38 = vpop.f32.mrb[151].mxu1  ;;  %4014 = vmatmul.mubr.bf16.gmra.mrb[16].mxu0 %v3679_v11  ;;  %v3563_v39 = vmax.f32 %v3275_v14, 0.0  ;;  %v11438_v17 = vld [vmem:[#allocation3 + $0x560] ss:$8 sps:$4 sm:$0xff]  }
 0x3da   : > { %v3281_v21 = vadd.f32 %v3280_v38, %v12441_v53  ;;  %v3564_v26 = vmax.f32 %v3277_v16, 0.0  ;;  %v11443_v38 = vld [vmem:[#allocation3 + $0x574] ss:$8 sps:$4 sm:$0xff]  }
 0x3db   : > { %v3565_v22 = vmax.f32 %v3279_v19, 0.0  ;;  %10508 = vmatmul.mubr.msk.bf16.vlgmr.msra.gmra.mrb[0].mxu1 %vm830_vm2, %v11670_v24 }
 0x3dc   : > { %v3566_v27 = vmax.f32 %v3281_v21, 0.0  ;;  %5086 = vmatpush1.bf16.msra.mxu1 %v11420_v18  ;;  %4614 = vmatprep.mubr.bf16.mxu1 %v11748_v1 }
 0x3dd   : > { %v3681_v29 = vpack.c.bf16 %v3565_v22, %v3563_v39  ;;  %5087 = vmatprep.subr.bf16.mxu1 %v11425_v20  ;;  %v11673_v22 = vld [vmem:[%s11902_s29 + $0x18] sm:$0xff]  }
 0x3de   : > { %v3284_v31 = vpop.f32.mrb[152].mxu1  ;;  %v3682_v32 = vpack.c.bf16 %v3566_v27, %v3564_v26  ;;  %v11441_v27 = vld [vmem:[#allocation3 + $0x570] ss:$8 sps:$4 sm:$0xff]  }
 0x3df   : > { %v3285_v10 = vadd.f32 %v3284_v31, %v12437_v3  ;;  %v3286_v34 = vpop.f32.mrb[153].mxu1 }
 0x3e0   : > { %v3287_v36 = vadd.f32 %v3286_v34, %v12441_v53  ;;  %v3288_v37 = vpop.f32.mrb[154].mxu1  ;;  %4023 = vmatprep.mubr.bf16.mxu0 %v3682_v32  ;;  %5088 = vmatpush1.bf16.msra.mxu1 %v11423_v28 }
 0x3e1   : > { %v3289_v41 = vadd.f32 %v3288_v37, %v12437_v3  ;;  %v3290_v42 = vpop.f32.mrb[155].mxu1  ;;  %4024 = vmatmul.mubr.bf16.gmra.mrb[20].mxu0 %v3681_v29  ;;  %5089 = vmatprep.subr.bf16.mxu1 %v11428_v30  ;;  %v3567_v45 = vmax.f32 %v3285_v10, 0.0  ;;  %v11446_v29 = vld [vmem:[#allocation3 + $0x584] ss:$8 sps:$4 sm:$0xff]   ;;  %v11444_v37 = vld [vmem:[#allocation3 + $0x580] ss:$8 sps:$4 sm:$0xff]  }
 0x3e2   : > { %v3291_v44 = vadd.f32 %v3290_v42, %v12441_v53  ;;  %v3568_v48 = vmax.f32 %v3287_v36, 0.0  ;;  %v11449_v42 = vld [vmem:[#allocation3 + $0x594] ss:$8 sps:$4 sm:$0xff]  }
 0x3e3   : > { %v3569_v46 = vmax.f32 %v3289_v41, 0.0  ;;  %10509 = vmatmul.mubr.msk.bf16.gmra.mrb[4].mxu1 %vm830_vm2, %v11671_v47 }
 0x3e4   : > { %v3570_v49 = vmax.f32 %v3291_v44, 0.0  ;;  %4624 = vmatprep.mubr.bf16.mxu1 %v11748_v1  ;;  %5090 = vmatpush1.bf16.msra.mxu1 %v11426_v40 }
 0x3e5   : > { %v3683_v50 = vpack.c.bf16 %v3569_v46, %v3567_v45  ;;  %5091 = vmatprep.subr.bf16.mxu1 %v11431_v43  ;;  %v11674_v46 = vld [vmem:[%s11902_s29 + $0x20] sm:$0xff]  }
 0x3e6   : > { %v3294_v52 = vpop.f32.mrb[156].mxu1  ;;  %v3684_v54 = vpack.c.bf16 %v3570_v49, %v3568_v48  ;;  %v11447_v49 = vld [vmem:[#allocation3 + $0x590] ss:$8 sps:$4 sm:$0xff]  }
 0x3e7   : > { %v3295_v55 = vadd.f32 %v3294_v52, %v12437_v3  ;;  %v3296_v56 = vpop.f32.mrb[157].mxu1 }
 0x3e8   : > { %v3297_v57 = vadd.f32 %v3296_v56, %v12441_v53  ;;  %v3298_v58 = vpop.f32.mrb[158].mxu1  ;;  %4033 = vmatprep.mubr.bf16.mxu0 %v3684_v54  ;;  %5092 = vmatpush1.bf16.msra.mxu1 %v11429_v0 }
 0x3e9   : > { %v3299_v60 = vadd.f32 %v3298_v58, %v12437_v3  ;;  %v3300_v61 = vpop.f32.mrb[159].mxu1  ;;  %4034 = vmatmul.mubr.bf16.gmra.mrb[24].mxu0 %v3683_v50  ;;  %5093 = vmatprep.subr.bf16.mxu1 %v11434_v51  ;;  %v3571_v63 = vmax.f32 %v3295_v55, 0.0  ;;  %v11452_v50 = vld [vmem:[#allocation3 + $0x5a4] ss:$8 sps:$4 sm:$0xff]   ;;  %v11450_v58 = vld [vmem:[#allocation3 + $0x5a0] ss:$8 sps:$4 sm:$0xff]  }
 0x3ea   : > { %v3301_v23 = vadd.f32 %v3300_v61, %v12441_v53  ;;  %v3572_v25 = vmax.f32 %v3297_v57, 0.0 }
 0x3eb   : > { %v3573_v2 = vmax.f32 %v3299_v60, 0.0  ;;  %10510 = vmatmul.mubr.msk.bf16.gmra.mrb[8].mxu1 %vm830_vm2, %v11672_v4 }
 0x3ec   : > { %v3574_v6 = vmax.f32 %v3301_v23, 0.0  ;;  %4634 = vmatprep.mubr.bf16.mxu1 %v11748_v1  ;;  %5094 = vmatpush1.bf16.msra.mxu1 %v11432_v59 }
 0x3ed   : > { %v3685_v8 = vpack.c.bf16 %v3573_v2, %v3571_v63  ;;  %5095 = vmatprep.subr.bf16.mxu1 %v11437_v62  ;;  %v11675_v63 = vld [vmem:[%s11902_s29 + $0x28] sm:$0xff]  }
 0x3ee   : > { %v3304_v11 = vpop.f32.mrb[160].mxu1  ;;  %v3686_v12 = vpack.c.bf16 %v3574_v6, %v3572_v25 }
 0x3ef   : > { %v3305_v13 = vadd.f32 %v3304_v11, %v12437_v3  ;;  %v3306_v14 = vpop.f32.mrb[161].mxu1 }
 0x3f0   : > { %v3307_v15 = vadd.f32 %v3306_v14, %v12441_v53  ;;  %v3308_v16 = vpop.f32.mrb[162].mxu1  ;;  %4043 = vmatprep.mubr.bf16.mxu0 %v3686_v12  ;;  %5096 = vmatpush1.bf16.msra.mxu1 %v11435_v7 }
 0x3f1   : > { %v3309_v18 = vadd.f32 %v3308_v16, %v12437_v3  ;;  %v3310_v19 = vpop.f32.mrb[163].mxu1  ;;  %4044 = vmatmul.mubr.bf16.gmra.mrb[28].mxu0 %v3685_v8  ;;  %5097 = vmatprep.subr.bf16.mxu1 %v11440_v9  ;;  %v3575_v21 = vmax.f32 %v3305_v13, 0.0 }
 0x3f2   : > { %v3311_v20 = vadd.f32 %v3310_v19, %v12441_v53  ;;  %v3576_v24 = vmax.f32 %v3307_v15, 0.0 }
 0x3f3   : > { %v3577_v39 = vmax.f32 %v3309_v18, 0.0  ;;  %10511 = vmatmul.mubr.msk.bf16.gmra.mrb[12].mxu1 %vm830_vm2, %v11673_v22  ;;  %v11676_v18 = vld [vmem:[%s11902_s29 + $0x30] sm:$0xff]  }
 0x3f4   : > { %v3578_v26 = vmax.f32 %v3311_v20, 0.0  ;;  %4644 = vmatprep.mubr.bf16.mxu1 %v11748_v1  ;;  %5098 = vmatpush1.bf16.msra.mxu1 %v11438_v17 }
 0x3f5   : > { %v3687_v28 = vpack.c.bf16 %v3577_v39, %v3575_v21  ;;  %5099 = vmatprep.subr.bf16.mxu1 %v11443_v38  ;;  %v11453_v21 = vld [vmem:[#allocation3 + $0x5b0] ss:$8 sps:$4 sm:$0xff]   ;;  %v11455_v39 = vld [vmem:[#allocation3 + $0x5b4] ss:$8 sps:$4 sm:$0xff]  }
 0x3f6   : > { %v3314_v30 = vpop.f32.mrb[164].mxu1  ;;  %v3688_v31 = vpack.c.bf16 %v3578_v26, %v3576_v24 }
 0x3f7   : > { %v3315_v32 = vadd.f32 %v3314_v30, %v12437_v3  ;;  %v3316_v10 = vpop.f32.mrb[165].mxu1 }
 0x3f8   : > { %v3317_v34 = vadd.f32 %v3316_v10, %v12441_v53  ;;  %v3318_v36 = vpop.f32.mrb[166].mxu1  ;;  %4053 = vmatprep.mubr.bf16.mxu0 %v3688_v31  ;;  %5100 = vmatpush1.bf16.msra.mxu1 %v11441_v27 }
 0x3f9   : > { %v3319_v40 = vadd.f32 %v3318_v36, %v12437_v3  ;;  %v3320_v41 = vpop.f32.mrb[167].mxu1  ;;  %4054 = vmatmul.mubr.bf16.gmra.mrb[32].mxu0 %v3687_v28  ;;  %5101 = vmatprep.subr.bf16.mxu1 %v11446_v29  ;;  %v3579_v44 = vmax.f32 %v3315_v32, 0.0  ;;  %v11677_v36 = vld [vmem:[%s11902_s29 + $0x38] sm:$0xff]  }
 0x3fa   : > { %v3321_v43 = vadd.f32 %v3320_v41, %v12441_v53  ;;  %v3580_v47 = vmax.f32 %v3317_v34, 0.0 }
 0x3fb   : > { %v3581_v45 = vmax.f32 %v3319_v40, 0.0  ;;  %10512 = vmatmul.mubr.msk.bf16.gmra.mrb[16].mxu1 %vm830_vm2, %v11674_v46 }
 0x3fc   : > { %v3582_v48 = vmax.f32 %v3321_v43, 0.0  ;;  %4654 = vmatprep.mubr.bf16.mxu1 %v11748_v1  ;;  %5102 = vmatpush1.bf16.msra.mxu1 %v11444_v37 }
 0x3fd   : > { %v3689_v0 = vpack.c.bf16 %v3581_v45, %v3579_v44  ;;  %5103 = vmatprep.subr.bf16.mxu1 %v11449_v42 }
 0x3fe   : > { %v3324_v51 = vpop.f32.mrb[168].mxu1  ;;  %v3690_v52 = vpack.c.bf16 %v3582_v48, %v3580_v47 }
 0x3ff   : > { %v3325_v54 = vadd.f32 %v3324_v51, %v12437_v3  ;;  %v3326_v55 = vpop.f32.mrb[169].mxu1 }
 0x400   : > { %v3327_v56 = vadd.f32 %v3326_v55, %v12441_v53  ;;  %v3328_v57 = vpop.f32.mrb[170].mxu1  ;;  %4063 = vmatprep.mubr.bf16.mxu0 %v3690_v52  ;;  %5104 = vmatpush1.bf16.msra.mxu1 %v11447_v49  ;;  %v11678_v52 = vld [vmem:[%s11902_s29 + $0x40] sm:$0xff]  }
 0x401   : > { %v3329_v59 = vadd.f32 %v3328_v57, %v12437_v3  ;;  %v3330_v60 = vpop.f32.mrb[171].mxu1  ;;  %4064 = vmatmul.mubr.bf16.gmra.mrb[36].mxu0 %v3689_v0  ;;  %5105 = vmatprep.subr.bf16.mxu1 %v11452_v50  ;;  %v3583_v62 = vmax.f32 %v3325_v54, 0.0  ;;  %v11456_v57 = vld [vmem:[#allocation3 + $0x5c0] ss:$8 sps:$4 sm:$0xff]  }
 0x402   : > { %v3331_v61 = vadd.f32 %v3330_v60, %v12441_v53  ;;  %v3584_v2 = vmax.f32 %v3327_v56, 0.0 }
 0x403   : > { %v3585_v23 = vmax.f32 %v3329_v59, 0.0  ;;  %10513 = vmatmul.mubr.msk.bf16.gmra.mrb[20].mxu1 %vm830_vm2, %v11675_v63 }
 0x404   : > { %v3586_v4 = vmax.f32 %v3331_v61, 0.0  ;;  %4664 = vmatprep.mubr.bf16.mxu1 %v11748_v1  ;;  %5106 = vmatpush1.bf16.msra.mxu1 %v11450_v58  ;;  %v11458_v58 = vld [vmem:[#allocation3 + $0x5c4] ss:$8 sps:$4 sm:$0xff]  }
 0x405   : > { %v3691_v25 = vpack.c.bf16 %v3585_v23, %v3583_v62  ;;  %5107 = vmatprep.subr.bf16.mxu1 %v11455_v39 }
 0x406   : > { %v3334_v6 = vpop.f32.mrb[172].mxu1  ;;  %v3692_v7 = vpack.c.bf16 %v3586_v4, %v3584_v2 }
 0x407   : > { %v3335_v8 = vadd.f32 %v3334_v6, %v12437_v3  ;;  %v3336_v9 = vpop.f32.mrb[173].mxu1 }
 0x408   : > { %v3337_v11 = vadd.f32 %v3336_v9, %v12441_v53  ;;  %v3338_v12 = vpop.f32.mrb[174].mxu1  ;;  %4073 = vmatprep.mubr.bf16.mxu0 %v3692_v7  ;;  %5108 = vmatpush1.bf16.msra.mxu1 %v11453_v21 }
 0x409   : > { %v3339_v13 = vadd.f32 %v3338_v12, %v12437_v3  ;;  %v3340_v14 = vpop.f32.mrb[175].mxu1  ;;  %4074 = vmatmul.mubr.bf16.gmra.mrb[40].mxu0 %v3691_v25  ;;  %v3587_v16 = vmax.f32 %v3335_v8, 0.0  ;;  %5109 = vmatprep.subr.bf16.mxu1 %v11458_v58  ;;  %v11679_v8 = vld [vmem:[%s11902_s29 + $0x48] sm:$0xff]  }
 0x40a   : > { %v3341_v15 = vadd.f32 %v3340_v14, %v12441_v53  ;;  %v3588_v19 = vmax.f32 %v3337_v11, 0.0 }
 0x40b   : > { %v3589_v17 = vmax.f32 %v3339_v13, 0.0  ;;  %10514 = vmatmul.mubr.msk.bf16.gmra.mrb[24].mxu1 %vm830_vm2, %v11676_v18 }
 0x40c   : > { %v3590_v38 = vmax.f32 %v3341_v15, 0.0  ;;  %4674 = vmatprep.mubr.bf16.mxu1 %v11748_v1  ;;  %5110 = vmatpush1.bf16.msra.mxu1 %v11456_v57 }
 0x40d   : > { %v3693_v20 = vpack.c.bf16 %v3589_v17, %v3587_v16 }
 0x40e   : > { %v3344_v22 = vpop.f32.mrb[176].mxu1  ;;  %v3694_v24 = vpack.c.bf16 %v3590_v38, %v3588_v19 }
 0x40f   : > { %v3345_v26 = vadd.f32 %v3344_v22, %v12437_v3  ;;  %v3346_v27 = vpop.f32.mrb[177].mxu1  ;;  %v11680_v22 = vld [vmem:[%s11902_s29 + $0x50] sm:$0xff]  }
 0x410   : > { %v3347_v28 = vadd.f32 %v3346_v27, %v12441_v53  ;;  %v3348_v29 = vpop.f32.mrb[178].mxu1  ;;  %4083 = vmatprep.mubr.bf16.mxu0 %v3694_v24 }
 0x411   : > { %v3349_v30 = vadd.f32 %v3348_v29, %v12437_v3  ;;  %v3350_v31 = vpop.f32.mrb[179].mxu1  ;;  %4084 = vmatmul.mubr.bf16.gmra.mrb[44].mxu0 %v3693_v20  ;;  %v3591_v10 = vmax.f32 %v3345_v26, 0.0  ;;  %v11461_v29 = vld [vmem:[#allocation3 + $0x5d4] ss:$8 sps:$4 sm:$0xff]  }
 0x412   : > { %v3351_v32 = vadd.f32 %v3350_v31, %v12441_v53  ;;  %v3592_v37 = vmax.f32 %v3347_v28, 0.0  ;;  %v11459_v28 = vld [vmem:[#allocation3 + $0x5d0] ss:$8 sps:$4 sm:$0xff]   ;;  %5111 = vmatprep.subr.bf16.mxu1 %v11461_v29 }
 0x413   : > { %v3593_v34 = vmax.f32 %v3349_v30, 0.0  ;;  %10515 = vmatmul.mubr.msk.bf16.gmra.mrb[28].mxu1 %vm830_vm2, %v11677_v36 }
 0x414   : > { %v3594_v40 = vmax.f32 %v3351_v32, 0.0  ;;  %4684 = vmatprep.mubr.bf16.mxu1 %v11748_v1  ;;  %5112 = vmatpush1.bf16.msra.mxu1 %v11459_v28 }
 0x415   : > { %v3695_v41 = vpack.c.bf16 %v3593_v34, %v3591_v10 }
 0x416   : > { %v3354_v42 = vpop.f32.mrb[180].mxu1  ;;  %v3696_v43 = vpack.c.bf16 %v3594_v40, %v3592_v37 }
 0x417   : > { %v3355_v44 = vadd.f32 %v3354_v42, %v12437_v3  ;;  %v3356_v45 = vpop.f32.mrb[181].mxu1 }
 0x418   : > { %v3357_v46 = vadd.f32 %v3356_v45, %v12441_v53  ;;  %v3358_v47 = vpop.f32.mrb[182].mxu1  ;;  %4093 = vmatprep.mubr.bf16.mxu0 %v3696_v43 }
 0x419   : > { %v3359_v48 = vadd.f32 %v3358_v47, %v12437_v3  ;;  %v3360_v49 = vpop.f32.mrb[183].mxu1  ;;  %4094 = vmatmul.mubr.bf16.gmra.mrb[48].mxu0 %v3695_v41  ;;  %v3595_v50 = vmax.f32 %v3355_v44, 0.0  ;;  %v11681_v44 = vld [vmem:[%s11902_s29 + $0x58] sm:$0xff]  }
 0x41a   : > { %v3361_v0 = vadd.f32 %v3360_v49, %v12441_v53  ;;  %v3596_v54 = vmax.f32 %v3357_v46, 0.0 }
 0x41b   : > { %v3597_v51 = vmax.f32 %v3359_v48, 0.0  ;;  %10516 = vmatmul.mubr.msk.bf16.gmra.mrb[32].mxu1 %vm830_vm2, %v11678_v52 }
 0x41c   : > { %v3598_v55 = vmax.f32 %v3361_v0, 0.0  ;;  %4694 = vmatprep.mubr.bf16.mxu1 %v11748_v1 }
 0x41d   : > { %v3697_v56 = vpack.c.bf16 %v3597_v51, %v3595_v50 }
 0x41e   : > { %v3364_v59 = vpop.f32.mrb[184].mxu1  ;;  %v3698_v60 = vpack.c.bf16 %v3598_v55, %v3596_v54 }
 0x41f   : > { %v3365_v61 = vadd.f32 %v3364_v59, %v12437_v3  ;;  %v3366_v62 = vpop.f32.mrb[185].mxu1  ;;  %v11682_v59 = vld [vmem:[%s11902_s29 + $0x60] sm:$0xff]  }
 0x420   : > { %v3367_v23 = vadd.f32 %v3366_v62, %v12441_v53  ;;  %v3368_v63 = vpop.f32.mrb[186].mxu1  ;;  %4103 = vmatprep.mubr.bf16.mxu0 %v3698_v60  ;;  %v11462_v60 = vld [vmem:[#allocation3 + $0x600] ss:$8 sps:$4 sm:$0xff]  }
 0x421   : > { %v3369_v2 = vadd.f32 %v3368_v63, %v12437_v3  ;;  %v3370_v4 = vpop.f32.mrb[187].mxu1  ;;  %4104 = vmatmul.mubr.bf16.gmra.mrb[52].mxu0 %v3697_v56  ;;  %v3599_v6 = vmax.f32 %v3365_v61, 0.0  ;;  %v11464_v61 = vld [vmem:[#allocation3 + $0x604] ss:$8 sps:$4 sm:$0xff]   ;;  %v11465_v63 = vld [vmem:[#allocation3 + $0x5e0] ss:$8 sps:$4 sm:$0xff]  }
 0x422   : > { %v3371_v25 = vadd.f32 %v3370_v4, %v12441_v53  ;;  %v3600_v9 = vmax.f32 %v3367_v23, 0.0  ;;  %5977 = vmatprep.subr.bf16.mxu0 %v11464_v61 }
 0x423   : > { %v3601_v7 = vmax.f32 %v3369_v2, 0.0  ;;  %10517 = vmatmul.mubr.msk.bf16.gmra.mrb[36].mxu1 %vm830_vm2, %v11679_v8  ;;  %v11467_v2 = vld [vmem:[#allocation3 + $0x5e4] ss:$8 sps:$4 sm:$0xff]   ;;  %5978 = vmatpush1.bf16.msra.mxu0 %v11462_v60 }
 0x424   : > { %v3602_v11 = vmax.f32 %v3371_v25, 0.0  ;;  %4704 = vmatprep.mubr.bf16.mxu1 %v11748_v1  ;;  %5113 = vmatprep.subr.bf16.mxu1 %v11467_v2 }
 0x425   : > { %v3699_v12 = vpack.c.bf16 %v3601_v7, %v3599_v6  ;;  %5114 = vmatpush1.bf16.msra.mxu1 %v11465_v63 }
 0x426   : > { %v3374_v13 = vpop.f32.mrb[188].mxu1  ;;  %v3700_v14 = vpack.c.bf16 %v3602_v11, %v3600_v9 }
 0x427   : > { %v3375_v15 = vadd.f32 %v3374_v13, %v12437_v3  ;;  %v3376_v16 = vpop.f32.mrb[189].mxu1 }
 0x428   : > { %v3377_v17 = vadd.f32 %v3376_v16, %v12441_v53  ;;  %v3378_v18 = vpop.f32.mrb[190].mxu1  ;;  %4113 = vmatprep.mubr.bf16.mxu0 %v3700_v14 }
 0x429   : > { %v3379_v19 = vadd.f32 %v3378_v18, %v12437_v3  ;;  %v3380_v38 = vpop.f32.mrb[191].mxu1  ;;  %4114 = vmatmul.mubr.bf16.gmra.mrb[56].mxu0 %v3699_v12  ;;  %v3603_v21 = vmax.f32 %v3375_v15, 0.0 }
 0x42a   : > { %v3381_v20 = vadd.f32 %v3380_v38, %v12441_v53  ;;  %v3604_v24 = vmax.f32 %v3377_v17, 0.0  ;;  %v11683_v17 = vld [vmem:[%s11902_s29 + $0x68] sm:$0xff]  }
 0x42b   : > { %v3605_v39 = vmax.f32 %v3379_v19, 0.0  ;;  %10518 = vmatmul.mubr.msk.bf16.gmra.mrb[40].mxu1 %vm830_vm2, %v11680_v22 }
 0x42c   : > { %v3606_v26 = vmax.f32 %v3381_v20, 0.0  ;;  %4714 = vmatprep.mubr.bf16.mxu1 %v11748_v1 }
 0x42d   : > { %v3701_v27 = vpack.c.bf16 %v3605_v39, %v3603_v21 }
 0x42e   : > { %v3384_v30 = vpop.f32.mrb[192].mxu1  ;;  %v3702_v31 = vpack.c.bf16 %v3606_v26, %v3604_v24 }
 0x42f   : > { %v3385_v32 = vadd.f32 %v3384_v30, %v12437_v3  ;;  %v3386_v10 = vpop.f32.mrb[193].mxu1 }
 0x430   : > { %v3387_v34 = vadd.f32 %v3386_v10, %v12441_v53  ;;  %v3388_v36 = vpop.f32.mrb[194].mxu1  ;;  %4123 = vmatprep.mubr.bf16.mxu0 %v3702_v31  ;;  %v11468_v10 = vld [vmem:[#allocation3 + $0x610] ss:$8 sps:$4 sm:$0xff]  }
 0x431   : > { %v3389_v37 = vadd.f32 %v3388_v36, %v12437_v3  ;;  %v3390_v40 = vpop.f32.mrb[195].mxu1  ;;  %4124 = vmatmul.mubr.bf16.gmra.mrb[60].mxu0 %v3701_v27  ;;  %v3607_v42 = vmax.f32 %v3385_v32, 0.0  ;;  %v11684_v32 = vld [vmem:[%s11902_s29 + $0x70] sm:$0xff]  }
 0x432   : > { %v3391_v41 = vadd.f32 %v3390_v40, %v12441_v53  ;;  %v3608_v45 = vmax.f32 %v3387_v34, 0.0  ;;  %v11470_v34 = vld [vmem:[#allocation3 + $0x614] ss:$8 sps:$4 sm:$0xff]   ;;  %v11471_v40 = vld [vmem:[#allocation3 + $0x5f0] ss:$8 sps:$4 sm:$0xff]  }
 0x433   : > { %v3609_v43 = vmax.f32 %v3389_v37, 0.0  ;;  %10519 = vmatmul.mubr.msk.bf16.gmra.mrb[44].mxu1 %vm830_vm2, %v11681_v44  ;;  %5979 = vmatprep.subr.bf16.mxu0 %v11470_v34 }
 0x434   : > { %v3610_v46 = vmax.f32 %v3391_v41, 0.0  ;;  %4724 = vmatprep.mubr.bf16.mxu1 %v11748_v1  ;;  %v11473_v41 = vld [vmem:[#allocation3 + $0x5f4] ss:$8 sps:$4 sm:$0xff]   ;;  %5980 = vmatpush1.bf16.msra.mxu0 %v11468_v10 }
 0x435   : > { %v3703_v47 = vpack.c.bf16 %v3609_v43, %v3607_v42  ;;  %5115 = vmatprep.subr.bf16.mxu1 %v11473_v41 }
 0x436   : > { %v3394_v48 = vpop.f32.mrb[196].mxu1  ;;  %v3704_v49 = vpack.c.bf16 %v3610_v46, %v3608_v45  ;;  %5116 = vmatpush1.bf16.msra.mxu1 %v11471_v40 }
 0x437   : > { %v3395_v0 = vadd.f32 %v3394_v48, %v12437_v3  ;;  %v3396_v50 = vpop.f32.mrb[197].mxu1 }
 0x438   : > { %v3397_v51 = vadd.f32 %v3396_v50, %v12441_v53  ;;  %v3398_v52 = vpop.f32.mrb[198].mxu1  ;;  %4133 = vmatprep.mubr.bf16.mxu0 %v3704_v49 }
 0x439   : > { %v3399_v54 = vadd.f32 %v3398_v52, %v12437_v3  ;;  %v3400_v55 = vpop.f32.mrb[199].mxu1  ;;  %4134 = vmatmul.mubr.bf16.gmra.mrb[64].mxu0 %v3703_v47  ;;  %v3611_v57 = vmax.f32 %v3395_v0, 0.0 }
 0x43a   : > { %v3401_v56 = vadd.f32 %v3400_v55, %v12441_v53  ;;  %v3612_v62 = vmax.f32 %v3397_v51, 0.0 }
 0x43b   : > { %v3613_v58 = vmax.f32 %v3399_v54, 0.0  ;;  %10520 = vmatmul.mubr.msk.bf16.gmra.mrb[48].mxu1 %vm830_vm2, %v11682_v59  ;;  %v11685_v54 = vld [vmem:[%s11902_s29 + $0x78] sm:$0xff]  }
 0x43c   : > { %v3614_v23 = vmax.f32 %v3401_v56, 0.0  ;;  %4734 = vmatprep.mubr.bf16.mxu1 %v11748_v1 }
 0x43d   : > { %v3705_v4 = vpack.c.bf16 %v3613_v58, %v3611_v57 }
 0x43e   : > { %v3404_v25 = vpop.f32.mrb[200].mxu1  ;;  %v3706_v6 = vpack.c.bf16 %v3614_v23, %v3612_v62 }
 0x43f   : > { %v3405_v7 = vadd.f32 %v3404_v25, %v12437_v3  ;;  %v3406_v8 = vpop.f32.mrb[201].mxu1 }
 0x440   : > { %v3407_v9 = vadd.f32 %v3406_v8, %v12441_v53  ;;  %v3408_v11 = vpop.f32.mrb[202].mxu1  ;;  %4143 = vmatprep.mubr.bf16.mxu0 %v3706_v6  ;;  %v11474_v8 = vld [vmem:[#allocation3 + $0x620] ss:$8 sps:$4 sm:$0xff]  }
 0x441   : > { %v3409_v12 = vadd.f32 %v3408_v11, %v12437_v3  ;;  %v3410_v13 = vpop.f32.mrb[203].mxu1  ;;  %4144 = vmatmul.mubr.bf16.gmra.mrb[68].mxu0 %v3705_v4  ;;  %v3615_v15 = vmax.f32 %v3405_v7, 0.0  ;;  %v11686_v7 = vld [vmem:[%s11902_s29 + $0x80] sm:$0xff]  }
 0x442   : > { %v3411_v14 = vadd.f32 %v3410_v13, %v12441_v53  ;;  %v3616_v18 = vmax.f32 %v3407_v9, 0.0  ;;  %v11476_v9 = vld [vmem:[#allocation3 + $0x624] ss:$8 sps:$4 sm:$0xff]  }
 0x443   : > { %v3617_v16 = vmax.f32 %v3409_v12, 0.0  ;;  %10521 = vmatmul.mubr.msk.bf16.gmra.mrb[52].mxu1 %vm830_vm2, %v11683_v17  ;;  %5981 = vmatprep.subr.bf16.mxu0 %v11476_v9 }
 0x444   : > { %v3618_v19 = vmax.f32 %v3411_v14, 0.0  ;;  %4744 = vmatprep.mubr.bf16.mxu1 %v11748_v1  ;;  %5982 = vmatpush1.bf16.msra.mxu0 %v11474_v8 }
 0x445   : > { %v3707_v38 = vpack.c.bf16 %v3617_v16, %v3615_v15 }
 0x446   : > { %v3414_v20 = vpop.f32.mrb[204].mxu1  ;;  %v3708_v21 = vpack.c.bf16 %v3618_v19, %v3616_v18 }
 0x447   : > { %v3415_v39 = vadd.f32 %v3414_v20, %v12437_v3  ;;  %v3416_v22 = vpop.f32.mrb[205].mxu1 }
 0x448   : > { %v3417_v24 = vadd.f32 %v3416_v22, %v12441_v53  ;;  %v3418_v26 = vpop.f32.mrb[206].mxu1  ;;  %4153 = vmatprep.mubr.bf16.mxu0 %v3708_v21 }
 0x449   : > { %v3419_v27 = vadd.f32 %v3418_v26, %v12437_v3  ;;  %v3420_v28 = vpop.f32.mrb[207].mxu1  ;;  %4154 = vmatmul.mubr.bf16.gmra.mrb[72].mxu0 %v3707_v38  ;;  %v3619_v30 = vmax.f32 %v3415_v39, 0.0 }
 0x44a   : > { %v3421_v29 = vadd.f32 %v3420_v28, %v12441_v53  ;;  %v3620_v36 = vmax.f32 %v3417_v24, 0.0  ;;  %v11687_v24 = vld [vmem:[%s11902_s29 + $0x88] sm:$0xff]  }
 0x44b   : > { %v3621_v31 = vmax.f32 %v3419_v27, 0.0  ;;  %10522 = vmatmul.mubr.msk.bf16.gmra.mrb[56].mxu1 %vm830_vm2, %v11684_v32 }
 0x44c   : > { %v3622_v37 = vmax.f32 %v3421_v29, 0.0  ;;  %4754 = vmatprep.mubr.bf16.mxu1 %v11748_v1 }
 0x44d   : > { %v3709_v42 = vpack.c.bf16 %v3621_v31, %v3619_v30 }
 0x44e   : > { %v3424_v43 = vpop.f32.mrb[208].mxu1  ;;  %v3710_v44 = vpack.c.bf16 %v3622_v37, %v3620_v36 }
 0x44f   : > { %v3425_v45 = vadd.f32 %v3424_v43, %v12437_v3  ;;  %v3426_v46 = vpop.f32.mrb[209].mxu1  ;;  %v11688_v43 = vld [vmem:[%s11902_s29 + $0x90] sm:$0xff]  }
 0x450   : > { %v3427_v47 = vadd.f32 %v3426_v46, %v12441_v53  ;;  %v3428_v48 = vpop.f32.mrb[210].mxu1  ;;  %4163 = vmatprep.mubr.bf16.mxu0 %v3710_v44  ;;  %v11477_v44 = vld [vmem:[#allocation3 + $0x630] ss:$8 sps:$4 sm:$0xff]  }
 0x451   : > { %v3429_v49 = vadd.f32 %v3428_v48, %v12437_v3  ;;  %v3430_v0 = vpop.f32.mrb[211].mxu1  ;;  %4164 = vmatmul.mubr.bf16.gmra.mrb[76].mxu0 %v3709_v42  ;;  %v3623_v51 = vmax.f32 %v3425_v45, 0.0  ;;  %v11479_v45 = vld [vmem:[#allocation3 + $0x634] ss:$8 sps:$4 sm:$0xff]  }
 0x452   : > { %v3431_v50 = vadd.f32 %v3430_v0, %v12441_v53  ;;  %v3624_v55 = vmax.f32 %v3427_v47, 0.0  ;;  %5983 = vmatprep.subr.bf16.mxu0 %v11479_v45 }
 0x453   : > { %v3625_v52 = vmax.f32 %v3429_v49, 0.0  ;;  %10523 = vmatmul.mubr.msk.bf16.gmra.mrb[60].mxu1 %vm830_vm2, %v11685_v54  ;;  %5984 = vmatpush1.bf16.msra.mxu0 %v11477_v44 }
 0x454   : > { %v3626_v56 = vmax.f32 %v3431_v50, 0.0  ;;  %4764 = vmatprep.mubr.bf16.mxu1 %v11748_v1 }
 0x455   : > { %v3711_v57 = vpack.c.bf16 %v3625_v52, %v3623_v51 }
 0x456   : > { %v3434_v58 = vpop.f32.mrb[212].mxu1  ;;  %v3712_v59 = vpack.c.bf16 %v3626_v56, %v3624_v55 }
 0x457   : > { %v3435_v60 = vadd.f32 %v3434_v58, %v12437_v3  ;;  %v3436_v61 = vpop.f32.mrb[213].mxu1 }
 0x458   : > { %v3437_v62 = vadd.f32 %v3436_v61, %v12441_v53  ;;  %v3438_v23 = vpop.f32.mrb[214].mxu1  ;;  %4173 = vmatprep.mubr.bf16.mxu0 %v3712_v59 }
 0x459   : > { %v3439_v63 = vadd.f32 %v3438_v23, %v12437_v3  ;;  %v3440_v2 = vpop.f32.mrb[215].mxu1  ;;  %4174 = vmatmul.mubr.bf16.gmra.mrb[80].mxu0 %v3711_v57  ;;  %v3627_v25 = vmax.f32 %v3435_v60, 0.0  ;;  %v11689_v60 = vld [vmem:[%s11902_s29 + $0x98] sm:$0xff]  }
 0x45a   : > { %v3441_v4 = vadd.f32 %v3440_v2, %v12441_v53  ;;  %v3628_v11 = vmax.f32 %v3437_v62, 0.0 }
 0x45b   : > { %v3629_v6 = vmax.f32 %v3439_v63, 0.0  ;;  %10524 = vmatmul.mubr.msk.bf16.gmra.mrb[64].mxu1 %vm830_vm2, %v11686_v7 }
 0x45c   : > { %v3630_v12 = vmax.f32 %v3441_v4, 0.0  ;;  %4774 = vmatprep.mubr.bf16.mxu1 %v11748_v1 }
 0x45d   : > { %v3713_v13 = vpack.c.bf16 %v3629_v6, %v3627_v25 }
 0x45e   : > { %v3444_v14 = vpop.f32.mrb[216].mxu1  ;;  %v3714_v15 = vpack.c.bf16 %v3630_v12, %v3628_v11 }
 0x45f   : > { %v3445_v16 = vadd.f32 %v3444_v14, %v12437_v3  ;;  %v3446_v17 = vpop.f32.mrb[217].mxu1  ;;  %v11690_v14 = vld [vmem:[%s11902_s29 + $0xa0] sm:$0xff]  }
 0x460   : > { %v3447_v18 = vadd.f32 %v3446_v17, %v12441_v53  ;;  %v3448_v19 = vpop.f32.mrb[218].mxu1  ;;  %4183 = vmatprep.mubr.bf16.mxu0 %v3714_v15  ;;  %v11480_v15 = vld [vmem:[#allocation3 + $0x640] ss:$8 sps:$4 sm:$0xff]  }
 0x461   : > { %v3449_v38 = vadd.f32 %v3448_v19, %v12437_v3  ;;  %v3450_v20 = vpop.f32.mrb[219].mxu1  ;;  %4184 = vmatmul.mubr.bf16.gmra.mrb[84].mxu0 %v3713_v13  ;;  %v3631_v39 = vmax.f32 %v3445_v16, 0.0  ;;  %v11482_v16 = vld [vmem:[#allocation3 + $0x644] ss:$8 sps:$4 sm:$0xff]  }
 0x462   : > { %v3451_v21 = vadd.f32 %v3450_v20, %v12441_v53  ;;  %v3632_v26 = vmax.f32 %v3447_v18, 0.0  ;;  %5985 = vmatprep.subr.bf16.mxu0 %v11482_v16 }
 0x463   : > { %v3633_v22 = vmax.f32 %v3449_v38, 0.0  ;;  %10525 = vmatmul.mubr.msk.bf16.gmra.mrb[68].mxu1 %vm830_vm2, %v11687_v24  ;;  %5986 = vmatpush1.bf16.msra.mxu0 %v11480_v15 }
 0x464   : > { %v3634_v27 = vmax.f32 %v3451_v21, 0.0  ;;  %4784 = vmatprep.mubr.bf16.mxu1 %v11748_v1 }
 0x465   : > { %v3715_v28 = vpack.c.bf16 %v3633_v22, %v3631_v39 }
 0x466   : > { %v3454_v29 = vpop.f32.mrb[220].mxu1  ;;  %v3716_v30 = vpack.c.bf16 %v3634_v27, %v3632_v26 }
 0x467   : > { %v3455_v31 = vadd.f32 %v3454_v29, %v12437_v3  ;;  %v3456_v32 = vpop.f32.mrb[221].mxu1 }
 0x468   : > { %v3457_v10 = vadd.f32 %v3456_v32, %v12441_v53  ;;  %v3458_v34 = vpop.f32.mrb[222].mxu1  ;;  %4193 = vmatprep.mubr.bf16.mxu0 %v3716_v30 }
 0x469   : > { %v3459_v36 = vadd.f32 %v3458_v34, %v12437_v3  ;;  %v3460_v37 = vpop.f32.mrb[223].mxu1  ;;  %4194 = vmatmul.mubr.bf16.gmra.mrb[88].mxu0 %v3715_v28  ;;  %v3635_v41 = vmax.f32 %v3455_v31, 0.0  ;;  %v11691_v31 = vld [vmem:[%s11902_s29 + $0xa8] sm:$0xff]  }
 0x46a   : > { %v3461_v40 = vadd.f32 %v3460_v37, %v12441_v53  ;;  %v3636_v46 = vmax.f32 %v3457_v10, 0.0 }
 0x46b   : > { %v3637_v42 = vmax.f32 %v3459_v36, 0.0  ;;  %10526 = vmatmul.mubr.msk.bf16.gmra.mrb[72].mxu1 %vm830_vm2, %v11688_v43 }
 0x46c   : > { %v3638_v47 = vmax.f32 %v3461_v40, 0.0  ;;  %4794 = vmatprep.mubr.bf16.mxu1 %v11748_v1  ;;  %v10459_v40 = vld [vmem:[%s15529_s4 + $0x8] sm:$0x3] }
 0x46d   : > { %v3717_v48 = vpack.c.bf16 %v3637_v42, %v3635_v41 }
 0x46e   : > { %v3464_v49 = vpop.f32.mrb[224].mxu1  ;;  %v3718_v0 = vpack.c.bf16 %v3638_v47, %v3636_v46  ;;  %v12641_v47 = vrot.slane %v10459_v40, %v11993_v33 }
 0x46f   : > { %v3465_v50 = vadd.f32 %v3464_v49, %v12437_v3  ;;  %v3466_v51 = vpop.f32.mrb[225].mxu1  ;;  %v12645_v49 = vrot.slane %v10459_v40, %v11998_v35 }
 0x470   : > { %v3467_v52 = vadd.f32 %v3466_v51, %v12441_v53  ;;  %v3468_v54 = vpop.f32.mrb[226].mxu1  ;;  %4203 = vmatprep.mubr.bf16.mxu0 %v3718_v0  ;;  %v11692_v51 = vld [vmem:[%s11902_s29 + $0xb0] sm:$0xff]  }
 0x471   : > { %v3469_v55 = vadd.f32 %v3468_v54, %v12437_v3  ;;  %v3470_v56 = vpop.f32.mrb[227].mxu1  ;;  %4204 = vmatmul.mubr.bf16.gmra.mrb[92].mxu0 %v3717_v48  ;;  %v3639_v58 = vmax.f32 %v3465_v50, 0.0  ;;  %v11485_v54 = vld [vmem:[#allocation3 + $0x654] ss:$8 sps:$4 sm:$0xff]  }
 0x472   : > { %v3471_v57 = vadd.f32 %v3470_v56, %v12441_v53  ;;  %v3640_v61 = vmax.f32 %v3467_v52, 0.0  ;;  %v11483_v52 = vld [vmem:[#allocation3 + $0x650] ss:$8 sps:$4 sm:$0xff]   ;;  %5987 = vmatprep.subr.bf16.mxu0 %v11485_v54 }
 0x473   : > { %v3641_v59 = vmax.f32 %v3469_v55, 0.0  ;;  %10527 = vmatmul.mubr.msk.bf16.gmra.mrb[76].mxu1 %vm830_vm2, %v11689_v60  ;;  %5988 = vmatpush1.bf16.msra.mxu0 %v11483_v52 }
 0x474   : > { %v3642_v62 = vmax.f32 %v3471_v57, 0.0  ;;  %4804 = vmatprep.mubr.bf16.mxu1 %v11748_v1 }
 0x475   : > { %v3719_v23 = vpack.c.bf16 %v3641_v59, %v3639_v58 }
 0x476   : > { %v3474_v63 = vpop.f32.mrb[228].mxu1  ;;  %v3720_v2 = vpack.c.bf16 %v3642_v62, %v3640_v61 }
 0x477   : > { %v3475_v4 = vadd.f32 %v3474_v63, %v12437_v3  ;;  %v3476_v25 = vpop.f32.mrb[229].mxu1 }
 0x478   : > { %v3477_v6 = vadd.f32 %v3476_v25, %v12441_v53  ;;  %v3478_v7 = vpop.f32.mrb[230].mxu1  ;;  %4213 = vmatprep.mubr.bf16.mxu0 %v3720_v2 }
 0x479   : > { %v3479_v8 = vadd.f32 %v3478_v7, %v12437_v3  ;;  %v3480_v9 = vpop.f32.mrb[231].mxu1  ;;  %4214 = vmatmul.mubr.bf16.gmra.mrb[96].mxu0 %v3719_v23  ;;  %v3643_v12 = vmax.f32 %v3475_v4, 0.0 }
 0x47a   : > { %v3481_v11 = vadd.f32 %v3480_v9, %v12441_v53  ;;  %v3644_v17 = vmax.f32 %v3477_v6, 0.0 }
 0x47b   : > { %v3645_v13 = vmax.f32 %v3479_v8, 0.0  ;;  %10528 = vmatmul.mubr.msk.bf16.gmra.mrb[80].mxu1 %vm830_vm2, %v11690_v14 }
 0x47c   : > { %v3646_v18 = vmax.f32 %v3481_v11, 0.0  ;;  %4814 = vmatprep.mubr.bf16.mxu1 %v11748_v1 }
 0x47d   : > { %v3721_v19 = vpack.c.bf16 %v3645_v13, %v3643_v12 }
 0x47e   : > { %v3484_v38 = vpop.f32.mrb[232].mxu1  ;;  %v3722_v20 = vpack.c.bf16 %v3646_v18, %v3644_v17 }
 0x47f   : > { %v3485_v21 = vadd.f32 %v3484_v38, %v12437_v3  ;;  %v3486_v39 = vpop.f32.mrb[233].mxu1 }
 0x480   : > { %v3487_v22 = vadd.f32 %v3486_v39, %v12441_v53  ;;  %v3488_v24 = vpop.f32.mrb[234].mxu1  ;;  %4223 = vmatprep.mubr.bf16.mxu0 %v3722_v20  ;;  %v11693_v20 = vld [vmem:[%s11902_s29 + $0xb8] sm:$0xff]  }
 0x481   : > { %v3489_v26 = vadd.f32 %v3488_v24, %v12437_v3  ;;  %v3490_v27 = vpop.f32.mrb[235].mxu1  ;;  %4224 = vmatmul.mubr.bf16.gmra.mrb[100].mxu0 %v3721_v19  ;;  %v3647_v29 = vmax.f32 %v3485_v21, 0.0 }
 0x482   : > { %v3491_v28 = vadd.f32 %v3490_v27, %v12441_v53  ;;  %v3648_v32 = vmax.f32 %v3487_v22, 0.0 }
 0x483   : > { %v3649_v30 = vmax.f32 %v3489_v26, 0.0  ;;  %10529 = vmatmul.mubr.msk.bf16.gmra.mrb[84].mxu1 %vm830_vm2, %v11691_v31 }
 0x484   : > { %v3650_v10 = vmax.f32 %v3491_v28, 0.0  ;;  %4824 = vmatprep.mubr.bf16.mxu1 %v11748_v1 }
 0x485   : > { %v3723_v34 = vpack.c.bf16 %v3649_v30, %v3647_v29 }
 0x486   : > { %v3494_v36 = vpop.f32.mrb[236].mxu1  ;;  %v3724_v37 = vpack.c.bf16 %v3650_v10, %v3648_v32 }
 0x487   : > { %v3495_v41 = vadd.f32 %v3494_v36, %v12437_v3  ;;  %v3496_v42 = vpop.f32.mrb[237].mxu1 }
 0x488   : > { %v3497_v43 = vadd.f32 %v3496_v42, %v12441_v53  ;;  %v3498_v44 = vpop.f32.mrb[238].mxu1  ;;  %4233 = vmatprep.mubr.bf16.mxu0 %v3724_v37 }
 0x489   : > { %v3499_v45 = vadd.f32 %v3498_v44, %v12437_v3  ;;  %v3500_v46 = vpop.f32.mrb[239].mxu1  ;;  %4234 = vmatmul.mubr.bf16.gmra.mrb[104].mxu0 %v3723_v34  ;;  %v3651_v0 = vmax.f32 %v3495_v41, 0.0 }
 0x48a   : > { %v3501_v48 = vadd.f32 %v3500_v46, %v12441_v53  ;;  %v3652_v55 = vmax.f32 %v3497_v43, 0.0 }
 0x48b   : > { %v3653_v50 = vmax.f32 %v3499_v45, 0.0  ;;  %10530 = vmatmul.mubr.msk.bf16.gmra.mrb[88].mxu1 %vm830_vm2, %v11692_v51 }
 0x48c   : > { %v3654_v56 = vmax.f32 %v3501_v48, 0.0  ;;  %v3975_v57 = vpop.f32.mrb[0].mxu0  ;;  %4834 = vmatprep.mubr.bf16.mxu1 %v11748_v1 }
 0x48d   : > { %v3725_v58 = vpack.c.bf16 %v3653_v50, %v3651_v0  ;;  %v3976_v59 = vadd.f32 %v3975_v57, %v12641_v47  ;;  %v3977_v60 = vpop.f32.mrb[1].mxu0  ;;  %v11488_v57 = vld [vmem:[#allocation3 + $0x664] ss:$8 sps:$4 sm:$0xff]  }
 0x48e   : > { %v3978_v61 = vadd.f32 %v3977_v60, %v12645_v49  ;;  %v3504_v62 = vpop.f32.mrb[240].mxu1  ;;  %v3979_v23 = vpop.f32.mrb[2].mxu0  ;;  %v3726_v63 = vpack.c.bf16 %v3654_v56, %v3652_v55  ;;  %v11694_v55 = vld [vmem:[%s11902_s29 + $0xc0] sm:$0xff]   ;;  %5989 = vmatprep.subr.bf16.mxu0 %v11488_v57 }
 0x48f   : > { %v3505_v2 = vadd.f32 %v3504_v62, %v12437_v3  ;;  %v3980_v4 = vadd.f32 %v3979_v23, %v12641_v47  ;;  %v3506_v25 = vpop.f32.mrb[241].mxu1  ;;  %v3981_v6 = vpop.f32.mrb[3].mxu0  ;;  %v4294_v11 = vmax.f32 %v3976_v59, 0.0  ;;  %v11486_v56 = vld [vmem:[#allocation3 + $0x660] ss:$8 sps:$4 sm:$0xff]  }
 0x490   : > { %v3507_v7 = vadd.f32 %v3506_v25, %v12441_v53  ;;  %v3982_v8 = vadd.f32 %v3981_v6, %v12645_v49  ;;  %v3508_v9 = vpop.f32.mrb[242].mxu1  ;;  %4243 = vmatprep.mubr.bf16.mxu0 %v3726_v63  ;;  %v4295_v15 = vmax.f32 %v3978_v61, 0.0  ;;  %5990 = vmatpush1.bf16.msra.mxu0 %v11486_v56 }
 0x491   : > { %v4296_v12 = vmax.f32 %v3980_v4, 0.0  ;;  %v3509_v13 = vadd.f32 %v3508_v9, %v12437_v3  ;;  %v3510_v14 = vpop.f32.mrb[243].mxu1  ;;  %4244 = vmatmul.mubr.bf16.gmra.mrb[108].mxu0 %v3725_v58  ;;  %v3655_v18 = vmax.f32 %v3505_v2, 0.0 }
 0x492   : > { %v4297_v16 = vmax.f32 %v3982_v8, 0.0  ;;  %v3511_v17 = vadd.f32 %v3510_v14, %v12441_v53  ;;  %v3656_v21 = vmax.f32 %v3507_v7, 0.0 }
 0x493   : > { %v12658_v19 = vpack.c.bf16 %v4296_v12, %v4294_v11  ;;  %v3657_v38 = vmax.f32 %v3509_v13, 0.0  ;;  %10531 = vmatmul.mubr.msk.bf16.gmra.mrb[92].mxu1 %vm830_vm2, %v11693_v20 }
 0x494   : > { %v3658_v39 = vmax.f32 %v3511_v17, 0.0  ;;  %v3985_v22 = vpop.f32.mrb[4].mxu0  ;;  %4844 = vmatprep.mubr.bf16.mxu1 %v11748_v1  ;;  %v12663_v24 = vpack.c.bf16 %v4297_v16, %v4295_v15 }
 0x495   : > { %v3727_v26 = vpack.c.bf16 %v3657_v38, %v3655_v18  ;;  %v3986_v27 = vadd.f32 %v3985_v22, %v12641_v47  ;;  %v3987_v28 = vpop.f32.mrb[5].mxu0 }
 0x496   : > { %v3988_v29 = vadd.f32 %v3987_v28, %v12645_v49  ;;  %v3514_v30 = vpop.f32.mrb[244].mxu1  ;;  %v3989_v31 = vpop.f32.mrb[6].mxu0  ;;  %v3728_v32 = vpack.c.bf16 %v3658_v39, %v3656_v21 }
 0x497   : > { %v3515_v10 = vadd.f32 %v3514_v30, %v12437_v3  ;;  %v3990_v34 = vadd.f32 %v3989_v31, %v12641_v47  ;;  %v3516_v36 = vpop.f32.mrb[245].mxu1  ;;  %v3991_v37 = vpop.f32.mrb[7].mxu0  ;;  %v4298_v43 = vmax.f32 %v3986_v27, 0.0  ;;  %v11695_v27 = vld [vmem:[%s11902_s29 + $0xc8] sm:$0xff]  }
 0x498   : > { %v3517_v40 = vadd.f32 %v3516_v36, %v12441_v53  ;;  %v3992_v41 = vadd.f32 %v3991_v37, %v12645_v49  ;;  %v3518_v42 = vpop.f32.mrb[246].mxu1  ;;  %4253 = vmatprep.mubr.bf16.mxu0 %v3728_v32  ;;  %v4299_v48 = vmax.f32 %v3988_v29, 0.0 }
 0x499   : > { %v4300_v44 = vmax.f32 %v3990_v34, 0.0  ;;  %v3519_v45 = vadd.f32 %v3518_v42, %v12437_v3  ;;  %v3520_v46 = vpop.f32.mrb[247].mxu1  ;;  %4254 = vmatmul.mubr.bf16.gmra.mrb[112].mxu0 %v3727_v26  ;;  %v3659_v51 = vmax.f32 %v3515_v10, 0.0 }
 0x49a   : > { %v4301_v0 = vmax.f32 %v3992_v41, 0.0  ;;  %v3521_v50 = vadd.f32 %v3520_v46, %v12441_v53  ;;  %v3660_v58 = vmax.f32 %v3517_v40, 0.0 }
 0x49b   : > { %v12673_v52 = vpack.c.bf16 %v4300_v44, %v4298_v43  ;;  %v3661_v54 = vmax.f32 %v3519_v45, 0.0  ;;  %10532 = vmatmul.mubr.msk.bf16.gmra.mrb[96].mxu1 %vm830_vm2, %v11694_v55 }
 0x49c   : > { %v3662_v59 = vmax.f32 %v3521_v50, 0.0  ;;  %v3995_v60 = vpop.f32.mrb[8].mxu0  ;;  %4854 = vmatprep.mubr.bf16.mxu1 %v11748_v1  ;;  %v12678_v61 = vpack.c.bf16 %v4301_v0, %v4299_v48 }
 0x49d   : > { %v3729_v62 = vpack.c.bf16 %v3661_v54, %v3659_v51  ;;  %v3996_v23 = vadd.f32 %v3995_v60, %v12641_v47  ;;  %v3997_v63 = vpop.f32.mrb[9].mxu0 }
 0x49e   : > { %v3998_v2 = vadd.f32 %v3997_v63, %v12645_v49  ;;  %v3524_v4 = vpop.f32.mrb[248].mxu1  ;;  %v3999_v25 = vpop.f32.mrb[10].mxu0  ;;  %v3730_v6 = vpack.c.bf16 %v3662_v59, %v3660_v58  ;;  %v11489_v63 = vld [vmem:[#allocation3 + $0x670] ss:$8 sps:$4 sm:$0xff]  }
 0x49f   : > { %v3525_v7 = vadd.f32 %v3524_v4, %v12437_v3  ;;  %v4000_v8 = vadd.f32 %v3999_v25, %v12641_v47  ;;  %v3526_v9 = vpop.f32.mrb[249].mxu1  ;;  %v4001_v11 = vpop.f32.mrb[11].mxu0  ;;  %v4302_v15 = vmax.f32 %v3996_v23, 0.0  ;;  %v11696_v23 = vld [vmem:[%s11902_s29 + $0xd0] sm:$0xff]  }
 0x4a0   : > { %v3527_v12 = vadd.f32 %v3526_v9, %v12441_v53  ;;  %v4002_v13 = vadd.f32 %v4001_v11, %v12645_v49  ;;  %v3528_v14 = vpop.f32.mrb[250].mxu1  ;;  %4263 = vmatprep.mubr.bf16.mxu0 %v3730_v6  ;;  %v4303_v38 = vmax.f32 %v3998_v2, 0.0  ;;  %v11491_v2 = vld [vmem:[#allocation3 + $0x674] ss:$8 sps:$4 sm:$0xff]  }
 0x4a1   : > { %v4304_v16 = vmax.f32 %v4000_v8, 0.0  ;;  %v3529_v17 = vadd.f32 %v3528_v14, %v12437_v3  ;;  %v3530_v18 = vpop.f32.mrb[251].mxu1  ;;  %4264 = vmatmul.mubr.bf16.gmra.mrb[116].mxu0 %v3729_v62  ;;  %v3663_v39 = vmax.f32 %v3525_v7, 0.0  ;;  %5991 = vmatprep.subr.bf16.mxu0 %v11491_v2  ;;  %v11699_v2 = vld [vmem:[%s11902_s29 + $0xe8] sm:$0xff]  }
 0x4a2   : > { %v4305_v20 = vmax.f32 %v4002_v13, 0.0  ;;  %v3531_v21 = vadd.f32 %v3530_v18, %v12441_v53  ;;  %v3664_v28 = vmax.f32 %v3527_v12, 0.0  ;;  %5992 = vmatpush1.bf16.msra.mxu0 %v11489_v63 }
 0x4a3   : > { %v12688_v22 = vpack.c.bf16 %v4304_v16, %v4302_v15  ;;  %v3665_v26 = vmax.f32 %v3529_v17, 0.0  ;;  %10533 = vmatmul.mubr.msk.bf16.gmra.mrb[100].mxu1 %vm830_vm2, %v11695_v27 }
 0x4a4   : > { %v3666_v29 = vmax.f32 %v3531_v21, 0.0  ;;  %v4005_v30 = vpop.f32.mrb[12].mxu0  ;;  %4864 = vmatprep.mubr.bf16.mxu1 %v11748_v1  ;;  %v12693_v31 = vpack.c.bf16 %v4305_v20, %v4303_v38  ;;  %v11697_v21 = vld [vmem:[%s11902_s29 + $0xd8] sm:$0xff]  }
 0x4a5   : > { %v3731_v32 = vpack.c.bf16 %v3665_v26, %v3663_v39  ;;  %v4006_v10 = vadd.f32 %v4005_v30, %v12641_v47  ;;  %v4007_v34 = vpop.f32.mrb[13].mxu0 }
 0x4a6   : > { %v4008_v36 = vadd.f32 %v4007_v34, %v12645_v49  ;;  %v3534_v37 = vpop.f32.mrb[252].mxu1  ;;  %v4009_v40 = vpop.f32.mrb[14].mxu0  ;;  %v3732_v41 = vpack.c.bf16 %v3666_v29, %v3664_v28 }
 0x4a7   : > { %v3535_v42 = vadd.f32 %v3534_v37, %v12437_v3  ;;  %v4010_v43 = vadd.f32 %v4009_v40, %v12641_v47  ;;  %v3536_v44 = vpop.f32.mrb[253].mxu1  ;;  %v4011_v45 = vpop.f32.mrb[15].mxu0  ;;  %v4306_v50 = vmax.f32 %v4006_v10, 0.0 }
 0x4a8   : > { %v3537_v46 = vadd.f32 %v3536_v44, %v12441_v53  ;;  %v4012_v48 = vadd.f32 %v4011_v45, %v12645_v49  ;;  %v3538_v0 = vpop.f32.mrb[254].mxu1  ;;  %4273 = vmatprep.mubr.bf16.mxu0 %v3732_v41  ;;  %v4307_v56 = vmax.f32 %v4008_v36, 0.0  ;;  %v11492_v44 = vld [vmem:[#allocation3 + $0x680] ss:$8 sps:$4 sm:$0xff]   ;;  %v11494_v45 = vld [vmem:[#allocation3 + $0x684] ss:$8 sps:$4 sm:$0xff]  }
 0x4a9   : > { %v4308_v51 = vmax.f32 %v4010_v43, 0.0  ;;  %v3539_v54 = vadd.f32 %v3538_v0, %v12437_v3  ;;  %v3540_v55 = vpop.f32.mrb[255].mxu1  ;;  %4274 = vmatmul.mubr.bf16.gmra.mrb[120].mxu0 %v3731_v32  ;;  %v3667_v59 = vmax.f32 %v3535_v42, 0.0  ;;  %v11698_v43 = vld [vmem:[%s11902_s29 + $0xe0] sm:$0xff]   ;;  %5993 = vmatprep.subr.bf16.mxu0 %v11494_v45  ;;  %v11701_v45 = vld [vmem:[%s11902_s29 + $0xf8] sm:$0xff]  }
 0x4aa   : > { %v4309_v57 = vmax.f32 %v4012_v48, 0.0  ;;  %v3541_v58 = vadd.f32 %v3540_v55, %v12441_v53  ;;  %v3668_v4 = vmax.f32 %v3537_v46, 0.0  ;;  %5994 = vmatpush1.bf16.msra.mxu0 %v11492_v44 }
 0x4ab   : > { %v12703_v60 = vpack.c.bf16 %v4308_v51, %v4306_v50  ;;  %v3669_v62 = vmax.f32 %v3539_v54, 0.0  ;;  %10534 = vmatmul.mubr.msk.bf16.gmra.mrb[104].mxu1 %vm830_vm2, %v11696_v23 }
 0x4ac   : > { %v3670_v25 = vmax.f32 %v3541_v58, 0.0  ;;  %v4015_v6 = vpop.f32.mrb[16].mxu0  ;;  %4874 = vmatprep.mubr.bf16.mxu1 %v11748_v1  ;;  %v12708_v3 = vpack.c.bf16 %v4309_v57, %v4307_v56 }
 0x4ad   : > { %v3733_v7 = vpack.c.bf16 %v3669_v62, %v3667_v59  ;;  %v4016_v8 = vadd.f32 %v4015_v6, %v12641_v47  ;;  %v4017_v53 = vpop.f32.mrb[17].mxu0 }
 0x4ae   : > { %v4018_v9 = vadd.f32 %v4017_v53, %v12645_v49  ;;  %v4019_v11 = vpop.f32.mrb[18].mxu0  ;;  %v3734_v12 = vpack.c.bf16 %v3670_v25, %v3668_v4 }
 0x4af   : > { %v4020_v13 = vadd.f32 %v4019_v11, %v12641_v47  ;;  %v4021_v14 = vpop.f32.mrb[19].mxu0  ;;  %v4310_v16 = vmax.f32 %v4016_v8, 0.0 }
 0x4b0   : > { %v4022_v15 = vadd.f32 %v4021_v14, %v12645_v49  ;;  %4283 = vmatprep.mubr.bf16.mxu0 %v3734_v12  ;;  %v4311_v18 = vmax.f32 %v4018_v9, 0.0 }
 0x4b1   : > { %v4312_v17 = vmax.f32 %v4020_v13, 0.0  ;;  %4284 = vmatmul.mubr.bf16.gmra.mrb[124].mxu0 %v3733_v7 }
 0x4b2   : > { %v4313_v38 = vmax.f32 %v4022_v15, 0.0 }
 0x4b3   : > { %v12714_v20 = vpack.c.bf16 %v4312_v17, %v4310_v16  ;;  %10535 = vmatmul.mubr.msk.bf16.gmra.mrb[108].mxu1 %vm830_vm2, %v11697_v21  ;;  %v11497_v21 = vld [vmem:[#allocation3 + $0x694] ss:$8 sps:$4 sm:$0xff]  }
 0x4b4   : > { %v4025_v39 = vpop.f32.mrb[20].mxu0  ;;  %4884 = vmatprep.mubr.bf16.mxu1 %v11748_v1  ;;  %v12719_v26 = vpack.c.bf16 %v4313_v38, %v4311_v18  ;;  %v11700_v18 = vld [vmem:[%s11902_s29 + $0xf0] sm:$0xff]   ;;  %5995 = vmatprep.subr.bf16.mxu0 %v11497_v21 }
 0x4b5   : > { %v4026_v27 = vadd.f32 %v4025_v39, %v12641_v47  ;;  %v4027_v28 = vpop.f32.mrb[21].mxu0  ;;  %v11495_v38 = vld [vmem:[#allocation3 + $0x690] ss:$8 sps:$4 sm:$0xff]  }
 0x4b6   : > { %v4028_v29 = vadd.f32 %v4027_v28, %v12645_v49  ;;  %v4029_v30 = vpop.f32.mrb[22].mxu0  ;;  %5996 = vmatpush1.bf16.msra.mxu0 %v11495_v38 }
 0x4b7   : > { %v4030_v32 = vadd.f32 %v4029_v30, %v12641_v47  ;;  %v4031_v10 = vpop.f32.mrb[23].mxu0  ;;  %v4314_v36 = vmax.f32 %v4026_v27, 0.0 }
 0x4b8   : > { %v4032_v34 = vadd.f32 %v4031_v10, %v12645_v49  ;;  %v4315_v40 = vmax.f32 %v4028_v29, 0.0 }
 0x4b9   : > { %v4316_v37 = vmax.f32 %v4030_v32, 0.0 }
 0x4ba   : > { %v4317_v41 = vmax.f32 %v4032_v34, 0.0 }
 0x4bb   : > { %v12725_v42 = vpack.c.bf16 %v4316_v37, %v4314_v36  ;;  %10536 = vmatmul.mubr.msk.bf16.gmra.mrb[112].mxu1 %vm830_vm2, %v11698_v43 }
 0x4bc   : > { %v4035_v46 = vpop.f32.mrb[24].mxu0  ;;  %4894 = vmatprep.mubr.bf16.mxu1 %v11748_v1  ;;  %v12730_v48 = vpack.c.bf16 %v4317_v41, %v4315_v40 }
 0x4bd   : > { %v4036_v0 = vadd.f32 %v4035_v46, %v12641_v47  ;;  %v4037_v50 = vpop.f32.mrb[25].mxu0 }
 0x4be   : > { %v4038_v51 = vadd.f32 %v4037_v50, %v12645_v49  ;;  %v4039_v54 = vpop.f32.mrb[26].mxu0 }
 0x4bf   : > { %v4040_v55 = vadd.f32 %v4039_v54, %v12641_v47  ;;  %v4041_v56 = vpop.f32.mrb[27].mxu0  ;;  %v4318_v58 = vmax.f32 %v4036_v0, 0.0 }
 0x4c0   : > { %v4042_v57 = vadd.f32 %v4041_v56, %v12645_v49  ;;  %v4319_v62 = vmax.f32 %v4038_v51, 0.0 }
 0x4c1   : > { %v4320_v59 = vmax.f32 %v4040_v55, 0.0 }
 0x4c2   : > { %v4321_v23 = vmax.f32 %v4042_v57, 0.0 }
 0x4c3   : > { %v12736_v63 = vpack.c.bf16 %v4320_v59, %v4318_v58  ;;  %10537 = vmatmul.mubr.msk.bf16.gmra.mrb[116].mxu1 %vm830_vm2, %v11699_v2 }
 0x4c4   : > { %v4045_v4 = vpop.f32.mrb[28].mxu0  ;;  %4904 = vmatprep.mubr.bf16.mxu1 %v11748_v1  ;;  %v12741_v25 = vpack.c.bf16 %v4321_v23, %v4319_v62 }
 0x4c5   : > { %v4046_v6 = vadd.f32 %v4045_v4, %v12641_v47  ;;  %v4047_v7 = vpop.f32.mrb[29].mxu0 }
 0x4c6   : > { %v4048_v8 = vadd.f32 %v4047_v7, %v12645_v49  ;;  %v4049_v53 = vpop.f32.mrb[30].mxu0 }
 0x4c7   : > { %v4050_v9 = vadd.f32 %v4049_v53, %v12641_v47  ;;  %v4051_v11 = vpop.f32.mrb[31].mxu0  ;;  %v4322_v13 = vmax.f32 %v4046_v6, 0.0  ;;  %v11500_v6 = vld [vmem:[#allocation3 + $0x6a4] ss:$8 sps:$4 sm:$0xff]  }
 0x4c8   : > { %v4052_v12 = vadd.f32 %v4051_v11, %v12645_v49  ;;  %v4323_v15 = vmax.f32 %v4048_v8, 0.0  ;;  %5997 = vmatprep.subr.bf16.mxu0 %v11500_v6 }
 0x4c9   : > { %v4324_v14 = vmax.f32 %v4050_v9, 0.0 }
 0x4ca   : > { %v4325_v16 = vmax.f32 %v4052_v12, 0.0 }
 0x4cb   : > { %v12747_v17 = vpack.c.bf16 %v4324_v14, %v4322_v13  ;;  %10538 = vmatmul.mubr.msk.bf16.gmra.mrb[120].mxu1 %vm830_vm2, %v11700_v18 }
 0x4cc   : > { %v4055_v39 = vpop.f32.mrb[32].mxu0  ;;  %4914 = vmatprep.mubr.bf16.mxu1 %v11748_v1  ;;  %v12752_v27 = vpack.c.bf16 %v4325_v16, %v4323_v15 }
 0x4cd   : > { %v4056_v28 = vadd.f32 %v4055_v39, %v12641_v47  ;;  %v4057_v29 = vpop.f32.mrb[33].mxu0 }
 0x4ce   : > { %v4058_v30 = vadd.f32 %v4057_v29, %v12645_v49  ;;  %v4059_v32 = vpop.f32.mrb[34].mxu0 }
 0x4cf   : > { %v4060_v10 = vadd.f32 %v4059_v32, %v12641_v47  ;;  %v4061_v34 = vpop.f32.mrb[35].mxu0  ;;  %v4326_v37 = vmax.f32 %v4056_v28, 0.0 }
 0x4d0   : > { %v4062_v36 = vadd.f32 %v4061_v34, %v12645_v49  ;;  %v4327_v41 = vmax.f32 %v4058_v30, 0.0 }
 0x4d1   : > { %v4328_v40 = vmax.f32 %v4060_v10, 0.0 }
 0x4d2   : > { %v4329_v43 = vmax.f32 %v4062_v36, 0.0 }
 0x4d3   : > { %v12758_v44 = vpack.c.bf16 %v4328_v40, %v4326_v37  ;;  %10539 = vmatmul.mubr.msk.bf16.gmra.mrb[124].mxu1 %vm830_vm2, %v11701_v45  ;;  %v11503_v45 = vld [vmem:[#allocation3 + $0x6b4] ss:$8 sps:$4 sm:$0xff]  }
 0x4d4   : > { %v4065_v46 = vpop.f32.mrb[36].mxu0  ;;  %5117 = vmatprep.mubr.bf16.mxu1 %v12663_v24  ;;  %v12763_v0 = vpack.c.bf16 %v4329_v43, %v4327_v41  ;;  %v11498_v24 = vld [vmem:[#allocation3 + $0x6a0] ss:$8 sps:$4 sm:$0xff]  }
 0x4d5   : > { %v4066_v50 = vadd.f32 %v4065_v46, %v12641_v47  ;;  %v4067_v51 = vpop.f32.mrb[37].mxu0  ;;  %5998 = vmatpush1.bf16.msra.mxu0 %v11498_v24 }
 0x4d6   : > { %v4068_v54 = vadd.f32 %v4067_v51, %v12645_v49  ;;  %v4069_v55 = vpop.f32.mrb[38].mxu0  ;;  %5999 = vmatprep.subr.bf16.mxu0 %v11503_v45 }
 0x4d7   : > { %v4070_v56 = vadd.f32 %v4069_v55, %v12641_v47  ;;  %v4071_v57 = vpop.f32.mrb[39].mxu0  ;;  %v4330_v59 = vmax.f32 %v4066_v50, 0.0 }
 0x4d8   : > { %v4072_v58 = vadd.f32 %v4071_v57, %v12645_v49  ;;  %v4331_v23 = vmax.f32 %v4068_v54, 0.0 }
 0x4d9   : > { %v4332_v62 = vmax.f32 %v4070_v56, 0.0 }
 0x4da   : > { %v4333_v2 = vmax.f32 %v4072_v58, 0.0 }
 0x4db   : > { %v12769_v4 = vpack.c.bf16 %v4332_v62, %v4330_v59  ;;  %5118 = vmatmul.mubr.bf16.vlgmr.msra.gmra.mrb[0].mxu1 %v12658_v19 }
 0x4dc   : > { %v4075_v7 = vpop.f32.mrb[40].mxu0  ;;  %5127 = vmatprep.mubr.bf16.mxu1 %v12678_v61  ;;  %v12773_v8 = vpack.c.bf16 %v4333_v2, %v4331_v23 }
 0x4dd   : > { %v4076_v53 = vadd.f32 %v4075_v7, %v12641_v47  ;;  %v4077_v9 = vpop.f32.mrb[41].mxu0 }
 0x4de   : > { %v4078_v11 = vadd.f32 %v4077_v9, %v12645_v49  ;;  %v4079_v12 = vpop.f32.mrb[42].mxu0 }
 0x4df   : > { %v4080_v13 = vadd.f32 %v4079_v12, %v12641_v47  ;;  %v4081_v14 = vpop.f32.mrb[43].mxu0  ;;  %v4334_v15 = vmax.f32 %v4076_v53, 0.0 }
 0x4e0   : > { %v4082_v19 = vadd.f32 %v4081_v14, %v12645_v49  ;;  %v4335_v18 = vmax.f32 %v4078_v11, 0.0 }
 0x4e1   : > { %v4336_v16 = vmax.f32 %v4080_v13, 0.0 }
 0x4e2   : > { %v4337_v38 = vmax.f32 %v4082_v19, 0.0 }
 0x4e3   : > { %v12779_v61 = vpack.c.bf16 %v4336_v16, %v4334_v15  ;;  %5128 = vmatmul.mubr.bf16.gmra.mrb[4].mxu1 %v12673_v52 }
 0x4e4   : > { %v4085_v21 = vpop.f32.mrb[44].mxu0  ;;  %5137 = vmatprep.mubr.bf16.mxu1 %v12693_v31  ;;  %v12783_v39 = vpack.c.bf16 %v4337_v38, %v4335_v18  ;;  %v11501_v31 = vld [vmem:[#allocation3 + $0x6b0] ss:$8 sps:$4 sm:$0xff]   ;;  %v11506_v38 = vld [vmem:[#allocation3 + $0x6c4] ss:$8 sps:$4 sm:$0xff]  }
 0x4e5   : > { %v4086_v28 = vadd.f32 %v4085_v21, %v12641_v47  ;;  %v4087_v29 = vpop.f32.mrb[45].mxu0  ;;  %6000 = vmatpush1.bf16.msra.mxu0 %v11501_v31 }
 0x4e6   : > { %v4088_v30 = vadd.f32 %v4087_v29, %v12645_v49  ;;  %v4089_v32 = vpop.f32.mrb[46].mxu0  ;;  %6001 = vmatprep.subr.bf16.mxu0 %v11506_v38 }
 0x4e7   : > { %v4090_v10 = vadd.f32 %v4089_v32, %v12641_v47  ;;  %v4091_v34 = vpop.f32.mrb[47].mxu0  ;;  %v4338_v37 = vmax.f32 %v4086_v28, 0.0 }
 0x4e8   : > { %v4092_v36 = vadd.f32 %v4091_v34, %v12645_v49  ;;  %v4339_v41 = vmax.f32 %v4088_v30, 0.0 }
 0x4e9   : > { %v4340_v40 = vmax.f32 %v4090_v10, 0.0 }
 0x4ea   : > { %v4341_v52 = vmax.f32 %v4092_v36, 0.0 }
 0x4eb   : > { %v12789_v43 = vpack.c.bf16 %v4340_v40, %v4338_v37  ;;  %5138 = vmatmul.mubr.bf16.gmra.mrb[8].mxu1 %v12688_v22 }
 0x4ec   : > { %v4095_v46 = vpop.f32.mrb[48].mxu0  ;;  %5147 = vmatprep.mubr.bf16.mxu1 %v12708_v3  ;;  %v12793_v50 = vpack.c.bf16 %v4341_v52, %v4339_v41 }
 0x4ed   : > { %v4096_v51 = vadd.f32 %v4095_v46, %v12641_v47  ;;  %v4097_v54 = vpop.f32.mrb[49].mxu0 }
 0x4ee   : > { %v4098_v55 = vadd.f32 %v4097_v54, %v12645_v49  ;;  %v4099_v56 = vpop.f32.mrb[50].mxu0 }
 0x4ef   : > { %v4100_v57 = vadd.f32 %v4099_v56, %v12641_v47  ;;  %v4101_v58 = vpop.f32.mrb[51].mxu0  ;;  %v4342_v59 = vmax.f32 %v4096_v51, 0.0 }
 0x4f0   : > { %v4102_v22 = vadd.f32 %v4101_v58, %v12645_v49  ;;  %v4343_v23 = vmax.f32 %v4098_v55, 0.0 }
 0x4f1   : > { %v4344_v62 = vmax.f32 %v4100_v57, 0.0 }
 0x4f2   : > { %v4345_v2 = vmax.f32 %v4102_v22, 0.0 }
 0x4f3   : > { %v12799_v3 = vpack.c.bf16 %v4344_v62, %v4342_v59  ;;  %5148 = vmatmul.mubr.bf16.gmra.mrb[12].mxu1 %v12703_v60 }
 0x4f4   : > { %v4105_v24 = vpop.f32.mrb[52].mxu0  ;;  %5157 = vmatprep.mubr.bf16.mxu1 %v12719_v26  ;;  %v12803_v6 = vpack.c.bf16 %v4345_v2, %v4343_v23  ;;  %v11504_v26 = vld [vmem:[#allocation3 + $0x6c0] ss:$8 sps:$4 sm:$0xff]   ;;  %v11509_v2 = vld [vmem:[#allocation3 + $0x6d4] ss:$8 sps:$4 sm:$0xff]  }
 0x4f5   : > { %v4106_v7 = vadd.f32 %v4105_v24, %v12641_v47  ;;  %v4107_v53 = vpop.f32.mrb[53].mxu0  ;;  %6002 = vmatpush1.bf16.msra.mxu0 %v11504_v26 }
 0x4f6   : > { %v4108_v9 = vadd.f32 %v4107_v53, %v12645_v49  ;;  %v4109_v11 = vpop.f32.mrb[54].mxu0  ;;  %6003 = vmatprep.subr.bf16.mxu0 %v11509_v2 }
 0x4f7   : > { %v4110_v12 = vadd.f32 %v4109_v11, %v12641_v47  ;;  %v4111_v13 = vpop.f32.mrb[55].mxu0  ;;  %v4346_v19 = vmax.f32 %v4106_v7, 0.0 }
 0x4f8   : > { %v4112_v14 = vadd.f32 %v4111_v13, %v12645_v49  ;;  %v4347_v16 = vmax.f32 %v4108_v9, 0.0 }
 0x4f9   : > { %v4348_v15 = vmax.f32 %v4110_v12, 0.0 }
 0x4fa   : > { %v4349_v60 = vmax.f32 %v4112_v14, 0.0 }
 0x4fb   : > { %v12809_v18 = vpack.c.bf16 %v4348_v15, %v4346_v19  ;;  %5158 = vmatmul.mubr.bf16.gmra.mrb[16].mxu1 %v12714_v20 }
 0x4fc   : > { %v4115_v21 = vpop.f32.mrb[56].mxu0  ;;  %5167 = vmatprep.mubr.bf16.mxu1 %v12730_v48  ;;  %v12813_v28 = vpack.c.bf16 %v4349_v60, %v4347_v16 }
 0x4fd   : > { %v4116_v29 = vadd.f32 %v4115_v21, %v12641_v47  ;;  %v4117_v30 = vpop.f32.mrb[57].mxu0  ;;  %v11510_v21 = vld [vmem:[#allocation3 + $0x6e0] ss:$8 sps:$4 sm:$0xff]  }
 0x4fe   : > { %v4118_v32 = vadd.f32 %v4117_v30, %v12645_v49  ;;  %v4119_v10 = vpop.f32.mrb[58].mxu0 }
 0x4ff   : > { %v4120_v34 = vadd.f32 %v4119_v10, %v12641_v47  ;;  %v4121_v36 = vpop.f32.mrb[59].mxu0  ;;  %v4350_v37 = vmax.f32 %v4116_v29, 0.0  ;;  %v11512_v29 = vld [vmem:[#allocation3 + $0x6e4] ss:$8 sps:$4 sm:$0xff]  }
 0x500   : > { %v4122_v20 = vadd.f32 %v4121_v36, %v12645_v49  ;;  %v4351_v41 = vmax.f32 %v4118_v32, 0.0 }
 0x501   : > { %v4352_v40 = vmax.f32 %v4120_v34, 0.0 }
 0x502   : > { %v4353_v52 = vmax.f32 %v4122_v20, 0.0 }
 0x503   : > { %v12819_v48 = vpack.c.bf16 %v4352_v40, %v4350_v37  ;;  %5168 = vmatmul.mubr.bf16.gmra.mrb[20].mxu1 %v12725_v42 }
 0x504   : > { %v4125_v31 = vpop.f32.mrb[60].mxu0  ;;  %5177 = vmatprep.mubr.bf16.mxu1 %v12741_v25  ;;  %v12823_v45 = vpack.c.bf16 %v4353_v52, %v4351_v41  ;;  %v11507_v25 = vld [vmem:[#allocation3 + $0x6d0] ss:$8 sps:$4 sm:$0xff]  }
 0x505   : > { %v4126_v46 = vadd.f32 %v4125_v31, %v12641_v47  ;;  %v4127_v51 = vpop.f32.mrb[61].mxu0  ;;  %6004 = vmatpush1.bf16.msra.mxu0 %v11507_v25 }
 0x506   : > { %v4128_v54 = vadd.f32 %v4127_v51, %v12645_v49  ;;  %v4129_v55 = vpop.f32.mrb[62].mxu0  ;;  %6005 = vmatprep.subr.bf16.mxu0 %v11512_v29 }
 0x507   : > { %v4130_v56 = vadd.f32 %v4129_v55, %v12641_v47  ;;  %v4131_v57 = vpop.f32.mrb[63].mxu0  ;;  %v4354_v22 = vmax.f32 %v4126_v46, 0.0 }
 0x508   : > { %v4132_v58 = vadd.f32 %v4131_v57, %v12645_v49  ;;  %v4355_v62 = vmax.f32 %v4128_v54, 0.0 }
 0x509   : > { %v4356_v59 = vmax.f32 %v4130_v56, 0.0  ;;  %6006 = vmatpush1.bf16.msra.mxu0 %v11510_v21 }
 0x50a   : > { %v4357_v42 = vmax.f32 %v4132_v58, 0.0 }
 0x50b   : > { %v12829_v23 = vpack.c.bf16 %v4356_v59, %v4354_v22  ;;  %5178 = vmatmul.mubr.bf16.gmra.mrb[24].mxu1 %v12736_v63 }
 0x50c   : > { %v4135_v24 = vpop.f32.mrb[64].mxu0  ;;  %5187 = vmatprep.mubr.bf16.mxu1 %v12752_v27  ;;  %v12833_v7 = vpack.c.bf16 %v4357_v42, %v4355_v62 }
 0x50d   : > { %v4136_v53 = vadd.f32 %v4135_v24, %v12641_v47  ;;  %v4137_v9 = vpop.f32.mrb[65].mxu0  ;;  %v11513_v24 = vld [vmem:[#allocation3 + $0x6f0] ss:$8 sps:$4 sm:$0xff]  }
 0x50e   : > { %v4138_v11 = vadd.f32 %v4137_v9, %v12645_v49  ;;  %v4139_v12 = vpop.f32.mrb[66].mxu0 }
 0x50f   : > { %v4140_v13 = vadd.f32 %v4139_v12, %v12641_v47  ;;  %v4141_v14 = vpop.f32.mrb[67].mxu0  ;;  %v4358_v19 = vmax.f32 %v4136_v53, 0.0  ;;  %v11515_v53 = vld [vmem:[#allocation3 + $0x6f4] ss:$8 sps:$4 sm:$0xff]  }
 0x510   : > { %v4142_v63 = vadd.f32 %v4141_v14, %v12645_v49  ;;  %v4359_v16 = vmax.f32 %v4138_v11, 0.0  ;;  %6007 = vmatprep.subr.bf16.mxu0 %v11515_v53  ;;  %v11518_v53 = vld [vmem:[#allocation3 + $0x704] ss:$8 sps:$4 sm:$0xff]  }
 0x511   : > { %v4360_v15 = vmax.f32 %v4140_v13, 0.0  ;;  %6008 = vmatpush1.bf16.msra.mxu0 %v11513_v24 }
 0x512   : > { %v4361_v60 = vmax.f32 %v4142_v63, 0.0  ;;  %6728 = vmatprep.subr.bf16.mxu0 %v11518_v53 }
 0x513   : > { %v12839_v27 = vpack.c.bf16 %v4360_v15, %v4358_v19  ;;  %5188 = vmatmul.mubr.bf16.gmra.mrb[28].mxu1 %v12747_v17 }
 0x514   : > { %v4145_v26 = vpop.f32.mrb[68].mxu0  ;;  %5197 = vmatprep.mubr.bf16.mxu1 %v12763_v0  ;;  %v12843_v38 = vpack.c.bf16 %v4361_v60, %v4359_v16 }
 0x515   : > { %v4146_v30 = vadd.f32 %v4145_v26, %v12641_v47  ;;  %v4147_v32 = vpop.f32.mrb[69].mxu0 }
 0x516   : > { %v4148_v10 = vadd.f32 %v4147_v32, %v12645_v49  ;;  %v4149_v34 = vpop.f32.mrb[70].mxu0 }
 0x517   : > { %v4150_v36 = vadd.f32 %v4149_v34, %v12641_v47  ;;  %v4151_v20 = vpop.f32.mrb[71].mxu0  ;;  %v4362_v37 = vmax.f32 %v4146_v30, 0.0 }
 0x518   : > { %v4152_v17 = vadd.f32 %v4151_v20, %v12645_v49  ;;  %v4363_v0 = vmax.f32 %v4148_v10, 0.0 }
 0x519   : > { %v4364_v40 = vmax.f32 %v4150_v36, 0.0 }
 0x51a   : > { %v4365_v41 = vmax.f32 %v4152_v17, 0.0 }
 0x51b   : > { %v12849_v52 = vpack.c.bf16 %v4364_v40, %v4362_v37  ;;  %5198 = vmatmul.mubr.bf16.gmra.mrb[32].mxu1 %v12758_v44 }
 0x51c   : > { %v4155_v31 = vpop.f32.mrb[72].mxu0  ;;  %5207 = vmatprep.mubr.bf16.mxu1 %v12773_v8  ;;  %v12853_v46 = vpack.c.bf16 %v4365_v41, %v4363_v0 }
 0x51d   : > { %v4156_v51 = vadd.f32 %v4155_v31, %v12641_v47  ;;  %v4157_v54 = vpop.f32.mrb[73].mxu0 }
 0x51e   : > { %v4158_v55 = vadd.f32 %v4157_v54, %v12645_v49  ;;  %v4159_v56 = vpop.f32.mrb[74].mxu0 }
 0x51f   : > { %v4160_v57 = vadd.f32 %v4159_v56, %v12641_v47  ;;  %v4161_v58 = vpop.f32.mrb[75].mxu0  ;;  %v4366_v59 = vmax.f32 %v4156_v51, 0.0 }
 0x520   : > { %v4162_v22 = vadd.f32 %v4161_v58, %v12645_v49  ;;  %v4367_v42 = vmax.f32 %v4158_v55, 0.0 }
 0x521   : > { %v4368_v62 = vmax.f32 %v4160_v57, 0.0 }
 0x522   : > { %v4369_v44 = vmax.f32 %v4162_v22, 0.0 }
 0x523   : > { %v12859_v25 = vpack.c.bf16 %v4368_v62, %v4366_v59  ;;  %5208 = vmatmul.mubr.bf16.gmra.mrb[36].mxu1 %v12769_v4 }
 0x524   : > { %v4165_v8 = vpop.f32.mrb[76].mxu0  ;;  %5217 = vmatprep.mubr.bf16.mxu1 %v12783_v39  ;;  %v12863_v2 = vpack.c.bf16 %v4369_v44, %v4367_v42 }
 0x525   : > { %v4166_v9 = vadd.f32 %v4165_v8, %v12641_v47  ;;  %v4167_v11 = vpop.f32.mrb[77].mxu0 }
 0x526   : > { %v4168_v12 = vadd.f32 %v4167_v11, %v12645_v49  ;;  %v4169_v13 = vpop.f32.mrb[78].mxu0 }
 0x527   : > { %v4170_v14 = vadd.f32 %v4169_v13, %v12641_v47  ;;  %v4171_v63 = vpop.f32.mrb[79].mxu0  ;;  %v4370_v19 = vmax.f32 %v4166_v9, 0.0 }
 0x528   : > { %v4172_v4 = vadd.f32 %v4171_v63, %v12645_v49  ;;  %v4371_v39 = vmax.f32 %v4168_v12, 0.0 }
 0x529   : > { %v4372_v15 = vmax.f32 %v4170_v14, 0.0 }
 0x52a   : > { %v4373_v16 = vmax.f32 %v4172_v4, 0.0 }
 0x52b   : > { %v12869_v60 = vpack.c.bf16 %v4372_v15, %v4370_v19  ;;  %5218 = vmatmul.mubr.bf16.gmra.mrb[40].mxu1 %v12779_v61 }
 0x52c   : > { %v4175_v26 = vpop.f32.mrb[80].mxu0  ;;  %5227 = vmatprep.mubr.bf16.mxu1 %v12793_v50  ;;  %v12873_v21 = vpack.c.bf16 %v4373_v16, %v4371_v39 }
 0x52d   : > { %v4176_v29 = vadd.f32 %v4175_v26, %v12641_v47  ;;  %v4177_v30 = vpop.f32.mrb[81].mxu0 }
 0x52e   : > { %v4178_v32 = vadd.f32 %v4177_v30, %v12645_v49  ;;  %v4179_v10 = vpop.f32.mrb[82].mxu0 }
 0x52f   : > { %v4180_v34 = vadd.f32 %v4179_v10, %v12641_v47  ;;  %v4181_v36 = vpop.f32.mrb[83].mxu0  ;;  %v4374_v17 = vmax.f32 %v4176_v29, 0.0 }
 0x530   : > { %v4182_v20 = vadd.f32 %v4181_v36, %v12645_v49  ;;  %v4375_v40 = vmax.f32 %v4178_v32, 0.0 }
 0x531   : > { %v4376_v37 = vmax.f32 %v4180_v34, 0.0 }
 0x532   : > { %v4377_v61 = vmax.f32 %v4182_v20, 0.0 }
 0x533   : > { %v12879_v0 = vpack.c.bf16 %v4376_v37, %v4374_v17  ;;  %5228 = vmatmul.mubr.bf16.gmra.mrb[44].mxu1 %v12789_v43 }
 0x534   : > { %v4185_v50 = vpop.f32.mrb[84].mxu0  ;;  %5237 = vmatprep.mubr.bf16.mxu1 %v12803_v6  ;;  %v12883_v41 = vpack.c.bf16 %v4377_v61, %v4375_v40 }
 0x535   : > { %v4186_v31 = vadd.f32 %v4185_v50, %v12641_v47  ;;  %v4187_v51 = vpop.f32.mrb[85].mxu0 }
 0x536   : > { %v4188_v54 = vadd.f32 %v4187_v51, %v12645_v49  ;;  %v4189_v55 = vpop.f32.mrb[86].mxu0 }
 0x537   : > { %v4190_v56 = vadd.f32 %v4189_v55, %v12641_v47  ;;  %v4191_v57 = vpop.f32.mrb[87].mxu0  ;;  %v4378_v22 = vmax.f32 %v4186_v31, 0.0 }
 0x538   : > { %v4192_v58 = vadd.f32 %v4191_v57, %v12645_v49  ;;  %v4379_v62 = vmax.f32 %v4188_v54, 0.0 }
 0x539   : > { %v4380_v59 = vmax.f32 %v4190_v56, 0.0 }
 0x53a   : > { %v4381_v43 = vmax.f32 %v4192_v58, 0.0 }
 0x53b   : > { %v12889_v42 = vpack.c.bf16 %v4380_v59, %v4378_v22  ;;  %5238 = vmatmul.mubr.bf16.gmra.mrb[48].mxu1 %v12799_v3 }
 0x53c   : > { %v4195_v6 = vpop.f32.mrb[88].mxu0  ;;  %5247 = vmatprep.mubr.bf16.mxu1 %v12813_v28  ;;  %v12893_v44 = vpack.c.bf16 %v4381_v43, %v4379_v62 }
 0x53d   : > { %v4196_v8 = vadd.f32 %v4195_v6, %v12641_v47  ;;  %v4197_v24 = vpop.f32.mrb[89].mxu0 }
 0x53e   : > { %v4198_v9 = vadd.f32 %v4197_v24, %v12645_v49  ;;  %v4199_v11 = vpop.f32.mrb[90].mxu0 }
 0x53f   : > { %v4200_v12 = vadd.f32 %v4199_v11, %v12641_v47  ;;  %v4201_v13 = vpop.f32.mrb[91].mxu0  ;;  %v4382_v63 = vmax.f32 %v4196_v8, 0.0 }
 0x540   : > { %v4202_v14 = vadd.f32 %v4201_v13, %v12645_v49  ;;  %v4383_v4 = vmax.f32 %v4198_v9, 0.0 }
 0x541   : > { %v4384_v3 = vmax.f32 %v4200_v12, 0.0 }
 0x542   : > { %v4385_v19 = vmax.f32 %v4202_v14, 0.0 }
 0x543   : > { %v12899_v28 = vpack.c.bf16 %v4384_v3, %v4382_v63  ;;  %5248 = vmatmul.mubr.bf16.gmra.mrb[52].mxu1 %v12809_v18 }
 0x544   : > { %v4205_v15 = vpop.f32.mrb[92].mxu0  ;;  %5257 = vmatprep.mubr.bf16.mxu1 %v12823_v45  ;;  %v12903_v39 = vpack.c.bf16 %v4385_v19, %v4383_v4 }
 0x545   : > { %v4206_v16 = vadd.f32 %v4205_v15, %v12641_v47  ;;  %v4207_v26 = vpop.f32.mrb[93].mxu0 }
 0x546   : > { %v4208_v29 = vadd.f32 %v4207_v26, %v12645_v49  ;;  %v4209_v30 = vpop.f32.mrb[94].mxu0 }
 0x547   : > { %v4210_v32 = vadd.f32 %v4209_v30, %v12641_v47  ;;  %v4211_v10 = vpop.f32.mrb[95].mxu0  ;;  %v4386_v36 = vmax.f32 %v4206_v16, 0.0 }
 0x548   : > { %v4212_v34 = vadd.f32 %v4211_v10, %v12645_v49  ;;  %v4387_v17 = vmax.f32 %v4208_v29, 0.0 }
 0x549   : > { %v4388_v20 = vmax.f32 %v4210_v32, 0.0 }
 0x54a   : > { %v4389_v18 = vmax.f32 %v4212_v34, 0.0 }
 0x54b   : > { %v12909_v37 = vpack.c.bf16 %v4388_v20, %v4386_v36  ;;  %5258 = vmatmul.mubr.bf16.gmra.mrb[56].mxu1 %v12819_v48 }
 0x54c   : > { %v4215_v45 = vpop.f32.mrb[96].mxu0  ;;  %5267 = vmatprep.mubr.bf16.mxu1 %v12833_v7  ;;  %v12913_v40 = vpack.c.bf16 %v4389_v18, %v4387_v17 }
 0x54d   : > { %v4216_v61 = vadd.f32 %v4215_v45, %v12641_v47  ;;  %v4217_v50 = vpop.f32.mrb[97].mxu0 }
 0x54e   : > { %v4218_v31 = vadd.f32 %v4217_v50, %v12645_v49  ;;  %v4219_v51 = vpop.f32.mrb[98].mxu0 }
 0x54f   : > { %v4220_v54 = vadd.f32 %v4219_v51, %v12641_v47  ;;  %v4221_v55 = vpop.f32.mrb[99].mxu0  ;;  %v4390_v57 = vmax.f32 %v4216_v61, 0.0 }
 0x550   : > { %v4222_v56 = vadd.f32 %v4221_v55, %v12645_v49  ;;  %v4391_v22 = vmax.f32 %v4218_v31, 0.0 }
 0x551   : > { %v4392_v58 = vmax.f32 %v4220_v54, 0.0 }
 0x552   : > { %v4393_v48 = vmax.f32 %v4222_v56, 0.0 }
 0x553   : > { %v12919_v59 = vpack.c.bf16 %v4392_v58, %v4390_v57  ;;  %5268 = vmatmul.mubr.bf16.gmra.mrb[60].mxu1 %v12829_v23 }
 0x554   : > { %v4225_v7 = vpop.f32.mrb[100].mxu0  ;;  %5277 = vmatprep.mubr.bf16.mxu1 %v12843_v38  ;;  %v12923_v62 = vpack.c.bf16 %v4393_v48, %v4391_v22 }
 0x555   : > { %v4226_v43 = vadd.f32 %v4225_v7, %v12641_v47  ;;  %v4227_v6 = vpop.f32.mrb[101].mxu0 }
 0x556   : > { %v4228_v8 = vadd.f32 %v4227_v6, %v12645_v49  ;;  %v4229_v24 = vpop.f32.mrb[102].mxu0 }
 0x557   : > { %v4230_v53 = vadd.f32 %v4229_v24, %v12641_v47  ;;  %v4231_v9 = vpop.f32.mrb[103].mxu0  ;;  %v4394_v12 = vmax.f32 %v4226_v43, 0.0 }
 0x558   : > { %v4232_v11 = vadd.f32 %v4231_v9, %v12645_v49  ;;  %v4395_v14 = vmax.f32 %v4228_v8, 0.0 }
 0x559   : > { %v4396_v13 = vmax.f32 %v4230_v53, 0.0 }
 0x55a   : > { %v4397_v23 = vmax.f32 %v4232_v11, 0.0 }
 0x55b   : > { %v12929_v63 = vpack.c.bf16 %v4396_v13, %v4394_v12  ;;  %5278 = vmatmul.mubr.bf16.gmra.mrb[64].mxu1 %v12839_v27 }
 0x55c   : > { %v4235_v38 = vpop.f32.mrb[104].mxu0  ;;  %5287 = vmatprep.mubr.bf16.mxu1 %v12853_v46  ;;  %v12933_v3 = vpack.c.bf16 %v4397_v23, %v4395_v14 }
 0x55d   : > { %v4236_v4 = vadd.f32 %v4235_v38, %v12641_v47  ;;  %v4237_v19 = vpop.f32.mrb[105].mxu0 }
 0x55e   : > { %v4238_v15 = vadd.f32 %v4237_v19, %v12645_v49  ;;  %v4239_v16 = vpop.f32.mrb[106].mxu0 }
 0x55f   : > { %v4240_v26 = vadd.f32 %v4239_v16, %v12641_v47  ;;  %v4241_v29 = vpop.f32.mrb[107].mxu0  ;;  %v4398_v32 = vmax.f32 %v4236_v4, 0.0 }
 0x560   : > { %v4242_v30 = vadd.f32 %v4241_v29, %v12645_v49  ;;  %v4399_v34 = vmax.f32 %v4238_v15, 0.0 }
 0x561   : > { %v4400_v10 = vmax.f32 %v4240_v26, 0.0 }
 0x562   : > { %v4401_v27 = vmax.f32 %v4242_v30, 0.0 }
 0x563   : > { %v12939_v36 = vpack.c.bf16 %v4400_v10, %v4398_v32  ;;  %5288 = vmatmul.mubr.bf16.gmra.mrb[68].mxu1 %v12849_v52 }
 0x564   : > { %v4245_v46 = vpop.f32.mrb[108].mxu0  ;;  %5297 = vmatprep.mubr.bf16.mxu1 %v12863_v2  ;;  %v12943_v20 = vpack.c.bf16 %v4401_v27, %v4399_v34 }
 0x565   : > { %v4246_v17 = vadd.f32 %v4245_v46, %v12641_v47  ;;  %v4247_v18 = vpop.f32.mrb[109].mxu0 }
 0x566   : > { %v4248_v45 = vadd.f32 %v4247_v18, %v12645_v49  ;;  %v4249_v61 = vpop.f32.mrb[110].mxu0 }
 0x567   : > { %v4250_v50 = vadd.f32 %v4249_v61, %v12641_v47  ;;  %v4251_v31 = vpop.f32.mrb[111].mxu0  ;;  %v4402_v54 = vmax.f32 %v4246_v17, 0.0 }
 0x568   : > { %v4252_v51 = vadd.f32 %v4251_v31, %v12645_v49  ;;  %v4403_v56 = vmax.f32 %v4248_v45, 0.0 }
 0x569   : > { %v4404_v55 = vmax.f32 %v4250_v50, 0.0 }
 0x56a   : > { %v4405_v52 = vmax.f32 %v4252_v51, 0.0 }
 0x56b   : > { %v12949_v57 = vpack.c.bf16 %v4404_v55, %v4402_v54  ;;  %5298 = vmatmul.mubr.bf16.gmra.mrb[72].mxu1 %v12859_v25 }
 0x56c   : > { %v4255_v2 = vpop.f32.mrb[112].mxu0  ;;  %5307 = vmatprep.mubr.bf16.mxu1 %v12873_v21  ;;  %v12953_v58 = vpack.c.bf16 %v4405_v52, %v4403_v56 }
 0x56d   : > { %v4256_v22 = vadd.f32 %v4255_v2, %v12641_v47  ;;  %v4257_v48 = vpop.f32.mrb[113].mxu0 }
 0x56e   : > { %v4258_v7 = vadd.f32 %v4257_v48, %v12645_v49  ;;  %v4259_v43 = vpop.f32.mrb[114].mxu0 }
 0x56f   : > { %v4260_v6 = vadd.f32 %v4259_v43, %v12641_v47  ;;  %v4261_v8 = vpop.f32.mrb[115].mxu0  ;;  %v4406_v53 = vmax.f32 %v4256_v22, 0.0 }
 0x570   : > { %v4262_v24 = vadd.f32 %v4261_v8, %v12645_v49  ;;  %v4407_v11 = vmax.f32 %v4258_v7, 0.0 }
 0x571   : > { %v4408_v9 = vmax.f32 %v4260_v6, 0.0 }
 0x572   : > { %v4409_v25 = vmax.f32 %v4262_v24, 0.0 }
 0x573   : > { %v12959_v12 = vpack.c.bf16 %v4408_v9, %v4406_v53  ;;  %5308 = vmatmul.mubr.bf16.gmra.mrb[76].mxu1 %v12869_v60 }
 0x574   : > { %v4265_v21 = vpop.f32.mrb[116].mxu0  ;;  %5317 = vmatprep.mubr.bf16.mxu1 %v12883_v41  ;;  %v12963_v13 = vpack.c.bf16 %v4409_v25, %v4407_v11 }
 0x575   : > { %v4266_v14 = vadd.f32 %v4265_v21, %v12641_v47  ;;  %v4267_v23 = vpop.f32.mrb[117].mxu0 }
 0x576   : > { %v4268_v38 = vadd.f32 %v4267_v23, %v12645_v49  ;;  %v4269_v4 = vpop.f32.mrb[118].mxu0 }
 0x577   : > { %v4270_v19 = vadd.f32 %v4269_v4, %v12641_v47  ;;  %v4271_v15 = vpop.f32.mrb[119].mxu0  ;;  %v4410_v26 = vmax.f32 %v4266_v14, 0.0 }
 0x578   : > { %v4272_v16 = vadd.f32 %v4271_v15, %v12645_v49  ;;  %v4411_v30 = vmax.f32 %v4268_v38, 0.0  ;;  %v11516_v38 = vld [vmem:[#allocation3 + $0x700] ss:$8 sps:$4 sm:$0xff]   ;;  %v11521_v15 = vld [vmem:[#allocation3 + $0x714] ss:$8 sps:$4 sm:$0xff]  }
 0x579   : > { %v4412_v29 = vmax.f32 %v4270_v19, 0.0 }
 0x57a   : > { %v4413_v60 = vmax.f32 %v4272_v16, 0.0 }
 0x57b   : > { %v12969_v32 = vpack.c.bf16 %v4412_v29, %v4410_v26  ;;  %5318 = vmatmul.mubr.bf16.gmra.mrb[80].mxu1 %v12879_v0 }
 0x57c   : > { %v4275_v41 = vpop.f32.mrb[120].mxu0  ;;  %5327 = vmatprep.mubr.bf16.mxu1 %v12893_v44  ;;  %v12973_v10 = vpack.c.bf16 %v4413_v60, %v4411_v30 }
 0x57d   : > { %v4276_v34 = vadd.f32 %v4275_v41, %v12641_v47  ;;  %v4277_v27 = vpop.f32.mrb[121].mxu0 }
 0x57e   : > { %v4278_v46 = vadd.f32 %v4277_v27, %v12645_v49  ;;  %v4279_v17 = vpop.f32.mrb[122].mxu0 }
 0x57f   : > { %v4280_v18 = vadd.f32 %v4279_v17, %v12641_v47  ;;  %v4281_v45 = vpop.f32.mrb[123].mxu0  ;;  %v4414_v50 = vmax.f32 %v4276_v34, 0.0  ;;  %v11524_v34 = vld [vmem:[#allocation3 + $0x724] ss:$8 sps:$4 sm:$0xff]  }
 0x580   : > { %v4282_v61 = vadd.f32 %v4281_v45, %v12645_v49  ;;  %v4415_v51 = vmax.f32 %v4278_v46, 0.0 }
 0x581   : > { %v4416_v31 = vmax.f32 %v4280_v18, 0.0 }
 0x582   : > { %v4417_v0 = vmax.f32 %v4282_v61, 0.0  ;;  %v11522_v61 = vld [vmem:[#allocation3 + $0x720] ss:$8 sps:$4 sm:$0xff]  }
 0x583   : > { %v12979_v54 = vpack.c.bf16 %v4416_v31, %v4414_v50  ;;  %5328 = vmatmul.mubr.bf16.gmra.mrb[84].mxu1 %v12889_v42 }
 0x584   : > { %v4285_v44 = vpop.f32.mrb[124].mxu0  ;;  %5337 = vmatprep.mubr.bf16.mxu1 %v12903_v39  ;;  %v12983_v55 = vpack.c.bf16 %v4417_v0, %v4415_v51  ;;  %v11527_v51 = vld [vmem:[#allocation3 + $0x734] ss:$8 sps:$4 sm:$0xff]  }
 0x585   : > { %v4286_v56 = vadd.f32 %v4285_v44, %v12641_v47  ;;  %v4287_v52 = vpop.f32.mrb[125].mxu0 }
 0x586   : > { %v4288_v2 = vadd.f32 %v4287_v52, %v12645_v49  ;;  %v4289_v22 = vpop.f32.mrb[126].mxu0  ;;  %v11525_v52 = vld [vmem:[#allocation3 + $0x730] ss:$8 sps:$4 sm:$0xff]  }
 0x587   : > { %v4290_v48 = vadd.f32 %v4289_v22, %v12641_v47  ;;  %v4291_v7 = vpop.f32.mrb[127].mxu0  ;;  %v4418_v6 = vmax.f32 %v4286_v56, 0.0  ;;  %v10572_v47 = vld [vmem:[%s15529_s4 + $0xa] sm:$0x3] }
 0x588   : > { %v4292_v43 = vadd.f32 %v4291_v7, %v12645_v49  ;;  %v4419_v24 = vmax.f32 %v4288_v2, 0.0  ;;  %v13006_v49 = vrot.slane %v10572_v47, %v11993_v33 }
 0x589   : > { %v4420_v8 = vmax.f32 %v4290_v48, 0.0  ;;  %v11530_v48 = vld [vmem:[#allocation3 + $0x744] ss:$8 sps:$4 sm:$0xff]  }
 0x58a   : > { %v4421_v42 = vmax.f32 %v4292_v43, 0.0 }
 0x58b   : > { %v12989_v53 = vpack.c.bf16 %v4420_v8, %v4418_v6  ;;  %5338 = vmatmul.mubr.bf16.gmra.mrb[88].mxu1 %v12899_v28  ;;  %v13010_v28 = vrot.slane %v10572_v47, %v11998_v35 }
 0x58c   : > { %5347 = vmatprep.mubr.bf16.mxu1 %v12913_v40  ;;  %v12993_v39 = vpack.c.bf16 %v4421_v42, %v4419_v24  ;;  %v11528_v42 = vld [vmem:[#allocation3 + $0x740] ss:$8 sps:$4 sm:$0xff]  }
 0x593   : > { %5348 = vmatmul.mubr.bf16.gmra.mrb[92].mxu1 %v12909_v37 }
 0x594   : > { %5357 = vmatprep.mubr.bf16.mxu1 %v12923_v62 }
 0x59b   : > { %5358 = vmatmul.mubr.bf16.gmra.mrb[96].mxu1 %v12919_v59 }
 0x59c   : > { %5367 = vmatprep.mubr.bf16.mxu1 %v12933_v3 }
 0x5a3   : > { %5368 = vmatmul.mubr.bf16.gmra.mrb[100].mxu1 %v12929_v63 }
 0x5a4   : > { %5377 = vmatprep.mubr.bf16.mxu1 %v12943_v20 }
 0x5ab   : > { %5378 = vmatmul.mubr.bf16.gmra.mrb[104].mxu1 %v12939_v36 }
 0x5ac   : > { %5387 = vmatprep.mubr.bf16.mxu1 %v12953_v58 }
 0x5ae   : > { %v5119_v37 = vpop.f32.mrb[0].mxu1 }
 0x5af   : > { %v5451_v40 = vadd.f32 %v13006_v49, %v5119_v37  ;;  %v5121_v59 = vpop.f32.mrb[1].mxu1 }
 0x5b0   : > { %v5452_v62 = vadd.f32 %v13010_v28, %v5121_v59  ;;  %v5123_v63 = vpop.f32.mrb[2].mxu1 }
 0x5b1   : > { %v5453_v3 = vadd.f32 %v13006_v49, %v5123_v63  ;;  %v5125_v20 = vpop.f32.mrb[3].mxu1  ;;  %v5579_v9 = vmax.f32 %v5451_v40, 0.0  ;;  %v11533_v40 = vld [vmem:[#allocation3 + $0x754] ss:$8 sps:$4 sm:$0xff]  }
 0x5b2   : > { %v5454_v36 = vadd.f32 %v13010_v28, %v5125_v20  ;;  %v5580_v58 = vmax.f32 %v5452_v62, 0.0 }
 0x5b3   : > { %v5581_v11 = vmax.f32 %v5453_v3, 0.0  ;;  %5388 = vmatmul.mubr.bf16.gmra.mrb[108].mxu1 %v12949_v57  ;;  %v11531_v3 = vld [vmem:[#allocation3 + $0x750] ss:$8 sps:$4 sm:$0xff]  }
 0x5b4   : > { %v5582_v25 = vmax.f32 %v5454_v36, 0.0  ;;  %5397 = vmatprep.mubr.bf16.mxu1 %v12963_v13  ;;  %v11519_v13 = vld [vmem:[#allocation3 + $0x710] ss:$8 sps:$4 sm:$0xff]  }
 0x5b5   : > { %v5707_v21 = vpack.c.bf16 %v5581_v11, %v5579_v9  ;;  %v11536_v9 = vld [vmem:[#allocation3 + $0x764] ss:$8 sps:$4 sm:$0xff]  }
 0x5b6   : > { %v5129_v14 = vpop.f32.mrb[4].mxu1  ;;  %v5708_v23 = vpack.c.bf16 %v5582_v25, %v5580_v58 }
 0x5b7   : > { %v5455_v4 = vadd.f32 %v13006_v49, %v5129_v14  ;;  %v5131_v19 = vpop.f32.mrb[5].mxu1 }
 0x5b8   : > { %v5456_v16 = vadd.f32 %v13010_v28, %v5131_v19  ;;  %v5133_v26 = vpop.f32.mrb[6].mxu1  ;;  %6009 = vmatprep.mubr.bf16.mxu0 %v5708_v23  ;;  %v11534_v23 = vld [vmem:[#allocation3 + $0x760] ss:$8 sps:$4 sm:$0xff]   ;;  %v11539_v19 = vld [vmem:[#allocation3 + $0x774] ss:$8 sps:$4 sm:$0xff]  }
 0x5b9   : > { %v5457_v29 = vadd.f32 %v13006_v49, %v5133_v26  ;;  %v5135_v30 = vpop.f32.mrb[7].mxu1  ;;  %6010 = vmatmul.mubr.bf16.vlgmr.msra.gmra.mrb[128].mxu0 %v5707_v21  ;;  %v5583_v60 = vmax.f32 %v5455_v4, 0.0 }
 0x5ba   : > { %v5458_v57 = vadd.f32 %v13010_v28, %v5135_v30  ;;  %6729 = vmatpush1.bf16.msra.mxu0 %v11516_v38  ;;  %v5584_v27 = vmax.f32 %v5456_v16, 0.0 }
 0x5bb   : > { %v5585_v41 = vmax.f32 %v5457_v29, 0.0  ;;  %5398 = vmatmul.mubr.bf16.gmra.mrb[112].mxu1 %v12959_v12  ;;  %6730 = vmatprep.subr.bf16.mxu0 %v11521_v15  ;;  %v11537_v29 = vld [vmem:[#allocation3 + $0x770] ss:$8 sps:$4 sm:$0xff]  }
 0x5bc   : > { %v5586_v46 = vmax.f32 %v5458_v57, 0.0  ;;  %5407 = vmatprep.mubr.bf16.mxu1 %v12973_v10 }
 0x5bd   : > { %v5709_v17 = vpack.c.bf16 %v5585_v41, %v5583_v60 }
 0x5be   : > { %v5139_v18 = vpop.f32.mrb[8].mxu1  ;;  %v5710_v45 = vpack.c.bf16 %v5586_v46, %v5584_v27  ;;  %6731 = vmatpush1.bf16.msra.mxu0 %v11519_v13  ;;  %v11542_v13 = vld [vmem:[#allocation3 + $0x784] ss:$8 sps:$4 sm:$0xff]  }
 0x5bf   : > { %v5459_v50 = vadd.f32 %v13006_v49, %v5139_v18  ;;  %v5141_v31 = vpop.f32.mrb[9].mxu1  ;;  %6732 = vmatprep.subr.bf16.mxu0 %v11524_v34 }
 0x5c0   : > { %v5460_v0 = vadd.f32 %v13010_v28, %v5141_v31  ;;  %v5143_v44 = vpop.f32.mrb[10].mxu1  ;;  %6019 = vmatprep.mubr.bf16.mxu0 %v5710_v45 }
 0x5c1   : > { %v5461_v12 = vadd.f32 %v13006_v49, %v5143_v44  ;;  %v5145_v56 = vpop.f32.mrb[11].mxu1  ;;  %6020 = vmatmul.mubr.bf16.gmra.mrb[132].mxu0 %v5709_v17  ;;  %v5587_v2 = vmax.f32 %v5459_v50, 0.0  ;;  %v11540_v17 = vld [vmem:[#allocation3 + $0x780] ss:$8 sps:$4 sm:$0xff]   ;;  %v11543_v44 = vld [vmem:[#allocation3 + $0x790] ss:$8 sps:$4 sm:$0xff]  }
 0x5c2   : > { %v5462_v10 = vadd.f32 %v13010_v28, %v5145_v56  ;;  %6733 = vmatpush1.bf16.msra.mxu0 %v11522_v61  ;;  %v5588_v7 = vmax.f32 %v5460_v0, 0.0  ;;  %v11545_v61 = vld [vmem:[#allocation3 + $0x794] ss:$8 sps:$4 sm:$0xff]  }
 0x5c3   : > { %v5589_v22 = vmax.f32 %v5461_v12, 0.0  ;;  %5408 = vmatmul.mubr.bf16.gmra.mrb[116].mxu1 %v12969_v32  ;;  %6734 = vmatprep.subr.bf16.mxu0 %v11527_v51 }
 0x5c4   : > { %v5590_v43 = vmax.f32 %v5462_v10, 0.0  ;;  %5417 = vmatprep.mubr.bf16.mxu1 %v12983_v55 }
 0x5c5   : > { %v5711_v6 = vpack.c.bf16 %v5589_v22, %v5587_v2  ;;  %v11548_v22 = vld [vmem:[#allocation3 + $0x7a4] ss:$8 sps:$4 sm:$0xff]  }
 0x5c6   : > { %v5149_v8 = vpop.f32.mrb[12].mxu1  ;;  %v5712_v24 = vpack.c.bf16 %v5590_v43, %v5588_v7  ;;  %6735 = vmatpush1.bf16.msra.mxu0 %v11525_v52  ;;  %v11546_v43 = vld [vmem:[#allocation3 + $0x7a0] ss:$8 sps:$4 sm:$0xff]  }
 0x5c7   : > { %v5463_v47 = vadd.f32 %v13006_v49, %v5149_v8  ;;  %v5151_v37 = vpop.f32.mrb[13].mxu1  ;;  %6736 = vmatprep.subr.bf16.mxu0 %v11530_v48 }
 0x5c8   : > { %v5464_v59 = vadd.f32 %v13010_v28, %v5151_v37  ;;  %v5153_v62 = vpop.f32.mrb[14].mxu1  ;;  %6029 = vmatprep.mubr.bf16.mxu0 %v5712_v24 }
 0x5c9   : > { %v5465_v32 = vadd.f32 %v13006_v49, %v5153_v62  ;;  %v5155_v63 = vpop.f32.mrb[15].mxu1  ;;  %6030 = vmatmul.mubr.bf16.gmra.mrb[136].mxu0 %v5711_v6  ;;  %v5591_v20 = vmax.f32 %v5463_v47, 0.0 }
 0x5ca   : > { %v5466_v55 = vadd.f32 %v13010_v28, %v5155_v63  ;;  %6737 = vmatpush1.bf16.msra.mxu0 %v11528_v42  ;;  %v5592_v11 = vmax.f32 %v5464_v59, 0.0 }
 0x5cb   : > { %v5593_v36 = vmax.f32 %v5465_v32, 0.0  ;;  %5418 = vmatmul.mubr.bf16.gmra.mrb[120].mxu1 %v12979_v54  ;;  %6738 = vmatprep.subr.bf16.mxu0 %v11533_v40 }
 0x5cc   : > { %v5594_v58 = vmax.f32 %v5466_v55, 0.0  ;;  %5427 = vmatprep.mubr.bf16.mxu1 %v12993_v39 }
 0x5cd   : > { %v5713_v25 = vpack.c.bf16 %v5593_v36, %v5591_v20 }
 0x5ce   : > { %v5159_v21 = vpop.f32.mrb[16].mxu1  ;;  %v5714_v14 = vpack.c.bf16 %v5594_v58, %v5592_v11  ;;  %6739 = vmatpush1.bf16.msra.mxu0 %v11531_v3 }
 0x5cf   : > { %v5467_v38 = vadd.f32 %v13006_v49, %v5159_v21  ;;  %v5161_v4 = vpop.f32.mrb[17].mxu1  ;;  %6740 = vmatprep.subr.bf16.mxu0 %v11536_v9 }
 0x5d0   : > { %v5468_v15 = vadd.f32 %v13010_v28, %v5161_v4  ;;  %v5163_v16 = vpop.f32.mrb[18].mxu1  ;;  %6039 = vmatprep.mubr.bf16.mxu0 %v5714_v14 }
 0x5d1   : > { %v5469_v54 = vadd.f32 %v13006_v49, %v5163_v16  ;;  %v5165_v26 = vpop.f32.mrb[19].mxu1  ;;  %6040 = vmatmul.mubr.bf16.gmra.mrb[140].mxu0 %v5713_v25  ;;  %v5595_v30 = vmax.f32 %v5467_v38, 0.0  ;;  %v11549_v16 = vld [vmem:[#allocation3 + $0x7b0] ss:$8 sps:$4 sm:$0xff]  }
 0x5d2   : > { %v5470_v39 = vadd.f32 %v13010_v28, %v5165_v26  ;;  %6741 = vmatpush1.bf16.msra.mxu0 %v11534_v23  ;;  %v5596_v60 = vmax.f32 %v5468_v15, 0.0 }
 0x5d3   : > { %v5597_v57 = vmax.f32 %v5469_v54, 0.0  ;;  %5428 = vmatmul.mubr.bf16.gmra.mrb[124].mxu1 %v12989_v53  ;;  %6742 = vmatprep.subr.bf16.mxu0 %v11539_v19  ;;  %v11551_v54 = vld [vmem:[#allocation3 + $0x7b4] ss:$8 sps:$4 sm:$0xff]  }
 0x5d4   : > { %v5598_v41 = vmax.f32 %v5470_v39, 0.0 }
 0x5d5   : > { %v5715_v34 = vpack.c.bf16 %v5597_v57, %v5595_v30 }
 0x5d6   : > { %v5169_v27 = vpop.f32.mrb[20].mxu1  ;;  %v5716_v46 = vpack.c.bf16 %v5598_v41, %v5596_v60  ;;  %6743 = vmatpush1.bf16.msra.mxu0 %v11537_v29 }
 0x5d7   : > { %v5471_v18 = vadd.f32 %v13006_v49, %v5169_v27  ;;  %v5171_v45 = vpop.f32.mrb[21].mxu1  ;;  %6744 = vmatprep.subr.bf16.mxu0 %v11542_v13 }
 0x5d8   : > { %v5472_v50 = vadd.f32 %v13010_v28, %v5171_v45  ;;  %v5173_v31 = vpop.f32.mrb[22].mxu1  ;;  %6049 = vmatprep.mubr.bf16.mxu0 %v5716_v46 }
 0x5d9   : > { %v5473_v53 = vadd.f32 %v13006_v49, %v5173_v31  ;;  %v5175_v51 = vpop.f32.mrb[23].mxu1  ;;  %6050 = vmatmul.mubr.bf16.gmra.mrb[144].mxu0 %v5715_v34  ;;  %v5599_v12 = vmax.f32 %v5471_v18, 0.0 }
 0x5da   : > { %v5474_v0 = vadd.f32 %v13010_v28, %v5175_v51  ;;  %6745 = vmatpush1.bf16.msra.mxu0 %v11540_v17  ;;  %v5600_v10 = vmax.f32 %v5472_v50, 0.0 }
 0x5db   : > { %v5601_v56 = vmax.f32 %v5473_v53, 0.0  ;;  %6746 = vmatprep.subr.bf16.mxu0 %v11545_v61 }
 0x5dc   : > { %v5602_v52 = vmax.f32 %v5474_v0, 0.0 }
 0x5dd   : > { %v5717_v2 = vpack.c.bf16 %v5601_v56, %v5599_v12 }
 0x5de   : > { %v5179_v48 = vpop.f32.mrb[24].mxu1  ;;  %v5718_v7 = vpack.c.bf16 %v5602_v52, %v5600_v10  ;;  %6747 = vmatpush1.bf16.msra.mxu0 %v11543_v44 }
 0x5df   : > { %v5475_v6 = vadd.f32 %v13006_v49, %v5179_v48  ;;  %v5181_v8 = vpop.f32.mrb[25].mxu1  ;;  %6748 = vmatprep.subr.bf16.mxu0 %v11548_v22 }
 0x5e0   : > { %v5476_v24 = vadd.f32 %v13010_v28, %v5181_v8  ;;  %v5183_v42 = vpop.f32.mrb[26].mxu1  ;;  %6059 = vmatprep.mubr.bf16.mxu0 %v5718_v7  ;;  %v11552_v7 = vld [vmem:[#allocation3 + $0x7c0] ss:$8 sps:$4 sm:$0xff]  }
 0x5e1   : > { %v5477_v47 = vadd.f32 %v13006_v49, %v5183_v42  ;;  %v5185_v37 = vpop.f32.mrb[27].mxu1  ;;  %6060 = vmatmul.mubr.bf16.gmra.mrb[148].mxu0 %v5717_v2  ;;  %v5603_v59 = vmax.f32 %v5475_v6, 0.0 }
 0x5e2   : > { %v5478_v40 = vadd.f32 %v13010_v28, %v5185_v37  ;;  %6749 = vmatpush1.bf16.msra.mxu0 %v11546_v43  ;;  %v5604_v32 = vmax.f32 %v5476_v24, 0.0  ;;  %v11554_v43 = vld [vmem:[#allocation3 + $0x7c4] ss:$8 sps:$4 sm:$0xff]  }
 0x5e3   : > { %v5605_v62 = vmax.f32 %v5477_v47, 0.0  ;;  %6750 = vmatprep.subr.bf16.mxu0 %v11551_v54 }
 0x5e4   : > { %v5606_v63 = vmax.f32 %v5478_v40, 0.0 }
 0x5e5   : > { %v5719_v55 = vpack.c.bf16 %v5605_v62, %v5603_v59 }
 0x5e6   : > { %v5189_v3 = vpop.f32.mrb[28].mxu1  ;;  %v5720_v20 = vpack.c.bf16 %v5606_v63, %v5604_v32  ;;  %6751 = vmatpush1.bf16.msra.mxu0 %v11549_v16 }
 0x5e7   : > { %v5479_v36 = vadd.f32 %v13006_v49, %v5189_v3  ;;  %v5191_v9 = vpop.f32.mrb[29].mxu1  ;;  %6752 = vmatprep.subr.bf16.mxu0 %v11554_v43 }
 0x5e8   : > { %v5480_v11 = vadd.f32 %v13010_v28, %v5191_v9  ;;  %v5193_v58 = vpop.f32.mrb[30].mxu1  ;;  %6069 = vmatprep.mubr.bf16.mxu0 %v5720_v20 }
 0x5e9   : > { %v5481_v25 = vadd.f32 %v13006_v49, %v5193_v58  ;;  %v5195_v21 = vpop.f32.mrb[31].mxu1  ;;  %6070 = vmatmul.mubr.bf16.gmra.mrb[152].mxu0 %v5719_v55  ;;  %v5607_v23 = vmax.f32 %v5479_v36, 0.0 }
 0x5ea   : > { %v5482_v14 = vadd.f32 %v13010_v28, %v5195_v21  ;;  %v5608_v4 = vmax.f32 %v5480_v11, 0.0  ;;  %6753 = vmatpush1.bf16.msra.mxu0 %v11552_v7 }
 0x5eb   : > { %v5609_v38 = vmax.f32 %v5481_v25, 0.0 }
 0x5ec   : > { %v5610_v19 = vmax.f32 %v5482_v14, 0.0 }
 0x5ed   : > { %v5721_v15 = vpack.c.bf16 %v5609_v38, %v5607_v23 }
 0x5ee   : > { %v5199_v26 = vpop.f32.mrb[32].mxu1  ;;  %v5722_v39 = vpack.c.bf16 %v5610_v19, %v5608_v4 }
 0x5ef   : > { %v5483_v29 = vadd.f32 %v13006_v49, %v5199_v26  ;;  %v5201_v30 = vpop.f32.mrb[33].mxu1  ;;  %v11555_v26 = vld [vmem:[#allocation3 + $0x7d0] ss:$8 sps:$4 sm:$0xff]  }
 0x5f0   : > { %v5484_v57 = vadd.f32 %v13010_v28, %v5201_v30  ;;  %v5203_v13 = vpop.f32.mrb[34].mxu1  ;;  %6079 = vmatprep.mubr.bf16.mxu0 %v5722_v39  ;;  %v11557_v39 = vld [vmem:[#allocation3 + $0x7d4] ss:$8 sps:$4 sm:$0xff]  }
 0x5f1   : > { %v5485_v60 = vadd.f32 %v13006_v49, %v5203_v13  ;;  %v5205_v41 = vpop.f32.mrb[35].mxu1  ;;  %6080 = vmatmul.mubr.bf16.gmra.mrb[156].mxu0 %v5721_v15  ;;  %v5611_v27 = vmax.f32 %v5483_v29, 0.0  ;;  %6754 = vmatprep.subr.bf16.mxu0 %v11557_v39 }
 0x5f2   : > { %v5486_v34 = vadd.f32 %v13010_v28, %v5205_v41  ;;  %v5612_v17 = vmax.f32 %v5484_v57, 0.0  ;;  %6755 = vmatpush1.bf16.msra.mxu0 %v11555_v26 }
 0x5f3   : > { %v5613_v46 = vmax.f32 %v5485_v60, 0.0 }
 0x5f4   : > { %v5614_v18 = vmax.f32 %v5486_v34, 0.0 }
 0x5f5   : > { %v5723_v45 = vpack.c.bf16 %v5613_v46, %v5611_v27 }
 0x5f6   : > { %v5209_v61 = vpop.f32.mrb[36].mxu1  ;;  %v5724_v50 = vpack.c.bf16 %v5614_v18, %v5612_v17 }
 0x5f7   : > { %v5487_v31 = vadd.f32 %v13006_v49, %v5209_v61  ;;  %v5211_v53 = vpop.f32.mrb[37].mxu1 }
 0x5f8   : > { %v5488_v51 = vadd.f32 %v13010_v28, %v5211_v53  ;;  %v5213_v0 = vpop.f32.mrb[38].mxu1  ;;  %6089 = vmatprep.mubr.bf16.mxu0 %v5724_v50 }
 0x5f9   : > { %v5489_v44 = vadd.f32 %v13006_v49, %v5213_v0  ;;  %v5215_v12 = vpop.f32.mrb[39].mxu1  ;;  %6090 = vmatmul.mubr.bf16.gmra.mrb[160].mxu0 %v5723_v45  ;;  %v5615_v10 = vmax.f32 %v5487_v31, 0.0 }
 0x5fa   : > { %v5490_v56 = vadd.f32 %v13010_v28, %v5215_v12  ;;  %v5616_v2 = vmax.f32 %v5488_v51, 0.0 }
 0x5fb   : > { %v5617_v52 = vmax.f32 %v5489_v44, 0.0 }
 0x5fc   : > { %v5618_v22 = vmax.f32 %v5490_v56, 0.0 }
 0x5fd   : > { %v5725_v48 = vpack.c.bf16 %v5617_v52, %v5615_v10 }
 0x5fe   : > { %v5219_v6 = vpop.f32.mrb[40].mxu1  ;;  %v5726_v8 = vpack.c.bf16 %v5618_v22, %v5616_v2 }
 0x5ff   : > { %v5491_v24 = vadd.f32 %v13006_v49, %v5219_v6  ;;  %v5221_v42 = vpop.f32.mrb[41].mxu1  ;;  %v11558_v6 = vld [vmem:[#allocation3 + $0x7e0] ss:$8 sps:$4 sm:$0xff]  }
 0x600   : > { %v5492_v47 = vadd.f32 %v13010_v28, %v5221_v42  ;;  %v5223_v37 = vpop.f32.mrb[42].mxu1  ;;  %6099 = vmatprep.mubr.bf16.mxu0 %v5726_v8  ;;  %v11560_v8 = vld [vmem:[#allocation3 + $0x7e4] ss:$8 sps:$4 sm:$0xff]  }
 0x601   : > { %v5493_v40 = vadd.f32 %v13006_v49, %v5223_v37  ;;  %v5225_v59 = vpop.f32.mrb[43].mxu1  ;;  %6100 = vmatmul.mubr.bf16.gmra.mrb[164].mxu0 %v5725_v48  ;;  %v5619_v32 = vmax.f32 %v5491_v24, 0.0  ;;  %6756 = vmatprep.subr.bf16.mxu0 %v11560_v8 }
 0x602   : > { %v5494_v62 = vadd.f32 %v13010_v28, %v5225_v59  ;;  %v5620_v55 = vmax.f32 %v5492_v47, 0.0  ;;  %6757 = vmatpush1.bf16.msra.mxu0 %v11558_v6 }
 0x603   : > { %v5621_v63 = vmax.f32 %v5493_v40, 0.0 }
 0x604   : > { %v5622_v3 = vmax.f32 %v5494_v62, 0.0 }
 0x605   : > { %v5727_v20 = vpack.c.bf16 %v5621_v63, %v5619_v32 }
 0x606   : > { %v5229_v36 = vpop.f32.mrb[44].mxu1  ;;  %v5728_v9 = vpack.c.bf16 %v5622_v3, %v5620_v55 }
 0x607   : > { %v5495_v11 = vadd.f32 %v13006_v49, %v5229_v36  ;;  %v5231_v58 = vpop.f32.mrb[45].mxu1 }
 0x608   : > { %v5496_v25 = vadd.f32 %v13010_v28, %v5231_v58  ;;  %v5233_v21 = vpop.f32.mrb[46].mxu1  ;;  %6109 = vmatprep.mubr.bf16.mxu0 %v5728_v9 }
 0x609   : > { %v5497_v14 = vadd.f32 %v13006_v49, %v5233_v21  ;;  %v5235_v23 = vpop.f32.mrb[47].mxu1  ;;  %6110 = vmatmul.mubr.bf16.gmra.mrb[168].mxu0 %v5727_v20  ;;  %v5623_v4 = vmax.f32 %v5495_v11, 0.0 }
 0x60a   : > { %v5498_v38 = vadd.f32 %v13010_v28, %v5235_v23  ;;  %v5624_v15 = vmax.f32 %v5496_v25, 0.0 }
 0x60b   : > { %v5625_v19 = vmax.f32 %v5497_v14, 0.0 }
 0x60c   : > { %v5626_v16 = vmax.f32 %v5498_v38, 0.0 }
 0x60d   : > { %v5729_v54 = vpack.c.bf16 %v5625_v19, %v5623_v4 }
 0x60e   : > { %v5239_v29 = vpop.f32.mrb[48].mxu1  ;;  %v5730_v30 = vpack.c.bf16 %v5626_v16, %v5624_v15 }
 0x60f   : > { %v5499_v57 = vadd.f32 %v13006_v49, %v5239_v29  ;;  %v5241_v13 = vpop.f32.mrb[49].mxu1  ;;  %v11561_v29 = vld [vmem:[#allocation3 + $0x7f0] ss:$8 sps:$4 sm:$0xff]  }
 0x610   : > { %v5500_v60 = vadd.f32 %v13010_v28, %v5241_v13  ;;  %v5243_v41 = vpop.f32.mrb[50].mxu1  ;;  %6119 = vmatprep.mubr.bf16.mxu0 %v5730_v30  ;;  %v11563_v30 = vld [vmem:[#allocation3 + $0x7f4] ss:$8 sps:$4 sm:$0xff]  }
 0x611   : > { %v5501_v34 = vadd.f32 %v13006_v49, %v5243_v41  ;;  %v5245_v27 = vpop.f32.mrb[51].mxu1  ;;  %6120 = vmatmul.mubr.bf16.gmra.mrb[172].mxu0 %v5729_v54  ;;  %v5627_v17 = vmax.f32 %v5499_v57, 0.0  ;;  %6758 = vmatprep.subr.bf16.mxu0 %v11563_v30 }
 0x612   : > { %v5502_v46 = vadd.f32 %v13010_v28, %v5245_v27  ;;  %v5628_v45 = vmax.f32 %v5500_v60, 0.0  ;;  %6759 = vmatpush1.bf16.msra.mxu0 %v11561_v29 }
 0x613   : > { %v5629_v18 = vmax.f32 %v5501_v34, 0.0 }
 0x614   : > { %v5630_v61 = vmax.f32 %v5502_v46, 0.0 }
 0x615   : > { %v5731_v50 = vpack.c.bf16 %v5629_v18, %v5627_v17 }
 0x616   : > { %v5249_v31 = vpop.f32.mrb[52].mxu1  ;;  %v5732_v53 = vpack.c.bf16 %v5630_v61, %v5628_v45 }
 0x617   : > { %v5503_v51 = vadd.f32 %v13006_v49, %v5249_v31  ;;  %v5251_v0 = vpop.f32.mrb[53].mxu1 }
 0x618   : > { %v5504_v44 = vadd.f32 %v13010_v28, %v5251_v0  ;;  %v5253_v12 = vpop.f32.mrb[54].mxu1  ;;  %6129 = vmatprep.mubr.bf16.mxu0 %v5732_v53 }
 0x619   : > { %v5505_v56 = vadd.f32 %v13006_v49, %v5253_v12  ;;  %v5255_v10 = vpop.f32.mrb[55].mxu1  ;;  %6130 = vmatmul.mubr.bf16.gmra.mrb[176].mxu0 %v5731_v50  ;;  %v5631_v2 = vmax.f32 %v5503_v51, 0.0 }
 0x61a   : > { %v5506_v52 = vadd.f32 %v13010_v28, %v5255_v10  ;;  %v5632_v48 = vmax.f32 %v5504_v44, 0.0 }
 0x61b   : > { %v5633_v22 = vmax.f32 %v5505_v56, 0.0 }
 0x61c   : > { %v5634_v7 = vmax.f32 %v5506_v52, 0.0 }
 0x61d   : > { %v5733_v43 = vpack.c.bf16 %v5633_v22, %v5631_v2 }
 0x61e   : > { %v5259_v24 = vpop.f32.mrb[56].mxu1  ;;  %v5734_v42 = vpack.c.bf16 %v5634_v7, %v5632_v48 }
 0x61f   : > { %v5507_v47 = vadd.f32 %v13006_v49, %v5259_v24  ;;  %v5261_v37 = vpop.f32.mrb[57].mxu1 }
 0x620   : > { %v5508_v40 = vadd.f32 %v13010_v28, %v5261_v37  ;;  %v5263_v59 = vpop.f32.mrb[58].mxu1  ;;  %6139 = vmatprep.mubr.bf16.mxu0 %v5734_v42 }
 0x621   : > { %v5509_v62 = vadd.f32 %v13006_v49, %v5263_v59  ;;  %v5265_v32 = vpop.f32.mrb[59].mxu1  ;;  %6140 = vmatmul.mubr.bf16.gmra.mrb[180].mxu0 %v5733_v43  ;;  %v5635_v55 = vmax.f32 %v5507_v47, 0.0 }
 0x622   : > { %v5510_v63 = vadd.f32 %v13010_v28, %v5265_v32  ;;  %v5636_v20 = vmax.f32 %v5508_v40, 0.0 }
 0x623   : > { %v5637_v3 = vmax.f32 %v5509_v62, 0.0 }
 0x624   : > { %v5638_v36 = vmax.f32 %v5510_v63, 0.0 }
 0x625   : > { %v5735_v9 = vpack.c.bf16 %v5637_v3, %v5635_v55 }
 0x626   : > { %v5269_v11 = vpop.f32.mrb[60].mxu1  ;;  %v5736_v58 = vpack.c.bf16 %v5638_v36, %v5636_v20 }
 0x627   : > { %v5511_v25 = vadd.f32 %v13006_v49, %v5269_v11  ;;  %v5271_v21 = vpop.f32.mrb[61].mxu1 }
 0x628   : > { %v5512_v14 = vadd.f32 %v13010_v28, %v5271_v21  ;;  %v5273_v23 = vpop.f32.mrb[62].mxu1  ;;  %6149 = vmatprep.mubr.bf16.mxu0 %v5736_v58 }
 0x629   : > { %v5513_v38 = vadd.f32 %v13006_v49, %v5273_v23  ;;  %v5275_v4 = vpop.f32.mrb[63].mxu1  ;;  %6150 = vmatmul.mubr.bf16.gmra.mrb[184].mxu0 %v5735_v9  ;;  %v5639_v15 = vmax.f32 %v5511_v25, 0.0 }
 0x62a   : > { %v5514_v19 = vadd.f32 %v13010_v28, %v5275_v4  ;;  %v5640_v54 = vmax.f32 %v5512_v14, 0.0 }
 0x62b   : > { %v5641_v16 = vmax.f32 %v5513_v38, 0.0 }
 0x62c   : > { %v5642_v26 = vmax.f32 %v5514_v19, 0.0 }
 0x62d   : > { %v5737_v39 = vpack.c.bf16 %v5641_v16, %v5639_v15 }
 0x62e   : > { %v5279_v57 = vpop.f32.mrb[64].mxu1  ;;  %v5738_v13 = vpack.c.bf16 %v5642_v26, %v5640_v54 }
 0x62f   : > { %v5515_v60 = vadd.f32 %v13006_v49, %v5279_v57  ;;  %v5281_v41 = vpop.f32.mrb[65].mxu1 }
 0x630   : > { %v5516_v34 = vadd.f32 %v13010_v28, %v5281_v41  ;;  %v5283_v27 = vpop.f32.mrb[66].mxu1  ;;  %6159 = vmatprep.mubr.bf16.mxu0 %v5738_v13 }
 0x631   : > { %v5517_v46 = vadd.f32 %v13006_v49, %v5283_v27  ;;  %v5285_v17 = vpop.f32.mrb[67].mxu1  ;;  %6160 = vmatmul.mubr.bf16.gmra.mrb[188].mxu0 %v5737_v39  ;;  %v5643_v45 = vmax.f32 %v5515_v60, 0.0 }
 0x632   : > { %v5518_v18 = vadd.f32 %v13010_v28, %v5285_v17  ;;  %v5644_v50 = vmax.f32 %v5516_v34, 0.0 }
 0x633   : > { %v5645_v61 = vmax.f32 %v5517_v46, 0.0 }
 0x634   : > { %v5646_v31 = vmax.f32 %v5518_v18, 0.0 }
 0x635   : > { %v5739_v53 = vpack.c.bf16 %v5645_v61, %v5643_v45 }
 0x636   : > { %v5289_v51 = vpop.f32.mrb[68].mxu1  ;;  %v5740_v0 = vpack.c.bf16 %v5646_v31, %v5644_v50 }
 0x637   : > { %v5519_v44 = vadd.f32 %v13006_v49, %v5289_v51  ;;  %v5291_v12 = vpop.f32.mrb[69].mxu1 }
 0x638   : > { %v5520_v56 = vadd.f32 %v13010_v28, %v5291_v12  ;;  %v5293_v10 = vpop.f32.mrb[70].mxu1  ;;  %6169 = vmatprep.mubr.bf16.mxu0 %v5740_v0 }
 0x639   : > { %v5521_v52 = vadd.f32 %v13006_v49, %v5293_v10  ;;  %v5295_v2 = vpop.f32.mrb[71].mxu1  ;;  %6170 = vmatmul.mubr.bf16.gmra.mrb[192].mxu0 %v5739_v53  ;;  %v5647_v48 = vmax.f32 %v5519_v44, 0.0 }
 0x63a   : > { %v5522_v22 = vadd.f32 %v13010_v28, %v5295_v2  ;;  %v5648_v43 = vmax.f32 %v5520_v56, 0.0 }
 0x63b   : > { %v5649_v7 = vmax.f32 %v5521_v52, 0.0 }
 0x63c   : > { %v5650_v6 = vmax.f32 %v5522_v22, 0.0 }
 0x63d   : > { %v5741_v8 = vpack.c.bf16 %v5649_v7, %v5647_v48 }
 0x63e   : > { %v5299_v24 = vpop.f32.mrb[72].mxu1  ;;  %v5742_v42 = vpack.c.bf16 %v5650_v6, %v5648_v43 }
 0x63f   : > { %v5523_v47 = vadd.f32 %v13006_v49, %v5299_v24  ;;  %v5301_v37 = vpop.f32.mrb[73].mxu1 }
 0x640   : > { %v5524_v40 = vadd.f32 %v13010_v28, %v5301_v37  ;;  %v5303_v59 = vpop.f32.mrb[74].mxu1  ;;  %6179 = vmatprep.mubr.bf16.mxu0 %v5742_v42 }
 0x641   : > { %v5525_v62 = vadd.f32 %v13006_v49, %v5303_v59  ;;  %v5305_v32 = vpop.f32.mrb[75].mxu1  ;;  %6180 = vmatmul.mubr.bf16.gmra.mrb[196].mxu0 %v5741_v8  ;;  %v5651_v55 = vmax.f32 %v5523_v47, 0.0 }
 0x642   : > { %v5526_v63 = vadd.f32 %v13010_v28, %v5305_v32  ;;  %v5652_v20 = vmax.f32 %v5524_v40, 0.0 }
 0x643   : > { %v5653_v3 = vmax.f32 %v5525_v62, 0.0 }
 0x644   : > { %v5654_v36 = vmax.f32 %v5526_v63, 0.0 }
 0x645   : > { %v5743_v9 = vpack.c.bf16 %v5653_v3, %v5651_v55 }
 0x646   : > { %v5309_v11 = vpop.f32.mrb[76].mxu1  ;;  %v5744_v58 = vpack.c.bf16 %v5654_v36, %v5652_v20 }
 0x647   : > { %v5527_v25 = vadd.f32 %v13006_v49, %v5309_v11  ;;  %v5311_v21 = vpop.f32.mrb[77].mxu1 }
 0x648   : > { %v5528_v14 = vadd.f32 %v13010_v28, %v5311_v21  ;;  %v5313_v23 = vpop.f32.mrb[78].mxu1  ;;  %6189 = vmatprep.mubr.bf16.mxu0 %v5744_v58 }
 0x649   : > { %v5529_v38 = vadd.f32 %v13006_v49, %v5313_v23  ;;  %v5315_v4 = vpop.f32.mrb[79].mxu1  ;;  %6190 = vmatmul.mubr.bf16.gmra.mrb[200].mxu0 %v5743_v9  ;;  %v5655_v15 = vmax.f32 %v5527_v25, 0.0 }
 0x64a   : > { %v5530_v19 = vadd.f32 %v13010_v28, %v5315_v4  ;;  %v5656_v54 = vmax.f32 %v5528_v14, 0.0 }
 0x64b   : > { %v5657_v16 = vmax.f32 %v5529_v38, 0.0 }
 0x64c   : > { %v5658_v26 = vmax.f32 %v5530_v19, 0.0 }
 0x64d   : > { %v5745_v39 = vpack.c.bf16 %v5657_v16, %v5655_v15 }
 0x64e   : > { %v5319_v29 = vpop.f32.mrb[80].mxu1  ;;  %v5746_v30 = vpack.c.bf16 %v5658_v26, %v5656_v54 }
 0x64f   : > { %v5531_v57 = vadd.f32 %v13006_v49, %v5319_v29  ;;  %v5321_v13 = vpop.f32.mrb[81].mxu1 }
 0x650   : > { %v5532_v60 = vadd.f32 %v13010_v28, %v5321_v13  ;;  %v5323_v41 = vpop.f32.mrb[82].mxu1  ;;  %6199 = vmatprep.mubr.bf16.mxu0 %v5746_v30 }
 0x651   : > { %v5533_v34 = vadd.f32 %v13006_v49, %v5323_v41  ;;  %v5325_v27 = vpop.f32.mrb[83].mxu1  ;;  %6200 = vmatmul.mubr.bf16.gmra.mrb[204].mxu0 %v5745_v39  ;;  %v5659_v17 = vmax.f32 %v5531_v57, 0.0 }
 0x652   : > { %v5534_v46 = vadd.f32 %v13010_v28, %v5325_v27  ;;  %v5660_v45 = vmax.f32 %v5532_v60, 0.0 }
 0x653   : > { %v5661_v18 = vmax.f32 %v5533_v34, 0.0 }
 0x654   : > { %v5662_v61 = vmax.f32 %v5534_v46, 0.0 }
 0x655   : > { %v5747_v50 = vpack.c.bf16 %v5661_v18, %v5659_v17 }
 0x656   : > { %v5329_v31 = vpop.f32.mrb[84].mxu1  ;;  %v5748_v53 = vpack.c.bf16 %v5662_v61, %v5660_v45 }
 0x657   : > { %v5535_v51 = vadd.f32 %v13006_v49, %v5329_v31  ;;  %v5331_v0 = vpop.f32.mrb[85].mxu1 }
 0x658   : > { %v5536_v44 = vadd.f32 %v13010_v28, %v5331_v0  ;;  %v5333_v12 = vpop.f32.mrb[86].mxu1  ;;  %6209 = vmatprep.mubr.bf16.mxu0 %v5748_v53 }
 0x659   : > { %v5537_v56 = vadd.f32 %v13006_v49, %v5333_v12  ;;  %v5335_v10 = vpop.f32.mrb[87].mxu1  ;;  %6210 = vmatmul.mubr.bf16.gmra.mrb[208].mxu0 %v5747_v50  ;;  %v5663_v2 = vmax.f32 %v5535_v51, 0.0 }
 0x65a   : > { %v5538_v52 = vadd.f32 %v13010_v28, %v5335_v10  ;;  %v5664_v48 = vmax.f32 %v5536_v44, 0.0 }
 0x65b   : > { %v5665_v22 = vmax.f32 %v5537_v56, 0.0 }
 0x65c   : > { %v5666_v7 = vmax.f32 %v5538_v52, 0.0 }
 0x65d   : > { %v5749_v43 = vpack.c.bf16 %v5665_v22, %v5663_v2 }
 0x65e   : > { %v5339_v6 = vpop.f32.mrb[88].mxu1  ;;  %v5750_v8 = vpack.c.bf16 %v5666_v7, %v5664_v48 }
 0x65f   : > { %v5539_v24 = vadd.f32 %v13006_v49, %v5339_v6  ;;  %v5341_v42 = vpop.f32.mrb[89].mxu1 }
 0x660   : > { %v5540_v47 = vadd.f32 %v13010_v28, %v5341_v42  ;;  %v5343_v37 = vpop.f32.mrb[90].mxu1  ;;  %6219 = vmatprep.mubr.bf16.mxu0 %v5750_v8 }
 0x661   : > { %v5541_v40 = vadd.f32 %v13006_v49, %v5343_v37  ;;  %v5345_v59 = vpop.f32.mrb[91].mxu1  ;;  %6220 = vmatmul.mubr.bf16.gmra.mrb[212].mxu0 %v5749_v43  ;;  %v5667_v32 = vmax.f32 %v5539_v24, 0.0 }
 0x662   : > { %v5542_v62 = vadd.f32 %v13010_v28, %v5345_v59  ;;  %v5668_v55 = vmax.f32 %v5540_v47, 0.0 }
 0x663   : > { %v5669_v63 = vmax.f32 %v5541_v40, 0.0 }
 0x664   : > { %v5670_v3 = vmax.f32 %v5542_v62, 0.0 }
 0x665   : > { %v5751_v20 = vpack.c.bf16 %v5669_v63, %v5667_v32 }
 0x666   : > { %v5349_v36 = vpop.f32.mrb[92].mxu1  ;;  %v5752_v9 = vpack.c.bf16 %v5670_v3, %v5668_v55 }
 0x667   : > { %v5543_v11 = vadd.f32 %v13006_v49, %v5349_v36  ;;  %v5351_v58 = vpop.f32.mrb[93].mxu1  ;;  %v10573_v36 = vld [vmem:[%s15529_s4 + $0xc] sm:$0x3] }
 0x668   : > { %v5544_v25 = vadd.f32 %v13010_v28, %v5351_v58  ;;  %v5353_v21 = vpop.f32.mrb[94].mxu1  ;;  %6229 = vmatprep.mubr.bf16.mxu0 %v5752_v9 }
 0x669   : > { %v5545_v14 = vadd.f32 %v13006_v49, %v5353_v21  ;;  %v5355_v23 = vpop.f32.mrb[95].mxu1  ;;  %6230 = vmatmul.mubr.bf16.gmra.mrb[216].mxu0 %v5751_v20  ;;  %v5671_v4 = vmax.f32 %v5543_v11, 0.0 }
 0x66a   : > { %v5546_v38 = vadd.f32 %v13010_v28, %v5355_v23  ;;  %v5672_v15 = vmax.f32 %v5544_v25, 0.0  ;;  %v13136_v23 = vrot.slane %v10573_v36, %v11993_v33 }
 0x66b   : > { %v5673_v19 = vmax.f32 %v5545_v14, 0.0 }
 0x66c   : > { %v5674_v16 = vmax.f32 %v5546_v38, 0.0 }
 0x66d   : > { %v5753_v54 = vpack.c.bf16 %v5673_v19, %v5671_v4  ;;  %v13140_v4 = vrot.slane %v10573_v36, %v11998_v35 }
 0x66e   : > { %v5359_v26 = vpop.f32.mrb[96].mxu1  ;;  %v5754_v39 = vpack.c.bf16 %v5674_v16, %v5672_v15 }
 0x66f   : > { %v5547_v29 = vadd.f32 %v13006_v49, %v5359_v26  ;;  %v5361_v30 = vpop.f32.mrb[97].mxu1 }
 0x670   : > { %v5548_v57 = vadd.f32 %v13010_v28, %v5361_v30  ;;  %v5363_v13 = vpop.f32.mrb[98].mxu1  ;;  %6239 = vmatprep.mubr.bf16.mxu0 %v5754_v39 }
 0x671   : > { %v5549_v60 = vadd.f32 %v13006_v49, %v5363_v13  ;;  %v5365_v41 = vpop.f32.mrb[99].mxu1  ;;  %6240 = vmatmul.mubr.bf16.gmra.mrb[220].mxu0 %v5753_v54  ;;  %v5675_v27 = vmax.f32 %v5547_v29, 0.0 }
 0x672   : > { %v5550_v34 = vadd.f32 %v13010_v28, %v5365_v41  ;;  %v5676_v17 = vmax.f32 %v5548_v57, 0.0 }
 0x673   : > { %v5677_v46 = vmax.f32 %v5549_v60, 0.0 }
 0x674   : > { %v5678_v18 = vmax.f32 %v5550_v34, 0.0 }
 0x675   : > { %v5755_v45 = vpack.c.bf16 %v5677_v46, %v5675_v27 }
 0x676   : > { %v5369_v61 = vpop.f32.mrb[100].mxu1  ;;  %v5756_v50 = vpack.c.bf16 %v5678_v18, %v5676_v17 }
 0x677   : > { %v5551_v31 = vadd.f32 %v13006_v49, %v5369_v61  ;;  %v5371_v53 = vpop.f32.mrb[101].mxu1 }
 0x678   : > { %v5552_v51 = vadd.f32 %v13010_v28, %v5371_v53  ;;  %v5373_v0 = vpop.f32.mrb[102].mxu1  ;;  %6249 = vmatprep.mubr.bf16.mxu0 %v5756_v50 }
 0x679   : > { %v5553_v44 = vadd.f32 %v13006_v49, %v5373_v0  ;;  %v5375_v12 = vpop.f32.mrb[103].mxu1  ;;  %6250 = vmatmul.mubr.bf16.gmra.mrb[224].mxu0 %v5755_v45  ;;  %v5679_v10 = vmax.f32 %v5551_v31, 0.0 }
 0x67a   : > { %v5554_v56 = vadd.f32 %v13010_v28, %v5375_v12  ;;  %v5680_v2 = vmax.f32 %v5552_v51, 0.0 }
 0x67b   : > { %v5681_v52 = vmax.f32 %v5553_v44, 0.0 }
 0x67c   : > { %v5682_v22 = vmax.f32 %v5554_v56, 0.0 }
 0x67d   : > { %v5757_v48 = vpack.c.bf16 %v5681_v52, %v5679_v10 }
 0x67e   : > { %v5379_v7 = vpop.f32.mrb[104].mxu1  ;;  %v5758_v43 = vpack.c.bf16 %v5682_v22, %v5680_v2 }
 0x67f   : > { %v5555_v6 = vadd.f32 %v13006_v49, %v5379_v7  ;;  %v5381_v8 = vpop.f32.mrb[105].mxu1 }
 0x680   : > { %v5556_v24 = vadd.f32 %v13010_v28, %v5381_v8  ;;  %v5383_v42 = vpop.f32.mrb[106].mxu1  ;;  %6259 = vmatprep.mubr.bf16.mxu0 %v5758_v43 }
 0x681   : > { %v5557_v47 = vadd.f32 %v13006_v49, %v5383_v42  ;;  %v5385_v37 = vpop.f32.mrb[107].mxu1  ;;  %6260 = vmatmul.mubr.bf16.gmra.mrb[228].mxu0 %v5757_v48  ;;  %v5683_v59 = vmax.f32 %v5555_v6, 0.0 }
 0x682   : > { %v5558_v40 = vadd.f32 %v13010_v28, %v5385_v37  ;;  %v5684_v32 = vmax.f32 %v5556_v24, 0.0 }
 0x683   : > { %v5685_v62 = vmax.f32 %v5557_v47, 0.0 }
 0x684   : > { %v5686_v63 = vmax.f32 %v5558_v40, 0.0 }
 0x685   : > { %v5759_v55 = vpack.c.bf16 %v5685_v62, %v5683_v59 }
 0x686   : > { %v5389_v3 = vpop.f32.mrb[108].mxu1  ;;  %v5760_v20 = vpack.c.bf16 %v5686_v63, %v5684_v32 }
 0x687   : > { %v5559_v9 = vadd.f32 %v13006_v49, %v5389_v3  ;;  %v5391_v11 = vpop.f32.mrb[109].mxu1 }
 0x688   : > { %v5560_v58 = vadd.f32 %v13010_v28, %v5391_v11  ;;  %v5393_v25 = vpop.f32.mrb[110].mxu1  ;;  %6269 = vmatprep.mubr.bf16.mxu0 %v5760_v20 }
 0x689   : > { %v5561_v21 = vadd.f32 %v13006_v49, %v5393_v25  ;;  %v5395_v14 = vpop.f32.mrb[111].mxu1  ;;  %6270 = vmatmul.mubr.bf16.gmra.mrb[232].mxu0 %v5759_v55  ;;  %v5687_v19 = vmax.f32 %v5559_v9, 0.0 }
 0x68a   : > { %v5562_v38 = vadd.f32 %v13010_v28, %v5395_v14  ;;  %v5688_v16 = vmax.f32 %v5560_v58, 0.0 }
 0x68b   : > { %v5689_v15 = vmax.f32 %v5561_v21, 0.0 }
 0x68c   : > { %v5690_v54 = vmax.f32 %v5562_v38, 0.0  ;;  %v6011_v26 = vpop.f32.mrb[128].mxu0 }
 0x68d   : > { %v5761_v39 = vpack.c.bf16 %v5689_v15, %v5687_v19  ;;  %v6012_v29 = vadd.f32 %v6011_v26, %v13136_v23  ;;  %v6013_v30 = vpop.f32.mrb[129].mxu0 }
 0x68e   : > { %v6014_v57 = vadd.f32 %v6013_v30, %v13140_v4  ;;  %v5399_v13 = vpop.f32.mrb[112].mxu1  ;;  %v6015_v60 = vpop.f32.mrb[130].mxu0  ;;  %v5762_v41 = vpack.c.bf16 %v5690_v54, %v5688_v16 }
 0x68f   : > { %v5563_v34 = vadd.f32 %v13006_v49, %v5399_v13  ;;  %v6016_v27 = vadd.f32 %v6015_v60, %v13136_v23  ;;  %v5401_v46 = vpop.f32.mrb[113].mxu1  ;;  %v6017_v17 = vpop.f32.mrb[131].mxu0  ;;  %v6330_v50 = vmax.f32 %v6012_v29, 0.0 }
 0x690   : > { %v5564_v18 = vadd.f32 %v13010_v28, %v5401_v46  ;;  %v6018_v45 = vadd.f32 %v6017_v17, %v13140_v4  ;;  %v5403_v61 = vpop.f32.mrb[114].mxu1  ;;  %6279 = vmatprep.mubr.bf16.mxu0 %v5762_v41  ;;  %v6331_v0 = vmax.f32 %v6014_v57, 0.0 }
 0x691   : > { %v6332_v31 = vmax.f32 %v6016_v27, 0.0  ;;  %v5565_v53 = vadd.f32 %v13006_v49, %v5403_v61  ;;  %v5405_v51 = vpop.f32.mrb[115].mxu1  ;;  %6280 = vmatmul.mubr.bf16.gmra.mrb[236].mxu0 %v5761_v39  ;;  %v5691_v56 = vmax.f32 %v5563_v34, 0.0 }
 0x692   : > { %v6333_v44 = vmax.f32 %v6018_v45, 0.0  ;;  %v5566_v12 = vadd.f32 %v13010_v28, %v5405_v51  ;;  %v5692_v2 = vmax.f32 %v5564_v18, 0.0 }
 0x693   : > { %v13150_v10 = vpack.c.bf16 %v6332_v31, %v6330_v50  ;;  %v5693_v52 = vmax.f32 %v5565_v53, 0.0 }
 0x694   : > { %v5694_v22 = vmax.f32 %v5566_v12, 0.0  ;;  %v6021_v48 = vpop.f32.mrb[132].mxu0  ;;  %v13152_v7 = vpack.c.bf16 %v6333_v44, %v6331_v0 }
 0x695   : > { %v5763_v43 = vpack.c.bf16 %v5693_v52, %v5691_v56  ;;  %v6022_v6 = vadd.f32 %v6021_v48, %v13136_v23  ;;  %v6023_v8 = vpop.f32.mrb[133].mxu0 }
 0x696   : > { %v6024_v24 = vadd.f32 %v6023_v8, %v13140_v4  ;;  %v5409_v42 = vpop.f32.mrb[116].mxu1  ;;  %v6025_v47 = vpop.f32.mrb[134].mxu0  ;;  %v5764_v37 = vpack.c.bf16 %v5694_v22, %v5692_v2 }
 0x697   : > { %v5567_v40 = vadd.f32 %v13006_v49, %v5409_v42  ;;  %v6026_v59 = vadd.f32 %v6025_v47, %v13136_v23  ;;  %v5411_v62 = vpop.f32.mrb[117].mxu1  ;;  %v6027_v32 = vpop.f32.mrb[135].mxu0  ;;  %v6334_v20 = vmax.f32 %v6022_v6, 0.0 }
 0x698   : > { %v5568_v63 = vadd.f32 %v13010_v28, %v5411_v62  ;;  %v6028_v55 = vadd.f32 %v6027_v32, %v13140_v4  ;;  %v5413_v3 = vpop.f32.mrb[118].mxu1  ;;  %6289 = vmatprep.mubr.bf16.mxu0 %v5764_v37  ;;  %v6335_v58 = vmax.f32 %v6024_v24, 0.0 }
 0x699   : > { %v6336_v36 = vmax.f32 %v6026_v59, 0.0  ;;  %v5569_v9 = vadd.f32 %v13006_v49, %v5413_v3  ;;  %v5415_v11 = vpop.f32.mrb[119].mxu1  ;;  %6290 = vmatmul.mubr.bf16.gmra.mrb[240].mxu0 %v5763_v43  ;;  %v5695_v14 = vmax.f32 %v5567_v40, 0.0 }
 0x69a   : > { %v6337_v25 = vmax.f32 %v6028_v55, 0.0  ;;  %v5570_v21 = vadd.f32 %v13010_v28, %v5415_v11  ;;  %v5696_v15 = vmax.f32 %v5568_v63, 0.0 }
 0x69b   : > { %v13162_v38 = vpack.c.bf16 %v6336_v36, %v6334_v20  ;;  %v5697_v19 = vmax.f32 %v5569_v9, 0.0 }
 0x69c   : > { %v5698_v16 = vmax.f32 %v5570_v21, 0.0  ;;  %v6031_v54 = vpop.f32.mrb[136].mxu0  ;;  %v13164_v26 = vpack.c.bf16 %v6337_v25, %v6335_v58 }
 0x69d   : > { %v5765_v39 = vpack.c.bf16 %v5697_v19, %v5695_v14  ;;  %v6032_v29 = vadd.f32 %v6031_v54, %v13136_v23  ;;  %v6033_v30 = vpop.f32.mrb[137].mxu0 }
 0x69e   : > { %v5766_v57 = vpack.c.bf16 %v5698_v16, %v5696_v15  ;;  %v6034_v13 = vadd.f32 %v6033_v30, %v13140_v4  ;;  %v5419_v60 = vpop.f32.mrb[120].mxu1  ;;  %v6035_v41 = vpop.f32.mrb[138].mxu0 }
 0x69f   : > { %v5571_v34 = vadd.f32 %v13006_v49, %v5419_v60  ;;  %v6036_v27 = vadd.f32 %v6035_v41, %v13136_v23  ;;  %v5421_v46 = vpop.f32.mrb[121].mxu1  ;;  %v6037_v17 = vpop.f32.mrb[139].mxu0  ;;  %v6338_v50 = vmax.f32 %v6032_v29, 0.0 }
 0x6a0   : > { %v5572_v18 = vadd.f32 %v13010_v28, %v5421_v46  ;;  %v6038_v45 = vadd.f32 %v6037_v17, %v13140_v4  ;;  %v5423_v61 = vpop.f32.mrb[122].mxu1  ;;  %6299 = vmatprep.mubr.bf16.mxu0 %v5766_v57  ;;  %v6339_v0 = vmax.f32 %v6034_v13, 0.0 }
 0x6a1   : > { %v6340_v31 = vmax.f32 %v6036_v27, 0.0  ;;  %v5573_v53 = vadd.f32 %v13006_v49, %v5423_v61  ;;  %v5425_v51 = vpop.f32.mrb[123].mxu1  ;;  %6300 = vmatmul.mubr.bf16.gmra.mrb[244].mxu0 %v5765_v39  ;;  %v5699_v56 = vmax.f32 %v5571_v34, 0.0 }
 0x6a2   : > { %v6341_v44 = vmax.f32 %v6038_v45, 0.0  ;;  %v5574_v12 = vadd.f32 %v13010_v28, %v5425_v51  ;;  %v5700_v22 = vmax.f32 %v5572_v18, 0.0 }
 0x6a3   : > { %v13174_v52 = vpack.c.bf16 %v6340_v31, %v6338_v50  ;;  %v5701_v2 = vmax.f32 %v5573_v53, 0.0 }
 0x6a4   : > { %v5702_v48 = vmax.f32 %v5574_v12, 0.0  ;;  %v6041_v43 = vpop.f32.mrb[140].mxu0  ;;  %v13176_v6 = vpack.c.bf16 %v6341_v44, %v6339_v0 }
 0x6a5   : > { %v5767_v8 = vpack.c.bf16 %v5701_v2, %v5699_v56  ;;  %v6042_v24 = vadd.f32 %v6041_v43, %v13136_v23  ;;  %v6043_v42 = vpop.f32.mrb[141].mxu0 }
 0x6a6   : > { %v5768_v47 = vpack.c.bf16 %v5702_v48, %v5700_v22  ;;  %v6044_v37 = vadd.f32 %v6043_v42, %v13140_v4  ;;  %v5429_v40 = vpop.f32.mrb[124].mxu1  ;;  %v6045_v59 = vpop.f32.mrb[142].mxu0 }
 0x6a7   : > { %v5575_v62 = vadd.f32 %v13006_v49, %v5429_v40  ;;  %v6046_v32 = vadd.f32 %v6045_v59, %v13136_v23  ;;  %v5431_v63 = vpop.f32.mrb[125].mxu1  ;;  %v6047_v55 = vpop.f32.mrb[143].mxu0  ;;  %v6342_v9 = vmax.f32 %v6042_v24, 0.0 }
 0x6a8   : > { %v5576_v3 = vadd.f32 %v13010_v28, %v5431_v63  ;;  %v6048_v20 = vadd.f32 %v6047_v55, %v13140_v4  ;;  %v5433_v36 = vpop.f32.mrb[126].mxu1  ;;  %6309 = vmatprep.mubr.bf16.mxu0 %v5768_v47  ;;  %v6343_v21 = vmax.f32 %v6044_v37, 0.0 }
 0x6a9   : > { %v6344_v11 = vmax.f32 %v6046_v32, 0.0  ;;  %v5577_v58 = vadd.f32 %v13006_v49, %v5433_v36  ;;  %v5435_v25 = vpop.f32.mrb[127].mxu1  ;;  %6310 = vmatmul.mubr.bf16.gmra.mrb[248].mxu0 %v5767_v8  ;;  %v5703_v15 = vmax.f32 %v5575_v62, 0.0 }
 0x6aa   : > { %v6345_v14 = vmax.f32 %v6048_v20, 0.0  ;;  %v5578_v19 = vadd.f32 %v13010_v28, %v5435_v25  ;;  %v5704_v39 = vmax.f32 %v5576_v3, 0.0 }
 0x6ab   : > { %v13186_v16 = vpack.c.bf16 %v6344_v11, %v6342_v9  ;;  %v5705_v54 = vmax.f32 %v5577_v58, 0.0 }
 0x6ac   : > { %v5706_v29 = vmax.f32 %v5578_v19, 0.0  ;;  %v6051_v30 = vpop.f32.mrb[144].mxu0  ;;  %v13188_v57 = vpack.c.bf16 %v6345_v14, %v6343_v21 }
 0x6ad   : > { %v5769_v13 = vpack.c.bf16 %v5705_v54, %v5703_v15  ;;  %v6052_v60 = vadd.f32 %v6051_v30, %v13136_v23  ;;  %v6053_v41 = vpop.f32.mrb[145].mxu0 }
 0x6ae   : > { %v5770_v49 = vpack.c.bf16 %v5706_v29, %v5704_v39  ;;  %v6054_v34 = vadd.f32 %v6053_v41, %v13140_v4  ;;  %v6055_v27 = vpop.f32.mrb[146].mxu0  ;;  %v11566_v41 = vld [vmem:[#allocation3 + $0x4] ss:$8 sps:$4 sm:$0xff]  }
 0x6af   : > { %v6056_v46 = vadd.f32 %v6055_v27, %v13136_v23  ;;  %v6057_v28 = vpop.f32.mrb[147].mxu0  ;;  %v6346_v18 = vmax.f32 %v6052_v60, 0.0  ;;  %v11564_v60 = vld [vmem:[#allocation3] ss:$8 sps:$4 sm:$0xff]   ;;  %10988 = vmatprep.subr.bf16.mxu1 %v11566_v41  ;;  %7880 = vmatprep.subr.bf16.mxu0 %v11566_v41 }
 0x6b0   : > { %v6058_v17 = vadd.f32 %v6057_v28, %v13140_v4  ;;  %6319 = vmatprep.mubr.bf16.mxu0 %v5770_v49  ;;  %v6347_v61 = vmax.f32 %v6054_v34, 0.0  ;;  %11004 = vmatpush1.bf16.msra.mxu1 %v11564_v60 }
 0x6b1   : > { %v6348_v45 = vmax.f32 %v6056_v46, 0.0  ;;  %6320 = vmatmul.mubr.bf16.gmra.mrb[252].mxu0 %v5769_v13 }
 0x6b2   : > { %v6349_v50 = vmax.f32 %v6058_v17, 0.0  ;;  %6760 = vmatprep.mubr.bf16.mxu0 %v13152_v7 }
 0x6b3   : > { %v13195_v31 = vpack.c.bf16 %v6348_v45, %v6346_v18 }
 0x6b4   : > { %v6061_v53 = vpop.f32.mrb[148].mxu0  ;;  %v13197_v51 = vpack.c.bf16 %v6349_v50, %v6347_v61 }
 0x6b5   : > { %v6062_v0 = vadd.f32 %v6061_v53, %v13136_v23  ;;  %v6063_v44 = vpop.f32.mrb[149].mxu0 }
 0x6b6   : > { %v6064_v12 = vadd.f32 %v6063_v44, %v13140_v4  ;;  %v6065_v56 = vpop.f32.mrb[150].mxu0 }
 0x6b7   : > { %v6066_v2 = vadd.f32 %v6065_v56, %v13136_v23  ;;  %v6067_v22 = vpop.f32.mrb[151].mxu0  ;;  %v6350_v43 = vmax.f32 %v6062_v0, 0.0 }
 0x6b8   : > { %v6068_v48 = vadd.f32 %v6067_v22, %v13140_v4  ;;  %v6351_v7 = vmax.f32 %v6064_v12, 0.0 }
 0x6b9   : > { %v6352_v8 = vmax.f32 %v6066_v2, 0.0  ;;  %6761 = vmatmul.mubr.bf16.vlgmr.msra.gmra.mrb[0].mxu0 %v13150_v10 }
 0x6ba   : > { %v6353_v24 = vmax.f32 %v6068_v48, 0.0  ;;  %6770 = vmatprep.mubr.bf16.mxu0 %v13164_v26  ;;  %7881 = vmatpush1.bf16.msra.mxu0 %v11564_v60 }
 0x6bb   : > { %v13205_v42 = vpack.c.bf16 %v6352_v8, %v6350_v43 }
 0x6bc   : > { %v6071_v47 = vpop.f32.mrb[152].mxu0  ;;  %v13207_v37 = vpack.c.bf16 %v6353_v24, %v6351_v7 }
 0x6bd   : > { %v6072_v40 = vadd.f32 %v6071_v47, %v13136_v23  ;;  %v6073_v59 = vpop.f32.mrb[153].mxu0 }
 0x6be   : > { %v6074_v62 = vadd.f32 %v6073_v59, %v13140_v4  ;;  %v6075_v32 = vpop.f32.mrb[154].mxu0  ;;  %v11567_v59 = vld [vmem:[#allocation3 + $0x10] ss:$8 sps:$4 sm:$0xff]  }
 0x6bf   : > { %v6076_v63 = vadd.f32 %v6075_v32, %v13136_v23  ;;  %v6077_v55 = vpop.f32.mrb[155].mxu0  ;;  %v6354_v3 = vmax.f32 %v6072_v40, 0.0 }
 0x6c0   : > { %v6078_v10 = vadd.f32 %v6077_v55, %v13140_v4  ;;  %v6355_v26 = vmax.f32 %v6074_v62, 0.0  ;;  %v11569_v62 = vld [vmem:[#allocation3 + $0x14] ss:$8 sps:$4 sm:$0xff]  }
 0x6c1   : > { %v6356_v20 = vmax.f32 %v6076_v63, 0.0  ;;  %6771 = vmatmul.mubr.bf16.gmra.mrb[4].mxu0 %v13162_v38  ;;  %10989 = vmatprep.subr.bf16.mxu1 %v11569_v62 }
 0x6c2   : > { %v6357_v36 = vmax.f32 %v6078_v10, 0.0  ;;  %6780 = vmatprep.mubr.bf16.mxu0 %v13176_v6  ;;  %7882 = vmatprep.subr.bf16.mxu0 %v11569_v62 }
 0x6c3   : > { %v13215_v9 = vpack.c.bf16 %v6356_v20, %v6354_v3  ;;  %11005 = vmatpush1.bf16.msra.mxu1 %v11567_v59  ;;  %7883 = vmatpush1.bf16.msra.mxu0 %v11567_v59 }
 0x6c4   : > { %v6081_v11 = vpop.f32.mrb[156].mxu0  ;;  %v13217_v58 = vpack.c.bf16 %v6357_v36, %v6355_v26 }
 0x6c5   : > { %v6082_v25 = vadd.f32 %v6081_v11, %v13136_v23  ;;  %v6083_v21 = vpop.f32.mrb[157].mxu0 }
 0x6c6   : > { %v6084_v14 = vadd.f32 %v6083_v21, %v13140_v4  ;;  %v6085_v19 = vpop.f32.mrb[158].mxu0 }
 0x6c7   : > { %v6086_v15 = vadd.f32 %v6085_v19, %v13136_v23  ;;  %v6087_v54 = vpop.f32.mrb[159].mxu0  ;;  %v6358_v39 = vmax.f32 %v6082_v25, 0.0 }
 0x6c8   : > { %v6088_v38 = vadd.f32 %v6087_v54, %v13140_v4  ;;  %v6359_v6 = vmax.f32 %v6084_v14, 0.0 }
 0x6c9   : > { %v6360_v29 = vmax.f32 %v6086_v15, 0.0  ;;  %6781 = vmatmul.mubr.bf16.gmra.mrb[8].mxu0 %v13174_v52 }
 0x6ca   : > { %v6361_v30 = vmax.f32 %v6088_v38, 0.0  ;;  %6790 = vmatprep.mubr.bf16.mxu0 %v13188_v57 }
 0x6cb   : > { %v13225_v13 = vpack.c.bf16 %v6360_v29, %v6358_v39 }
 0x6cc   : > { %v6091_v49 = vpop.f32.mrb[160].mxu0  ;;  %v13227_v34 = vpack.c.bf16 %v6361_v30, %v6359_v6 }
 0x6cd   : > { %v6092_v27 = vadd.f32 %v6091_v49, %v13136_v23  ;;  %v6093_v46 = vpop.f32.mrb[161].mxu0 }
 0x6ce   : > { %v6094_v28 = vadd.f32 %v6093_v46, %v13140_v4  ;;  %v6095_v17 = vpop.f32.mrb[162].mxu0  ;;  %v11570_v46 = vld [vmem:[#allocation3 + $0x20] ss:$8 sps:$4 sm:$0xff]  }
 0x6cf   : > { %v6096_v52 = vadd.f32 %v6095_v17, %v13136_v23  ;;  %v6097_v57 = vpop.f32.mrb[163].mxu0  ;;  %v6362_v45 = vmax.f32 %v6092_v27, 0.0 }
 0x6d0   : > { %v6098_v18 = vadd.f32 %v6097_v57, %v13140_v4  ;;  %v6363_v50 = vmax.f32 %v6094_v28, 0.0  ;;  %v11572_v28 = vld [vmem:[#allocation3 + $0x24] ss:$8 sps:$4 sm:$0xff]  }
 0x6d1   : > { %v6364_v61 = vmax.f32 %v6096_v52, 0.0  ;;  %6791 = vmatmul.mubr.bf16.gmra.mrb[12].mxu0 %v13186_v16  ;;  %10990 = vmatprep.subr.bf16.mxu1 %v11572_v28 }
 0x6d2   : > { %v6365_v53 = vmax.f32 %v6098_v18, 0.0  ;;  %6800 = vmatprep.mubr.bf16.mxu0 %v13197_v51  ;;  %7884 = vmatprep.subr.bf16.mxu0 %v11572_v28 }
 0x6d3   : > { %v13235_v0 = vpack.c.bf16 %v6364_v61, %v6362_v45  ;;  %11006 = vmatpush1.bf16.msra.mxu1 %v11570_v46  ;;  %7885 = vmatpush1.bf16.msra.mxu0 %v11570_v46  ;;  %v11584_v46 = vld [vmem:[#allocation3 + $0x64] ss:$8 sps:$4 sm:$0xff]  }
 0x6d4   : > { %v6101_v44 = vpop.f32.mrb[164].mxu0  ;;  %v13237_v12 = vpack.c.bf16 %v6365_v53, %v6363_v50 }
 0x6d5   : > { %v6102_v56 = vadd.f32 %v6101_v44, %v13136_v23  ;;  %v6103_v2 = vpop.f32.mrb[165].mxu0 }
 0x6d6   : > { %v6104_v22 = vadd.f32 %v6103_v2, %v13140_v4  ;;  %v6105_v48 = vpop.f32.mrb[166].mxu0 }
 0x6d7   : > { %v6106_v43 = vadd.f32 %v6105_v48, %v13136_v23  ;;  %v6107_v8 = vpop.f32.mrb[167].mxu0  ;;  %v6366_v7 = vmax.f32 %v6102_v56, 0.0 }
 0x6d8   : > { %v6108_v16 = vadd.f32 %v6107_v8, %v13140_v4  ;;  %v6367_v51 = vmax.f32 %v6104_v22, 0.0 }
 0x6d9   : > { %v6368_v24 = vmax.f32 %v6106_v43, 0.0  ;;  %6801 = vmatmul.mubr.bf16.gmra.mrb[16].mxu0 %v13195_v31 }
 0x6da   : > { %v6369_v47 = vmax.f32 %v6108_v16, 0.0  ;;  %6810 = vmatprep.mubr.bf16.mxu0 %v13207_v37 }
 0x6db   : > { %v13245_v40 = vpack.c.bf16 %v6368_v24, %v6366_v7 }
 0x6dc   : > { %v6111_v32 = vpop.f32.mrb[168].mxu0  ;;  %v13247_v63 = vpack.c.bf16 %v6369_v47, %v6367_v51 }
 0x6dd   : > { %v6112_v55 = vadd.f32 %v6111_v32, %v13136_v23  ;;  %v6113_v10 = vpop.f32.mrb[169].mxu0 }
 0x6de   : > { %v6114_v3 = vadd.f32 %v6113_v10, %v13140_v4  ;;  %v6115_v20 = vpop.f32.mrb[170].mxu0  ;;  %v11573_v10 = vld [vmem:[#allocation3 + $0x30] ss:$8 sps:$4 sm:$0xff]  }
 0x6df   : > { %v6116_v31 = vadd.f32 %v6115_v20, %v13136_v23  ;;  %v6117_v37 = vpop.f32.mrb[171].mxu0  ;;  %v6370_v36 = vmax.f32 %v6112_v55, 0.0 }
 0x6e0   : > { %v6118_v26 = vadd.f32 %v6117_v37, %v13140_v4  ;;  %v6371_v25 = vmax.f32 %v6114_v3, 0.0 }
 0x6e1   : > { %v6372_v11 = vmax.f32 %v6116_v31, 0.0  ;;  %6811 = vmatmul.mubr.bf16.gmra.mrb[20].mxu0 %v13205_v42 }
 0x6e2   : > { %v6373_v21 = vmax.f32 %v6118_v26, 0.0  ;;  %6820 = vmatprep.mubr.bf16.mxu0 %v13217_v58 }
 0x6e3   : > { %v13255_v14 = vpack.c.bf16 %v6372_v11, %v6370_v36  ;;  %v11578_v36 = vld [vmem:[#allocation3 + $0x44] ss:$8 sps:$4 sm:$0xff]  }
 0x6e4   : > { %v6121_v19 = vpop.f32.mrb[172].mxu0  ;;  %v13257_v15 = vpack.c.bf16 %v6373_v21, %v6371_v25  ;;  %v11576_v25 = vld [vmem:[#allocation3 + $0x40] ss:$8 sps:$4 sm:$0xff]  }
 0x6e5   : > { %v6122_v54 = vadd.f32 %v6121_v19, %v13136_v23  ;;  %v6123_v38 = vpop.f32.mrb[173].mxu0 }
 0x6e6   : > { %v6124_v39 = vadd.f32 %v6123_v38, %v13140_v4  ;;  %v6125_v29 = vpop.f32.mrb[174].mxu0 }
 0x6e7   : > { %v6126_v6 = vadd.f32 %v6125_v29, %v13136_v23  ;;  %v6127_v30 = vpop.f32.mrb[175].mxu0  ;;  %v6374_v60 = vmax.f32 %v6122_v54, 0.0 }
 0x6e8   : > { %v6128_v42 = vadd.f32 %v6127_v30, %v13140_v4  ;;  %v6375_v58 = vmax.f32 %v6124_v39, 0.0  ;;  %v11581_v39 = vld [vmem:[#allocation3 + $0x54] ss:$8 sps:$4 sm:$0xff]   ;;  %v11579_v30 = vld [vmem:[#allocation3 + $0x50] ss:$8 sps:$4 sm:$0xff]  }
 0x6e9   : > { %v6376_v41 = vmax.f32 %v6126_v6, 0.0  ;;  %6821 = vmatmul.mubr.bf16.gmra.mrb[24].mxu0 %v13215_v9 }
 0x6ea   : > { %v6377_v49 = vmax.f32 %v6128_v42, 0.0  ;;  %6830 = vmatprep.mubr.bf16.mxu0 %v13227_v34 }
 0x6eb   : > { %v13265_v27 = vpack.c.bf16 %v6376_v41, %v6374_v60 }
 0x6ec   : > { %v6131_v17 = vpop.f32.mrb[176].mxu0  ;;  %v13267_v52 = vpack.c.bf16 %v6377_v49, %v6375_v58 }
 0x6ed   : > { %v6132_v57 = vadd.f32 %v6131_v17, %v13136_v23  ;;  %v6133_v18 = vpop.f32.mrb[177].mxu0  ;;  %v11582_v17 = vld [vmem:[#allocation3 + $0x60] ss:$8 sps:$4 sm:$0xff]  }
 0x6ee   : > { %v6134_v45 = vadd.f32 %v6133_v18, %v13140_v4  ;;  %v6135_v61 = vpop.f32.mrb[178].mxu0 }
 0x6ef   : > { %v6136_v9 = vadd.f32 %v6135_v61, %v13136_v23  ;;  %v6137_v34 = vpop.f32.mrb[179].mxu0  ;;  %v6378_v53 = vmax.f32 %v6132_v57, 0.0 }
 0x6f0   : > { %v6138_v50 = vadd.f32 %v6137_v34, %v13140_v4  ;;  %v6379_v56 = vmax.f32 %v6134_v45, 0.0 }
 0x6f1   : > { %v6380_v44 = vmax.f32 %v6136_v9, 0.0  ;;  %6831 = vmatmul.mubr.bf16.gmra.mrb[28].mxu0 %v13225_v13  ;;  %v11587_v9 = vld [vmem:[#allocation3 + $0x74] ss:$8 sps:$4 sm:$0xff]  }
 0x6f2   : > { %v6381_v2 = vmax.f32 %v6138_v50, 0.0  ;;  %6840 = vmatprep.mubr.bf16.mxu0 %v13237_v12  ;;  %v11575_v12 = vld [vmem:[#allocation3 + $0x34] ss:$8 sps:$4 sm:$0xff]  }
 0x6f3   : > { %v13275_v22 = vpack.c.bf16 %v6380_v44, %v6378_v53  ;;  %10991 = vmatprep.subr.bf16.mxu1 %v11575_v12  ;;  %7886 = vmatprep.subr.bf16.mxu0 %v11575_v12  ;;  %v11585_v53 = vld [vmem:[#allocation3 + $0x70] ss:$8 sps:$4 sm:$0xff]  }
 0x6f4   : > { %v6141_v48 = vpop.f32.mrb[180].mxu0  ;;  %v13277_v43 = vpack.c.bf16 %v6381_v2, %v6379_v56  ;;  %11007 = vmatpush1.bf16.msra.mxu1 %v11573_v10  ;;  %7887 = vmatpush1.bf16.msra.mxu0 %v11573_v10 }
 0x6f5   : > { %v6142_v8 = vadd.f32 %v6141_v48, %v13136_v23  ;;  %v6143_v16 = vpop.f32.mrb[181].mxu0  ;;  %10992 = vmatprep.subr.bf16.mxu1 %v11578_v36  ;;  %7888 = vmatprep.subr.bf16.mxu0 %v11578_v36 }
 0x6f6   : > { %v6144_v7 = vadd.f32 %v6143_v16, %v13140_v4  ;;  %v6145_v24 = vpop.f32.mrb[182].mxu0  ;;  %v11590_v16 = vld [vmem:[#allocation3 + $0x84] ss:$8 sps:$4 sm:$0xff]  }
 0x6f7   : > { %v6146_v51 = vadd.f32 %v6145_v24, %v13136_v23  ;;  %v6147_v47 = vpop.f32.mrb[183].mxu0  ;;  %v6382_v59 = vmax.f32 %v6142_v8, 0.0  ;;  %v11588_v24 = vld [vmem:[#allocation3 + $0x80] ss:$8 sps:$4 sm:$0xff]  }
 0x6f8   : > { %v6148_v13 = vadd.f32 %v6147_v47, %v13140_v4  ;;  %v6383_v32 = vmax.f32 %v6144_v7, 0.0  ;;  %11008 = vmatpush1.bf16.msra.mxu1 %v11576_v25  ;;  %7889 = vmatpush1.bf16.msra.mxu0 %v11576_v25  ;;  %v11594_v25 = vld [vmem:[#allocation3 + $0xa0] ss:$8 sps:$4 sm:$0xff]  }
 0x6f9   : > { %v6384_v62 = vmax.f32 %v6146_v51, 0.0  ;;  %6841 = vmatmul.mubr.bf16.gmra.mrb[32].mxu0 %v13235_v0  ;;  %10993 = vmatprep.subr.bf16.mxu1 %v11581_v39 }
 0x6fa   : > { %v6385_v55 = vmax.f32 %v6148_v13, 0.0  ;;  %6850 = vmatprep.mubr.bf16.mxu0 %v13247_v63  ;;  %7890 = vmatprep.subr.bf16.mxu0 %v11581_v39 }
 0x6fb   : > { %v13285_v3 = vpack.c.bf16 %v6384_v62, %v6382_v59  ;;  %v11593_v62 = vld [vmem:[#allocation3 + $0x94] ss:$8 sps:$4 sm:$0xff]  }
 0x6fc   : > { %v6151_v20 = vpop.f32.mrb[184].mxu0  ;;  %v13287_v31 = vpack.c.bf16 %v6385_v55, %v6383_v32  ;;  %11009 = vmatpush1.bf16.msra.mxu1 %v11579_v30  ;;  %7891 = vmatpush1.bf16.msra.mxu0 %v11579_v30  ;;  %v11591_v55 = vld [vmem:[#allocation3 + $0x90] ss:$8 sps:$4 sm:$0xff]  }
 0x6fd   : > { %v6152_v37 = vadd.f32 %v6151_v20, %v13136_v23  ;;  %v6153_v26 = vpop.f32.mrb[185].mxu0  ;;  %10994 = vmatprep.subr.bf16.mxu1 %v11584_v46  ;;  %7892 = vmatprep.subr.bf16.mxu0 %v11584_v46 }
 0x6fe   : > { %v6154_v0 = vadd.f32 %v6153_v26, %v13140_v4  ;;  %v6155_v11 = vpop.f32.mrb[186].mxu0 }
 0x6ff   : > { %v6156_v63 = vadd.f32 %v6155_v11, %v13136_v23  ;;  %v6157_v21 = vpop.f32.mrb[187].mxu0  ;;  %v6386_v54 = vmax.f32 %v6152_v37, 0.0 }
 0x700   : > { %v6158_v19 = vadd.f32 %v6157_v21, %v13140_v4  ;;  %v6387_v29 = vmax.f32 %v6154_v0, 0.0  ;;  %11010 = vmatpush1.bf16.msra.mxu1 %v11582_v17  ;;  %7893 = vmatpush1.bf16.msra.mxu0 %v11582_v17  ;;  %v11596_v0 = vld [vmem:[#allocation3 + $0xa4] ss:$8 sps:$4 sm:$0xff]   ;;  %v11600_v17 = vld [vmem:[#allocation3 + $0xc0] ss:$8 sps:$4 sm:$0xff]  }
 0x701   : > { %v6388_v38 = vmax.f32 %v6156_v63, 0.0  ;;  %6851 = vmatmul.mubr.bf16.gmra.mrb[36].mxu0 %v13245_v40  ;;  %10995 = vmatprep.subr.bf16.mxu1 %v11587_v9 }
 0x702   : > { %v6389_v6 = vmax.f32 %v6158_v19, 0.0  ;;  %6860 = vmatprep.mubr.bf16.mxu0 %v13257_v15  ;;  %7894 = vmatprep.subr.bf16.mxu0 %v11587_v9 }
 0x703   : > { %v13295_v42 = vpack.c.bf16 %v6388_v38, %v6386_v54  ;;  %v11599_v38 = vld [vmem:[#allocation3 + $0xb4] ss:$8 sps:$4 sm:$0xff]  }
 0x704   : > { %v6161_v60 = vpop.f32.mrb[188].mxu0  ;;  %v13297_v41 = vpack.c.bf16 %v6389_v6, %v6387_v29  ;;  %11011 = vmatpush1.bf16.msra.mxu1 %v11585_v53  ;;  %7895 = vmatpush1.bf16.msra.mxu0 %v11585_v53  ;;  %v11597_v6 = vld [vmem:[#allocation3 + $0xb0] ss:$8 sps:$4 sm:$0xff]  }
 0x705   : > { %v6162_v58 = vadd.f32 %v6161_v60, %v13136_v23  ;;  %v6163_v49 = vpop.f32.mrb[189].mxu0  ;;  %10996 = vmatprep.subr.bf16.mxu1 %v11590_v16  ;;  %7896 = vmatprep.subr.bf16.mxu0 %v11590_v16 }
 0x706   : > { %v6164_v40 = vadd.f32 %v6163_v49, %v13140_v4  ;;  %v6165_v28 = vpop.f32.mrb[190].mxu0 }
 0x707   : > { %v6166_v15 = vadd.f32 %v6165_v28, %v13136_v23  ;;  %v6167_v57 = vpop.f32.mrb[191].mxu0  ;;  %v6390_v45 = vmax.f32 %v6162_v58, 0.0 }
 0x708   : > { %v6168_v18 = vadd.f32 %v6167_v57, %v13140_v4  ;;  %v6391_v34 = vmax.f32 %v6164_v40, 0.0  ;;  %11012 = vmatpush1.bf16.msra.mxu1 %v11588_v24  ;;  %7897 = vmatpush1.bf16.msra.mxu0 %v11588_v24  ;;  %v11602_v40 = vld [vmem:[#allocation3 + $0xc4] ss:$8 sps:$4 sm:$0xff]   ;;  %v11606_v24 = vld [vmem:[#allocation3 + $0xe0] ss:$8 sps:$4 sm:$0xff]  }
 0x709   : > { %v6392_v61 = vmax.f32 %v6166_v15, 0.0  ;;  %6861 = vmatmul.mubr.bf16.gmra.mrb[40].mxu0 %v13255_v14  ;;  %10997 = vmatprep.subr.bf16.mxu1 %v11593_v62 }
 0x70a   : > { %v6393_v50 = vmax.f32 %v6168_v18, 0.0  ;;  %6870 = vmatprep.mubr.bf16.mxu0 %v13267_v52  ;;  %7898 = vmatprep.subr.bf16.mxu0 %v11593_v62 }
 0x70b   : > { %v13305_v44 = vpack.c.bf16 %v6392_v61, %v6390_v45  ;;  %v11605_v61 = vld [vmem:[#allocation3 + $0xd4] ss:$8 sps:$4 sm:$0xff]  }
 0x70c   : > { %v6171_v56 = vpop.f32.mrb[192].mxu0  ;;  %v13307_v2 = vpack.c.bf16 %v6393_v50, %v6391_v34  ;;  %11013 = vmatpush1.bf16.msra.mxu1 %v11591_v55  ;;  %7899 = vmatpush1.bf16.msra.mxu0 %v11591_v55  ;;  %v11603_v50 = vld [vmem:[#allocation3 + $0xd0] ss:$8 sps:$4 sm:$0xff]  }
 0x70d   : > { %v6172_v48 = vadd.f32 %v6171_v56, %v13136_v23  ;;  %v6173_v8 = vpop.f32.mrb[193].mxu0  ;;  %10998 = vmatprep.subr.bf16.mxu1 %v11596_v0  ;;  %7900 = vmatprep.subr.bf16.mxu0 %v11596_v0 }
 0x70e   : > { %v6174_v14 = vadd.f32 %v6173_v8, %v13140_v4  ;;  %v6175_v7 = vpop.f32.mrb[194].mxu0 }
 0x70f   : > { %v6176_v52 = vadd.f32 %v6175_v7, %v13136_v23  ;;  %v6177_v51 = vpop.f32.mrb[195].mxu0  ;;  %v6394_v13 = vmax.f32 %v6172_v48, 0.0 }
 0x710   : > { %v6178_v47 = vadd.f32 %v6177_v51, %v13140_v4  ;;  %v6395_v12 = vmax.f32 %v6174_v14, 0.0  ;;  %11014 = vmatpush1.bf16.msra.mxu1 %v11594_v25  ;;  %7901 = vmatpush1.bf16.msra.mxu0 %v11594_v25  ;;  %v11608_v14 = vld [vmem:[#allocation3 + $0xe4] ss:$8 sps:$4 sm:$0xff]  }
 0x711   : > { %v6396_v59 = vmax.f32 %v6176_v52, 0.0  ;;  %6871 = vmatmul.mubr.bf16.gmra.mrb[44].mxu0 %v13265_v27  ;;  %10999 = vmatprep.subr.bf16.mxu1 %v11599_v38 }
 0x712   : > { %v6397_v32 = vmax.f32 %v6178_v47, 0.0  ;;  %6880 = vmatprep.mubr.bf16.mxu0 %v13277_v43  ;;  %7902 = vmatprep.subr.bf16.mxu0 %v11599_v38 }
 0x713   : > { %v13315_v10 = vpack.c.bf16 %v6396_v59, %v6394_v13  ;;  %v11611_v59 = vld [vmem:[#allocation3 + $0xf4] ss:$8 sps:$4 sm:$0xff]  }
 0x714   : > { %v6181_v20 = vpop.f32.mrb[196].mxu0  ;;  %v13317_v37 = vpack.c.bf16 %v6397_v32, %v6395_v12  ;;  %11015 = vmatpush1.bf16.msra.mxu1 %v11597_v6  ;;  %7903 = vmatpush1.bf16.msra.mxu0 %v11597_v6  ;;  %v11609_v32 = vld [vmem:[#allocation3 + $0xf0] ss:$8 sps:$4 sm:$0xff]  }
 0x715   : > { %v6182_v26 = vadd.f32 %v6181_v20, %v13136_v23  ;;  %v6183_v36 = vpop.f32.mrb[197].mxu0  ;;  %11000 = vmatprep.subr.bf16.mxu1 %v11602_v40  ;;  %7904 = vmatprep.subr.bf16.mxu0 %v11602_v40 }
 0x716   : > { %v6184_v27 = vadd.f32 %v6183_v36, %v13140_v4  ;;  %v6185_v11 = vpop.f32.mrb[198].mxu0 }
 0x717   : > { %v6186_v43 = vadd.f32 %v6185_v11, %v13136_v23  ;;  %v6187_v63 = vpop.f32.mrb[199].mxu0  ;;  %v6398_v19 = vmax.f32 %v6182_v26, 0.0 }
 0x718   : > { %v6188_v21 = vadd.f32 %v6187_v63, %v13140_v4  ;;  %v6399_v39 = vmax.f32 %v6184_v27, 0.0  ;;  %11016 = vmatpush1.bf16.msra.mxu1 %v11600_v17  ;;  %7905 = vmatpush1.bf16.msra.mxu0 %v11600_v17 }
 0x719   : > { %v6400_v54 = vmax.f32 %v6186_v43, 0.0  ;;  %6881 = vmatmul.mubr.bf16.gmra.mrb[48].mxu0 %v13275_v22  ;;  %11001 = vmatprep.subr.bf16.mxu1 %v11605_v61 }
 0x71a   : > { %v6401_v29 = vmax.f32 %v6188_v21, 0.0  ;;  %6890 = vmatprep.mubr.bf16.mxu0 %v13287_v31  ;;  %7906 = vmatprep.subr.bf16.mxu0 %v11605_v61 }
 0x71b   : > { %v13325_v30 = vpack.c.bf16 %v6400_v54, %v6398_v19 }
 0x71c   : > { %v6191_v60 = vpop.f32.mrb[200].mxu0  ;;  %v13327_v58 = vpack.c.bf16 %v6401_v29, %v6399_v39  ;;  %11017 = vmatpush1.bf16.msra.mxu1 %v11603_v50  ;;  %7907 = vmatpush1.bf16.msra.mxu0 %v11603_v50 }
 0x71d   : > { %v6192_v49 = vadd.f32 %v6191_v60, %v13136_v23  ;;  %v6193_v46 = vpop.f32.mrb[201].mxu0  ;;  %11002 = vmatprep.subr.bf16.mxu1 %v11608_v14  ;;  %7908 = vmatprep.subr.bf16.mxu0 %v11608_v14 }
 0x71e   : > { %v6194_v22 = vadd.f32 %v6193_v46, %v13140_v4  ;;  %v6195_v28 = vpop.f32.mrb[202].mxu0 }
 0x71f   : > { %v6196_v31 = vadd.f32 %v6195_v28, %v13136_v23  ;;  %v6197_v15 = vpop.f32.mrb[203].mxu0  ;;  %v6402_v18 = vmax.f32 %v6192_v49, 0.0 }
 0x720   : > { %v6198_v57 = vadd.f32 %v6197_v15, %v13140_v4  ;;  %v6403_v9 = vmax.f32 %v6194_v22, 0.0  ;;  %11018 = vmatpush1.bf16.msra.mxu1 %v11606_v24  ;;  %7909 = vmatpush1.bf16.msra.mxu0 %v11606_v24 }
 0x721   : > { %v6404_v45 = vmax.f32 %v6196_v31, 0.0  ;;  %6891 = vmatmul.mubr.bf16.gmra.mrb[52].mxu0 %v13285_v3  ;;  %11003 = vmatprep.subr.bf16.mxu1 %v11611_v59 }
 0x722   : > { %v6405_v34 = vmax.f32 %v6198_v57, 0.0  ;;  %6900 = vmatprep.mubr.bf16.mxu0 %v13297_v41  ;;  %7910 = vmatprep.subr.bf16.mxu0 %v11611_v59 }
 0x723   : > { %v13335_v53 = vpack.c.bf16 %v6404_v45, %v6402_v18 }
 0x724   : > { %v6201_v56 = vpop.f32.mrb[204].mxu0  ;;  %v13337_v48 = vpack.c.bf16 %v6405_v34, %v6403_v9  ;;  %11019 = vmatpush1.bf16.msra.mxu1 %v11609_v32  ;;  %7911 = vmatpush1.bf16.msra.mxu0 %v11609_v32 }
 0x725   : > { %v6202_v8 = vadd.f32 %v6201_v56, %v13136_v23  ;;  %v6203_v16 = vpop.f32.mrb[205].mxu0  ;;  %8993 = vmatprep.subr.bf16.mxu1 %v11748_v1 }
 0x726   : > { %v6204_v3 = vadd.f32 %v6203_v16, %v13140_v4  ;;  %v6205_v7 = vpop.f32.mrb[206].mxu0 }
 0x727   : > { %v6206_v41 = vadd.f32 %v6205_v7, %v13136_v23  ;;  %v6207_v52 = vpop.f32.mrb[207].mxu0  ;;  %v6406_v47 = vmax.f32 %v6202_v8, 0.0 }
 0x728   : > { %v6208_v51 = vadd.f32 %v6207_v52, %v13140_v4  ;;  %v6407_v62 = vmax.f32 %v6204_v3, 0.0 }
 0x729   : > { %v6408_v13 = vmax.f32 %v6206_v41, 0.0  ;;  %6901 = vmatmul.mubr.bf16.gmra.mrb[56].mxu0 %v13295_v42 }
 0x72a   : > { %v6409_v12 = vmax.f32 %v6208_v51, 0.0  ;;  %6910 = vmatprep.mubr.bf16.mxu0 %v13307_v2 }
 0x72b   : > { %v13345_v55 = vpack.c.bf16 %v6408_v13, %v6406_v47 }
 0x72c   : > { %v6211_v20 = vpop.f32.mrb[208].mxu0  ;;  %v13347_v26 = vpack.c.bf16 %v6409_v12, %v6407_v62 }
 0x72d   : > { %v6212_v36 = vadd.f32 %v6211_v20, %v13136_v23  ;;  %v6213_v0 = vpop.f32.mrb[209].mxu0 }
 0x72e   : > { %v6214_v42 = vadd.f32 %v6213_v0, %v13140_v4  ;;  %v6215_v27 = vpop.f32.mrb[210].mxu0 }
 0x72f   : > { %v6216_v2 = vadd.f32 %v6215_v27, %v13136_v23  ;;  %v6217_v11 = vpop.f32.mrb[211].mxu0  ;;  %v6410_v43 = vmax.f32 %v6212_v36, 0.0 }
 0x730   : > { %v6218_v25 = vadd.f32 %v6217_v11, %v13140_v4  ;;  %v6411_v21 = vmax.f32 %v6214_v42, 0.0 }
 0x731   : > { %v6412_v63 = vmax.f32 %v6216_v2, 0.0  ;;  %6911 = vmatmul.mubr.bf16.gmra.mrb[60].mxu0 %v13305_v44 }
 0x732   : > { %v6413_v19 = vmax.f32 %v6218_v25, 0.0  ;;  %6920 = vmatprep.mubr.bf16.mxu0 %v13317_v37 }
 0x733   : > { %v13356_v54 = vpack.c.bf16 %v6412_v63, %v6410_v43 }
 0x734   : > { %v6221_v38 = vpop.f32.mrb[212].mxu0  ;;  %v6499_v39 = vpack.c.bf16 %v6413_v19, %v6411_v21 }
 0x735   : > { %v6222_v29 = vadd.f32 %v6221_v38, %v13136_v23  ;;  %v6223_v6 = vpop.f32.mrb[213].mxu0 }
 0x736   : > { %v6224_v60 = vadd.f32 %v6223_v6, %v13140_v4  ;;  %v6225_v49 = vpop.f32.mrb[214].mxu0 }
 0x737   : > { %v6226_v46 = vadd.f32 %v6225_v49, %v13136_v23  ;;  %v6227_v40 = vpop.f32.mrb[215].mxu0  ;;  %v6414_v44 = vmax.f32 %v6222_v29, 0.0 }
 0x738   : > { %v6228_v22 = vadd.f32 %v6227_v40, %v13140_v4  ;;  %v6415_v37 = vmax.f32 %v6224_v60, 0.0 }
 0x739   : > { %v6416_v28 = vmax.f32 %v6226_v46, 0.0  ;;  %6921 = vmatmul.mubr.bf16.gmra.mrb[64].mxu0 %v13315_v10 }
 0x73a   : > { %v6417_v17 = vmax.f32 %v6228_v22, 0.0  ;;  %6930 = vmatprep.mubr.bf16.mxu0 %v13327_v58 }
 0x73b   : > { %v13364_v31 = vpack.c.bf16 %v6416_v28, %v6414_v44 }
 0x73c   : > { %v6231_v15 = vpop.f32.mrb[216].mxu0  ;;  %v6501_v57 = vpack.c.bf16 %v6417_v17, %v6415_v37 }
 0x73d   : > { %v6232_v18 = vadd.f32 %v6231_v15, %v13136_v23  ;;  %v6233_v45 = vpop.f32.mrb[217].mxu0 }
 0x73e   : > { %v6234_v61 = vadd.f32 %v6233_v45, %v13140_v4  ;;  %v6235_v9 = vpop.f32.mrb[218].mxu0 }
 0x73f   : > { %v6236_v34 = vadd.f32 %v6235_v9, %v13136_v23  ;;  %v6237_v50 = vpop.f32.mrb[219].mxu0  ;;  %v6418_v10 = vmax.f32 %v6232_v18, 0.0 }
 0x740   : > { %v6238_v56 = vadd.f32 %v6237_v50, %v13140_v4  ;;  %v6419_v58 = vmax.f32 %v6234_v61, 0.0 }
 0x741   : > { %v6420_v8 = vmax.f32 %v6236_v34, 0.0  ;;  %6931 = vmatmul.mubr.bf16.gmra.mrb[68].mxu0 %v13325_v30 }
 0x742   : > { %v6421_v16 = vmax.f32 %v6238_v56, 0.0  ;;  %6940 = vmatprep.mubr.bf16.mxu0 %v13337_v48 }
 0x743   : > { %v13372_v14 = vpack.c.bf16 %v6420_v8, %v6418_v10 }
 0x744   : > { %v6241_v3 = vpop.f32.mrb[220].mxu0  ;;  %v6503_v7 = vpack.c.bf16 %v6421_v16, %v6419_v58 }
 0x745   : > { %v6242_v24 = vadd.f32 %v6241_v3, %v13136_v23  ;;  %v6243_v41 = vpop.f32.mrb[221].mxu0 }
 0x746   : > { %v6244_v52 = vadd.f32 %v6243_v41, %v13140_v4  ;;  %v6245_v51 = vpop.f32.mrb[222].mxu0 }
 0x747   : > { %v6246_v47 = vadd.f32 %v6245_v51, %v13136_v23  ;;  %v6247_v13 = vpop.f32.mrb[223].mxu0  ;;  %v6422_v30 = vmax.f32 %v6242_v24, 0.0 }
 0x748   : > { %v6248_v59 = vadd.f32 %v6247_v13, %v13140_v4  ;;  %v6423_v48 = vmax.f32 %v6244_v52, 0.0 }
 0x749   : > { %v6424_v62 = vmax.f32 %v6246_v47, 0.0  ;;  %6941 = vmatmul.mubr.bf16.gmra.mrb[72].mxu0 %v13335_v53 }
 0x74a   : > { %v6425_v12 = vmax.f32 %v6248_v59, 0.0  ;;  %6950 = vmatprep.mubr.bf16.mxu0 %v13347_v26 }
 0x74b   : > { %v13380_v32 = vpack.c.bf16 %v6424_v62, %v6422_v30 }
 0x74c   : > { %v6251_v20 = vpop.f32.mrb[224].mxu0  ;;  %v6505_v36 = vpack.c.bf16 %v6425_v12, %v6423_v48 }
 0x74d   : > { %v6252_v0 = vadd.f32 %v6251_v20, %v13136_v23  ;;  %v6253_v42 = vpop.f32.mrb[225].mxu0 }
 0x74e   : > { %v6254_v27 = vadd.f32 %v6253_v42, %v13140_v4  ;;  %v6255_v2 = vpop.f32.mrb[226].mxu0 }
 0x74f   : > { %v6256_v11 = vadd.f32 %v6255_v2, %v13136_v23  ;;  %v6257_v25 = vpop.f32.mrb[227].mxu0  ;;  %v6426_v53 = vmax.f32 %v6252_v0, 0.0 }
 0x750   : > { %v6258_v43 = vadd.f32 %v6257_v25, %v13140_v4  ;;  %v6427_v26 = vmax.f32 %v6254_v27, 0.0 }
 0x751   : > { %v6428_v63 = vmax.f32 %v6256_v11, 0.0  ;;  %6951 = vmatmul.mubr.bf16.gmra.mrb[76].mxu0 %v13345_v55 }
 0x752   : > { %v6429_v21 = vmax.f32 %v6258_v43, 0.0  ;;  %6960 = vmatprep.mubr.bf16.mxu0 %v6499_v39 }
 0x753   : > { %v13387_v19 = vpack.c.bf16 %v6428_v63, %v6426_v53 }
 0x754   : > { %v6261_v38 = vpop.f32.mrb[228].mxu0  ;;  %v6507_v29 = vpack.c.bf16 %v6429_v21, %v6427_v26 }
 0x755   : > { %v6262_v6 = vadd.f32 %v6261_v38, %v13136_v23  ;;  %v6263_v60 = vpop.f32.mrb[229].mxu0 }
 0x756   : > { %v6264_v49 = vadd.f32 %v6263_v60, %v13140_v4  ;;  %v6265_v46 = vpop.f32.mrb[230].mxu0 }
 0x757   : > { %v6266_v40 = vadd.f32 %v6265_v46, %v13136_v23  ;;  %v6267_v22 = vpop.f32.mrb[231].mxu0  ;;  %v6430_v28 = vmax.f32 %v6262_v6, 0.0 }
 0x758   : > { %v6268_v44 = vadd.f32 %v6267_v22, %v13140_v4  ;;  %v6431_v39 = vmax.f32 %v6264_v49, 0.0 }
 0x759   : > { %v6432_v55 = vmax.f32 %v6266_v40, 0.0  ;;  %6961 = vmatmul.mubr.bf16.gmra.mrb[80].mxu0 %v13356_v54 }
 0x75a   : > { %v6433_v37 = vmax.f32 %v6268_v44, 0.0  ;;  %6970 = vmatprep.mubr.bf16.mxu0 %v6501_v57 }
 0x75b   : > { %v13394_v17 = vpack.c.bf16 %v6432_v55, %v6430_v28 }
 0x75c   : > { %v6271_v15 = vpop.f32.mrb[232].mxu0  ;;  %v6509_v18 = vpack.c.bf16 %v6433_v37, %v6431_v39 }
 0x75d   : > { %v6272_v45 = vadd.f32 %v6271_v15, %v13136_v23  ;;  %v6273_v61 = vpop.f32.mrb[233].mxu0 }
 0x75e   : > { %v6274_v9 = vadd.f32 %v6273_v61, %v13140_v4  ;;  %v6275_v34 = vpop.f32.mrb[234].mxu0 }
 0x75f   : > { %v6276_v50 = vadd.f32 %v6275_v34, %v13136_v23  ;;  %v6277_v56 = vpop.f32.mrb[235].mxu0  ;;  %v6434_v8 = vmax.f32 %v6272_v45, 0.0 }
 0x760   : > { %v6278_v10 = vadd.f32 %v6277_v56, %v13140_v4  ;;  %v6435_v57 = vmax.f32 %v6274_v9, 0.0 }
 0x761   : > { %v6436_v54 = vmax.f32 %v6276_v50, 0.0  ;;  %6971 = vmatmul.mubr.bf16.gmra.mrb[84].mxu0 %v13364_v31 }
 0x762   : > { %v6437_v58 = vmax.f32 %v6278_v10, 0.0  ;;  %6980 = vmatprep.mubr.bf16.mxu0 %v6503_v7 }
 0x763   : > { %v13401_v16 = vpack.c.bf16 %v6436_v54, %v6434_v8 }
 0x764   : > { %v6281_v3 = vpop.f32.mrb[236].mxu0  ;;  %v6511_v24 = vpack.c.bf16 %v6437_v58, %v6435_v57 }
 0x765   : > { %v6282_v41 = vadd.f32 %v6281_v3, %v13136_v23  ;;  %v6283_v52 = vpop.f32.mrb[237].mxu0 }
 0x766   : > { %v6284_v51 = vadd.f32 %v6283_v52, %v13140_v4  ;;  %v6285_v47 = vpop.f32.mrb[238].mxu0 }
 0x767   : > { %v6286_v13 = vadd.f32 %v6285_v47, %v13136_v23  ;;  %v6287_v59 = vpop.f32.mrb[239].mxu0  ;;  %v6438_v62 = vmax.f32 %v6282_v41, 0.0 }
 0x768   : > { %v6288_v30 = vadd.f32 %v6287_v59, %v13140_v4  ;;  %v6439_v7 = vmax.f32 %v6284_v51, 0.0  ;;  %v10606_v59 = vld [vmem:[%s15529_s4 + $0xe] sm:$0x3] }
 0x769   : > { %v6440_v31 = vmax.f32 %v6286_v13, 0.0  ;;  %6981 = vmatmul.mubr.bf16.gmra.mrb[88].mxu0 %v13372_v14 }
 0x76a   : > { %v6441_v48 = vmax.f32 %v6288_v30, 0.0  ;;  %6990 = vmatprep.mubr.bf16.mxu0 %v6505_v36 }
 0x76b   : > { %v13408_v12 = vpack.c.bf16 %v6440_v31, %v6438_v62 }
 0x76c   : > { %v6291_v20 = vpop.f32.mrb[240].mxu0  ;;  %v6513_v0 = vpack.c.bf16 %v6441_v48, %v6439_v7  ;;  %v13446_v7 = vrot.slane %v10606_v59, %v11993_v33 }
 0x76d   : > { %v6292_v42 = vadd.f32 %v6291_v20, %v13136_v23  ;;  %v6293_v27 = vpop.f32.mrb[241].mxu0 }
 0x76e   : > { %v6294_v2 = vadd.f32 %v6293_v27, %v13140_v4  ;;  %v6295_v11 = vpop.f32.mrb[242].mxu0 }
 0x76f   : > { %v6296_v25 = vadd.f32 %v6295_v11, %v13136_v23  ;;  %v6297_v43 = vpop.f32.mrb[243].mxu0  ;;  %v6442_v63 = vmax.f32 %v6292_v42, 0.0  ;;  %v13449_v42 = vrot.slane %v10606_v59, %v11998_v35 }
 0x770   : > { %v6298_v53 = vadd.f32 %v6297_v43, %v13140_v4  ;;  %v6443_v36 = vmax.f32 %v6294_v2, 0.0 }
 0x771   : > { %v6444_v14 = vmax.f32 %v6296_v25, 0.0  ;;  %6991 = vmatmul.mubr.bf16.gmra.mrb[92].mxu0 %v13380_v32 }
 0x772   : > { %v6445_v26 = vmax.f32 %v6298_v53, 0.0  ;;  %7000 = vmatprep.mubr.bf16.mxu0 %v6507_v29 }
 0x773   : > { %v13415_v21 = vpack.c.bf16 %v6444_v14, %v6442_v63 }
 0x774   : > { %v6301_v38 = vpop.f32.mrb[244].mxu0  ;;  %v13417_v6 = vpack.c.bf16 %v6445_v26, %v6443_v36 }
 0x775   : > { %v6302_v60 = vadd.f32 %v6301_v38, %v13136_v23  ;;  %v6303_v49 = vpop.f32.mrb[245].mxu0 }
 0x776   : > { %v6304_v46 = vadd.f32 %v6303_v49, %v13140_v4  ;;  %v6305_v40 = vpop.f32.mrb[246].mxu0 }
 0x777   : > { %v6306_v22 = vadd.f32 %v6305_v40, %v13136_v23  ;;  %v6307_v44 = vpop.f32.mrb[247].mxu0  ;;  %v6446_v32 = vmax.f32 %v6302_v60, 0.0 }
 0x778   : > { %v6308_v28 = vadd.f32 %v6307_v44, %v13140_v4  ;;  %v6447_v29 = vmax.f32 %v6304_v46, 0.0 }
 0x779   : > { %v6448_v55 = vmax.f32 %v6306_v22, 0.0  ;;  %7001 = vmatmul.mubr.bf16.gmra.mrb[96].mxu0 %v13387_v19 }
 0x77a   : > { %v6449_v39 = vmax.f32 %v6308_v28, 0.0  ;;  %7010 = vmatprep.mubr.bf16.mxu0 %v6509_v18 }
 0x77b   : > { %v13424_v37 = vpack.c.bf16 %v6448_v55, %v6446_v32 }
 0x77c   : > { %v6311_v15 = vpop.f32.mrb[248].mxu0  ;;  %v13426_v45 = vpack.c.bf16 %v6449_v39, %v6447_v29 }
 0x77d   : > { %v6312_v61 = vadd.f32 %v6311_v15, %v13136_v23  ;;  %v6313_v9 = vpop.f32.mrb[249].mxu0 }
 0x77e   : > { %v6314_v34 = vadd.f32 %v6313_v9, %v13140_v4  ;;  %v6315_v50 = vpop.f32.mrb[250].mxu0 }
 0x77f   : > { %v6316_v56 = vadd.f32 %v6315_v50, %v13136_v23  ;;  %v6317_v10 = vpop.f32.mrb[251].mxu0  ;;  %v6450_v19 = vmax.f32 %v6312_v61, 0.0 }
 0x780   : > { %v6318_v8 = vadd.f32 %v6317_v10, %v13140_v4  ;;  %v6451_v18 = vmax.f32 %v6314_v34, 0.0 }
 0x781   : > { %v6452_v54 = vmax.f32 %v6316_v56, 0.0  ;;  %7011 = vmatmul.mubr.bf16.gmra.mrb[100].mxu0 %v13394_v17 }
 0x782   : > { %v6453_v57 = vmax.f32 %v6318_v8, 0.0  ;;  %7020 = vmatprep.mubr.bf16.mxu0 %v6511_v24 }
 0x783   : > { %v13433_v58 = vpack.c.bf16 %v6452_v54, %v6450_v19 }
 0x784   : > { %v6321_v3 = vpop.f32.mrb[252].mxu0  ;;  %v13435_v41 = vpack.c.bf16 %v6453_v57, %v6451_v18 }
 0x785   : > { %v6322_v52 = vadd.f32 %v6321_v3, %v13136_v23  ;;  %v6323_v51 = vpop.f32.mrb[253].mxu0 }
 0x786   : > { %v6324_v47 = vadd.f32 %v6323_v51, %v13140_v4  ;;  %v6325_v13 = vpop.f32.mrb[254].mxu0 }
 0x787   : > { %v6326_v17 = vadd.f32 %v6325_v13, %v13136_v23  ;;  %v6327_v30 = vpop.f32.mrb[255].mxu0  ;;  %v6454_v62 = vmax.f32 %v6322_v52, 0.0  ;;  %v7273_v23 = vld [vmem:[%s15530_s5] sm:$0x3] }
 0x788   : > { %v6328_v24 = vadd.f32 %v6327_v30, %v13140_v4  ;;  %v6455_v48 = vmax.f32 %v6324_v47, 0.0  ;;  %v13460_v25 = vrot.slane %v7273_v23, %v11993_v33  ;;  %v13464_v53 = vrot.slane %v7273_v23, %v11998_v35 }
 0x789   : > { %v6456_v31 = vmax.f32 %v6326_v17, 0.0  ;;  %7021 = vmatmul.mubr.bf16.gmra.mrb[104].mxu0 %v13401_v16 }
 0x78a   : > { %v6457_v20 = vmax.f32 %v6328_v24, 0.0  ;;  %7030 = vmatprep.mubr.bf16.mxu0 %v6513_v0 }
 0x78b   : > { %v13454_v27 = vpack.c.bf16 %v6456_v31, %v6454_v62 }
 0x78c   : > { %v6762_v4 = vpop.f32.mrb[0].mxu0  ;;  %v13456_v2 = vpack.c.bf16 %v6457_v20, %v6455_v48 }
 0x78d   : > { %v6763_v16 = vadd.f32 %v6762_v4, %v13446_v7  ;;  %v6764_v11 = vpop.f32.mrb[1].mxu0 }
 0x78e   : > { %v6765_v0 = vadd.f32 %v6764_v11, %v13449_v42  ;;  %v6766_v43 = vpop.f32.mrb[2].mxu0 }
 0x78f   : > { %v6767_v63 = vadd.f32 %v6766_v43, %v13446_v7  ;;  %v6768_v14 = vpop.f32.mrb[3].mxu0  ;;  %v7081_v36 = vmax.f32 %v6763_v16, 0.0 }
 0x790   : > { %v6769_v26 = vadd.f32 %v6768_v14, %v13449_v42  ;;  %v7082_v38 = vmax.f32 %v6765_v0, 0.0 }
 0x791   : > { %v7083_v60 = vmax.f32 %v6767_v63, 0.0  ;;  %7031 = vmatmul.mubr.bf16.gmra.mrb[108].mxu0 %v13408_v12  ;;  %v7285_v49 = vmul.f32 %v13460_v25, %v7081_v36 }
 0x792   : > { %v7084_v46 = vmax.f32 %v6769_v26, 0.0  ;;  %7040 = vmatprep.mubr.bf16.mxu0 %v13417_v6  ;;  %v7286_v40 = vmul.f32 %v13464_v53, %v7082_v38 }
 0x793   : > { %v13472_v22 = vpack.c.bf16 %v7083_v60, %v7081_v36  ;;  %v7287_v44 = vmul.f32 %v13460_v25, %v7083_v60 }
 0x794   : > { %v6772_v28 = vpop.f32.mrb[4].mxu0  ;;  %v7413_v32 = vadd.f32 %v7286_v40, %v7285_v49  ;;  %v7288_v55 = vmul.f32 %v13464_v53, %v7084_v46  ;;  %v13476_v29 = vpack.c.bf16 %v7084_v46, %v7082_v38 }
 0x795   : > { %v6773_v39 = vadd.f32 %v6772_v28, %v13446_v7  ;;  %v6774_v12 = vpop.f32.mrb[5].mxu0 }
 0x796   : > { %v6775_v15 = vadd.f32 %v6774_v12, %v13449_v42  ;;  %v6776_v61 = vpop.f32.mrb[6].mxu0  ;;  %7414 = vadd.xlane.f32.xlu0 %v7413_v32  ;;  %v7416_v6 = vadd.f32 %v7288_v55, %v7287_v44 }
 0x797   : > { %v6777_v9 = vadd.f32 %v6776_v61, %v13446_v7  ;;  %v6778_v34 = vpop.f32.mrb[7].mxu0  ;;  %v7085_v50 = vmax.f32 %v6773_v39, 0.0 }
 0x798   : > { %v6779_v56 = vadd.f32 %v6778_v34, %v13449_v42  ;;  %v7086_v10 = vmax.f32 %v6775_v15, 0.0 }
 0x799   : > { %v7087_v8 = vmax.f32 %v6777_v9, 0.0  ;;  %7041 = vmatmul.mubr.bf16.gmra.mrb[112].mxu0 %v13415_v21  ;;  %v7289_v19 = vmul.f32 %v13460_v25, %v7085_v50 }
 0x79a   : > { %v7088_v54 = vmax.f32 %v6779_v56, 0.0  ;;  %7050 = vmatprep.mubr.bf16.mxu0 %v13426_v45  ;;  %7417 = vadd.xlane.f32.xlu0 %v7416_v6  ;;  %v7290_v18 = vmul.f32 %v13464_v53, %v7086_v10 }
 0x79b   : > { %v13486_v57 = vpack.c.bf16 %v7087_v8, %v7085_v50  ;;  %v7291_v3 = vmul.f32 %v13460_v25, %v7087_v8 }
 0x79c   : > { %v6782_v52 = vpop.f32.mrb[8].mxu0  ;;  %v7419_v51 = vadd.f32 %v7290_v18, %v7289_v19  ;;  %v7292_v47 = vmul.f32 %v13464_v53, %v7088_v54  ;;  %v13490_v13 = vpack.c.bf16 %v7088_v54, %v7086_v10 }
 0x79d   : > { %v6783_v21 = vadd.f32 %v6782_v52, %v13446_v7  ;;  %v6784_v59 = vpop.f32.mrb[9].mxu0 }
 0x79e   : > { %v6785_v17 = vadd.f32 %v6784_v59, %v13449_v42  ;;  %v6786_v30 = vpop.f32.mrb[10].mxu0  ;;  %7420 = vadd.xlane.f32.xlu1 %v7419_v51  ;;  %v7422_v45 = vadd.f32 %v7292_v47, %v7291_v3 }
 0x79f   : > { %v7089_v24 = vmax.f32 %v6783_v21, 0.0  ;;  %v6787_v62 = vadd.f32 %v6786_v30, %v13446_v7  ;;  %v6788_v31 = vpop.f32.mrb[11].mxu0 }
 0x7a0   : > { %v7090_v48 = vmax.f32 %v6785_v17, 0.0  ;;  %v6789_v20 = vadd.f32 %v6788_v31, %v13449_v42 }
 0x7a1   : > { %v7091_v23 = vmax.f32 %v6787_v62, 0.0  ;;  %7051 = vmatmul.mubr.bf16.gmra.mrb[116].mxu0 %v13424_v37  ;;  %v7293_v4 = vmul.f32 %v13460_v25, %v7089_v24 }
 0x7a2   : > { %v7092_v16 = vmax.f32 %v6789_v20, 0.0  ;;  %7060 = vmatprep.mubr.bf16.mxu0 %v13435_v41  ;;  %7423 = vadd.xlane.f32.xlu1 %v7422_v45  ;;  %v7294_v11 = vmul.f32 %v13464_v53, %v7090_v48 }
 0x7a3   : > { %v13500_v0 = vpack.c.bf16 %v7091_v23, %v7089_v24  ;;  %v7295_v43 = vmul.f32 %v13460_v25, %v7091_v23 }
 0x7a4   : > { %v6792_v63 = vpop.f32.mrb[12].mxu0  ;;  %v7425_v14 = vadd.f32 %v7294_v11, %v7293_v4  ;;  %v7296_v36 = vmul.f32 %v13464_v53, %v7092_v16  ;;  %v13504_v26 = vpack.c.bf16 %v7092_v16, %v7090_v48 }
 0x7a5   : > { %v6793_v37 = vadd.f32 %v6792_v63, %v13446_v7  ;;  %v6794_v38 = vpop.f32.mrb[13].mxu0 }
 0x7a6   : > { %v6795_v60 = vadd.f32 %v6794_v38, %v13449_v42  ;;  %v6796_v49 = vpop.f32.mrb[14].mxu0  ;;  %7426 = vadd.xlane.f32.xlu0 %v7425_v14  ;;  %v7428_v41 = vadd.f32 %v7296_v36, %v7295_v43 }
 0x7a7   : > { %v7093_v46 = vmax.f32 %v6793_v37, 0.0  ;;  %v6797_v40 = vadd.f32 %v6796_v49, %v13446_v7  ;;  %v6798_v44 = vpop.f32.mrb[15].mxu0 }
 0x7a8   : > { %v7094_v28 = vmax.f32 %v6795_v60, 0.0  ;;  %v6799_v32 = vadd.f32 %v6798_v44, %v13449_v42  ;;  %7429 = vadd.xlane.f32.xlu1 %v7428_v41 }
 0x7a9   : > { %v7297_v55 = vmul.f32 %v13460_v25, %v7093_v46  ;;  %v7095_v39 = vmax.f32 %v6797_v40, 0.0  ;;  %7061 = vmatmul.mubr.bf16.gmra.mrb[120].mxu0 %v13433_v58 }
 0x7aa   : > { %v7298_v12 = vmul.f32 %v13464_v53, %v7094_v28  ;;  %v7096_v15 = vmax.f32 %v6799_v32, 0.0  ;;  %7070 = vmatprep.mubr.bf16.mxu0 %v13456_v2 }
 0x7ab   : > { %v7215_v61 = vpack.c.bf16 %v7095_v39, %v7093_v46  ;;  %v7299_v6 = vmul.f32 %v13460_v25, %v7095_v39 }
 0x7ac   : > { %v7216_v9 = vpack.c.bf16 %v7096_v15, %v7094_v28  ;;  %v7300_v34 = vmul.f32 %v13464_v53, %v7096_v15  ;;  %v6802_v50 = vpop.f32.mrb[16].mxu0  ;;  %v7431_v56 = vadd.f32 %v7298_v12, %v7297_v55 }
 0x7ad   : > { %v6803_v10 = vadd.f32 %v6802_v50, %v13446_v7  ;;  %v6804_v8 = vpop.f32.mrb[17].mxu0 }
 0x7ae   : > { %v6805_v19 = vadd.f32 %v6804_v8, %v13449_v42  ;;  %v6806_v54 = vpop.f32.mrb[18].mxu0  ;;  %7942 = vmatprep.mubr.bf16.mxu1 %v7216_v9  ;;  %7432 = vadd.xlane.f32.xlu0 %v7431_v56  ;;  %v7434_v58 = vadd.f32 %v7300_v34, %v7299_v6 }
 0x7af   : > { %v7097_v18 = vmax.f32 %v6803_v10, 0.0  ;;  %v6807_v2 = vadd.f32 %v6806_v54, %v13446_v7  ;;  %v6808_v3 = vpop.f32.mrb[19].mxu0  ;;  %7943 = vmatmul.mubr.bf16.vlgmr.msra.gmra.mrb[128].mxu1 %v7215_v61 }
 0x7b0   : > { %v7098_v52 = vmax.f32 %v6805_v19, 0.0  ;;  %v6809_v51 = vadd.f32 %v6808_v3, %v13449_v42  ;;  %7435 = vadd.xlane.f32.xlu1 %v7434_v58 }
 0x7b1   : > { %v7301_v47 = vmul.f32 %v13460_v25, %v7097_v18  ;;  %v7099_v21 = vmax.f32 %v6807_v2, 0.0  ;;  %7071 = vmatmul.mubr.bf16.gmra.mrb[124].mxu0 %v13454_v27 }
 0x7b2   : > { %v7302_v59 = vmul.f32 %v13464_v53, %v7098_v52  ;;  %v7100_v17 = vmax.f32 %v6809_v51, 0.0  ;;  %7912 = vmatprep.mubr.bf16.mxu0 %v13476_v29 }
 0x7b3   : > { %v7217_v30 = vpack.c.bf16 %v7099_v21, %v7097_v18  ;;  %v7303_v45 = vmul.f32 %v13460_v25, %v7099_v21 }
 0x7b4   : > { %v7218_v24 = vpack.c.bf16 %v7100_v17, %v7098_v52  ;;  %v7304_v62 = vmul.f32 %v13464_v53, %v7100_v17  ;;  %v6812_v31 = vpop.f32.mrb[20].mxu0  ;;  %v7437_v48 = vadd.f32 %v7302_v59, %v7301_v47 }
 0x7b5   : > { %v6813_v20 = vadd.f32 %v6812_v31, %v13446_v7  ;;  %v6814_v23 = vpop.f32.mrb[21].mxu0 }
 0x7b6   : > { %v6815_v4 = vadd.f32 %v6814_v23, %v13449_v42  ;;  %v6816_v16 = vpop.f32.mrb[22].mxu0  ;;  %7952 = vmatprep.mubr.bf16.mxu1 %v7218_v24  ;;  %7438 = vadd.xlane.f32.xlu0 %v7437_v48  ;;  %v7440_v27 = vadd.f32 %v7304_v62, %v7303_v45 }
 0x7b7   : > { %v7101_v11 = vmax.f32 %v6813_v20, 0.0  ;;  %v6817_v29 = vadd.f32 %v6816_v16, %v13446_v7  ;;  %v6818_v43 = vpop.f32.mrb[23].mxu0  ;;  %7953 = vmatmul.mubr.bf16.gmra.mrb[132].mxu1 %v7217_v30 }
 0x7b8   : > { %v7102_v63 = vmax.f32 %v6815_v4, 0.0  ;;  %v6819_v14 = vadd.f32 %v6818_v43, %v13449_v42  ;;  %7441 = vadd.xlane.f32.xlu1 %v7440_v27 }
 0x7b9   : > { %v7305_v36 = vmul.f32 %v13460_v25, %v7101_v11  ;;  %v7103_v37 = vmax.f32 %v6817_v29, 0.0  ;;  %7913 = vmatmul.mubr.bf16.vlgmr.msra.gmra.mrb[128].mxu0 %v13472_v22 }
 0x7ba   : > { %v7306_v38 = vmul.f32 %v13464_v53, %v7102_v63  ;;  %v7104_v60 = vmax.f32 %v6819_v14, 0.0  ;;  %7922 = vmatprep.mubr.bf16.mxu0 %v13490_v13 }
 0x7bb   : > { %v7219_v49 = vpack.c.bf16 %v7103_v37, %v7101_v11  ;;  %v7307_v41 = vmul.f32 %v13460_v25, %v7103_v37  ;;  %v11612_v11 = vld [vmem:[%s15533_s8] sm:$0xff]  }
 0x7bc   : > { %v7220_v46 = vpack.c.bf16 %v7104_v60, %v7102_v63  ;;  %v7308_v40 = vmul.f32 %v13464_v53, %v7104_v60  ;;  %v6822_v44 = vpop.f32.mrb[24].mxu0  ;;  %v7443_v28 = vadd.f32 %v7306_v38, %v7305_v36  ;;  %8994 = vmatpush1.bf16.msra.mxu1 %v11612_v11 }
 0x7bd   : > { %v6823_v32 = vadd.f32 %v6822_v44, %v13446_v7  ;;  %v6824_v55 = vpop.f32.mrb[25].mxu0  ;;  %8995 = vmatprep.subr.bf16.mxu1 %v11748_v1 }
 0x7be   : > { %v6825_v39 = vadd.f32 %v6824_v55, %v13449_v42  ;;  %v6826_v12 = vpop.f32.mrb[26].mxu0  ;;  %7962 = vmatprep.mubr.bf16.mxu1 %v7220_v46  ;;  %7444 = vadd.xlane.f32.xlu0 %v7443_v28  ;;  %v7446_v22 = vadd.f32 %v7308_v40, %v7307_v41 }
 0x7bf   : > { %v7105_v15 = vmax.f32 %v6823_v32, 0.0  ;;  %v6827_v13 = vadd.f32 %v6826_v12, %v13446_v7  ;;  %v6828_v61 = vpop.f32.mrb[27].mxu0  ;;  %7963 = vmatmul.mubr.bf16.gmra.mrb[136].mxu1 %v7219_v49 }
 0x7c0   : > { %v7106_v6 = vmax.f32 %v6825_v39, 0.0  ;;  %v6829_v9 = vadd.f32 %v6828_v61, %v13449_v42  ;;  %7447 = vadd.xlane.f32.xlu1 %v7446_v22 }
 0x7c1   : > { %v7309_v34 = vmul.f32 %v13460_v25, %v7105_v15  ;;  %v7107_v50 = vmax.f32 %v6827_v13, 0.0  ;;  %7923 = vmatmul.mubr.bf16.gmra.mrb[132].mxu0 %v13486_v57 }
 0x7c2   : > { %v7310_v56 = vmul.f32 %v13464_v53, %v7106_v6  ;;  %v7108_v10 = vmax.f32 %v6829_v9, 0.0  ;;  %7932 = vmatprep.mubr.bf16.mxu0 %v13504_v26 }
 0x7c3   : > { %v7221_v8 = vpack.c.bf16 %v7107_v50, %v7105_v15  ;;  %v7311_v19 = vmul.f32 %v13460_v25, %v7107_v50 }
 0x7c4   : > { %v7222_v54 = vpack.c.bf16 %v7108_v10, %v7106_v6  ;;  %v7312_v58 = vmul.f32 %v13464_v53, %v7108_v10  ;;  %v6832_v18 = vpop.f32.mrb[28].mxu0  ;;  %v7449_v2 = vadd.f32 %v7310_v56, %v7309_v34 }
 0x7c5   : > { %v6833_v3 = vadd.f32 %v6832_v18, %v13446_v7  ;;  %v6834_v52 = vpop.f32.mrb[29].mxu0 }
 0x7c6   : > { %v6835_v51 = vadd.f32 %v6834_v52, %v13449_v42  ;;  %v6836_v47 = vpop.f32.mrb[30].mxu0  ;;  %7972 = vmatprep.mubr.bf16.mxu1 %v7222_v54  ;;  %7450 = vadd.xlane.f32.xlu0 %v7449_v2  ;;  %v7452_v57 = vadd.f32 %v7312_v58, %v7311_v19  ;;  %v11613_v2 = vld [vmem:[%s15533_s8 + $0x8] sm:$0xff]  }
 0x7c7   : > { %v7109_v21 = vmax.f32 %v6833_v3, 0.0  ;;  %v6837_v26 = vadd.f32 %v6836_v47, %v13446_v7  ;;  %v6838_v59 = vpop.f32.mrb[31].mxu0  ;;  %7973 = vmatmul.mubr.bf16.gmra.mrb[140].mxu1 %v7221_v8 }
 0x7c8   : > { %v7110_v17 = vmax.f32 %v6835_v51, 0.0  ;;  %v6839_v30 = vadd.f32 %v6838_v59, %v13449_v42  ;;  %7453 = vadd.xlane.f32.xlu1 %v7452_v57  ;;  %8996 = vmatpush1.bf16.msra.mxu1 %v11613_v2  ;;  %v11618_v2 = vld [vmem:[%s15533_s8 + $0x30] sm:$0xff]  }
 0x7c9   : > { %v7313_v45 = vmul.f32 %v13460_v25, %v7109_v21  ;;  %v7111_v24 = vmax.f32 %v6837_v26, 0.0  ;;  %7933 = vmatmul.mubr.bf16.gmra.mrb[136].mxu0 %v13500_v0  ;;  %8997 = vmatprep.subr.bf16.mxu1 %v11748_v1 }
 0x7ca   : > { %v7314_v62 = vmul.f32 %v13464_v53, %v7110_v17  ;;  %v7112_v31 = vmax.f32 %v6839_v30, 0.0 }
 0x7cb   : > { %v7223_v48 = vpack.c.bf16 %v7111_v24, %v7109_v21  ;;  %v7315_v20 = vmul.f32 %v13460_v25, %v7111_v24  ;;  %v11614_v24 = vld [vmem:[%s15533_s8 + $0x10] sm:$0xff]  }
 0x7cc   : > { %v7224_v23 = vpack.c.bf16 %v7112_v31, %v7110_v17  ;;  %v7316_v4 = vmul.f32 %v13464_v53, %v7112_v31  ;;  %v6842_v16 = vpop.f32.mrb[32].mxu0  ;;  %v7455_v27 = vadd.f32 %v7314_v62, %v7313_v45  ;;  %8998 = vmatpush1.bf16.msra.mxu1 %v11614_v24 }
 0x7cd   : > { %v6843_v29 = vadd.f32 %v6842_v16, %v13446_v7  ;;  %v6844_v43 = vpop.f32.mrb[33].mxu0  ;;  %8999 = vmatprep.subr.bf16.mxu1 %v11748_v1 }
 0x7ce   : > { %v6845_v0 = vadd.f32 %v6844_v43, %v13449_v42  ;;  %v6846_v63 = vpop.f32.mrb[34].mxu0  ;;  %7982 = vmatprep.mubr.bf16.mxu1 %v7224_v23  ;;  %7456 = vadd.xlane.f32.xlu0 %v7455_v27  ;;  %v7458_v14 = vadd.f32 %v7316_v4, %v7315_v20 }
 0x7cf   : > { %v7113_v36 = vmax.f32 %v6843_v29, 0.0  ;;  %v6847_v37 = vadd.f32 %v6846_v63, %v13446_v7  ;;  %v6848_v38 = vpop.f32.mrb[35].mxu0  ;;  %7983 = vmatmul.mubr.bf16.gmra.mrb[144].mxu1 %v7223_v48  ;;  %v11615_v29 = vld [vmem:[%s15533_s8 + $0x18] sm:$0xff]  }
 0x7d0   : > { %v7114_v60 = vmax.f32 %v6845_v0, 0.0  ;;  %v6849_v49 = vadd.f32 %v6848_v38, %v13449_v42  ;;  %7459 = vadd.xlane.f32.xlu1 %v7458_v14  ;;  %9000 = vmatpush1.bf16.msra.mxu1 %v11615_v29  ;;  %v11620_v29 = vld [vmem:[%s15533_s8 + $0x40] sm:$0xff]  }
 0x7d1   : > { %v7317_v41 = vmul.f32 %v13460_v25, %v7113_v36  ;;  %v7115_v46 = vmax.f32 %v6847_v37, 0.0  ;;  %9001 = vmatprep.subr.bf16.mxu1 %v11748_v1 }
 0x7d2   : > { %v7318_v40 = vmul.f32 %v13464_v53, %v7114_v60  ;;  %v7116_v44 = vmax.f32 %v6849_v49, 0.0 }
 0x7d3   : > { %v7225_v28 = vpack.c.bf16 %v7115_v46, %v7113_v36  ;;  %v7319_v32 = vmul.f32 %v13460_v25, %v7115_v46 }
 0x7d4   : > { %v7226_v55 = vpack.c.bf16 %v7116_v44, %v7114_v60  ;;  %v7320_v39 = vmul.f32 %v13464_v53, %v7116_v44  ;;  %v6852_v12 = vpop.f32.mrb[36].mxu0  ;;  %v7461_v22 = vadd.f32 %v7318_v40, %v7317_v41  ;;  %v11616_v40 = vld [vmem:[%s15533_s8 + $0x20] sm:$0xff]  }
 0x7d5   : > { %v6853_v15 = vadd.f32 %v6852_v12, %v13446_v7  ;;  %v6854_v13 = vpop.f32.mrb[37].mxu0  ;;  %9002 = vmatpush1.bf16.msra.mxu1 %v11616_v40 }
 0x7d6   : > { %v6855_v61 = vadd.f32 %v6854_v13, %v13449_v42  ;;  %v6856_v6 = vpop.f32.mrb[38].mxu0  ;;  %7992 = vmatprep.mubr.bf16.mxu1 %v7226_v55  ;;  %7462 = vadd.xlane.f32.xlu0 %v7461_v22  ;;  %v7464_v9 = vadd.f32 %v7320_v39, %v7319_v32 }
 0x7d7   : > { %v7117_v34 = vmax.f32 %v6853_v15, 0.0  ;;  %v6857_v50 = vadd.f32 %v6856_v6, %v13446_v7  ;;  %v6858_v56 = vpop.f32.mrb[39].mxu0  ;;  %7993 = vmatmul.mubr.bf16.gmra.mrb[148].mxu1 %v7225_v28  ;;  %9003 = vmatprep.subr.bf16.mxu1 %v11748_v1 }
 0x7d8   : > { %v7118_v10 = vmax.f32 %v6855_v61, 0.0  ;;  %v6859_v8 = vadd.f32 %v6858_v56, %v13449_v42  ;;  %7465 = vadd.xlane.f32.xlu1 %v7464_v9  ;;  %v11617_v61 = vld [vmem:[%s15533_s8 + $0x28] sm:$0xff]  }
 0x7d9   : > { %v7321_v19 = vmul.f32 %v13460_v25, %v7117_v34  ;;  %v7119_v54 = vmax.f32 %v6857_v50, 0.0  ;;  %9004 = vmatpush1.bf16.msra.mxu1 %v11617_v61  ;;  %v11622_v61 = vld [vmem:[%s15533_s8 + $0x50] sm:$0xff]  }
 0x7da   : > { %v7322_v58 = vmul.f32 %v13464_v53, %v7118_v10  ;;  %v7120_v18 = vmax.f32 %v6859_v8, 0.0  ;;  %9005 = vmatprep.subr.bf16.mxu1 %v11748_v1 }
 0x7db   : > { %v7227_v3 = vpack.c.bf16 %v7119_v54, %v7117_v34  ;;  %v7323_v52 = vmul.f32 %v13460_v25, %v7119_v54 }
 0x7dc   : > { %v7228_v51 = vpack.c.bf16 %v7120_v18, %v7118_v10  ;;  %v7324_v47 = vmul.f32 %v13464_v53, %v7120_v18  ;;  %v6862_v57 = vpop.f32.mrb[40].mxu0  ;;  %v7467_v21 = vadd.f32 %v7322_v58, %v7321_v19 }
 0x7dd   : > { %v6863_v26 = vadd.f32 %v6862_v57, %v13446_v7  ;;  %v6864_v59 = vpop.f32.mrb[41].mxu0  ;;  %9006 = vmatpush1.bf16.msra.mxu1 %v11618_v2 }
 0x7de   : > { %v6865_v17 = vadd.f32 %v6864_v59, %v13449_v42  ;;  %v6866_v30 = vpop.f32.mrb[42].mxu0  ;;  %8002 = vmatprep.mubr.bf16.mxu1 %v7228_v51  ;;  %7468 = vadd.xlane.f32.xlu0 %v7467_v21  ;;  %v7470_v45 = vadd.f32 %v7324_v47, %v7323_v52 }
 0x7df   : > { %v7121_v62 = vmax.f32 %v6863_v26, 0.0  ;;  %v6867_v31 = vadd.f32 %v6866_v30, %v13446_v7  ;;  %v6868_v48 = vpop.f32.mrb[43].mxu0  ;;  %8003 = vmatmul.mubr.bf16.gmra.mrb[152].mxu1 %v7227_v3  ;;  %9007 = vmatprep.subr.bf16.mxu1 %v11748_v1  ;;  %v11619_v30 = vld [vmem:[%s15533_s8 + $0x38] sm:$0xff]  }
 0x7e0   : > { %v7122_v20 = vmax.f32 %v6865_v17, 0.0  ;;  %v6869_v23 = vadd.f32 %v6868_v48, %v13449_v42  ;;  %7471 = vadd.xlane.f32.xlu1 %v7470_v45 }
 0x7e1   : > { %v7325_v4 = vmul.f32 %v13460_v25, %v7121_v62  ;;  %v7123_v16 = vmax.f32 %v6867_v31, 0.0  ;;  %9008 = vmatpush1.bf16.msra.mxu1 %v11619_v30 }
 0x7e2   : > { %v7326_v27 = vmul.f32 %v13464_v53, %v7122_v20  ;;  %v7124_v11 = vmax.f32 %v6869_v23, 0.0  ;;  %9009 = vmatprep.subr.bf16.mxu1 %v11748_v1 }
 0x7e3   : > { %v7229_v43 = vpack.c.bf16 %v7123_v16, %v7121_v62  ;;  %v7327_v0 = vmul.f32 %v13460_v25, %v7123_v16 }
 0x7e4   : > { %v7230_v63 = vpack.c.bf16 %v7124_v11, %v7122_v20  ;;  %v7328_v14 = vmul.f32 %v13464_v53, %v7124_v11  ;;  %v6872_v36 = vpop.f32.mrb[44].mxu0  ;;  %v7473_v37 = vadd.f32 %v7326_v27, %v7325_v4 }
 0x7e5   : > { %v6873_v38 = vadd.f32 %v6872_v36, %v13446_v7  ;;  %v6874_v60 = vpop.f32.mrb[45].mxu0  ;;  %9010 = vmatpush1.bf16.msra.mxu1 %v11620_v29  ;;  %v11625_v29 = vld [vmem:[%s15533_s8 + $0x68] sm:$0xff]  }
 0x7e6   : > { %v6875_v49 = vadd.f32 %v6874_v60, %v13449_v42  ;;  %v6876_v41 = vpop.f32.mrb[46].mxu0  ;;  %8012 = vmatprep.mubr.bf16.mxu1 %v7230_v63  ;;  %7474 = vadd.xlane.f32.xlu0 %v7473_v37  ;;  %v7476_v46 = vadd.f32 %v7328_v14, %v7327_v0 }
 0x7e7   : > { %v7125_v44 = vmax.f32 %v6873_v38, 0.0  ;;  %v6877_v28 = vadd.f32 %v6876_v41, %v13446_v7  ;;  %v6878_v32 = vpop.f32.mrb[47].mxu0  ;;  %8013 = vmatmul.mubr.bf16.gmra.mrb[156].mxu1 %v7229_v43  ;;  %9011 = vmatprep.subr.bf16.mxu1 %v11748_v1  ;;  %v11621_v41 = vld [vmem:[%s15533_s8 + $0x48] sm:$0xff]  }
 0x7e8   : > { %v7126_v55 = vmax.f32 %v6875_v49, 0.0  ;;  %v6879_v39 = vadd.f32 %v6878_v32, %v13449_v42  ;;  %7477 = vadd.xlane.f32.xlu1 %v7476_v46 }
 0x7e9   : > { %v7329_v12 = vmul.f32 %v13460_v25, %v7125_v44  ;;  %v7127_v22 = vmax.f32 %v6877_v28, 0.0  ;;  %9012 = vmatpush1.bf16.msra.mxu1 %v11621_v41 }
 0x7ea   : > { %v7330_v15 = vmul.f32 %v13464_v53, %v7126_v55  ;;  %v7128_v13 = vmax.f32 %v6879_v39, 0.0  ;;  %9013 = vmatprep.subr.bf16.mxu1 %v11748_v1 }
 0x7eb   : > { %v7231_v6 = vpack.c.bf16 %v7127_v22, %v7125_v44  ;;  %v7331_v9 = vmul.f32 %v13460_v25, %v7127_v22 }
 0x7ec   : > { %v7232_v34 = vpack.c.bf16 %v7128_v13, %v7126_v55  ;;  %v7332_v50 = vmul.f32 %v13464_v53, %v7128_v13  ;;  %v6882_v56 = vpop.f32.mrb[48].mxu0  ;;  %v7479_v10 = vadd.f32 %v7330_v15, %v7329_v12 }
 0x7ed   : > { %v6883_v8 = vadd.f32 %v6882_v56, %v13446_v7  ;;  %v6884_v19 = vpop.f32.mrb[49].mxu0  ;;  %9014 = vmatpush1.bf16.msra.mxu1 %v11622_v61 }
 0x7ee   : > { %v6885_v54 = vadd.f32 %v6884_v19, %v13449_v42  ;;  %v6886_v58 = vpop.f32.mrb[50].mxu0  ;;  %8022 = vmatprep.mubr.bf16.mxu1 %v7232_v34  ;;  %7480 = vadd.xlane.f32.xlu0 %v7479_v10  ;;  %v7482_v18 = vadd.f32 %v7332_v50, %v7331_v9 }
 0x7ef   : > { %v7129_v3 = vmax.f32 %v6883_v8, 0.0  ;;  %v6887_v52 = vadd.f32 %v6886_v58, %v13446_v7  ;;  %v6888_v51 = vpop.f32.mrb[51].mxu0  ;;  %8023 = vmatmul.mubr.bf16.gmra.mrb[160].mxu1 %v7231_v6  ;;  %9015 = vmatprep.subr.bf16.mxu1 %v11748_v1  ;;  %v11623_v58 = vld [vmem:[%s15533_s8 + $0x58] sm:$0xff]  }
 0x7f0   : > { %v7130_v47 = vmax.f32 %v6885_v54, 0.0  ;;  %v6889_v57 = vadd.f32 %v6888_v51, %v13449_v42  ;;  %7483 = vadd.xlane.f32.xlu1 %v7482_v18 }
 0x7f1   : > { %v7333_v21 = vmul.f32 %v13460_v25, %v7129_v3  ;;  %v7131_v26 = vmax.f32 %v6887_v52, 0.0  ;;  %9016 = vmatpush1.bf16.msra.mxu1 %v11623_v58 }
 0x7f2   : > { %v7334_v59 = vmul.f32 %v13464_v53, %v7130_v47  ;;  %v7132_v17 = vmax.f32 %v6889_v57, 0.0  ;;  %9017 = vmatprep.subr.bf16.mxu1 %v11748_v1 }
 0x7f3   : > { %v7233_v45 = vpack.c.bf16 %v7131_v26, %v7129_v3  ;;  %v7335_v24 = vmul.f32 %v13460_v25, %v7131_v26 }
 0x7f4   : > { %v7234_v62 = vpack.c.bf16 %v7132_v17, %v7130_v47  ;;  %v7336_v31 = vmul.f32 %v13464_v53, %v7132_v17  ;;  %v6892_v48 = vpop.f32.mrb[52].mxu0  ;;  %v7485_v20 = vadd.f32 %v7334_v59, %v7333_v21 }
 0x7f5   : > { %v6893_v23 = vadd.f32 %v6892_v48, %v13446_v7  ;;  %v6894_v4 = vpop.f32.mrb[53].mxu0 }
 0x7f6   : > { %v6895_v16 = vadd.f32 %v6894_v4, %v13449_v42  ;;  %v6896_v27 = vpop.f32.mrb[54].mxu0  ;;  %8032 = vmatprep.mubr.bf16.mxu1 %v7234_v62  ;;  %7486 = vadd.xlane.f32.xlu0 %v7485_v20  ;;  %v7488_v11 = vadd.f32 %v7336_v31, %v7335_v24  ;;  %v11624_v62 = vld [vmem:[%s15533_s8 + $0x60] sm:$0xff]  }
 0x7f7   : > { %v7133_v43 = vmax.f32 %v6893_v23, 0.0  ;;  %v6897_v0 = vadd.f32 %v6896_v27, %v13446_v7  ;;  %v6898_v63 = vpop.f32.mrb[55].mxu0  ;;  %8033 = vmatmul.mubr.bf16.gmra.mrb[164].mxu1 %v7233_v45 }
 0x7f8   : > { %v7134_v14 = vmax.f32 %v6895_v16, 0.0  ;;  %v6899_v36 = vadd.f32 %v6898_v63, %v13449_v42  ;;  %7489 = vadd.xlane.f32.xlu1 %v7488_v11  ;;  %9018 = vmatpush1.bf16.msra.mxu1 %v11624_v62 }
 0x7f9   : > { %v7337_v37 = vmul.f32 %v13460_v25, %v7133_v43  ;;  %v7135_v38 = vmax.f32 %v6897_v0, 0.0  ;;  %9019 = vmatprep.subr.bf16.mxu1 %v11748_v1 }
 0x7fa   : > { %v7338_v60 = vmul.f32 %v13464_v53, %v7134_v14  ;;  %v7136_v49 = vmax.f32 %v6899_v36, 0.0 }
 0x7fb   : > { %v7235_v46 = vpack.c.bf16 %v7135_v38, %v7133_v43  ;;  %v7339_v40 = vmul.f32 %v13460_v25, %v7135_v38  ;;  %v11626_v38 = vld [vmem:[%s15534_s9] sm:$0xff]  }
 0x7fc   : > { %v7236_v44 = vpack.c.bf16 %v7136_v49, %v7134_v14  ;;  %v7340_v28 = vmul.f32 %v13464_v53, %v7136_v49  ;;  %v6902_v32 = vpop.f32.mrb[56].mxu0  ;;  %v7491_v55 = vadd.f32 %v7338_v60, %v7337_v37  ;;  %9020 = vmatpush1.bf16.msra.mxu1 %v11625_v29  ;;  %10840 = vmatprep.subr.bf16.mxu0 %v11626_v38 }
 0x7fd   : > { %v6903_v39 = vadd.f32 %v6902_v32, %v13446_v7  ;;  %v6904_v12 = vpop.f32.mrb[57].mxu0  ;;  %v11628_v32 = vld [vmem:[%s15534_s9 + $0x8] sm:$0x3f]   ;;  %10841 = vmatpush3.bf16.msra.mxu0 %v11626_v38  ;;  %9021 = vmatprep.subr.bf16.mxu1 %v11748_v1 }
 0x7fe   : > { %v6905_v22 = vadd.f32 %v6904_v12, %v13449_v42  ;;  %v6906_v15 = vpop.f32.mrb[58].mxu0  ;;  %8042 = vmatprep.mubr.bf16.mxu1 %v7236_v44  ;;  %7492 = vadd.xlane.f32.xlu0 %v7491_v55  ;;  %v7494_v13 = vadd.f32 %v7340_v28, %v7339_v40  ;;  %v11627_v28 = vld [vmem:[%s15533_s8 + $0x70] sm:$0xff]   ;;  %v8603_v12 = vsel %vm8601_vm3, 4294967295, %v11749_v5  ;;  %v11629_v5 = vld [vmem:[%s15533_s8 + $0x78] sm:$0xff]  }
 0x7ff   : > { %v7137_v6 = vmax.f32 %v6903_v39, 0.0  ;;  %v6907_v9 = vadd.f32 %v6906_v15, %v13446_v7  ;;  %v6908_v34 = vpop.f32.mrb[59].mxu0  ;;  %8043 = vmatmul.mubr.bf16.gmra.mrb[168].mxu1 %v7235_v46 }
 0x800   : > { %v7138_v50 = vmax.f32 %v6905_v22, 0.0  ;;  %v6909_v56 = vadd.f32 %v6908_v34, %v13449_v42  ;;  %7495 = vadd.xlane.f32.xlu1 %v7494_v13  ;;  %v8604_v13 = vsel %vm8602_vm4, %v8603_v12, 0  ;;  %9022 = vmatpush1.bf16.msra.mxu1 %v11627_v28 }
 0x801   : > { %v7341_v10 = vmul.f32 %v13460_v25, %v7137_v6  ;;  %v7139_v8 = vmax.f32 %v6907_v9, 0.0  ;;  %v8606_v9 = vand.u32 %v11628_v32, %v8604_v13  ;;  %9023 = vmatprep.subr.bf16.mxu1 %v11748_v1 }
 0x802   : > { %v7342_v19 = vmul.f32 %v13464_v53, %v7138_v50  ;;  %v7140_v54 = vmax.f32 %v6909_v56, 0.0 }
 0x803   : > { %v7237_v18 = vpack.c.bf16 %v7139_v8, %v7137_v6  ;;  %v7343_v2 = vmul.f32 %v13460_v25, %v7139_v8  ;;  %10842 = vmatprep.subr.bf16.mxu0 %v8606_v9 }
 0x804   : > { %v7238_v3 = vpack.c.bf16 %v7140_v54, %v7138_v50  ;;  %v7344_v52 = vmul.f32 %v13464_v53, %v7140_v54  ;;  %v6912_v51 = vpop.f32.mrb[60].mxu0  ;;  %v7497_v47 = vadd.f32 %v7342_v19, %v7341_v10  ;;  %v11630_v54 = vld [vmem:[%s13701_s15] sm:$0xff]   ;;  %10843 = vmatpush3.bf16.msra.mxu0 %v8606_v9  ;;  %9024 = vmatpush1.bf16.msra.mxu1 %v11629_v5 }
 0x805   : > { %v6913_v57 = vadd.f32 %v6912_v51, %v13446_v7  ;;  %v6914_v21 = vpop.f32.mrb[61].mxu0  ;;  %10844 = vmatprep.mubr.msk.bf16.mxu0 %vm8504_vm5, %v11630_v54 }
 0x806   : > { %v6915_v26 = vadd.f32 %v6914_v21, %v13449_v42  ;;  %v6916_v59 = vpop.f32.mrb[62].mxu0  ;;  %8052 = vmatprep.mubr.bf16.mxu1 %v7238_v3  ;;  %7498 = vadd.xlane.f32.xlu0 %v7497_v47  ;;  %v7500_v17 = vadd.f32 %v7344_v52, %v7343_v2  ;;  %v11631_v52 = vld [vmem:[%s13701_s15 + $0x8] sm:$0xff]  }
 0x807   : > { %v7141_v30 = vmax.f32 %v6913_v57, 0.0  ;;  %v6917_v45 = vadd.f32 %v6916_v59, %v13446_v7  ;;  %v6918_v24 = vpop.f32.mrb[63].mxu0  ;;  %8053 = vmatmul.mubr.bf16.gmra.mrb[172].mxu1 %v7237_v18  ;;  %10845 = vmatmul.mubr.msk.bf16.vlgmr.msra.gmra.mrb[140].mxu0 %vm8504_vm5, %v11631_v52 }
 0x808   : > { %v7142_v31 = vmax.f32 %v6915_v26, 0.0  ;;  %v6919_v48 = vadd.f32 %v6918_v24, %v13449_v42  ;;  %7501 = vadd.xlane.f32.xlu1 %v7500_v17 }
 0x809   : > { %v7345_v20 = vmul.f32 %v13460_v25, %v7141_v30  ;;  %v7143_v23 = vmax.f32 %v6917_v45, 0.0 }
 0x80a   : > { %v7346_v4 = vmul.f32 %v13464_v53, %v7142_v31  ;;  %v7144_v16 = vmax.f32 %v6919_v48, 0.0 }
 0x80b   : > { %v7239_v27 = vpack.c.bf16 %v7143_v23, %v7141_v30  ;;  %v7347_v11 = vmul.f32 %v13460_v25, %v7143_v23 }
 0x80c   : > { %v7240_v43 = vpack.c.bf16 %v7144_v16, %v7142_v31  ;;  %v7348_v0 = vmul.f32 %v13464_v53, %v7144_v16  ;;  %v6922_v63 = vpop.f32.mrb[64].mxu0  ;;  %v7503_v14 = vadd.f32 %v7346_v4, %v7345_v20 }
 0x80d   : > { %v6923_v36 = vadd.f32 %v6922_v63, %v13446_v7  ;;  %v6924_v37 = vpop.f32.mrb[65].mxu0 }
 0x80e   : > { %v6925_v60 = vadd.f32 %v6924_v37, %v13449_v42  ;;  %v6926_v49 = vpop.f32.mrb[66].mxu0  ;;  %8062 = vmatprep.mubr.bf16.mxu1 %v7240_v43  ;;  %7504 = vadd.xlane.f32.xlu0 %v7503_v14  ;;  %v7506_v41 = vadd.f32 %v7348_v0, %v7347_v11 }
 0x80f   : > { %v7145_v46 = vmax.f32 %v6923_v36, 0.0  ;;  %v6927_v40 = vadd.f32 %v6926_v49, %v13446_v7  ;;  %v6928_v44 = vpop.f32.mrb[67].mxu0  ;;  %8063 = vmatmul.mubr.bf16.gmra.mrb[176].mxu1 %v7239_v27 }
 0x810   : > { %v7146_v55 = vmax.f32 %v6925_v60, 0.0  ;;  %v6929_v39 = vadd.f32 %v6928_v44, %v13449_v42  ;;  %7507 = vadd.xlane.f32.xlu1 %v7506_v41 }
 0x811   : > { %v7349_v22 = vmul.f32 %v13460_v25, %v7145_v46  ;;  %v7147_v15 = vmax.f32 %v6927_v40, 0.0 }
 0x812   : > { %v7350_v61 = vmul.f32 %v13464_v53, %v7146_v55  ;;  %v7148_v6 = vmax.f32 %v6929_v39, 0.0 }
 0x813   : > { %v7241_v34 = vpack.c.bf16 %v7147_v15, %v7145_v46  ;;  %v7351_v50 = vmul.f32 %v13460_v25, %v7147_v15 }
 0x814   : > { %v7242_v56 = vpack.c.bf16 %v7148_v6, %v7146_v55  ;;  %v7352_v10 = vmul.f32 %v13464_v53, %v7148_v6  ;;  %v6932_v8 = vpop.f32.mrb[68].mxu0  ;;  %v7509_v19 = vadd.f32 %v7350_v61, %v7349_v22  ;;  %v11632_v55 = vld [vmem:[%s13701_s15 + $0x10] sm:$0xff]   ;;  %v11633_v22 = vld [vmem:[%s13701_s15 + $0x18] sm:$0xff]  }
 0x815   : > { %v6933_v1 = vadd.f32 %v6932_v8, %v13446_v7  ;;  %v6934_v58 = vpop.f32.mrb[69].mxu0  ;;  %10848 = vmatprep.mubr.msk.bf16.mxu0 %vm8504_vm5, %v11632_v55 }
 0x816   : > { %v6935_v18 = vadd.f32 %v6934_v58, %v13449_v42  ;;  %v6936_v2 = vpop.f32.mrb[70].mxu0  ;;  %8072 = vmatprep.mubr.bf16.mxu1 %v7242_v56  ;;  %7510 = vadd.xlane.f32.xlu0 %v7509_v19  ;;  %v7512_v3 = vadd.f32 %v7352_v10, %v7351_v50 }
 0x817   : > { %v7149_v51 = vmax.f32 %v6933_v1, 0.0  ;;  %v6937_v47 = vadd.f32 %v6936_v2, %v13446_v7  ;;  %v6938_v57 = vpop.f32.mrb[71].mxu0  ;;  %8073 = vmatmul.mubr.bf16.gmra.mrb[180].mxu1 %v7241_v34  ;;  %10849 = vmatmul.mubr.msk.bf16.gmra.mrb[144].mxu0 %vm8504_vm5, %v11633_v22 }
 0x818   : > { %v7150_v21 = vmax.f32 %v6935_v18, 0.0  ;;  %v6939_v26 = vadd.f32 %v6938_v57, %v13449_v42  ;;  %7513 = vadd.xlane.f32.xlu1 %v7512_v3 }
 0x819   : > { %v7353_v59 = vmul.f32 %v13460_v25, %v7149_v51  ;;  %v7151_v17 = vmax.f32 %v6937_v47, 0.0 }
 0x81a   : > { %v7354_v30 = vmul.f32 %v13464_v53, %v7150_v21  ;;  %v7152_v45 = vmax.f32 %v6939_v26, 0.0 }
 0x81b   : > { %v7243_v24 = vpack.c.bf16 %v7151_v17, %v7149_v51  ;;  %v7355_v62 = vmul.f32 %v13460_v25, %v7151_v17 }
 0x81c   : > { %v7244_v31 = vpack.c.bf16 %v7152_v45, %v7150_v21  ;;  %v7356_v48 = vmul.f32 %v13464_v53, %v7152_v45  ;;  %v6942_v20 = vpop.f32.mrb[72].mxu0  ;;  %v7515_v23 = vadd.f32 %v7354_v30, %v7353_v59 }
 0x81d   : > { %v6943_v4 = vadd.f32 %v6942_v20, %v13446_v7  ;;  %v6944_v16 = vpop.f32.mrb[73].mxu0 }
 0x81e   : > { %v6945_v27 = vadd.f32 %v6944_v16, %v13449_v42  ;;  %v6946_v11 = vpop.f32.mrb[74].mxu0  ;;  %8082 = vmatprep.mubr.bf16.mxu1 %v7244_v31  ;;  %7516 = vadd.xlane.f32.xlu0 %v7515_v23  ;;  %v7518_v29 = vadd.f32 %v7356_v48, %v7355_v62 }
 0x81f   : > { %v7153_v43 = vmax.f32 %v6943_v4, 0.0  ;;  %v6947_v0 = vadd.f32 %v6946_v11, %v13446_v7  ;;  %v6948_v63 = vpop.f32.mrb[75].mxu0  ;;  %8083 = vmatmul.mubr.bf16.gmra.mrb[184].mxu1 %v7243_v24 }
 0x820   : > { %v7154_v14 = vmax.f32 %v6945_v27, 0.0  ;;  %v6949_v36 = vadd.f32 %v6948_v63, %v13449_v42  ;;  %7519 = vadd.xlane.f32.xlu1 %v7518_v29 }
 0x821   : > { %v7357_v37 = vmul.f32 %v13460_v25, %v7153_v43  ;;  %v7155_v38 = vmax.f32 %v6947_v0, 0.0  ;;  %v11634_v0 = vld [vmem:[%s13701_s15 + $0x20] sm:$0xff]  }
 0x822   : > { %v7358_v60 = vmul.f32 %v13464_v53, %v7154_v14  ;;  %v7156_v49 = vmax.f32 %v6949_v36, 0.0  ;;  %v11635_v36 = vld [vmem:[%s13701_s15 + $0x28] sm:$0xff]   ;;  %10852 = vmatprep.mubr.msk.bf16.mxu0 %vm8504_vm5, %v11634_v0 }
 0x823   : > { %v7245_v41 = vpack.c.bf16 %v7155_v38, %v7153_v43  ;;  %v7359_v46 = vmul.f32 %v13460_v25, %v7155_v38  ;;  %v7415_v47 = vpop.xlane.xlu0 %7414  ;;  %10853 = vmatmul.mubr.msk.bf16.gmra.mrb[148].mxu0 %vm8504_vm5, %v11635_v36 }
 0x824   : > { %v7246_v40 = vpack.c.bf16 %v7156_v49, %v7154_v14  ;;  %v7360_v44 = vmul.f32 %v13464_v53, %v7156_v49  ;;  %v6952_v28 = vpop.f32.mrb[76].mxu0  ;;  %v7521_v32 = vadd.f32 %v7358_v60, %v7357_v37  ;;  %v13753_v37 = vld [vmem:[#allocation2] ss:$0 sm:$0xff] }
 0x825   : > { %v6953_v39 = vadd.f32 %v6952_v28, %v13446_v7  ;;  %v6954_v12 = vpop.f32.mrb[77].mxu0  ;;  %v7612_v22 = vadd.f32 %v13753_v37, %v7415_v47 }
 0x826   : > { %v6955_v15 = vadd.f32 %v6954_v12, %v13449_v42  ;;  %v6956_v13 = vpop.f32.mrb[78].mxu0  ;;  %8092 = vmatprep.mubr.bf16.mxu1 %v7246_v40  ;;  %7522 = vadd.xlane.f32.xlu0 %v7521_v32  ;;  %v7524_v61 = vadd.f32 %v7360_v44, %v7359_v46 }
 0x827   : > { %v7157_v6 = vmax.f32 %v6953_v39, 0.0  ;;  %v6957_v9 = vadd.f32 %v6956_v13, %v13446_v7  ;;  %v6958_v34 = vpop.f32.mrb[79].mxu0  ;;  %8093 = vmatmul.mubr.bf16.gmra.mrb[188].mxu1 %v7245_v41  ;;  %v7418_v16 = vpop.xlane.xlu0 %7417 }
 0x828   : > { %v7158_v50 = vmax.f32 %v6955_v15, 0.0  ;;  %v6959_v5 = vadd.f32 %v6958_v34, %v13449_v42  ;;  %7525 = vadd.xlane.f32.xlu1 %v7524_v61  ;;  %v7613_v41 = vadd.f32 %v13753_v37, %v7418_v16 }
 0x829   : > { %v7361_v56 = vmul.f32 %v13460_v25, %v7157_v6  ;;  %v7159_v10 = vmax.f32 %v6957_v9, 0.0 }
 0x82a   : > { %v7362_v8 = vmul.f32 %v13464_v53, %v7158_v50  ;;  %v7160_v19 = vmax.f32 %v6959_v5, 0.0 }
 0x82b   : > { %v7247_v54 = vpack.c.bf16 %v7159_v10, %v7157_v6  ;;  %v7363_v1 = vmul.f32 %v13460_v25, %v7159_v10  ;;  %v7421_v28 = vpop.xlane.xlu1 %7420 }
 0x82c   : > { %v7248_v58 = vpack.c.bf16 %v7160_v19, %v7158_v50  ;;  %v7364_v18 = vmul.f32 %v13464_v53, %v7160_v19  ;;  %v6962_v2 = vpop.f32.mrb[80].mxu0  ;;  %v13736_v3 = vadd.f32 %v7362_v8, %v7361_v56  ;;  %v7614_v61 = vadd.f32 %v13753_v37, %v7421_v28 }
 0x82d   : > { %v6963_v52 = vadd.f32 %v6962_v2, %v13446_v7  ;;  %v6964_v51 = vpop.f32.mrb[81].mxu0 }
 0x82e   : > { %v6965_v57 = vadd.f32 %v6964_v51, %v13449_v42  ;;  %v6966_v21 = vpop.f32.mrb[82].mxu0  ;;  %8102 = vmatprep.mubr.bf16.mxu1 %v7248_v58  ;;  %v13740_v26 = vadd.f32 %v7364_v18, %v7363_v1 }
 0x82f   : > { %v7161_v59 = vmax.f32 %v6963_v52, 0.0  ;;  %v6967_v17 = vadd.f32 %v6966_v21, %v13446_v7  ;;  %v6968_v30 = vpop.f32.mrb[83].mxu0  ;;  %8103 = vmatmul.mubr.bf16.gmra.mrb[192].mxu1 %v7247_v54 }
 0x830   : > { %v7162_v45 = vmax.f32 %v6965_v57, 0.0  ;;  %v6969_v24 = vadd.f32 %v6968_v30, %v13449_v42 }
 0x831   : > { %v7365_v62 = vmul.f32 %v13460_v25, %v7161_v59  ;;  %v7163_v31 = vmax.f32 %v6967_v17, 0.0 }
 0x832   : > { %v7366_v48 = vmul.f32 %v13464_v53, %v7162_v45  ;;  %v7164_v20 = vmax.f32 %v6969_v24, 0.0 }
 0x833   : > { %v7249_v23 = vpack.c.bf16 %v7163_v31, %v7161_v59  ;;  %v7367_v4 = vmul.f32 %v13460_v25, %v7163_v31  ;;  %v11636_v31 = vld [vmem:[%s13701_s15 + $0x30] sm:$0xff]  }
 0x834   : > { %v7250_v27 = vpack.c.bf16 %v7164_v20, %v7162_v45  ;;  %v7368_v11 = vmul.f32 %v13464_v53, %v7164_v20  ;;  %v6972_v29 = vpop.f32.mrb[84].mxu0  ;;  %v13748_v43 = vadd.f32 %v7366_v48, %v7365_v62  ;;  %10856 = vmatprep.mubr.msk.bf16.mxu0 %vm8504_vm5, %v11636_v31 }
 0x835   : > { %v6973_v63 = vadd.f32 %v6972_v29, %v13446_v7  ;;  %v6974_v14 = vpop.f32.mrb[85].mxu0 }
 0x836   : > { %v6975_v38 = vadd.f32 %v6974_v14, %v13449_v42  ;;  %v6976_v60 = vpop.f32.mrb[86].mxu0  ;;  %8112 = vmatprep.mubr.bf16.mxu1 %v7250_v27  ;;  %v13756_v49 = vadd.f32 %v7368_v11, %v7367_v4  ;;  %v11637_v4 = vld [vmem:[%s13701_s15 + $0x38] sm:$0xff]  }
 0x837   : > { %v7165_v46 = vmax.f32 %v6973_v63, 0.0  ;;  %v6977_v40 = vadd.f32 %v6976_v60, %v13446_v7  ;;  %v6978_v44 = vpop.f32.mrb[87].mxu0  ;;  %8113 = vmatmul.mubr.bf16.gmra.mrb[196].mxu1 %v7249_v23  ;;  %10857 = vmatmul.mubr.msk.bf16.gmra.mrb[152].mxu0 %vm8504_vm5, %v11637_v4 }
 0x838   : > { %v7166_v32 = vmax.f32 %v6975_v38, 0.0  ;;  %v6979_v55 = vadd.f32 %v6978_v44, %v13449_v42 }
 0x839   : > { %v7369_v39 = vmul.f32 %v13460_v25, %v7165_v46  ;;  %v7167_v12 = vmax.f32 %v6977_v40, 0.0  ;;  %9875 = vrot.lane.b32.xlu1 %v7613_v41, %s11750_s14 }
 0x83a   : > { %v7370_v15 = vmul.f32 %v13464_v53, %v7166_v32  ;;  %v7168_v13 = vmax.f32 %v6979_v55, 0.0 }
 0x83b   : > { %v7251_v6 = vpack.c.bf16 %v7167_v12, %v7165_v46  ;;  %v7371_v9 = vmul.f32 %v13460_v25, %v7167_v12 }
 0x83c   : > { %v7252_v34 = vpack.c.bf16 %v7168_v13, %v7166_v32  ;;  %v7372_v50 = vmul.f32 %v13464_v53, %v7168_v13  ;;  %v6982_v5 = vpop.f32.mrb[88].mxu0  ;;  %9873 = vrot.lane.b32.xlu0 %v7612_v22, %s11750_s14  ;;  %v13771_v56 = vadd.f32 %v7370_v15, %v7369_v39 }
 0x83d   : > { %v6983_v10 = vadd.f32 %v6982_v5, %v13446_v7  ;;  %v6984_v8 = vpop.f32.mrb[89].mxu0  ;;  %9877 = vrot.lane.b32.xlu1 %v7614_v61, %s11750_s14 }
 0x83e   : > { %v6985_v19 = vadd.f32 %v6984_v8, %v13449_v42  ;;  %v6986_v54 = vpop.f32.mrb[90].mxu0  ;;  %8122 = vmatprep.mubr.bf16.mxu1 %v7252_v34  ;;  %v13776_v1 = vadd.f32 %v7372_v50, %v7371_v9 }
 0x83f   : > { %v7169_v58 = vmax.f32 %v6983_v10, 0.0  ;;  %v6987_v18 = vadd.f32 %v6986_v54, %v13446_v7  ;;  %v6988_v2 = vpop.f32.mrb[91].mxu0  ;;  %8123 = vmatmul.mubr.bf16.gmra.mrb[200].mxu1 %v7251_v6 }
 0x840   : > { %v7170_v52 = vmax.f32 %v6985_v19, 0.0  ;;  %v6989_v51 = vadd.f32 %v6988_v2, %v13449_v42 }
 0x841   : > { %v7373_v47 = vmul.f32 %v13460_v25, %v7169_v58  ;;  %v7171_v57 = vmax.f32 %v6987_v18, 0.0 }
 0x842   : > { %v7374_v21 = vmul.f32 %v13464_v53, %v7170_v52  ;;  %v7172_v59 = vmax.f32 %v6989_v51, 0.0 }
 0x843   : > { %v7253_v17 = vpack.c.bf16 %v7171_v57, %v7169_v58  ;;  %v7375_v30 = vmul.f32 %v13460_v25, %v7171_v57 }
 0x844   : > { %v7254_v45 = vpack.c.bf16 %v7172_v59, %v7170_v52  ;;  %v7376_v24 = vmul.f32 %v13464_v53, %v7172_v59  ;;  %v6992_v62 = vpop.f32.mrb[92].mxu0  ;;  %v13785_v48 = vadd.f32 %v7374_v21, %v7373_v47  ;;  %v11638_v47 = vld [vmem:[%s13701_s15 + $0x40] sm:$0xff]  }
 0x845   : > { %v6993_v20 = vadd.f32 %v6992_v62, %v13446_v7  ;;  %v6994_v23 = vpop.f32.mrb[93].mxu0  ;;  %10860 = vmatprep.mubr.msk.bf16.mxu0 %vm8504_vm5, %v11638_v47 }
 0x846   : > { %v6995_v16 = vadd.f32 %v6994_v23, %v13449_v42  ;;  %v6996_v27 = vpop.f32.mrb[94].mxu0  ;;  %8132 = vmatprep.mubr.bf16.mxu1 %v7254_v45  ;;  %v13791_v11 = vadd.f32 %v7376_v24, %v7375_v30 }
 0x847   : > { %v7173_v29 = vmax.f32 %v6993_v20, 0.0  ;;  %v6997_v0 = vadd.f32 %v6996_v27, %v13446_v7  ;;  %v6998_v63 = vpop.f32.mrb[95].mxu0  ;;  %8133 = vmatmul.mubr.bf16.gmra.mrb[204].mxu1 %v7253_v17  ;;  %v11639_v17 = vld [vmem:[%s13701_s15 + $0x48] sm:$0xff]  }
 0x848   : > { %v7174_v14 = vmax.f32 %v6995_v16, 0.0  ;;  %v6999_v36 = vadd.f32 %v6998_v63, %v13449_v42  ;;  %10861 = vmatmul.mubr.msk.bf16.gmra.mrb[156].mxu0 %vm8504_vm5, %v11639_v17 }
 0x849   : > { %v7377_v38 = vmul.f32 %v13460_v25, %v7173_v29  ;;  %v7175_v60 = vmax.f32 %v6997_v0, 0.0 }
 0x84a   : > { %v7378_v41 = vmul.f32 %v13464_v53, %v7174_v14  ;;  %v7176_v46 = vmax.f32 %v6999_v36, 0.0 }
 0x84b   : > { %v7255_v40 = vpack.c.bf16 %v7175_v60, %v7173_v29  ;;  %v7379_v44 = vmul.f32 %v13460_v25, %v7175_v60 }
 0x84c   : > { %v7256_v28 = vpack.c.bf16 %v7176_v46, %v7174_v14  ;;  %v7380_v32 = vmul.f32 %v13464_v53, %v7176_v46  ;;  %v7002_v55 = vpop.f32.mrb[96].mxu0  ;;  %v13800_v39 = vadd.f32 %v7378_v41, %v7377_v38 }
 0x84d   : > { %v7003_v12 = vadd.f32 %v7002_v55, %v13446_v7  ;;  %v7004_v22 = vpop.f32.mrb[97].mxu0 }
 0x84e   : > { %v7005_v15 = vadd.f32 %v7004_v22, %v13449_v42  ;;  %v7006_v13 = vpop.f32.mrb[98].mxu0  ;;  %8142 = vmatprep.mubr.bf16.mxu1 %v7256_v28  ;;  %v13804_v61 = vadd.f32 %v7380_v32, %v7379_v44 }
 0x84f   : > { %v7177_v6 = vmax.f32 %v7003_v12, 0.0  ;;  %v7007_v9 = vadd.f32 %v7006_v13, %v13446_v7  ;;  %v7008_v34 = vpop.f32.mrb[99].mxu0  ;;  %8143 = vmatmul.mubr.bf16.gmra.mrb[208].mxu1 %v7255_v40 }
 0x850   : > { %v7178_v50 = vmax.f32 %v7005_v15, 0.0  ;;  %v7009_v5 = vadd.f32 %v7008_v34, %v13449_v42 }
 0x851   : > { %v7381_v10 = vmul.f32 %v13460_v25, %v7177_v6  ;;  %v7179_v8 = vmax.f32 %v7007_v9, 0.0 }
 0x852   : > { %v7382_v19 = vmul.f32 %v13464_v53, %v7178_v50  ;;  %v7180_v54 = vmax.f32 %v7009_v5, 0.0 }
 0x853   : > { %v7257_v58 = vpack.c.bf16 %v7179_v8, %v7177_v6  ;;  %v7383_v18 = vmul.f32 %v13460_v25, %v7179_v8 }
 0x854   : > { %v7258_v2 = vpack.c.bf16 %v7180_v54, %v7178_v50  ;;  %v7384_v52 = vmul.f32 %v13464_v53, %v7180_v54  ;;  %v7012_v51 = vpop.f32.mrb[100].mxu0  ;;  %v13813_v57 = vadd.f32 %v7382_v19, %v7381_v10 }
 0x855   : > { %v7013_v21 = vadd.f32 %v7012_v51, %v13446_v7  ;;  %v7014_v59 = vpop.f32.mrb[101].mxu0 }
 0x856   : > { %v7015_v30 = vadd.f32 %v7014_v59, %v13449_v42  ;;  %v7016_v45 = vpop.f32.mrb[102].mxu0  ;;  %8152 = vmatprep.mubr.bf16.mxu1 %v7258_v2  ;;  %v13819_v24 = vadd.f32 %v7384_v52, %v7383_v18  ;;  %v11641_v2 = vld [vmem:[%s13701_s15 + $0x58] sm:$0xff]  }
 0x857   : > { %v7181_v62 = vmax.f32 %v7013_v21, 0.0  ;;  %v7017_v31 = vadd.f32 %v7016_v45, %v13446_v7  ;;  %v7018_v20 = vpop.f32.mrb[103].mxu0  ;;  %8153 = vmatmul.mubr.bf16.gmra.mrb[212].mxu1 %v7257_v58 }
 0x858   : > { %v7182_v23 = vmax.f32 %v7015_v30, 0.0  ;;  %v7019_v4 = vadd.f32 %v7018_v20, %v13449_v42 }
 0x859   : > { %v7385_v16 = vmul.f32 %v13460_v25, %v7181_v62  ;;  %v7183_v27 = vmax.f32 %v7017_v31, 0.0 }
 0x85a   : > { %v7386_v29 = vmul.f32 %v13464_v53, %v7182_v23  ;;  %v7184_v0 = vmax.f32 %v7019_v4, 0.0 }
 0x85b   : > { %v7259_v63 = vpack.c.bf16 %v7183_v27, %v7181_v62  ;;  %v7387_v14 = vmul.f32 %v13460_v25, %v7183_v27  ;;  %7528 = vadd.xlane.f32.xlu0 %v13736_v3 }
 0x85c   : > { %v7260_v36 = vpack.c.bf16 %v7184_v0, %v7182_v23  ;;  %v7388_v38 = vmul.f32 %v13464_v53, %v7184_v0  ;;  %v7022_v60 = vpop.f32.mrb[104].mxu0  ;;  %v13829_v41 = vadd.f32 %v7386_v29, %v7385_v16 }
 0x85d   : > { %v7023_v46 = vadd.f32 %v7022_v60, %v13446_v7  ;;  %v7024_v40 = vpop.f32.mrb[105].mxu0 }
 0x85e   : > { %v7025_v44 = vadd.f32 %v7024_v40, %v13449_v42  ;;  %v7026_v28 = vpop.f32.mrb[106].mxu0  ;;  %8162 = vmatprep.mubr.bf16.mxu1 %v7260_v36  ;;  %v13833_v32 = vadd.f32 %v7388_v38, %v7387_v14 }
 0x85f   : > { %v7185_v55 = vmax.f32 %v7023_v46, 0.0  ;;  %v7027_v12 = vadd.f32 %v7026_v28, %v13446_v7  ;;  %v7028_v3 = vpop.f32.mrb[107].mxu0  ;;  %8163 = vmatmul.mubr.bf16.gmra.mrb[216].mxu1 %v7259_v63  ;;  %7534 = vadd.xlane.f32.xlu0 %v13748_v43  ;;  %v11640_v43 = vld [vmem:[%s13701_s15 + $0x50] sm:$0xff]   ;;  %v7424_v63 = vpop.xlane.xlu1 %7423 }
 0x860   : > { %v7186_v22 = vmax.f32 %v7025_v44, 0.0  ;;  %v7029_v15 = vadd.f32 %v7028_v3, %v13449_v42  ;;  %10864 = vmatprep.mubr.msk.bf16.mxu0 %vm8504_vm5, %v11640_v43  ;;  %v11642_v43 = vld [vmem:[%s13701_s15 + $0x60] sm:$0xff]  }
 0x861   : > { %v7389_v13 = vmul.f32 %v13460_v25, %v7185_v55  ;;  %v7187_v6 = vmax.f32 %v7027_v12, 0.0  ;;  %7531 = vadd.xlane.f32.xlu1 %v13740_v26  ;;  %10865 = vmatmul.mubr.msk.bf16.gmra.mrb[160].mxu0 %vm8504_vm5, %v11641_v2  ;;  %v7427_v12 = vpop.xlane.xlu0 %7426 }
 0x862   : > { %v7390_v9 = vmul.f32 %v13464_v53, %v7186_v22  ;;  %v7188_v34 = vmax.f32 %v7029_v15, 0.0  ;;  %10868 = vmatprep.mubr.msk.bf16.mxu0 %vm8504_vm5, %v11642_v43 }
 0x863   : > { %v7261_v50 = vpack.c.bf16 %v7187_v6, %v7185_v55  ;;  %v7391_v5 = vmul.f32 %v13460_v25, %v7187_v6  ;;  %v7615_v55 = vadd.f32 %v13753_v37, %v7424_v63 }
 0x864   : > { %v7262_v10 = vpack.c.bf16 %v7188_v34, %v7186_v22  ;;  %v7392_v8 = vmul.f32 %v13464_v53, %v7188_v34  ;;  %v7032_v19 = vpop.f32.mrb[108].mxu0  ;;  %v13844_v54 = vadd.f32 %v7390_v9, %v7389_v13  ;;  %v7616_v34 = vadd.f32 %v13753_v37, %v7427_v12 }
 0x865   : > { %v7033_v58 = vadd.f32 %v7032_v19, %v13446_v7  ;;  %v7034_v18 = vpop.f32.mrb[109].mxu0 }
 0x866   : > { %v7035_v52 = vadd.f32 %v7034_v18, %v13449_v42  ;;  %v7036_v26 = vpop.f32.mrb[110].mxu0  ;;  %8172 = vmatprep.mubr.bf16.mxu1 %v7262_v10  ;;  %v13850_v51 = vadd.f32 %v7392_v8, %v7391_v5 }
 0x867   : > { %v7189_v47 = vmax.f32 %v7033_v58, 0.0  ;;  %v7037_v21 = vadd.f32 %v7036_v26, %v13446_v7  ;;  %v7038_v59 = vpop.f32.mrb[111].mxu0  ;;  %8173 = vmatmul.mubr.bf16.gmra.mrb[220].mxu1 %v7261_v50 }
 0x868   : > { %15547 = vst [vmem:[#allocation6_spill] sm:$0xff] %v13850_v51  ;;  %v7190_v17 = vmax.f32 %v7035_v52, 0.0  ;;  %v7039_v30 = vadd.f32 %v7038_v59, %v13449_v42  ;;  %v11643_v52 = vld [vmem:[%s13701_s15 + $0x68] sm:$0xff]  }
 0x869   : > { %v7393_v45 = vmul.f32 %v13460_v25, %v7189_v47  ;;  %v7191_v62 = vmax.f32 %v7037_v21, 0.0  ;;  %10869 = vmatmul.mubr.msk.bf16.gmra.mrb[164].mxu0 %vm8504_vm5, %v11643_v52 }
 0x86a   : > { %v7394_v31 = vmul.f32 %v13464_v53, %v7190_v17  ;;  %v7192_v20 = vmax.f32 %v7039_v30, 0.0 }
 0x86b   : > { %v7263_v23 = vpack.c.bf16 %v7191_v62, %v7189_v47  ;;  %v7395_v4 = vmul.f32 %v13460_v25, %v7191_v62 }
 0x86c   : > { %v7264_v16 = vpack.c.bf16 %v7192_v20, %v7190_v17  ;;  %v7396_v27 = vmul.f32 %v13464_v53, %v7192_v20  ;;  %v7042_v29 = vpop.f32.mrb[112].mxu0  ;;  %v13859_v0 = vadd.f32 %v7394_v31, %v7393_v45 }
 0x86d   : > { %v7043_v14 = vadd.f32 %v7042_v29, %v13446_v7  ;;  %v7044_v36 = vpop.f32.mrb[113].mxu0 }
 0x86e   : > { %15548 = vst [vmem:[#allocation7_spill] sm:$0xff] %v13859_v0  ;;  %v7045_v38 = vadd.f32 %v7044_v36, %v13449_v42  ;;  %v7046_v60 = vpop.f32.mrb[114].mxu0  ;;  %8182 = vmatprep.mubr.bf16.mxu1 %v7264_v16  ;;  %v13863_v46 = vadd.f32 %v7396_v27, %v7395_v4 }
 0x86f   : > { %v7193_v40 = vmax.f32 %v7043_v14, 0.0  ;;  %v7047_v44 = vadd.f32 %v7046_v60, %v13446_v7  ;;  %v7048_v28 = vpop.f32.mrb[115].mxu0  ;;  %8183 = vmatmul.mubr.bf16.gmra.mrb[224].mxu1 %v7263_v23 }
 0x870   : > { %15549 = vst [vmem:[#allocation8_spill] sm:$0xff] %v13863_v46  ;;  %v7194_v3 = vmax.f32 %v7045_v38, 0.0  ;;  %v7049_v22 = vadd.f32 %v7048_v28, %v13449_v42  ;;  %v7708_v28 = vld [vmem:[%s15532_s7] sm:$0x3] }
 0x871   : > { %v7397_v15 = vmul.f32 %v13460_v25, %v7193_v40  ;;  %v7195_v13 = vmax.f32 %v7047_v44, 0.0 }
 0x872   : > { %v7398_v6 = vmul.f32 %v13464_v53, %v7194_v3  ;;  %v7196_v9 = vmax.f32 %v7049_v22, 0.0  ;;  %9879 = vrot.lane.b32.xlu1 %v7615_v55, %s11750_s14 }
 0x873   : > { %v7265_v50 = vpack.c.bf16 %v7195_v13, %v7193_v40  ;;  %v7399_v5 = vmul.f32 %v13460_v25, %v7195_v13 }
 0x874   : > { %v7266_v10 = vpack.c.bf16 %v7196_v9, %v7194_v3  ;;  %v7400_v8 = vmul.f32 %v13464_v53, %v7196_v9  ;;  %v7052_v19 = vpop.f32.mrb[116].mxu0  ;;  %v13875_v58 = vadd.f32 %v7398_v6, %v7397_v15 }
 0x875   : > { %v7053_v18 = vadd.f32 %v7052_v19, %v13446_v7  ;;  %v7054_v2 = vpop.f32.mrb[117].mxu0  ;;  %9881 = vrot.lane.b32.xlu0 %v7616_v34, %s11750_s14  ;;  %v13904_v34 = vrot.slane %v7708_v28, %v11993_v33 }
 0x876   : > { %15550 = vst [vmem:[#allocation9_spill] sm:$0xff] %v13875_v58  ;;  %v7055_v26 = vadd.f32 %v7054_v2, %v13449_v42  ;;  %v7056_v47 = vpop.f32.mrb[118].mxu0  ;;  %8192 = vmatprep.mubr.bf16.mxu1 %v7266_v10  ;;  %v13882_v21 = vadd.f32 %v7400_v8, %v7399_v5  ;;  %v13908_v8 = vrot.slane %v7708_v28, %v11998_v35 }
 0x877   : > { %v7197_v59 = vmax.f32 %v7053_v18, 0.0  ;;  %v7057_v17 = vadd.f32 %v7056_v47, %v13446_v7  ;;  %v7058_v30 = vpop.f32.mrb[119].mxu0  ;;  %8193 = vmatmul.mubr.bf16.gmra.mrb[228].mxu1 %v7265_v50 }
 0x878   : > { %15551 = vst [vmem:[#allocation10_spill] sm:$0xff] %v13882_v21  ;;  %v7198_v45 = vmax.f32 %v7055_v26, 0.0  ;;  %v7059_v62 = vadd.f32 %v7058_v30, %v13449_v42 }
 0x879   : > { %v7401_v31 = vmul.f32 %v13460_v25, %v7197_v59  ;;  %v7199_v20 = vmax.f32 %v7057_v17, 0.0 }
 0x87a   : > { %v7402_v23 = vmul.f32 %v13464_v53, %v7198_v45  ;;  %v7200_v4 = vmax.f32 %v7059_v62, 0.0 }
 0x87b   : > { %v7267_v16 = vpack.c.bf16 %v7199_v20, %v7197_v59  ;;  %v7403_v27 = vmul.f32 %v13460_v25, %v7199_v20  ;;  %v11644_v59 = vld [vmem:[%s13701_s15 + $0x70] sm:$0xff]  }
 0x87c   : > { %v7268_v29 = vpack.c.bf16 %v7200_v4, %v7198_v45  ;;  %v7404_v63 = vmul.f32 %v13464_v53, %v7200_v4  ;;  %v7062_v14 = vpop.f32.mrb[120].mxu0  ;;  %v13891_v36 = vadd.f32 %v7402_v23, %v7401_v31  ;;  %v11645_v45 = vld [vmem:[%s13701_s15 + $0x78] sm:$0xff]   ;;  %10872 = vmatprep.mubr.msk.bf16.mxu0 %vm8504_vm5, %v11644_v59 }
 0x87d   : > { %v7063_v38 = vadd.f32 %v7062_v14, %v13446_v7  ;;  %v7064_v60 = vpop.f32.mrb[121].mxu0  ;;  %10873 = vmatmul.mubr.msk.bf16.gmra.mrb[168].mxu0 %vm8504_vm5, %v11645_v45 }
 0x87e   : > { %15552 = vst [vmem:[#allocation11_spill] sm:$0xff] %v13891_v36  ;;  %v7065_v40 = vadd.f32 %v7064_v60, %v13449_v42  ;;  %v7066_v44 = vpop.f32.mrb[122].mxu0  ;;  %8202 = vmatprep.mubr.bf16.mxu1 %v7268_v29  ;;  %v13898_v55 = vadd.f32 %v7404_v63, %v7403_v27 }
 0x87f   : > { %v7201_v12 = vmax.f32 %v7063_v38, 0.0  ;;  %v7067_v3 = vadd.f32 %v7066_v44, %v13446_v7  ;;  %v7068_v22 = vpop.f32.mrb[123].mxu0  ;;  %8203 = vmatmul.mubr.bf16.gmra.mrb[232].mxu1 %v7267_v16 }
 0x880   : > { %15553 = vst [vmem:[#allocation12_spill] sm:$0xff] %v13898_v55  ;;  %v7202_v15 = vmax.f32 %v7065_v40, 0.0  ;;  %v7069_v13 = vadd.f32 %v7068_v22, %v13449_v42 }
 0x881   : > { %v7405_v6 = vmul.f32 %v13460_v25, %v7201_v12  ;;  %v7203_v9 = vmax.f32 %v7067_v3, 0.0 }
 0x882   : > { %v7406_v50 = vmul.f32 %v13464_v53, %v7202_v15  ;;  %v7204_v5 = vmax.f32 %v7069_v13, 0.0  ;;  %v7944_v10 = vpop.f32.mrb[128].mxu1 }
 0x883   : > { %v7269_v19 = vpack.c.bf16 %v7203_v9, %v7201_v12  ;;  %v7407_v43 = vmul.f32 %v13460_v25, %v7203_v9  ;;  %v7946_v18 = vpop.f32.mrb[129].mxu1  ;;  %v13914_v33 = vadd.f32 %v7944_v10, %v13904_v34 }
 0x884   : > { %v7270_v2 = vpack.c.bf16 %v7204_v5, %v7202_v15  ;;  %v7408_v52 = vmul.f32 %v13464_v53, %v7204_v5  ;;  %v7072_v26 = vpop.f32.mrb[124].mxu0  ;;  %v7948_v47 = vpop.f32.mrb[130].mxu1  ;;  %v13921_v62 = vadd.f32 %v7406_v50, %v7405_v6  ;;  %v13924_v31 = vadd.f32 %v7946_v18, %v13908_v8 }
 0x885   : > { %v7073_v17 = vadd.f32 %v7072_v26, %v13446_v7  ;;  %v13918_v30 = vadd.f32 %v7948_v47, %v13904_v34  ;;  %v7950_v35 = vpop.f32.mrb[131].mxu1  ;;  %v7074_v23 = vpop.f32.mrb[125].mxu0 }
 0x886   : > { %15554 = vst [vmem:[#allocation13_spill] sm:$0xff] %v13921_v62  ;;  %v13927_v20 = vadd.f32 %v7950_v35, %v13908_v8  ;;  %8212 = vmatprep.mubr.bf16.mxu1 %v7270_v2  ;;  %v13930_v4 = vadd.f32 %v7408_v52, %v7407_v43  ;;  %v7075_v29 = vadd.f32 %v7074_v23, %v13449_v42  ;;  %v7076_v63 = vpop.f32.mrb[126].mxu0 }
 0x887   : > { %v7205_v16 = vmax.f32 %v7073_v17, 0.0  ;;  %v8239_v27 = vpack.c.bf16 %v13918_v30, %v13914_v33  ;;  %8213 = vmatmul.mubr.bf16.gmra.mrb[236].mxu1 %v7269_v19  ;;  %v7077_v38 = vadd.f32 %v7076_v63, %v13446_v7  ;;  %v7078_v60 = vpop.f32.mrb[127].mxu0 }
 0x888   : > { %15555 = vst [vmem:[#allocation14_spill] sm:$0xff] %v13930_v4  ;;  %v8240_v14 = vpack.c.bf16 %v13927_v20, %v13924_v31  ;;  %v7206_v40 = vmax.f32 %v7075_v29, 0.0  ;;  %v7079_v44 = vadd.f32 %v7078_v60, %v13449_v42 }
 0x889   : > { %v7409_v28 = vmul.f32 %v13460_v25, %v7205_v16  ;;  %v7207_v12 = vmax.f32 %v7077_v38, 0.0 }
 0x88a   : > { %v7954_v3 = vpop.f32.mrb[132].mxu1  ;;  %v7410_v22 = vmul.f32 %v13464_v53, %v7206_v40  ;;  %v7208_v15 = vmax.f32 %v7079_v44, 0.0 }
 0x88b   : > { %v7956_v13 = vpop.f32.mrb[133].mxu1  ;;  %v7271_v6 = vpack.c.bf16 %v7207_v12, %v7205_v16  ;;  %v7411_v9 = vmul.f32 %v13460_v25, %v7207_v12  ;;  %v13945_v19 = vadd.f32 %v7954_v3, %v13904_v34 }
 0x88c   : > { %v7914_v50 = vpop.f32.mrb[128].mxu0  ;;  %v7958_v5 = vpop.f32.mrb[134].mxu1  ;;  %v7272_v10 = vpack.c.bf16 %v7208_v15, %v7206_v40  ;;  %v7412_v7 = vmul.f32 %v13464_v53, %v7208_v15  ;;  %v13951_v18 = vadd.f32 %v7956_v13, %v13908_v8  ;;  %v13956_v25 = vadd.f32 %v7410_v22, %v7409_v28  ;;  %v11646_v28 = vld [vmem:[%s13701_s15 + $0x80] sm:$0xff]   ;;  %v11647_v15 = vld [vmem:[%s13701_s15 + $0x88] sm:$0xff]  }
 0x88d   : > { %v13948_v42 = vadd.f32 %v7958_v5, %v13904_v34  ;;  %v7960_v43 = vpop.f32.mrb[135].mxu1  ;;  %v7916_v52 = vpop.f32.mrb[129].mxu0  ;;  %v7915_v59 = vadd.f32 %v7914_v50, %v13904_v34  ;;  %10876 = vmatprep.mubr.msk.bf16.mxu0 %vm8504_vm5, %v11646_v28 }
 0x88e   : > { %v13954_v2 = vadd.f32 %v7960_v43, %v13908_v8  ;;  %15556 = vst [vmem:[#allocation15_spill] sm:$0xff] %v13956_v25  ;;  %v7918_v53 = vpop.f32.mrb[130].mxu0  ;;  %8222 = vmatprep.mubr.bf16.mxu1 %v7272_v10  ;;  %v13960_v47 = vadd.f32 %v7412_v7, %v7411_v9  ;;  %v7917_v23 = vadd.f32 %v7916_v52, %v13908_v8  ;;  %v7433_v28 = vpop.xlane.xlu0 %7432 }
 0x88f   : > { %v8241_v26 = vpack.c.bf16 %v13948_v42, %v13945_v19  ;;  %v7919_v35 = vadd.f32 %v7918_v53, %v13904_v34  ;;  %v7920_v45 = vpop.f32.mrb[131].mxu0  ;;  %8223 = vmatmul.mubr.bf16.gmra.mrb[240].mxu1 %v7271_v6  ;;  %10877 = vmatmul.mubr.msk.bf16.gmra.mrb[172].mxu0 %vm8504_vm5, %v11647_v15 }
 0x890   : > { %15557 = vst [vmem:[#allocation16_spill] sm:$0xff] %v13960_v47  ;;  %v8242_v17 = vpack.c.bf16 %v13954_v2, %v13951_v18  ;;  %v7921_v16 = vadd.f32 %v7920_v45, %v13908_v8 }
 0x891   : > { %v8233_v29 = vpack.c.bf16 %v7919_v35, %v7915_v59 }
 0x892   : > { %v7964_v63 = vpop.f32.mrb[136].mxu1  ;;  %v8234_v38 = vpack.c.bf16 %v7921_v16, %v7917_v23 }
 0x893   : > { %v7966_v60 = vpop.f32.mrb[137].mxu1  ;;  %v13971_v12 = vadd.f32 %v7964_v63, %v13904_v34 }
 0x894   : > { %v7968_v40 = vpop.f32.mrb[138].mxu1  ;;  %7540 = vadd.xlane.f32.xlu0 %v13771_v56  ;;  %v7924_v44 = vpop.f32.mrb[132].mxu0  ;;  %9025 = vmatprep.mubr.bf16.mxu1 %v8234_v38  ;;  %v13978_v13 = vadd.f32 %v7966_v60, %v13908_v8 }
 0x895   : > { %v13974_v3 = vadd.f32 %v7968_v40, %v13904_v34  ;;  %v7970_v22 = vpop.f32.mrb[139].mxu1  ;;  %v7926_v9 = vpop.f32.mrb[133].mxu0  ;;  %v7925_v5 = vadd.f32 %v7924_v44, %v13904_v34 }
 0x896   : > { %v13981_v6 = vadd.f32 %v7970_v22, %v13908_v8  ;;  %7537 = vadd.xlane.f32.xlu1 %v13756_v49  ;;  %v7928_v50 = vpop.f32.mrb[134].mxu0  ;;  %v7927_v52 = vadd.f32 %v7926_v9, %v13908_v8 }
 0x897   : > { %v8243_v56 = vpack.c.bf16 %v13974_v3, %v13971_v12  ;;  %v7929_v7 = vadd.f32 %v7928_v50, %v13904_v34  ;;  %v7930_v43 = vpop.f32.mrb[135].mxu0  ;;  %9026 = vmatmul.mubr.bf16.vlgmr.msra.gmra.mrb[244].mxu1 %v8233_v29 }
 0x898   : > { %v8244_v10 = vpack.c.bf16 %v13981_v6, %v13978_v13  ;;  %v7931_v49 = vadd.f32 %v7930_v43, %v13908_v8 }
 0x899   : > { %v8235_v53 = vpack.c.bf16 %v7929_v7, %v7925_v5 }
 0x89a   : > { %v7974_v59 = vpop.f32.mrb[140].mxu1  ;;  %v8236_v35 = vpack.c.bf16 %v7931_v49, %v7927_v52  ;;  %v7430_v52 = vpop.xlane.xlu1 %7429 }
 0x89b   : > { %v7976_v45 = vpop.f32.mrb[141].mxu1  ;;  %v13995_v63 = vadd.f32 %v7974_v59, %v13904_v34 }
 0x89c   : > { %v7934_v23 = vpop.f32.mrb[136].mxu0  ;;  %v7978_v16 = vpop.f32.mrb[142].mxu1  ;;  %9033 = vmatprep.mubr.bf16.mxu1 %v8236_v35  ;;  %v14001_v29 = vadd.f32 %v7976_v45, %v13908_v8 }
 0x89d   : > { %v13998_v38 = vadd.f32 %v7978_v16, %v13904_v34  ;;  %v7980_v60 = vpop.f32.mrb[143].mxu1  ;;  %v7936_v44 = vpop.f32.mrb[137].mxu0  ;;  %v7935_v15 = vadd.f32 %v7934_v23, %v13904_v34  ;;  %v7617_v23 = vadd.f32 %v13753_v37, %v7430_v52 }
 0x89e   : > { %v14004_v40 = vadd.f32 %v7980_v60, %v13908_v8  ;;  %v7938_v22 = vpop.f32.mrb[138].mxu0  ;;  %v7937_v7 = vadd.f32 %v7936_v44, %v13908_v8  ;;  %v11648_v60 = vld [vmem:[%s13701_s15 + $0x90] sm:$0xff]  }
 0x89f   : > { %v7939_v50 = vadd.f32 %v7938_v22, %v13904_v34  ;;  %v7940_v5 = vpop.f32.mrb[139].mxu0  ;;  %9034 = vmatmul.mubr.bf16.gmra.mrb[248].mxu1 %v8235_v53  ;;  %v11649_v22 = vld [vmem:[%s13701_s15 + $0x98] sm:$0xff]   ;;  %10880 = vmatprep.mubr.msk.bf16.mxu0 %vm8504_vm5, %v11648_v60 }
 0x8a0   : > { %v7941_v43 = vadd.f32 %v7940_v5, %v13908_v8  ;;  %10881 = vmatmul.mubr.msk.bf16.gmra.mrb[176].mxu0 %vm8504_vm5, %v11649_v22  ;;  %v11650_v22 = vld [vmem:[%s13701_s15 + $0xa0] sm:$0xff]   ;;  %v15558_v13 = vpack.c.bf16 %v14004_v40, %v14001_v29  ;;  %v15559_v29 = vpack.c.bf16 %v13998_v38, %v13995_v63 }
 0x8a1   : > { %v8237_v49 = vpack.c.bf16 %v7939_v50, %v7935_v15  ;;  %10884 = vmatprep.mubr.msk.bf16.mxu0 %vm8504_vm5, %v11650_v22 }
 0x8a2   : > { %v7984_v59 = vpop.f32.mrb[144].mxu1  ;;  %v8238_v35 = vpack.c.bf16 %v7941_v43, %v7937_v7  ;;  %v7618_v7 = vadd.f32 %v13753_v37, %v7433_v28 }
 0x8a3   : > { %v7986_v45 = vpop.f32.mrb[145].mxu1  ;;  %v14017_v9 = vadd.f32 %v7984_v59, %v13904_v34 }
 0x8a4   : > { %v7988_v16 = vpop.f32.mrb[146].mxu1  ;;  %9041 = vmatprep.mubr.bf16.mxu1 %v8238_v35  ;;  %v14024_v5 = vadd.f32 %v7986_v45, %v13908_v8 }
 0x8a5   : > { %v14020_v53 = vadd.f32 %v7988_v16, %v13904_v34  ;;  %v7990_v44 = vpop.f32.mrb[147].mxu1 }
 0x8a6   : > { %v14027_v15 = vadd.f32 %v7990_v44, %v13908_v8 }
 0x8a7   : > { %v8247_v50 = vpack.c.bf16 %v14020_v53, %v14017_v9  ;;  %9883 = vrot.lane.b32.xlu1 %v7617_v23, %s11750_s14  ;;  %9042 = vmatmul.mubr.bf16.gmra.mrb[252].mxu1 %v8237_v49  ;;  %v7436_v9 = vpop.xlane.xlu1 %7435 }
 0x8a8   : > { %v8248_v43 = vpack.c.bf16 %v14027_v15, %v14024_v5  ;;  %9049 = vmatprep.mubr.bf16.mxu1 %v8240_v14 }
 0x8aa   : > { %v7994_v52 = vpop.f32.mrb[148].mxu1  ;;  %9885 = vrot.lane.b32.xlu0 %v7618_v7, %s11750_s14 }
 0x8ab   : > { %v7996_v59 = vpop.f32.mrb[149].mxu1  ;;  %v14042_v45 = vadd.f32 %v7994_v52, %v13904_v34  ;;  %v11651_v52 = vld [vmem:[%s13701_s15 + $0xa8] sm:$0xff]  }
 0x8ac   : > { %v7998_v35 = vpop.f32.mrb[150].mxu1  ;;  %v14048_v49 = vadd.f32 %v7996_v59, %v13908_v8  ;;  %10885 = vmatmul.mubr.msk.bf16.gmra.mrb[180].mxu0 %vm8504_vm5, %v11651_v52  ;;  %v11653_v52 = vld [vmem:[%s13701_s15 + $0xb8] sm:$0xff]  }
 0x8ad   : > { %v14045_v28 = vadd.f32 %v7998_v35, %v13904_v34  ;;  %v8000_v16 = vpop.f32.mrb[151].mxu1 }
 0x8ae   : > { %v8001_v31 = vadd.f32 %v8000_v16, %v13908_v8 }
 0x8af   : > { %v8249_v20 = vpack.c.bf16 %v14045_v28, %v14042_v45  ;;  %9050 = vmatmul.mubr.bf16.gmra.mrb[0].mxu1 %v8239_v27 }
 0x8b0   : > { %v8250_v14 = vpack.c.bf16 %v8001_v31, %v14048_v49  ;;  %9057 = vmatprep.mubr.bf16.mxu1 %v8242_v17 }
 0x8b2   : > { %v8004_v60 = vpop.f32.mrb[152].mxu1 }
 0x8b3   : > { %v8006_v23 = vpop.f32.mrb[153].mxu1  ;;  %v14062_v5 = vadd.f32 %v8004_v60, %v13904_v34 }
 0x8b4   : > { %v8008_v44 = vpop.f32.mrb[154].mxu1  ;;  %v14069_v59 = vadd.f32 %v8006_v23, %v13908_v8  ;;  %v11652_v23 = vld [vmem:[%s13701_s15 + $0xb0] sm:$0xff]  }
 0x8b5   : > { %v14065_v15 = vadd.f32 %v8008_v44, %v13904_v34  ;;  %v8010_v7 = vpop.f32.mrb[155].mxu1  ;;  %10888 = vmatprep.mubr.msk.bf16.mxu0 %vm8504_vm5, %v11652_v23 }
 0x8b6   : > { %v14072_v33 = vadd.f32 %v8010_v7, %v13908_v8  ;;  %10889 = vmatmul.mubr.msk.bf16.gmra.mrb[184].mxu0 %vm8504_vm5, %v11653_v52  ;;  %v11655_v52 = vld [vmem:[%s13701_s15 + $0xc8] sm:$0xff]  }
 0x8b7   : > { %v8251_v30 = vpack.c.bf16 %v14065_v15, %v14062_v5  ;;  %9058 = vmatmul.mubr.bf16.gmra.mrb[4].mxu1 %v8241_v26  ;;  %v11660_v5 = vld [vmem:[%s15536_s11 + $0x10] sm:$0xff]  }
 0x8b8   : > { %v8252_v27 = vpack.c.bf16 %v14072_v33, %v14069_v59  ;;  %9065 = vmatprep.mubr.bf16.mxu1 %v8244_v10 }
 0x8ba   : > { %v8014_v18 = vpop.f32.mrb[156].mxu1 }
 0x8bb   : > { %v8016_v2 = vpop.f32.mrb[157].mxu1  ;;  %v14087_v35 = vadd.f32 %v8014_v18, %v13904_v34 }
 0x8bc   : > { %v8018_v17 = vpop.f32.mrb[158].mxu1  ;;  %v14093_v31 = vadd.f32 %v8016_v2, %v13908_v8 }
 0x8bd   : > { %v14090_v16 = vadd.f32 %v8018_v17, %v13904_v34  ;;  %v8020_v49 = vpop.f32.mrb[159].mxu1 }
 0x8be   : > { %v14096_v19 = vadd.f32 %v8020_v49, %v13908_v8 }
 0x8bf   : > { %v8253_v42 = vpack.c.bf16 %v14090_v16, %v14087_v35  ;;  %9066 = vmatmul.mubr.bf16.gmra.mrb[8].mxu1 %v8243_v56  ;;  %v11664_v35 = vld [vmem:[%s15536_s11 + $0x20] sm:$0xff]  }
 0x8c0   : > { %v8254_v26 = vpack.c.bf16 %v14096_v19, %v14093_v31  ;;  %9073 = vmatprep.mubr.bf16.mxu1 %v15558_v13 }
 0x8c2   : > { %v8024_v6 = vpop.f32.mrb[160].mxu1 }
 0x8c3   : > { %v8026_v10 = vpop.f32.mrb[161].mxu1  ;;  %v14110_v44 = vadd.f32 %v8024_v6, %v13904_v34 }
 0x8c4   : > { %v8028_v60 = vpop.f32.mrb[162].mxu1  ;;  %v14117_v59 = vadd.f32 %v8026_v10, %v13908_v8  ;;  %v11654_v10 = vld [vmem:[%s13701_s15 + $0xc0] sm:$0xff]  }
 0x8c5   : > { %v14113_v22 = vadd.f32 %v8028_v60, %v13904_v34  ;;  %v8030_v7 = vpop.f32.mrb[163].mxu1  ;;  %10892 = vmatprep.mubr.msk.bf16.mxu0 %vm8504_vm5, %v11654_v10 }
 0x8c6   : > { %v14120_v12 = vadd.f32 %v8030_v7, %v13908_v8  ;;  %10893 = vmatmul.mubr.msk.bf16.gmra.mrb[188].mxu0 %vm8504_vm5, %v11655_v52  ;;  %v11657_v52 = vld [vmem:[%s15536_s11 + $0x8] sm:$0xff]  }
 0x8c7   : > { %v8255_v3 = vpack.c.bf16 %v14113_v22, %v14110_v44  ;;  %9074 = vmatmul.mubr.bf16.gmra.mrb[12].mxu1 %v15559_v29  ;;  %v11668_v44 = vld [vmem:[%s15536_s11 + $0x30] sm:$0xff]  }
 0x8c8   : > { %v8256_v56 = vpack.c.bf16 %v14120_v12, %v14117_v59  ;;  %9081 = vmatprep.mubr.bf16.mxu1 %v8248_v43 }
 0x8c9   : > { %7546 = vadd.xlane.f32.xlu0 %v13785_v48 }
 0x8ca   : > { %v8034_v40 = vpop.f32.mrb[164].mxu1 }
 0x8cb   : > { %v8036_v33 = vpop.f32.mrb[165].mxu1  ;;  %7543 = vadd.xlane.f32.xlu1 %v13776_v1  ;;  %v14134_v2 = vadd.f32 %v8034_v40, %v13904_v34 }
 0x8cc   : > { %v8038_v18 = vpop.f32.mrb[166].mxu1  ;;  %v14140_v63 = vadd.f32 %v8036_v33, %v13908_v8  ;;  %v7439_v33 = vpop.xlane.xlu0 %7438 }
 0x8cd   : > { %v14137_v17 = vadd.f32 %v8038_v18, %v13904_v34  ;;  %v8040_v49 = vpop.f32.mrb[167].mxu1 }
 0x8ce   : > { %v14143_v38 = vadd.f32 %v8040_v49, %v13908_v8 }
 0x8cf   : > { %v8257_v48 = vpack.c.bf16 %v14137_v17, %v14134_v2  ;;  %9082 = vmatmul.mubr.bf16.gmra.mrb[16].mxu1 %v8247_v50 }
 0x8d0   : > { %v8258_v1 = vpack.c.bf16 %v14143_v38, %v14140_v63  ;;  %9089 = vmatprep.mubr.bf16.mxu1 %v8250_v14  ;;  %v7619_v14 = vadd.f32 %v13753_v37, %v7436_v9 }
 0x8d2   : > { %v8044_v43 = vpop.f32.mrb[168].mxu1 }
 0x8d3   : > { %v8046_v13 = vpop.f32.mrb[169].mxu1  ;;  %v14154_v60 = vadd.f32 %v8044_v43, %v13904_v34 }
 0x8d4   : > { %v8048_v6 = vpop.f32.mrb[170].mxu1  ;;  %v14161_v29 = vadd.f32 %v8046_v13, %v13908_v8  ;;  %v11656_v13 = vld [vmem:[%s15536_s11] sm:$0xff]  }
 0x8d5   : > { %v14157_v23 = vadd.f32 %v8048_v6, %v13904_v34  ;;  %v8050_v7 = vpop.f32.mrb[171].mxu1  ;;  %v7620_v6 = vadd.f32 %v13753_v37, %v7439_v33  ;;  %10908 = vmatprep.subr.bf16.mxu0 %v11656_v13 }
 0x8d6   : > { %v14164_v40 = vadd.f32 %v8050_v7, %v13908_v8  ;;  %10909 = vmatpush3.bf16.msra.mxu0 %v11656_v13 }
 0x8d7   : > { %v8259_v53 = vpack.c.bf16 %v14157_v23, %v14154_v60  ;;  %9090 = vmatmul.mubr.bf16.gmra.mrb[20].mxu1 %v8249_v20  ;;  %10910 = vmatprep.subr.bf16.mxu0 %v11657_v52  ;;  %v7445_v23 = vpop.xlane.xlu0 %7444 }
 0x8d8   : > { %v8260_v50 = vpack.c.bf16 %v14164_v40, %v14161_v29  ;;  %9097 = vmatprep.mubr.bf16.mxu1 %v8252_v27 }
 0x8da   : > { %v8054_v18 = vpop.f32.mrb[172].mxu1  ;;  %10911 = vmatpush3.bf16.msra.mxu0 %v11657_v52  ;;  %v11662_v52 = vld [vmem:[%s13701_s15 + $0xe0] sm:$0xff]   ;;  %v14251_v12 = vpop.f32.mrb[140].mxu0 }
 0x8db   : > { %v8056_v49 = vpop.f32.mrb[173].mxu1  ;;  %v14182_v10 = vadd.f32 %v8054_v18, %v13904_v34  ;;  %v11659_v18 = vld [vmem:[%s13701_s15 + $0xd8] sm:$0xff]   ;;  %10912 = vmatprep.subr.bf16.mxu0 %v11660_v5  ;;  %v7451_v46 = vpop.xlane.xlu0 %7450 }
 0x8dc   : > { %v8058_v43 = vpop.f32.mrb[174].mxu1  ;;  %9887 = vrot.lane.b32.xlu1 %v7619_v14, %s11750_s14  ;;  %v14188_v20 = vadd.f32 %v8056_v49, %v13908_v8  ;;  %v11658_v14 = vld [vmem:[%s13701_s15 + $0xd0] sm:$0xff]  }
 0x8dd   : > { %v14185_v45 = vadd.f32 %v8058_v43, %v13904_v34  ;;  %v8060_v28 = vpop.f32.mrb[175].mxu1  ;;  %10896 = vmatprep.mubr.msk.bf16.mxu0 %vm8504_vm5, %v11658_v14  ;;  %v11663_v14 = vld [vmem:[%s13701_s15 + $0xe8] sm:$0xff]  }
 0x8de   : > { %v14191_v27 = vadd.f32 %v8060_v28, %v13908_v8  ;;  %10897 = vmatmul.mubr.msk.bf16.gmra.mrb[192].mxu0 %vm8504_vm5, %v11659_v18 }
 0x8df   : > { %v8261_v7 = vpack.c.bf16 %v14185_v45, %v14182_v10  ;;  %9889 = vrot.lane.b32.xlu0 %v7620_v6, %s11750_s14  ;;  %9098 = vmatmul.mubr.bf16.gmra.mrb[24].mxu1 %v8251_v30  ;;  %v11661_v6 = vld [vmem:[%s15536_s11 + $0x18] sm:$0xff]  }
 0x8e0   : > { %v8262_v37 = vpack.c.bf16 %v14191_v27, %v14188_v20  ;;  %9105 = vmatprep.mubr.bf16.mxu1 %v8254_v26  ;;  %10913 = vmatpush3.bf16.msra.mxu0 %v11660_v5 }
 0x8e1   : > { %10914 = vmatprep.subr.bf16.mxu0 %v11661_v6  ;;  %10900 = vmatprep.mubr.msk.bf16.mxu0 %vm8504_vm5, %v11662_v52  ;;  %v11665_v52 = vld [vmem:[%s15536_s11 + $0x28] sm:$0xff]  }
 0x8e2   : > { %v8064_v9 = vpop.f32.mrb[176].mxu1 }
 0x8e3   : > { %v8066_v33 = vpop.f32.mrb[177].mxu1  ;;  %v14214_v15 = vadd.f32 %v8064_v9, %v13904_v34 }
 0x8e4   : > { %v8068_v49 = vpop.f32.mrb[178].mxu1  ;;  %v14221_v19 = vadd.f32 %v8066_v33, %v13908_v8  ;;  %10915 = vmatpush3.bf16.msra.mxu0 %v11661_v6 }
 0x8e5   : > { %v14217_v30 = vadd.f32 %v8068_v49, %v13904_v34  ;;  %v8070_v31 = vpop.f32.mrb[179].mxu1  ;;  %v14260_v49 = vpop.f32.mrb[141].mxu0  ;;  %10916 = vmatprep.subr.bf16.mxu0 %v11664_v35 }
 0x8e6   : > { %v14224_v26 = vadd.f32 %v8070_v31, %v13908_v8  ;;  %10901 = vmatmul.mubr.msk.bf16.gmra.mrb[196].mxu0 %vm8504_vm5, %v11663_v14  ;;  %v14264_v31 = vpop.f32.mrb[142].mxu0  ;;  %v11666_v14 = vld [vmem:[%s13701_s15 + $0xf0] sm:$0xff]  }
 0x8e7   : > { %v8263_v43 = vpack.c.bf16 %v14217_v30, %v14214_v15  ;;  %9106 = vmatmul.mubr.bf16.gmra.mrb[28].mxu1 %v8253_v42  ;;  %10904 = vmatprep.mubr.msk.bf16.mxu0 %vm8504_vm5, %v11666_v14  ;;  %v11669_v14 = vld [vmem:[%s15536_s11 + $0x38] sm:$0xff]  }
 0x8e8   : > { %v8264_v13 = vpack.c.bf16 %v14224_v26, %v14221_v19  ;;  %9113 = vmatprep.mubr.bf16.mxu1 %v8256_v56  ;;  %10917 = vmatpush3.bf16.msra.mxu0 %v11664_v35  ;;  %v11667_v35 = vld [vmem:[%s13701_s15 + $0xf8] sm:$0xff]  }
 0x8e9   : > { %10918 = vmatprep.subr.bf16.mxu0 %v11665_v52 }
 0x8ea   : > { %v8074_v28 = vpop.f32.mrb[180].mxu1 }
 0x8eb   : > { %v8076_v9 = vpop.f32.mrb[181].mxu1  ;;  %v14246_v16 = vadd.f32 %v8074_v28, %v13904_v34  ;;  %v14271_v28 = vpop.f32.mrb[143].mxu0 }
 0x8ec   : > { %v8078_v33 = vpop.f32.mrb[182].mxu1  ;;  %v14255_v56 = vadd.f32 %v8076_v9, %v13908_v8  ;;  %10919 = vmatpush3.bf16.msra.mxu0 %v11665_v52 }
 0x8ed   : > { %v14249_v42 = vadd.f32 %v8078_v33, %v13904_v34  ;;  %v8080_v59 = vpop.f32.mrb[183].mxu1  ;;  %10920 = vmatprep.subr.bf16.mxu0 %v11668_v44 }
 0x8ee   : > { %v14258_v18 = vadd.f32 %v8080_v59, %v13908_v8  ;;  %10905 = vmatmul.mubr.msk.bf16.gmra.mrb[200].mxu0 %vm8504_vm5, %v11667_v35 }
 0x8ef   : > { %9114 = vmatmul.mubr.bf16.gmra.mrb[32].mxu1 %v8255_v3 }
 0x8f0   : > { %v8266_v6 = vpack.c.bf16 %v14258_v18, %v14255_v56  ;;  %9121 = vmatprep.mubr.bf16.mxu1 %v8258_v1  ;;  %10921 = vmatpush3.bf16.msra.mxu0 %v11668_v44 }
 0x8f1   : > { %10922 = vmatprep.subr.bf16.mxu0 %v11669_v14 }
 0x8f2   : > { %v8084_v9 = vpop.f32.mrb[184].mxu1 }
 0x8f3   : > { %v8086_v33 = vpop.f32.mrb[185].mxu1  ;;  %v14286_v22 = vadd.f32 %v8084_v9, %v13904_v34 }
 0x8f4   : > { %v8088_v59 = vpop.f32.mrb[186].mxu1  ;;  %v14293_v38 = vadd.f32 %v8086_v33, %v13908_v8  ;;  %10923 = vmatpush3.bf16.msra.mxu0 %v11669_v14 }
 0x8f5   : > { %v14289_v3 = vadd.f32 %v8088_v59, %v13904_v34  ;;  %v8090_v63 = vpop.f32.mrb[187].mxu1  ;;  %v14311_v59 = vpop.f32.mrb[144].mxu0 }
 0x8f6   : > { %v14296_v1 = vadd.f32 %v8090_v63, %v13908_v8  ;;  %v14313_v63 = vpop.f32.mrb[145].mxu0 }
 0x8f7   : > { %9122 = vmatmul.mubr.bf16.gmra.mrb[36].mxu1 %v8257_v48  ;;  %v14321_v52 = vpop.f32.mrb[146].mxu0 }
 0x8f8   : > { %9129 = vmatprep.mubr.bf16.mxu1 %v8260_v50  ;;  %v14330_v50 = vpop.f32.mrb[147].mxu0 }
 0x8f9   : > { %v14365_v27 = vpop.f32.mrb[148].mxu0 }
 0x8fa   : > { %v8094_v33 = vpop.f32.mrb[188].mxu1 }
 0x8fb   : > { %v8096_v35 = vpop.f32.mrb[189].mxu1  ;;  %v14316_v2 = vadd.f32 %v8094_v33, %v13904_v34 }
 0x8fc   : > { %v8098_v44 = vpop.f32.mrb[190].mxu1  ;;  %v14324_v29 = vadd.f32 %v8096_v35, %v13908_v8 }
 0x8fd   : > { %v14319_v17 = vadd.f32 %v8098_v44, %v13904_v34  ;;  %v8100_v48 = vpop.f32.mrb[191].mxu1 }
 0x8fe   : > { %v14327_v40 = vadd.f32 %v8100_v48, %v13908_v8  ;;  %7552 = vadd.xlane.f32.xlu0 %v13800_v39 }
 0x8ff   : > { %9130 = vmatmul.mubr.bf16.gmra.mrb[40].mxu1 %v8259_v53  ;;  %v7442_v53 = vpop.xlane.xlu1 %7441 }
 0x900   : > { %7549 = vadd.xlane.f32.xlu1 %v13791_v11  ;;  %9137 = vmatprep.mubr.bf16.mxu1 %v8262_v37 }
 0x902   : > { %v8104_v35 = vpop.f32.mrb[192].mxu1 }
 0x903   : > { %v8106_v39 = vpop.f32.mrb[193].mxu1  ;;  %v14344_v48 = vadd.f32 %v8104_v35, %v13904_v34 }
 0x904   : > { %v8108_v44 = vpop.f32.mrb[194].mxu1  ;;  %v14350_v9 = vadd.f32 %v8106_v39, %v13908_v8 }
 0x905   : > { %v14347_v14 = vadd.f32 %v8108_v44, %v13904_v34  ;;  %v8110_v33 = vpop.f32.mrb[195].mxu1 }
 0x906   : > { %v14353_v60 = vadd.f32 %v8110_v33, %v13908_v8  ;;  %v14367_v33 = vpop.f32.mrb[149].mxu0 }
 0x907   : > { %9138 = vmatmul.mubr.bf16.gmra.mrb[44].mxu1 %v8261_v7  ;;  %v14369_v39 = vpop.f32.mrb[150].mxu0 }
 0x908   : > { %9145 = vmatprep.mubr.bf16.mxu1 %v8264_v13  ;;  %v14377_v7 = vpop.f32.mrb[151].mxu0  ;;  %v14385_v13 = vld [vmem:[#allocation2] ss:$0 sm:$0xff] }
 0x909   : > { %v7621_v11 = vadd.f32 %v14385_v13, %v7442_v53 }
 0x90a   : > { %v8114_v20 = vpop.f32.mrb[196].mxu1 }
 0x90b   : > { %v8116_v37 = vpop.f32.mrb[197].mxu1  ;;  %v14372_v44 = vadd.f32 %v8114_v20, %v13904_v34 }
 0x90c   : > { %v8118_v35 = vpop.f32.mrb[198].mxu1  ;;  %v14380_v19 = vadd.f32 %v8116_v37, %v13908_v8  ;;  %v7622_v37 = vadd.f32 %v14385_v13, %v7445_v23  ;;  %v14420_v23 = vpop.f32.mrb[152].mxu0 }
 0x90d   : > { %v14375_v10 = vadd.f32 %v8118_v35, %v13904_v34  ;;  %v8120_v45 = vpop.f32.mrb[199].mxu1 }
 0x90e   : > { %v14383_v26 = vadd.f32 %v8120_v45, %v13908_v8 }
 0x90f   : > { %9146 = vmatmul.mubr.bf16.gmra.mrb[48].mxu1 %v8263_v43 }
 0x910   : > { %v8274_v35 = vpack.c.bf16 %v14383_v26, %v14380_v19  ;;  %9153 = vmatprep.mubr.bf16.mxu1 %v8266_v6  ;;  %v15560_v6 = vpack.c.bf16 %v14249_v42, %v14246_v16 }
 0x911   : > { %9891 = vrot.lane.b32.xlu1 %v7621_v11, %s11750_s14  ;;  %v15561_v11 = vpack.c.bf16 %v14296_v1, %v14293_v38 }
 0x912   : > { %v8124_v53 = vpop.f32.mrb[200].mxu1 }
 0x913   : > { %v8126_v45 = vpop.f32.mrb[201].mxu1  ;;  %v14402_v20 = vadd.f32 %v8124_v53, %v13904_v34 }
 0x914   : > { %v8128_v5 = vpop.f32.mrb[202].mxu1  ;;  %9893 = vrot.lane.b32.xlu0 %v7622_v37, %s11750_s14  ;;  %v14408_v30 = vadd.f32 %v8126_v45, %v13908_v8  ;;  %v14422_v37 = vpop.f32.mrb[153].mxu0 }
 0x915   : > { %v14405_v19 = vadd.f32 %v8128_v5, %v13904_v34  ;;  %v8130_v15 = vpop.f32.mrb[203].mxu1  ;;  %v14424_v45 = vpop.f32.mrb[154].mxu0 }
 0x916   : > { %v8131_v43 = vadd.f32 %v8130_v15, %v13908_v8  ;;  %v14432_v42 = vpop.f32.mrb[155].mxu0 }
 0x917   : > { %9154 = vmatmul.mubr.bf16.gmra.mrb[52].mxu1 %v15560_v6 }
 0x918   : > { %v8276_v18 = vpack.c.bf16 %v8131_v43, %v14408_v30  ;;  %9161 = vmatprep.mubr.bf16.mxu1 %v15561_v11  ;;  %v15562_v11 = vpack.c.bf16 %v14289_v3, %v14286_v22 }
 0x91a   : > { %v8134_v5 = vpop.f32.mrb[204].mxu1 }
 0x91b   : > { %v8136_v26 = vpop.f32.mrb[205].mxu1  ;;  %v14427_v15 = vadd.f32 %v8134_v5, %v13904_v34  ;;  %v15563_v5 = vpack.c.bf16 %v14327_v40, %v14324_v29  ;;  %v15564_v40 = vpack.c.bf16 %v14319_v17, %v14316_v2 }
 0x91c   : > { %v8138_v53 = vpop.f32.mrb[206].mxu1  ;;  %v14435_v38 = vadd.f32 %v8136_v26, %v13908_v8 }
 0x91d   : > { %v14430_v30 = vadd.f32 %v8138_v53, %v13904_v34  ;;  %v8140_v16 = vpop.f32.mrb[207].mxu1 }
 0x91e   : > { %v14438_v1 = vadd.f32 %v8140_v16, %v13908_v8 }
 0x91f   : > { %9162 = vmatmul.mubr.bf16.gmra.mrb[56].mxu1 %v15562_v11  ;;  %v14472_v11 = vpop.f32.mrb[156].mxu0 }
 0x920   : > { %v8278_v6 = vpack.c.bf16 %v14438_v1, %v14435_v38  ;;  %9169 = vmatprep.mubr.bf16.mxu1 %v15563_v5 }
 0x922   : > { %v8144_v53 = vpop.f32.mrb[208].mxu1 }
 0x923   : > { %v8146_v26 = vpop.f32.mrb[209].mxu1  ;;  %v14451_v16 = vadd.f32 %v8144_v53, %v13904_v34 }
 0x924   : > { %v8148_v56 = vpop.f32.mrb[210].mxu1  ;;  %v14457_v38 = vadd.f32 %v8146_v26, %v13908_v8 }
 0x925   : > { %v14454_v47 = vadd.f32 %v8148_v56, %v13904_v34  ;;  %v8150_v43 = vpop.f32.mrb[211].mxu1  ;;  %v15565_v56 = vpack.c.bf16 %v14353_v60, %v14350_v9 }
 0x926   : > { %v14460_v22 = vadd.f32 %v8150_v43, %v13908_v8  ;;  %v14474_v43 = vpop.f32.mrb[157].mxu0 }
 0x927   : > { %9170 = vmatmul.mubr.bf16.gmra.mrb[60].mxu1 %v15564_v40  ;;  %v14476_v26 = vpop.f32.mrb[158].mxu0 }
 0x928   : > { %9177 = vmatprep.mubr.bf16.mxu1 %v15565_v56  ;;  %v14484_v17 = vpop.f32.mrb[159].mxu0 }
 0x92a   : > { %v8154_v1 = vpop.f32.mrb[212].mxu1 }
 0x92b   : > { %v8156_v5 = vpop.f32.mrb[213].mxu1  ;;  %v14479_v3 = vadd.f32 %v8154_v1, %v13904_v34  ;;  %v15566_v1 = vpack.c.bf16 %v14347_v14, %v14344_v48 }
 0x92c   : > { %v8158_v53 = vpop.f32.mrb[214].mxu1  ;;  %v14487_v9 = vadd.f32 %v8156_v5, %v13908_v8 }
 0x92d   : > { %v14482_v29 = vadd.f32 %v8158_v53, %v13904_v34  ;;  %v8160_v2 = vpop.f32.mrb[215].mxu1 }
 0x92e   : > { %v14490_v60 = vadd.f32 %v8160_v2, %v13908_v8 }
 0x92f   : > { %9178 = vmatmul.mubr.bf16.gmra.mrb[64].mxu1 %v15566_v1 }
 0x930   : > { %9185 = vmatprep.mubr.bf16.mxu1 %v8274_v35  ;;  %v15567_v35 = vpack.c.bf16 %v14375_v10, %v14372_v44 }
 0x932   : > { %v8164_v53 = vpop.f32.mrb[216].mxu1 }
 0x933   : > { %v8166_v4 = vpop.f32.mrb[217].mxu1  ;;  %7558 = vadd.xlane.f32.xlu0 %v13813_v57  ;;  %v14501_v25 = vadd.f32 %v8164_v53, %v13904_v34 }
 0x934   : > { %v8168_v5 = vpop.f32.mrb[218].mxu1  ;;  %v14508_v56 = vadd.f32 %v8166_v4, %v13908_v8  ;;  %v14520_v53 = vpop.f32.mrb[160].mxu0 }
 0x935   : > { %v14504_v2 = vadd.f32 %v8168_v5, %v13904_v34  ;;  %v8170_v40 = vpop.f32.mrb[219].mxu1  ;;  %7555 = vadd.xlane.f32.xlu1 %v13804_v61  ;;  %v14522_v4 = vpop.f32.mrb[161].mxu0 }
 0x936   : > { %v14511_v14 = vadd.f32 %v8170_v40, %v13908_v8  ;;  %v14524_v40 = vpop.f32.mrb[162].mxu0 }
 0x937   : > { %9186 = vmatmul.mubr.bf16.gmra.mrb[68].mxu1 %v15567_v35  ;;  %v14532_v62 = vpop.f32.mrb[163].mxu0 }
 0x938   : > { %9193 = vmatprep.mubr.bf16.mxu1 %v8276_v18 }
 0x93a   : > { %v8174_v1 = vpop.f32.mrb[220].mxu1 }
 0x93b   : > { %v8176_v61 = vpop.f32.mrb[221].mxu1  ;;  %v14527_v55 = vadd.f32 %v8174_v1, %v13904_v34  ;;  %v15568_v1 = vpack.c.bf16 %v14405_v19, %v14402_v20  ;;  %v7624_v19 = vadd.f32 %v14385_v13, %v7451_v46 }
 0x93c   : > { %v8178_v5 = vpop.f32.mrb[222].mxu1  ;;  %v14535_v44 = vadd.f32 %v8176_v61, %v13908_v8 }
 0x93d   : > { %v14530_v48 = vadd.f32 %v8178_v5, %v13904_v34  ;;  %v8180_v57 = vpop.f32.mrb[223].mxu1  ;;  %v7448_v5 = vpop.xlane.xlu1 %7447 }
 0x93e   : > { %v14538_v10 = vadd.f32 %v8180_v57, %v13908_v8  ;;  %v7623_v61 = vadd.f32 %v14385_v13, %v7448_v5 }
 0x93f   : > { %9194 = vmatmul.mubr.bf16.gmra.mrb[72].mxu1 %v15568_v1  ;;  %v14573_v1 = vpop.f32.mrb[164].mxu0 }
 0x940   : > { %9201 = vmatprep.mubr.bf16.mxu1 %v8278_v6  ;;  %15571 = vst [vmem:[#allocation17_spill] sm:$0xff] %v14573_v1  ;;  %v14575_v5 = vpop.f32.mrb[165].mxu0 }
 0x941   : > { %v14577_v6 = vpop.f32.mrb[166].mxu0 }
 0x942   : > { %v8184_v21 = vpop.f32.mrb[224].mxu1  ;;  %15572 = vst [vmem:[#allocation18_spill] sm:$0xff] %v14577_v6 }
 0x943   : > { %v8186_v36 = vpop.f32.mrb[225].mxu1  ;;  %v14549_v57 = vadd.f32 %v8184_v21, %v13904_v34 }
 0x944   : > { %v8188_v58 = vpop.f32.mrb[226].mxu1  ;;  %v14555_v35 = vadd.f32 %v8186_v36, %v13908_v8  ;;  %v15570_v36 = vpack.c.bf16 %v14460_v22, %v14457_v38  ;;  %v14585_v38 = vpop.f32.mrb[167].mxu0 }
 0x945   : > { %v14552_v18 = vadd.f32 %v8188_v58, %v13904_v34  ;;  %v8190_v51 = vpop.f32.mrb[227].mxu1  ;;  %v15569_v58 = vpack.c.bf16 %v14430_v30, %v14427_v15 }
 0x946   : > { %v14558_v20 = vadd.f32 %v8190_v51, %v13908_v8  ;;  %9895 = vrot.lane.b32.xlu1 %v7623_v61, %s11750_s14 }
 0x947   : > { %9202 = vmatmul.mubr.bf16.gmra.mrb[76].mxu1 %v15569_v58 }
 0x948   : > { %v8288_v21 = vpack.c.bf16 %v14558_v20, %v14555_v35  ;;  %9209 = vmatprep.mubr.bf16.mxu1 %v15570_v36  ;;  %v15573_v36 = vpack.c.bf16 %v14454_v47, %v14451_v16 }
 0x949   : > { %9897 = vrot.lane.b32.xlu0 %v7624_v19, %s11750_s14 }
 0x94a   : > { %v8194_v51 = vpop.f32.mrb[228].mxu1 }
 0x94b   : > { %v8196_v46 = vpop.f32.mrb[229].mxu1  ;;  %v14580_v35 = vadd.f32 %v8194_v51, %v13904_v34  ;;  %v15574_v51 = vpack.c.bf16 %v14490_v60, %v14487_v9  ;;  %v15575_v60 = vpack.c.bf16 %v14482_v29, %v14479_v3 }
 0x94c   : > { %v8198_v61 = vpop.f32.mrb[230].mxu1  ;;  %v8197_v22 = vadd.f32 %v8196_v46, %v13908_v8 }
 0x94d   : > { %v14583_v15 = vadd.f32 %v8198_v61, %v13904_v34  ;;  %v8200_v30 = vpop.f32.mrb[231].mxu1 }
 0x94e   : > { %v8201_v20 = vadd.f32 %v8200_v30, %v13908_v8 }
 0x94f   : > { %9210 = vmatmul.mubr.bf16.gmra.mrb[80].mxu1 %v15573_v36 }
 0x950   : > { %v8290_v58 = vpack.c.bf16 %v8201_v20, %v8197_v22  ;;  %9217 = vmatprep.mubr.bf16.mxu1 %v15574_v51  ;;  %v14619_v36 = vpop.f32.mrb[168].mxu0 }
 0x951   : > { %15577 = vst [vmem:[#allocation19_spill] sm:$0xff] %v14619_v36  ;;  %v14627_v9 = vpop.f32.mrb[169].mxu0 }
 0x952   : > { %v8204_v61 = vpop.f32.mrb[232].mxu1 }
 0x953   : > { %v8206_v6 = vpop.f32.mrb[233].mxu1  ;;  %v14598_v0 = vadd.f32 %v8204_v61, %v13904_v34 }
 0x954   : > { %v8208_v1 = vpop.f32.mrb[234].mxu1  ;;  %v14604_v22 = vadd.f32 %v8206_v6, %v13908_v8 }
 0x955   : > { %v14601_v46 = vadd.f32 %v8208_v1, %v13904_v34  ;;  %v8210_v30 = vpop.f32.mrb[235].mxu1  ;;  %v15576_v1 = vpack.c.bf16 %v14511_v14, %v14508_v56  ;;  %v14635_v56 = vpop.f32.mrb[170].mxu0 }
 0x956   : > { %v14607_v47 = vadd.f32 %v8210_v30, %v13908_v8  ;;  %15578 = vst [vmem:[#allocation20_spill] sm:$0xff] %v14635_v56 }
 0x957   : > { %9218 = vmatmul.mubr.bf16.gmra.mrb[84].mxu1 %v15575_v60  ;;  %v14639_v60 = vpop.f32.mrb[171].mxu0 }
 0x958   : > { %9225 = vmatprep.mubr.bf16.mxu1 %v15576_v1 }
 0x95a   : > { %v8214_v20 = vpop.f32.mrb[236].mxu1 }
 0x95b   : > { %v8216_v6 = vpop.f32.mrb[237].mxu1  ;;  %v14622_v61 = vadd.f32 %v8214_v20, %v13904_v34  ;;  %v15579_v20 = vpack.c.bf16 %v14504_v2, %v14501_v25 }
 0x95c   : > { %v8218_v51 = vpop.f32.mrb[238].mxu1  ;;  %v14630_v3 = vadd.f32 %v8216_v6, %v13908_v8  ;;  %v15580_v6 = vpack.c.bf16 %v14538_v10, %v14535_v44  ;;  %v15581_v44 = vpack.c.bf16 %v14530_v48, %v14527_v55 }
 0x95d   : > { %v14625_v30 = vadd.f32 %v8218_v51, %v13904_v34  ;;  %v8220_v16 = vpop.f32.mrb[239].mxu1 }
 0x95e   : > { %v14633_v29 = vadd.f32 %v8220_v16, %v13908_v8 }
 0x95f   : > { %9226 = vmatmul.mubr.bf16.gmra.mrb[88].mxu1 %v15579_v20 }
 0x960   : > { %9233 = vmatprep.mubr.bf16.mxu1 %v15580_v6 }
 0x962   : > { %v8224_v16 = vpop.f32.mrb[240].mxu1  ;;  %v14670_v10 = vpop.f32.mrb[172].mxu0 }
 0x963   : > { %v8226_v51 = vpop.f32.mrb[241].mxu1  ;;  %v14650_v56 = vadd.f32 %v8224_v16, %v13904_v34  ;;  %15582 = vst [vmem:[#allocation21_spill] sm:$0xff] %v14670_v10 }
 0x964   : > { %v8228_v19 = vpop.f32.mrb[242].mxu1  ;;  %v14656_v1 = vadd.f32 %v8226_v51, %v13908_v8 }
 0x965   : > { %v14653_v14 = vadd.f32 %v8228_v19, %v13904_v34  ;;  %v8230_v36 = vpop.f32.mrb[243].mxu1 }
 0x966   : > { %v14659_v25 = vadd.f32 %v8230_v36, %v13908_v8  ;;  %v14675_v8 = vld [vmem:[%s15535_s10] ss:$0 sm:$0xff]  ;;  %v14677_v36 = vpop.f32.mrb[173].mxu0 }
 0x967   : > { %9234 = vmatmul.mubr.bf16.gmra.mrb[92].mxu1 %v15581_v44  ;;  %v15585_v44 = vpack.c.bf16 %v14552_v18, %v14549_v57  ;;  %v15586_v18 = vpack.c.bf16 %v14583_v15, %v14580_v35 }
 0x968   : > { %7564 = vadd.xlane.f32.xlu0 %v13829_v41  ;;  %9241 = vmatprep.mubr.bf16.mxu1 %v8288_v21  ;;  %v14680_v41 = vpop.f32.mrb[174].mxu0 }
 0x969   : > { %15583 = vst [vmem:[#allocation22_spill] sm:$0xff] %v14680_v41  ;;  %v14682_v6 = vpop.f32.mrb[175].mxu0 }
 0x96a   : > { %7561 = vadd.xlane.f32.xlu1 %v13819_v24  ;;  %v9027_v19 = vpop.f32.mrb[244].mxu1  ;;  %15584 = vst [vmem:[#allocation23_spill] sm:$0xff] %v14682_v6  ;;  %v7454_v6 = vpop.xlane.xlu1 %7453 }
 0x96b   : > { %v9028_v55 = vadd.f32 %v9027_v19, %v14260_v49  ;;  %v9029_v48 = vpop.f32.mrb[245].mxu1  ;;  %v7625_v57 = vadd.f32 %v14385_v13, %v7454_v6 }
 0x96c   : > { %v9030_v20 = vpop.f32.mrb[246].mxu1 }
 0x96d   : > { %v9289_v24 = vadd.f32 %v14675_v8, %v9028_v55  ;;  %v9031_v21 = vadd.f32 %v9030_v20, %v14271_v28  ;;  %v9032_v16 = vpop.f32.mrb[247].mxu1 }
 0x96f   : > { %v9290_v51 = vadd.f32 %v14675_v8, %v9031_v21  ;;  %9242 = vmatmul.mubr.bf16.gmra.mrb[96].mxu1 %v15585_v44  ;;  %v9353_v2 = vmax.f32 %v9289_v24, 0.0 }
 0x970   : > { %9249 = vmatprep.mubr.bf16.mxu1 %v8290_v58  ;;  %v7457_v58 = vpop.xlane.xlu0 %7456 }
 0x971   : > { %v9354_v49 = vmax.f32 %v9290_v51, 0.0 }
 0x972   : > { %v9035_v19 = vpop.f32.mrb[248].mxu1 }
 0x973   : > { %v9036_v48 = vadd.f32 %v14251_v12, %v9035_v19  ;;  %v9037_v34 = vpop.f32.mrb[249].mxu1  ;;  %v9417_v41 = vpack.c.bf16 %v9354_v49, %v9353_v2  ;;  %v15587_v12 = vpack.c.bf16 %v14607_v47, %v14604_v22  ;;  %v14701_v24 = vpop.f32.mrb[176].mxu0 }
 0x974   : > { %v9038_v10 = vpop.f32.mrb[250].mxu1 }
 0x975   : > { %v9291_v55 = vadd.f32 %v14675_v8, %v9036_v48  ;;  %v9039_v28 = vadd.f32 %v14264_v31, %v9038_v10  ;;  %v9040_v20 = vpop.f32.mrb[251].mxu1  ;;  %10924 = vmatprep.mubr.bf16.mxu0 %v9417_v41  ;;  %v14704_v10 = vpop.f32.mrb[177].mxu0  ;;  %v7626_v41 = vadd.f32 %v14385_v13, %v7457_v58  ;;  %v15588_v48 = vpack.c.bf16 %v14601_v46, %v14598_v0 }
 0x976   : > { %v14708_v16 = vpop.f32.mrb[178].mxu0  ;;  %v15590_v46 = vpack.c.bf16 %v14625_v30, %v14622_v61 }
 0x977   : > { %v9292_v21 = vadd.f32 %v14675_v8, %v9039_v28  ;;  %9250 = vmatmul.mubr.bf16.gmra.mrb[100].mxu1 %v15586_v18  ;;  %v9355_v2 = vmax.f32 %v9291_v55, 0.0  ;;  %v14710_v22 = vpop.f32.mrb[179].mxu0 }
 0x978   : > { %9257 = vmatprep.mubr.bf16.mxu1 %v15587_v12 }
 0x979   : > { %v9356_v34 = vmax.f32 %v9292_v21, 0.0 }
 0x97a   : > { %v9043_v31 = vpop.f32.mrb[252].mxu1 }
 0x97b   : > { %9899 = vrot.lane.b32.xlu1 %v7625_v57, %s11750_s14  ;;  %v9418_v35 = vpack.c.bf16 %v9356_v34, %v9355_v2  ;;  %v9044_v15 = vadd.f32 %v9043_v31, %v14313_v63  ;;  %v9045_v6 = vpop.f32.mrb[253].mxu1  ;;  %v15589_v63 = vpack.c.bf16 %v14633_v29, %v14630_v3  ;;  %v15591_v3 = vpack.c.bf16 %v14659_v25, %v14656_v1 }
 0x97c   : > { %v9046_v51 = vpop.f32.mrb[254].mxu1 }
 0x97d   : > { %v9293_v47 = vadd.f32 %v14675_v8, %v9044_v15  ;;  %v9047_v44 = vadd.f32 %v9046_v51, %v14330_v50  ;;  %v9048_v49 = vpop.f32.mrb[255].mxu1  ;;  %10925 = vmatmul.mubr.bf16.vlgmr.msra.gmra.mrb[204].mxu0 %v9418_v35 }
 0x97e   : > { %9901 = vrot.lane.b32.xlu0 %v7626_v41, %s11750_s14 }
 0x97f   : > { %v9294_v19 = vadd.f32 %v14675_v8, %v9047_v44  ;;  %9258 = vmatmul.mubr.bf16.gmra.mrb[104].mxu1 %v15588_v48  ;;  %v9357_v55 = vmax.f32 %v9293_v47, 0.0  ;;  %v14732_v34 = vpop.f32.mrb[180].mxu0  ;;  %v15592_v44 = vpack.c.bf16 %v14653_v14, %v14650_v56 }
 0x980   : > { %9265 = vmatprep.mubr.bf16.mxu1 %v15589_v63  ;;  %v14735_v15 = vpop.f32.mrb[181].mxu0 }
 0x981   : > { %v9358_v28 = vmax.f32 %v9294_v19, 0.0  ;;  %v14739_v1 = vpop.f32.mrb[182].mxu0 }
 0x982   : > { %v9051_v20 = vpop.f32.mrb[0].mxu1  ;;  %v14741_v25 = vpop.f32.mrb[183].mxu0 }
 0x983   : > { %v9052_v21 = vadd.f32 %v14311_v59, %v9051_v20  ;;  %v9053_v50 = vpop.f32.mrb[1].mxu1  ;;  %v9419_v18 = vpack.c.bf16 %v9358_v28, %v9357_v55 }
 0x984   : > { %v9054_v57 = vpop.f32.mrb[2].mxu1 }
 0x985   : > { %v9295_v58 = vadd.f32 %v14675_v8, %v9052_v21  ;;  %v9055_v12 = vadd.f32 %v14321_v52, %v9054_v57  ;;  %v9056_v2 = vpop.f32.mrb[3].mxu1  ;;  %10928 = vmatprep.mubr.bf16.mxu0 %v9419_v18 }
 0x987   : > { %v9296_v0 = vadd.f32 %v14675_v8, %v9055_v12  ;;  %9266 = vmatmul.mubr.bf16.gmra.mrb[108].mxu1 %v15590_v46  ;;  %v9359_v59 = vmax.f32 %v9295_v58, 0.0 }
 0x988   : > { %9273 = vmatprep.mubr.bf16.mxu1 %v15591_v3 }
 0x989   : > { %v9360_v29 = vmax.f32 %v9296_v0, 0.0  ;;  %v14751_v56 = vpop.f32.mrb[184].mxu0 }
 0x98a   : > { %v9059_v31 = vpop.f32.mrb[4].mxu1  ;;  %v14753_v58 = vpop.f32.mrb[185].mxu0 }
 0x98b   : > { %v9420_v41 = vpack.c.bf16 %v9360_v29, %v9359_v59  ;;  %v9060_v52 = vadd.f32 %v9059_v31, %v14367_v33  ;;  %v9061_v35 = vpop.f32.mrb[5].mxu1  ;;  %v14756_v0 = vpop.f32.mrb[186].mxu0 }
 0x98c   : > { %v9062_v6 = vpop.f32.mrb[6].mxu1 }
 0x98d   : > { %v9297_v51 = vadd.f32 %v14675_v8, %v9060_v52  ;;  %v9063_v61 = vadd.f32 %v9062_v6, %v14377_v7  ;;  %v9064_v30 = vpop.f32.mrb[7].mxu1  ;;  %10929 = vmatmul.mubr.bf16.gmra.mrb[208].mxu0 %v9420_v41 }
 0x98f   : > { %v9298_v47 = vadd.f32 %v14675_v8, %v9063_v61  ;;  %9274 = vmatmul.mubr.bf16.gmra.mrb[112].mxu1 %v15592_v44  ;;  %v9361_v33 = vmax.f32 %v9297_v51, 0.0  ;;  %v7460_v44 = vpop.xlane.xlu1 %7459 }
 0x991   : > { %v9362_v49 = vmax.f32 %v9298_v47, 0.0 }
 0x992   : > { %v9067_v19 = vpop.f32.mrb[8].mxu1 }
 0x993   : > { %v9068_v48 = vadd.f32 %v14365_v27, %v9067_v19  ;;  %v9069_v63 = vpop.f32.mrb[9].mxu1  ;;  %v9421_v55 = vpack.c.bf16 %v9362_v49, %v9361_v33 }
 0x994   : > { %v9070_v7 = vpop.f32.mrb[10].mxu1 }
 0x995   : > { %v9299_v28 = vadd.f32 %v14675_v8, %v9068_v48  ;;  %v9071_v20 = vadd.f32 %v14369_v39, %v9070_v7  ;;  %v9072_v21 = vpop.f32.mrb[11].mxu1  ;;  %10932 = vmatprep.mubr.bf16.mxu0 %v9421_v55  ;;  %v14759_v39 = vpop.f32.mrb[187].mxu0 }
 0x996   : > { %v7463_v21 = vpop.xlane.xlu0 %7462 }
 0x997   : > { %v9300_v50 = vadd.f32 %v14675_v8, %v9071_v20  ;;  %v9363_v18 = vmax.f32 %v9299_v28, 0.0  ;;  %v7627_v20 = vadd.f32 %v14385_v13, %v7460_v44 }
 0x999   : > { %v9364_v57 = vmax.f32 %v9300_v50, 0.0  ;;  %v14769_v49 = vpop.f32.mrb[188].mxu0 }
 0x99a   : > { %v9075_v14 = vpop.f32.mrb[12].mxu1  ;;  %v14771_v48 = vpop.f32.mrb[189].mxu0 }
 0x99b   : > { %v9422_v12 = vpack.c.bf16 %v9364_v57, %v9363_v18  ;;  %v9076_v27 = vadd.f32 %v9075_v14, %v14422_v37  ;;  %v9077_v2 = vpop.f32.mrb[13].mxu1  ;;  %v14774_v7 = vpop.f32.mrb[190].mxu0 }
 0x99c   : > { %v9078_v46 = vpop.f32.mrb[14].mxu1 }
 0x99d   : > { %7570 = vadd.xlane.f32.xlu0 %v13844_v54  ;;  %v9301_v3 = vadd.f32 %v14675_v8, %v9076_v27  ;;  %v9079_v59 = vadd.f32 %v9078_v46, %v14432_v42  ;;  %v9080_v29 = vpop.f32.mrb[15].mxu1  ;;  %10933 = vmatmul.mubr.bf16.gmra.mrb[212].mxu0 %v9422_v12 }
 0x99f   : > { %7567 = vadd.xlane.f32.xlu1 %v13833_v32  ;;  %v9302_v31 = vadd.f32 %v14675_v8, %v9079_v59  ;;  %v9365_v41 = vmax.f32 %v9301_v3, 0.0 }
 0x9a1   : > { %v9366_v37 = vmax.f32 %v9302_v31, 0.0 }
 0x9a2   : > { %v9083_v52 = vpop.f32.mrb[16].mxu1 }
 0x9a3   : > { %v9084_v35 = vadd.f32 %v14420_v23, %v9083_v52  ;;  %v9085_v6 = vpop.f32.mrb[17].mxu1  ;;  %v9423_v51 = vpack.c.bf16 %v9366_v37, %v9365_v41 }
 0x9a4   : > { %v9086_v54 = vpop.f32.mrb[18].mxu1 }
 0x9a5   : > { %v9303_v61 = vadd.f32 %v14675_v8, %v9084_v35  ;;  %v9087_v30 = vadd.f32 %v14424_v45, %v9086_v54  ;;  %v9088_v47 = vpop.f32.mrb[19].mxu1  ;;  %10936 = vmatprep.mubr.bf16.mxu0 %v9423_v51  ;;  %v14776_v45 = vpop.f32.mrb[191].mxu0 }
 0x9a7   : > { %v9304_v42 = vadd.f32 %v14675_v8, %v9087_v30  ;;  %v9367_v32 = vmax.f32 %v9303_v61, 0.0 }
 0x9a9   : > { %v9368_v33 = vmax.f32 %v9304_v42, 0.0 }
 0x9aa   : > { %v9091_v19 = vpop.f32.mrb[20].mxu1 }
 0x9ab   : > { %v9424_v23 = vpack.c.bf16 %v9368_v33, %v9367_v32  ;;  %v9092_v63 = vadd.f32 %v9091_v19, %v14474_v43  ;;  %v9093_v55 = vpop.f32.mrb[21].mxu1  ;;  %v7628_v43 = vadd.f32 %v14385_v13, %v7463_v21 }
 0x9ac   : > { %v9094_v28 = vpop.f32.mrb[22].mxu1 }
 0x9ad   : > { %v9305_v50 = vadd.f32 %v14675_v8, %v9092_v63  ;;  %v9095_v18 = vadd.f32 %v9094_v28, %v14484_v17  ;;  %v9096_v57 = vpop.f32.mrb[23].mxu1  ;;  %10937 = vmatmul.mubr.bf16.gmra.mrb[216].mxu0 %v9424_v23 }
 0x9af   : > { %v9306_v14 = vadd.f32 %v14675_v8, %v9095_v18  ;;  %v9369_v12 = vmax.f32 %v9305_v50, 0.0 }
 0x9b0   : > { %9903 = vrot.lane.b32.xlu1 %v7627_v20, %s11750_s14 }
 0x9b1   : > { %v9370_v27 = vmax.f32 %v9306_v14, 0.0  ;;  %v14789_v6 = vpop.f32.mrb[192].mxu0 }
 0x9b2   : > { %v9099_v2 = vpop.f32.mrb[24].mxu1  ;;  %v14791_v54 = vpop.f32.mrb[193].mxu0 }
 0x9b3   : > { %9905 = vrot.lane.b32.xlu0 %v7628_v43, %s11750_s14  ;;  %v9100_v46 = vadd.f32 %v14472_v11, %v9099_v2  ;;  %v9101_v3 = vpop.f32.mrb[25].mxu1  ;;  %v9425_v59 = vpack.c.bf16 %v9370_v27, %v9369_v12  ;;  %v14794_v47 = vpop.f32.mrb[194].mxu0 }
 0x9b4   : > { %v9102_v29 = vpop.f32.mrb[26].mxu1  ;;  %v14796_v44 = vpop.f32.mrb[195].mxu0 }
 0x9b5   : > { %v9307_v17 = vadd.f32 %v14675_v8, %v9100_v46  ;;  %v9103_v31 = vadd.f32 %v14476_v26, %v9102_v29  ;;  %v9104_v41 = vpop.f32.mrb[27].mxu1  ;;  %10940 = vmatprep.mubr.bf16.mxu0 %v9425_v59 }
 0x9b7   : > { %v9308_v37 = vadd.f32 %v14675_v8, %v9103_v31  ;;  %v9371_v52 = vmax.f32 %v9307_v17, 0.0 }
 0x9b9   : > { %v9372_v35 = vmax.f32 %v9308_v37, 0.0  ;;  %v14805_v14 = vpop.f32.mrb[196].mxu0 }
 0x9ba   : > { %v9107_v51 = vpop.f32.mrb[28].mxu1  ;;  %v14807_v27 = vpop.f32.mrb[197].mxu0 }
 0x9bb   : > { %v9426_v61 = vpack.c.bf16 %v9372_v35, %v9371_v52  ;;  %v9108_v11 = vadd.f32 %v9107_v51, %v14522_v4  ;;  %v9109_v30 = vpop.f32.mrb[29].mxu1  ;;  %v14809_v46 = vpop.f32.mrb[198].mxu0 }
 0x9bc   : > { %v9110_v42 = vpop.f32.mrb[30].mxu1  ;;  %v14812_v29 = vpop.f32.mrb[199].mxu0  ;;  %v15593_v30 = vld [vmem:[#allocation7_spill] sm:$0xff] }
 0x9bd   : > { %v9309_v26 = vadd.f32 %v14675_v8, %v9108_v11  ;;  %v9111_v32 = vadd.f32 %v9110_v42, %v14532_v62  ;;  %v9112_v33 = vpop.f32.mrb[31].mxu1  ;;  %10941 = vmatmul.mubr.bf16.gmra.mrb[220].mxu0 %v9426_v61 }
 0x9bf   : > { %v9310_v19 = vadd.f32 %v14675_v8, %v9111_v32  ;;  %v9373_v23 = vmax.f32 %v9309_v26, 0.0  ;;  %v15594_v26 = vld [vmem:[#allocation17_spill] sm:$0xff] }
 0x9c1   : > { %v9374_v63 = vmax.f32 %v9310_v19, 0.0  ;;  %v14814_v17 = vpop.f32.mrb[200].mxu0  ;;  %v15595_v19 = vld [vmem:[#allocation6_spill] sm:$0xff] }
 0x9c2   : > { %v9115_v55 = vpop.f32.mrb[32].mxu1  ;;  %v14818_v52 = vpop.f32.mrb[201].mxu0 }
 0x9c3   : > { %v9116_v28 = vadd.f32 %v14520_v53, %v9115_v55  ;;  %v9117_v4 = vpop.f32.mrb[33].mxu1  ;;  %v9427_v20 = vpack.c.bf16 %v9374_v63, %v9373_v23  ;;  %v14820_v35 = vpop.f32.mrb[202].mxu0  ;;  %v15596_v55 = vld [vmem:[#allocation18_spill] sm:$0xff] }
 0x9c4   : > { %v9118_v21 = vpop.f32.mrb[34].mxu1  ;;  %v14823_v61 = vpop.f32.mrb[203].mxu0 }
 0x9c5   : > { %v9311_v50 = vadd.f32 %v14675_v8, %v9116_v28  ;;  %v9119_v18 = vadd.f32 %v14524_v40, %v9118_v21  ;;  %v9120_v57 = vpop.f32.mrb[35].mxu1  ;;  %10944 = vmatprep.mubr.bf16.mxu0 %v9427_v20 }
 0x9c7   : > { %v9312_v62 = vadd.f32 %v14675_v8, %v9119_v18  ;;  %v9375_v43 = vmax.f32 %v9311_v50, 0.0 }
 0x9c9   : > { %v9376_v12 = vmax.f32 %v9312_v62, 0.0 }
 0x9ca   : > { %v9123_v2 = vpop.f32.mrb[36].mxu1 }
 0x9cb   : > { %v9428_v53 = vpack.c.bf16 %v9376_v12, %v9375_v43  ;;  %v9124_v3 = vadd.f32 %v9123_v2, %v14575_v5  ;;  %v9125_v59 = vpop.f32.mrb[37].mxu1 }
 0x9cc   : > { %v9126_v40 = vpop.f32.mrb[38].mxu1  ;;  %v7466_v59 = vpop.xlane.xlu1 %7465 }
 0x9cd   : > { %v9313_v31 = vadd.f32 %v14675_v8, %v9124_v3  ;;  %v9127_v41 = vadd.f32 %v9126_v40, %v14585_v38  ;;  %v9128_v37 = vpop.f32.mrb[39].mxu1  ;;  %10945 = vmatmul.mubr.bf16.gmra.mrb[224].mxu0 %v9428_v53 }
 0x9ce   : > { %v7629_v37 = vadd.f32 %v14385_v13, %v7466_v59  ;;  %v15600_v59 = vld [vmem:[#allocation21_spill] sm:$0xff] }
 0x9cf   : > { %v9314_v51 = vadd.f32 %v14675_v8, %v9127_v41  ;;  %v9377_v5 = vmax.f32 %v9313_v31, 0.0 }
 0x9d1   : > { %v9378_v11 = vmax.f32 %v9314_v51, 0.0  ;;  %v7469_v51 = vpop.xlane.xlu0 %7468 }
 0x9d2   : > { %7576 = vadd.xlane.f32.xlu0 %v15593_v30  ;;  %v9131_v42 = vpop.f32.mrb[40].mxu1 }
 0x9d3   : > { %v9132_v32 = vadd.f32 %v15594_v26, %v9131_v42  ;;  %v9133_v33 = vpop.f32.mrb[41].mxu1  ;;  %v9429_v38 = vpack.c.bf16 %v9378_v11, %v9377_v5  ;;  %v15597_v11 = vld [vmem:[#allocation19_spill] sm:$0xff] }
 0x9d4   : > { %7573 = vadd.xlane.f32.xlu1 %v15595_v19  ;;  %v9134_v23 = vpop.f32.mrb[42].mxu1  ;;  %v15598_v33 = vld [vmem:[#allocation20_spill] sm:$0xff] }
 0x9d5   : > { %v9315_v63 = vadd.f32 %v14675_v8, %v9132_v32  ;;  %v9135_v28 = vadd.f32 %v15596_v55, %v9134_v23  ;;  %v9136_v4 = vpop.f32.mrb[43].mxu1  ;;  %10948 = vmatprep.mubr.bf16.mxu0 %v9429_v38 }
 0x9d7   : > { %v9316_v20 = vadd.f32 %v14675_v8, %v9135_v28  ;;  %v9379_v21 = vmax.f32 %v9315_v63, 0.0 }
 0x9d9   : > { %v9380_v50 = vmax.f32 %v9316_v20, 0.0 }
 0x9da   : > { %v9139_v18 = vpop.f32.mrb[44].mxu1 }
 0x9db   : > { %v9430_v57 = vpack.c.bf16 %v9380_v50, %v9379_v21  ;;  %v9140_v62 = vadd.f32 %v9139_v18, %v14627_v9  ;;  %v9141_v43 = vpop.f32.mrb[45].mxu1 }
 0x9dc   : > { %v9142_v12 = vpop.f32.mrb[46].mxu1 }
 0x9dd   : > { %v9317_v2 = vadd.f32 %v14675_v8, %v9140_v62  ;;  %v9143_v53 = vadd.f32 %v9142_v12, %v14639_v60  ;;  %v9144_v3 = vpop.f32.mrb[47].mxu1  ;;  %10949 = vmatmul.mubr.bf16.gmra.mrb[228].mxu0 %v9430_v57  ;;  %v7630_v60 = vadd.f32 %v14385_v13, %v7469_v51  ;;  %v15599_v57 = vld [vmem:[#allocation23_spill] sm:$0xff]  ;;  %v15601_v51 = vld [vmem:[#allocation22_spill] sm:$0xff] }
 0x9df   : > { %v9318_v40 = vadd.f32 %v14675_v8, %v9143_v53  ;;  %v9381_v31 = vmax.f32 %v9317_v2, 0.0 }
 0x9e1   : > { %v9382_v41 = vmax.f32 %v9318_v40, 0.0 }
 0x9e2   : > { %v9147_v5 = vpop.f32.mrb[48].mxu1 }
 0x9e3   : > { %v9148_v30 = vadd.f32 %v15597_v11, %v9147_v5  ;;  %v9149_v9 = vpop.f32.mrb[49].mxu1  ;;  %v9431_v42 = vpack.c.bf16 %v9382_v41, %v9381_v31 }
 0x9e4   : > { %v9150_v26 = vpop.f32.mrb[50].mxu1 }
 0x9e5   : > { %9907 = vrot.lane.b32.xlu1 %v7629_v37, %s11750_s14  ;;  %v9319_v32 = vadd.f32 %v14675_v8, %v9148_v30  ;;  %v9151_v19 = vadd.f32 %v15598_v33, %v9150_v26  ;;  %v9152_v38 = vpop.f32.mrb[51].mxu1  ;;  %10952 = vmatprep.mubr.bf16.mxu0 %v9431_v42 }
 0x9e7   : > { %v9320_v23 = vadd.f32 %v14675_v8, %v9151_v19  ;;  %v9383_v63 = vmax.f32 %v9319_v32, 0.0 }
 0x9e8   : > { %9909 = vrot.lane.b32.xlu0 %v7630_v60, %s11750_s14 }
 0x9e9   : > { %v9384_v55 = vmax.f32 %v9320_v23, 0.0 }
 0x9ea   : > { %v9155_v28 = vpop.f32.mrb[52].mxu1 }
 0x9eb   : > { %v9432_v4 = vpack.c.bf16 %v9384_v55, %v9383_v63  ;;  %v9156_v20 = vadd.f32 %v9155_v28, %v14677_v36  ;;  %v9157_v21 = vpop.f32.mrb[53].mxu1 }
 0x9ec   : > { %v9158_v50 = vpop.f32.mrb[54].mxu1 }
 0x9ed   : > { %v9321_v18 = vadd.f32 %v14675_v8, %v9156_v20  ;;  %v9159_v62 = vadd.f32 %v9158_v50, %v15599_v57  ;;  %v9160_v43 = vpop.f32.mrb[55].mxu1  ;;  %10953 = vmatmul.mubr.bf16.gmra.mrb[232].mxu0 %v9432_v4 }
 0x9ef   : > { %v9322_v12 = vadd.f32 %v14675_v8, %v9159_v62  ;;  %v9385_v2 = vmax.f32 %v9321_v18, 0.0 }
 0x9f1   : > { %v9386_v53 = vmax.f32 %v9322_v12, 0.0  ;;  %v15602_v12 = vld [vmem:[#allocation9_spill] sm:$0xff] }
 0x9f2   : > { %v9163_v3 = vpop.f32.mrb[56].mxu1 }
 0x9f3   : > { %v9164_v40 = vadd.f32 %v15600_v59, %v9163_v3  ;;  %v9165_v31 = vpop.f32.mrb[57].mxu1  ;;  %v9433_v41 = vpack.c.bf16 %v9386_v53, %v9385_v2  ;;  %v15603_v2 = vld [vmem:[#allocation8_spill] sm:$0xff] }
 0x9f4   : > { %v9166_v37 = vpop.f32.mrb[58].mxu1 }
 0x9f5   : > { %v9323_v36 = vadd.f32 %v14675_v8, %v9164_v40  ;;  %v9167_v5 = vadd.f32 %v15601_v51, %v9166_v37  ;;  %v9168_v11 = vpop.f32.mrb[59].mxu1  ;;  %10956 = vmatprep.mubr.bf16.mxu0 %v9433_v41  ;;  %v7472_v37 = vpop.xlane.xlu1 %7471 }
 0x9f7   : > { %v9324_v30 = vadd.f32 %v14675_v8, %v9167_v5  ;;  %v9387_v9 = vmax.f32 %v9323_v36, 0.0 }
 0x9f9   : > { %v9388_v42 = vmax.f32 %v9324_v30, 0.0  ;;  %v14865_v11 = vpop.xlane.xlu1 %7477 }
 0x9fa   : > { %v9171_v26 = vpop.f32.mrb[60].mxu1 }
 0x9fb   : > { %v9434_v60 = vpack.c.bf16 %v9388_v42, %v9387_v9  ;;  %v9172_v32 = vadd.f32 %v9171_v26, %v14704_v10  ;;  %v9173_v33 = vpop.f32.mrb[61].mxu1 }
 0x9fc   : > { %v9174_v19 = vpop.f32.mrb[62].mxu1 }
 0x9fd   : > { %v9325_v38 = vadd.f32 %v14675_v8, %v9172_v32  ;;  %v9175_v23 = vadd.f32 %v9174_v19, %v14710_v22  ;;  %v9176_v63 = vpop.f32.mrb[63].mxu1  ;;  %10957 = vmatmul.mubr.bf16.gmra.mrb[236].mxu0 %v9434_v60  ;;  %v7475_v32 = vpop.xlane.xlu0 %7474 }
 0x9fe   : > { %v14868_v19 = vpop.xlane.xlu1 %7483  ;;  %v7631_v63 = vadd.f32 %v14385_v13, %v7472_v37 }
 0x9ff   : > { %v9326_v55 = vadd.f32 %v14675_v8, %v9175_v23  ;;  %v9389_v28 = vmax.f32 %v9325_v38, 0.0 }
 0xa01   : > { %v9390_v4 = vmax.f32 %v9326_v55, 0.0 }
 0xa02   : > { %v9179_v20 = vpop.f32.mrb[64].mxu1 }
 0xa03   : > { %v9180_v21 = vadd.f32 %v14701_v24, %v9179_v20  ;;  %v9181_v50 = vpop.f32.mrb[65].mxu1  ;;  %v9435_v18 = vpack.c.bf16 %v9390_v4, %v9389_v28  ;;  %v14874_v28 = vpop.xlane.xlu0 %7480 }
 0xa04   : > { %v9182_v57 = vpop.f32.mrb[66].mxu1  ;;  %v14876_v4 = vpop.xlane.xlu1 %7489 }
 0xa05   : > { %v9327_v10 = vadd.f32 %v14675_v8, %v9180_v21  ;;  %v9183_v62 = vadd.f32 %v14708_v16, %v9182_v57  ;;  %v9184_v43 = vpop.f32.mrb[67].mxu1  ;;  %10960 = vmatprep.mubr.bf16.mxu0 %v9435_v18  ;;  %v7632_v21 = vadd.f32 %v14385_v13, %v7475_v32 }
 0xa07   : > { %7582 = vadd.xlane.f32.xlu0 %v15602_v12  ;;  %v9328_v22 = vadd.f32 %v14675_v8, %v9183_v62  ;;  %v9391_v53 = vmax.f32 %v9327_v10, 0.0  ;;  %v14881_v10 = vpop.xlane.xlu0 %7486 }
 0xa08   : > { %v14884_v43 = vpop.xlane.xlu1 %7495 }
 0xa09   : > { %7579 = vadd.xlane.f32.xlu1 %v15603_v2  ;;  %v9392_v3 = vmax.f32 %v9328_v22, 0.0 }
 0xa0a   : > { %v9187_v59 = vpop.f32.mrb[68].mxu1 }
 0xa0b   : > { %v9436_v40 = vpack.c.bf16 %v9392_v3, %v9391_v53  ;;  %v9188_v24 = vadd.f32 %v9187_v59, %v14735_v15  ;;  %v9189_v31 = vpop.f32.mrb[69].mxu1  ;;  %v14889_v53 = vpop.xlane.xlu0 %7492 }
 0xa0c   : > { %v9190_v41 = vpop.f32.mrb[70].mxu1  ;;  %v14891_v3 = vpop.xlane.xlu1 %7501 }
 0xa0d   : > { %v9329_v36 = vadd.f32 %v14675_v8, %v9188_v24  ;;  %v9191_v16 = vadd.f32 %v9190_v41, %v14741_v25  ;;  %v9192_v51 = vpop.f32.mrb[71].mxu1  ;;  %10961 = vmatmul.mubr.bf16.gmra.mrb[240].mxu0 %v9436_v40 }
 0xa0f   : > { %v9330_v5 = vadd.f32 %v14675_v8, %v9191_v16  ;;  %v9393_v30 = vmax.f32 %v9329_v36, 0.0  ;;  %v14894_v37 = vpop.xlane.xlu0 %7498 }
 0xa10   : > { %v14896_v16 = vpop.xlane.xlu1 %7507 }
 0xa11   : > { %v9394_v9 = vmax.f32 %v9330_v5, 0.0 }
 0xa12   : > { %v9195_v42 = vpop.f32.mrb[72].mxu1 }
 0xa13   : > { %v9196_v26 = vadd.f32 %v14732_v34, %v9195_v42  ;;  %v9197_v60 = vpop.f32.mrb[73].mxu1  ;;  %v9437_v15 = vpack.c.bf16 %v9394_v9, %v9393_v30  ;;  %v14901_v9 = vpop.xlane.xlu0 %7504 }
 0xa14   : > { %v9198_v33 = vpop.f32.mrb[74].mxu1  ;;  %v14903_v42 = vpop.xlane.xlu1 %7513 }
 0xa15   : > { %v9331_v38 = vadd.f32 %v14675_v8, %v9196_v26  ;;  %v9199_v25 = vadd.f32 %v14739_v1, %v9198_v33  ;;  %v9200_v23 = vpop.f32.mrb[75].mxu1  ;;  %10964 = vmatprep.mubr.bf16.mxu0 %v9437_v15 }
 0xa17   : > { %v9332_v55 = vadd.f32 %v14675_v8, %v9199_v25  ;;  %v9395_v34 = vmax.f32 %v9331_v38, 0.0  ;;  %v14906_v38 = vpop.xlane.xlu0 %7510 }
 0xa18   : > { %v14908_v23 = vpop.xlane.xlu1 %7519 }
 0xa19   : > { %v9396_v20 = vmax.f32 %v9332_v55, 0.0 }
 0xa1a   : > { %9911 = vrot.lane.b32.xlu1 %v7631_v63, %s11750_s14  ;;  %v9203_v50 = vpop.f32.mrb[76].mxu1 }
 0xa1b   : > { %v9438_v18 = vpack.c.bf16 %v9396_v20, %v9395_v34  ;;  %v9204_v1 = vadd.f32 %v9203_v50, %v14753_v58  ;;  %v9205_v57 = vpop.f32.mrb[77].mxu1  ;;  %v14913_v20 = vpop.xlane.xlu0 %7516 }
 0xa1c   : > { %v9206_v62 = vpop.f32.mrb[78].mxu1 }
 0xa1d   : > { %9913 = vrot.lane.b32.xlu0 %v7632_v21, %s11750_s14  ;;  %v9333_v12 = vadd.f32 %v14675_v8, %v9204_v1  ;;  %v9207_v22 = vadd.f32 %v9206_v62, %v14759_v39  ;;  %v9208_v2 = vpop.f32.mrb[79].mxu1  ;;  %10965 = vmatmul.mubr.bf16.gmra.mrb[244].mxu0 %v9438_v18  ;;  %v14915_v21 = vpop.xlane.xlu1 %7525 }
 0xa1f   : > { %v9334_v13 = vadd.f32 %v14675_v8, %v9207_v22  ;;  %v9397_v58 = vmax.f32 %v9333_v12, 0.0  ;;  %v14918_v12 = vpop.xlane.xlu0 %7522 }
 0xa21   : > { %v9398_v59 = vmax.f32 %v9334_v13, 0.0 }
 0xa22   : > { %v9211_v40 = vpop.f32.mrb[80].mxu1 }
 0xa23   : > { %v9212_v24 = vadd.f32 %v14751_v56, %v9211_v40  ;;  %v9213_v31 = vpop.f32.mrb[81].mxu1  ;;  %v9439_v41 = vpack.c.bf16 %v9398_v59, %v9397_v58  ;;  %v14922_v58 = vpop.permute.xlu1 %9875 }
 0xa24   : > { %v9214_v36 = vpop.f32.mrb[82].mxu1  ;;  %v14925_v31 = vpop.permute.xlu0 %9873 }
 0xa25   : > { %v9335_v39 = vadd.f32 %v14675_v8, %v9212_v24  ;;  %v9215_v51 = vadd.f32 %v14756_v0, %v9214_v36  ;;  %v9216_v5 = vpop.f32.mrb[83].mxu1  ;;  %10968 = vmatprep.mubr.bf16.mxu0 %v9439_v41 }
 0xa27   : > { %v9336_v30 = vadd.f32 %v14675_v8, %v9215_v51  ;;  %v9399_v56 = vmax.f32 %v9335_v39, 0.0  ;;  %v15604_v51 = vld [vmem:[#allocation11_spill] sm:$0xff] }
 0xa29   : > { %v9400_v26 = vmax.f32 %v9336_v30, 0.0  ;;  %v9878_v30 = vpop.permute.xlu1 %9877 }
 0xa2a   : > { %v9219_v60 = vpop.f32.mrb[84].mxu1 }
 0xa2b   : > { %v9440_v15 = vpack.c.bf16 %v9400_v26, %v9399_v56  ;;  %v9220_v32 = vadd.f32 %v9219_v60, %v14771_v48  ;;  %v9221_v33 = vpop.f32.mrb[85].mxu1  ;;  %v15605_v60 = vld [vmem:[#allocation10_spill] sm:$0xff] }
 0xa2c   : > { %v9222_v25 = vpop.f32.mrb[86].mxu1 }
 0xa2d   : > { %v9337_v0 = vadd.f32 %v14675_v8, %v9220_v32  ;;  %v9223_v63 = vadd.f32 %v9222_v25, %v14776_v45  ;;  %v9224_v55 = vpop.f32.mrb[87].mxu1  ;;  %10969 = vmatmul.mubr.bf16.gmra.mrb[248].mxu0 %v9440_v15  ;;  %v14932_v15 = vpop.xlane.xlu0 %7528 }
 0xa2e   : > { %v14935_v33 = vpop.xlane.xlu1 %7531 }
 0xa2f   : > { %v9338_v34 = vadd.f32 %v14675_v8, %v9223_v63  ;;  %v9401_v50 = vmax.f32 %v9337_v0, 0.0 }
 0xa31   : > { %v9402_v48 = vmax.f32 %v9338_v34, 0.0 }
 0xa32   : > { %v9227_v18 = vpop.f32.mrb[88].mxu1 }
 0xa33   : > { %v9228_v1 = vadd.f32 %v14769_v49, %v9227_v18  ;;  %v9229_v57 = vpop.f32.mrb[89].mxu1  ;;  %v9441_v62 = vpack.c.bf16 %v9402_v48, %v9401_v50  ;;  %v14938_v50 = vpop.xlane.xlu0 %7534 }
 0xa34   : > { %v9230_v22 = vpop.f32.mrb[90].mxu1  ;;  %v9880_v57 = vpop.permute.xlu1 %9879 }
 0xa35   : > { %v9339_v45 = vadd.f32 %v14675_v8, %v9228_v1  ;;  %v9231_v2 = vadd.f32 %v14774_v7, %v9230_v22  ;;  %v9232_v13 = vpop.f32.mrb[91].mxu1  ;;  %10972 = vmatprep.mubr.bf16.mxu0 %v9441_v62 }
 0xa37   : > { %v9340_v59 = vadd.f32 %v14675_v8, %v9231_v2  ;;  %v9403_v40 = vmax.f32 %v9339_v45, 0.0  ;;  %v14943_v2 = vpop.permute.xlu0 %9881 }
 0xa38   : > { %v14945_v13 = vpop.xlane.xlu1 %7537 }
 0xa39   : > { %v9404_v24 = vmax.f32 %v9340_v59, 0.0 }
 0xa3a   : > { %v9235_v49 = vpop.f32.mrb[92].mxu1 }
 0xa3b   : > { %v9442_v41 = vpack.c.bf16 %v9404_v24, %v9403_v40  ;;  %v9236_v36 = vadd.f32 %v9235_v49, %v14791_v54  ;;  %v9237_v39 = vpop.f32.mrb[93].mxu1  ;;  %v14948_v49 = vld [vmem:[#allocation2] ss:$0 sm:$0xff] }
 0xa3c   : > { %7588 = vadd.xlane.f32.xlu0 %v15604_v51  ;;  %v9238_v5 = vpop.f32.mrb[94].mxu1 }
 0xa3d   : > { %v9341_v7 = vadd.f32 %v14675_v8, %v9236_v36  ;;  %v9239_v56 = vadd.f32 %v9238_v5, %v14796_v44  ;;  %v9240_v26 = vpop.f32.mrb[95].mxu1  ;;  %10973 = vmatmul.mubr.bf16.gmra.mrb[252].mxu0 %v9442_v41  ;;  %v7634_v5 = vadd.f32 %v14948_v49, %v14874_v28 }
 0xa3e   : > { %7585 = vadd.xlane.f32.xlu1 %v15605_v60 }
 0xa3f   : > { %v9342_v32 = vadd.f32 %v14675_v8, %v9239_v56  ;;  %v9405_v54 = vmax.f32 %v9341_v7, 0.0  ;;  %v14963_v7 = vpop.xlane.xlu0 %7540 }
 0xa41   : > { %v9406_v25 = vmax.f32 %v9342_v32, 0.0 }
 0xa42   : > { %v9243_v0 = vpop.f32.mrb[96].mxu1 }
 0xa43   : > { %v9244_v63 = vadd.f32 %v14789_v6, %v9243_v0  ;;  %v9245_v55 = vpop.f32.mrb[97].mxu1  ;;  %v9443_v34 = vpack.c.bf16 %v9406_v25, %v9405_v54 }
 0xa44   : > { %v9246_v44 = vpop.f32.mrb[98].mxu1 }
 0xa45   : > { %v9343_v48 = vadd.f32 %v14675_v8, %v9244_v63  ;;  %v9247_v18 = vadd.f32 %v14794_v47, %v9246_v44  ;;  %v9248_v1 = vpop.f32.mrb[99].mxu1  ;;  %10976 = vmatprep.mubr.bf16.mxu0 %v9443_v34  ;;  %v7633_v47 = vadd.f32 %v14948_v49, %v14865_v11 }
 0xa47   : > { %v9344_v62 = vadd.f32 %v14675_v8, %v9247_v18  ;;  %v9407_v22 = vmax.f32 %v9343_v48, 0.0 }
 0xa49   : > { %v9408_v45 = vmax.f32 %v9344_v62, 0.0 }
 0xa4a   : > { %v9251_v6 = vpop.f32.mrb[100].mxu1 }
 0xa4b   : > { %v9444_v59 = vpack.c.bf16 %v9408_v45, %v9407_v22  ;;  %v9252_v40 = vadd.f32 %v9251_v6, %v14807_v27  ;;  %v9253_v24 = vpop.f32.mrb[101].mxu1  ;;  %v14959_v27 = vld [vmem:[%s15537_s12] ss:$0 sm:$0xff]  ;;  %v9886_v45 = vpop.permute.xlu0 %9885 }
 0xa4c   : > { %v9254_v41 = vpop.f32.mrb[102].mxu1 }
 0xa4d   : > { %v9345_v36 = vadd.f32 %v14675_v8, %v9252_v40  ;;  %v9255_v39 = vadd.f32 %v9254_v41, %v14812_v29  ;;  %v9256_v51 = vpop.f32.mrb[103].mxu1  ;;  %10977 = vmatmul.mubr.bf16.gmra.mrb[0].mxu0 %v9444_v59  ;;  %v14966_v29 = vpop.permute.xlu1 %9883 }
 0xa4f   : > { %9915 = vrot.lane.b32.xlu1 %v7633_v47, %s11750_s14  ;;  %v9346_v11 = vadd.f32 %v14675_v8, %v9255_v39  ;;  %v9409_v26 = vmax.f32 %v9345_v36, 0.0  ;;  %v14998_v47 = vpop.xlane.xlu0 %7546 }
 0xa50   : > { %v10926_v56 = vpop.f32.mrb[204].mxu0 }
 0xa51   : > { %v9410_v60 = vmax.f32 %v9346_v11, 0.0  ;;  %v9563_v32 = vadd.f32 %v10926_v56, %v14959_v27  ;;  %v9554_v28 = vpop.f32.mrb[205].mxu0  ;;  %v14989_v40 = vpop.xlane.xlu1 %7543 }
 0xa52   : > { %9917 = vrot.lane.b32.xlu0 %v7634_v5, %s11750_s14  ;;  %v9555_v54 = vadd.f32 %v14959_v27, %v9554_v28  ;;  %v9259_v25 = vpop.f32.mrb[104].mxu1  ;;  %v10927_v0 = vpop.f32.mrb[206].mxu0 }
 0xa53   : > { %v10068_v63 = vsel %vm10065_vm6, %v9563_v32, %v9878_v30  ;;  %v9260_v55 = vadd.f32 %v14805_v14, %v9259_v25  ;;  %v9566_v34 = vadd.f32 %v10927_v0, %v14959_v27  ;;  %v9261_v44 = vpop.f32.mrb[105].mxu1  ;;  %v9557_v48 = vpop.f32.mrb[207].mxu0  ;;  %v9445_v18 = vpack.c.bf16 %v9410_v60, %v9409_v26 }
 0xa54   : > { %10133 = vst.msk [vmem:[%s14971_s25 + $0x10] sm:$0xff] %vm10130_vm7, %v10068_v63  ;;  %v10066_v1 = vsel %vm10065_vm6, %v9555_v54, %v14925_v31  ;;  %v9558_v62 = vadd.f32 %v14959_v27, %v9557_v48  ;;  %v9262_v22 = vpop.f32.mrb[106].mxu1  ;;  %v9890_v60 = vpop.permute.xlu0 %9889 }
 0xa55   : > { %10131 = vst.msk [vmem:[%s14971_s25] sm:$0xff] %vm10130_vm7, %v10066_v1  ;;  %v9347_v14 = vadd.f32 %v14675_v8, %v9260_v55  ;;  %v10069_v30 = vsel %vm10065_vm6, %v9566_v34, %v9880_v57  ;;  %v9263_v6 = vadd.f32 %v14809_v46, %v9262_v22  ;;  %v9264_v59 = vpop.f32.mrb[107].mxu1  ;;  %10980 = vmatprep.mubr.bf16.mxu0 %v9445_v18  ;;  %v9888_v5 = vpop.permute.xlu1 %9887 }
 0xa56   : > { %10134 = vst.msk [vmem:[%s14971_s25 + $0x18] sm:$0xff] %vm10130_vm7, %v10069_v30  ;;  %v10067_v31 = vsel %vm10065_vm6, %v9558_v62, %v14922_v58 }
 0xa57   : > { %10132 = vst.msk [vmem:[%s14971_s25 + $0x8] sm:$0xff] %vm10130_vm7, %v10067_v31  ;;  %v9348_v24 = vadd.f32 %v14675_v8, %v9263_v6  ;;  %v9411_v41 = vmax.f32 %v9347_v14, 0.0 }
 0xa59   : > { %v9412_v36 = vmax.f32 %v9348_v24, 0.0  ;;  %v15004_v28 = vpop.xlane.xlu1 %7549 }
 0xa5a   : > { %v9267_v57 = vpop.f32.mrb[108].mxu1 }
 0xa5b   : > { %v9446_v39 = vpack.c.bf16 %v9412_v36, %v9411_v41  ;;  %v9268_v46 = vadd.f32 %v9267_v57, %v14818_v52  ;;  %v9269_v51 = vpop.f32.mrb[109].mxu1 }
 0xa5c   : > { %v9270_v11 = vpop.f32.mrb[110].mxu1 }
 0xa5d   : > { %v9349_v56 = vadd.f32 %v14675_v8, %v9268_v46  ;;  %v9271_v26 = vadd.f32 %v9270_v11, %v14823_v61  ;;  %v9272_v58 = vpop.f32.mrb[111].mxu1  ;;  %10981 = vmatmul.mubr.bf16.gmra.mrb[4].mxu0 %v9446_v39  ;;  %v15008_v61 = vpop.xlane.xlu0 %7552 }
 0xa5e   : > { %v9892_v41 = vpop.permute.xlu1 %9891 }
 0xa5f   : > { %v9350_v32 = vadd.f32 %v14675_v8, %v9271_v26  ;;  %v9413_v25 = vmax.f32 %v9349_v56, 0.0  ;;  %v15606_v26 = vld [vmem:[#allocation13_spill] sm:$0xff] }
 0xa60   : > { %v10930_v54 = vpop.f32.mrb[208].mxu0 }
 0xa61   : > { %v9414_v0 = vmax.f32 %v9350_v32, 0.0  ;;  %v9579_v52 = vadd.f32 %v10930_v54, %v14959_v27  ;;  %v9570_v63 = vpop.f32.mrb[209].mxu0  ;;  %v9894_v46 = vpop.permute.xlu0 %9893 }
 0xa62   : > { %v9571_v55 = vadd.f32 %v14959_v27, %v9570_v63  ;;  %v9275_v34 = vpop.f32.mrb[112].mxu1  ;;  %v10931_v44 = vpop.f32.mrb[210].mxu0 }
 0xa63   : > { %v10072_v48 = vsel %vm10065_vm6, %v9579_v52, %v9886_v45  ;;  %v9276_v8 = vadd.f32 %v14814_v17, %v9275_v34  ;;  %v9582_v18 = vadd.f32 %v10931_v44, %v14959_v27  ;;  %v9277_v1 = vpop.f32.mrb[113].mxu1  ;;  %v9447_v62 = vpack.c.bf16 %v9414_v0, %v9413_v25  ;;  %v9573_v14 = vpop.f32.mrb[211].mxu0  ;;  %v11704_v45 = vld [vmem:[%s15535_s10] ss:$0 sm:$0xff]  ;;  %v15607_v25 = vld [vmem:[#allocation12_spill] sm:$0xff] }
 0xa64   : > { %10137 = vst.msk [vmem:[%s14971_s25 + $0x30] sm:$0xff] %vm10130_vm7, %v10072_v48  ;;  %v10070_v22 = vsel %vm10065_vm6, %v9571_v55, %v14943_v2  ;;  %v9278_v30 = vpop.f32.mrb[114].mxu1  ;;  %v9574_v59 = vadd.f32 %v14959_v27, %v9573_v14  ;;  %v15031_v51 = vpop.xlane.xlu1 %7555 }
 0xa65   : > { %10135 = vst.msk [vmem:[%s14971_s25 + $0x20] sm:$0xff] %vm10130_vm7, %v10070_v22  ;;  %v9351_v17 = vadd.f32 %v11704_v45, %v9276_v8  ;;  %v10073_v6 = vsel %vm10065_vm6, %v9582_v18, %v9888_v5  ;;  %v9279_v31 = vadd.f32 %v14820_v35, %v9278_v30  ;;  %v9280_v24 = vpop.f32.mrb[115].mxu1  ;;  %10984 = vmatprep.mubr.bf16.mxu0 %v9447_v62  ;;  %v15033_v35 = vpop.xlane.xlu0 %7558 }
 0xa66   : > { %10138 = vst.msk [vmem:[%s14971_s25 + $0x38] sm:$0xff] %vm10130_vm7, %v10073_v6  ;;  %v10071_v2 = vsel %vm10065_vm6, %v9574_v59, %v14966_v29  ;;  %v7635_v30 = vadd.f32 %v14948_v49, %v14868_v19  ;;  %v7636_v19 = vadd.f32 %v14948_v49, %v14881_v10 }
 0xa67   : > { %v9352_v36 = vadd.f32 %v11704_v45, %v9279_v31  ;;  %10136 = vst.msk [vmem:[%s14971_s25 + $0x28] sm:$0xff] %vm10130_vm7, %v10071_v2  ;;  %v9415_v57 = vmax.f32 %v9351_v17, 0.0 }
 0xa68   : > { %v9896_v11 = vpop.permute.xlu1 %9895 }
 0xa69   : > { %v9416_v39 = vmax.f32 %v9352_v36, 0.0  ;;  %v9898_v55 = vpop.permute.xlu0 %9897 }
 0xa6b   : > { %v9448_v5 = vpack.c.bf16 %v9416_v39, %v9415_v57 }
 0xa6c   : > { %v15041_v34 = vpop.xlane.xlu1 %7561 }
 0xa6d   : > { %10985 = vmatmul.mubr.bf16.gmra.mrb[8].mxu0 %v9448_v5  ;;  %v15055_v1 = vpop.xlane.xlu0 %7564 }
 0xa70   : > { %v10934_v56 = vpop.f32.mrb[212].mxu0  ;;  %v9900_v62 = vpop.permute.xlu1 %9899 }
 0xa71   : > { %7594 = vadd.xlane.f32.xlu0 %v15606_v26  ;;  %v9595_v29 = vadd.f32 %v10934_v56, %v14959_v27  ;;  %v9586_v58 = vpop.f32.mrb[213].mxu0  ;;  %v9902_v22 = vpop.permute.xlu0 %9901 }
 0xa72   : > { %v9587_v32 = vadd.f32 %v14959_v27, %v9586_v58  ;;  %v10935_v54 = vpop.f32.mrb[214].mxu0 }
 0xa73   : > { %7591 = vadd.xlane.f32.xlu1 %v15607_v25  ;;  %v10076_v0 = vsel %vm10065_vm6, %v9595_v29, %v9894_v46  ;;  %v9598_v52 = vadd.f32 %v10935_v54, %v14959_v27  ;;  %v9589_v63 = vpop.f32.mrb[215].mxu0 }
 0xa74   : > { %10141 = vst.msk [vmem:[%s14971_s25 + $0x50] sm:$0xff] %vm10130_vm7, %v10076_v0  ;;  %v10074_v44 = vsel %vm10065_vm6, %v9587_v32, %v9890_v60  ;;  %v9590_v48 = vadd.f32 %v14959_v27, %v9589_v63  ;;  %v15057_v14 = vpop.xlane.xlu1 %7567 }
 0xa75   : > { %10139 = vst.msk [vmem:[%s14971_s25 + $0x40] sm:$0xff] %vm10130_vm7, %v10074_v44  ;;  %v10077_v8 = vsel %vm10065_vm6, %v9598_v52, %v9896_v11  ;;  %v15062_v6 = vpop.xlane.xlu0 %7570 }
 0xa76   : > { %10142 = vst.msk [vmem:[%s14971_s25 + $0x58] sm:$0xff] %vm10130_vm7, %v10077_v8  ;;  %v10075_v18 = vsel %vm10065_vm6, %v9590_v48, %v9892_v41 }
 0xa77   : > { %10140 = vst.msk [vmem:[%s14971_s25 + $0x48] sm:$0xff] %vm10130_vm7, %v10075_v18 }
 0xa78   : > { %v9904_v36 = vpop.permute.xlu1 %9903 }
 0xa79   : > { %v9906_v10 = vpop.permute.xlu0 %9905 }
 0xa7c   : > { %v15083_v11 = vpop.xlane.xlu1 %7573 }
 0xa7d   : > { %v15085_v56 = vpop.xlane.xlu0 %7576 }
 0xa80   : > { %v10938_v60 = vpop.f32.mrb[216].mxu0  ;;  %v9908_v29 = vpop.permute.xlu1 %9907 }
 0xa81   : > { %v9611_v45 = vadd.f32 %v10938_v60, %v14959_v27  ;;  %v9602_v17 = vpop.f32.mrb[217].mxu0  ;;  %v9910_v54 = vpop.permute.xlu0 %9909 }
 0xa82   : > { %v9603_v59 = vadd.f32 %v14959_v27, %v9602_v17  ;;  %v10939_v31 = vpop.f32.mrb[218].mxu0 }
 0xa83   : > { %v10080_v24 = vsel %vm10065_vm6, %v9611_v45, %v9902_v22  ;;  %v9614_v41 = vadd.f32 %v10939_v31, %v14959_v27  ;;  %v9605_v2 = vpop.f32.mrb[219].mxu0 }
 0xa84   : > { %9919 = vrot.lane.b32.xlu1 %v7635_v30, %s11750_s14  ;;  %10145 = vst.msk [vmem:[%s14971_s25 + $0x70] sm:$0xff] %vm10130_vm7, %v10080_v24  ;;  %v10078_v57 = vsel %vm10065_vm6, %v9603_v59, %v9898_v55  ;;  %v9606_v39 = vadd.f32 %v14959_v27, %v9605_v2  ;;  %v15608_v2 = vld [vmem:[#allocation15_spill] sm:$0xff] }
 0xa85   : > { %10143 = vst.msk [vmem:[%s14971_s25 + $0x60] sm:$0xff] %vm10130_vm7, %v10078_v57  ;;  %v10081_v46 = vsel %vm10065_vm6, %v9614_v41, %v9904_v36 }
 0xa86   : > { %10146 = vst.msk [vmem:[%s14971_s25 + $0x78] sm:$0xff] %vm10130_vm7, %v10081_v46  ;;  %v10079_v5 = vsel %vm10065_vm6, %v9606_v39, %v9900_v62 }
 0xa87   : > { %9921 = vrot.lane.b32.xlu0 %v7636_v19, %s11750_s14  ;;  %10144 = vst.msk [vmem:[%s14971_s25 + $0x68] sm:$0xff] %vm10130_vm7, %v10079_v5  ;;  %v15609_v19 = vld [vmem:[#allocation14_spill] sm:$0xff]  ;;  %v7637_v5 = vadd.f32 %v14948_v49, %v14876_v4 }
 0xa90   : > { %v10942_v26 = vpop.f32.mrb[220].mxu0 }
 0xa91   : > { %v9627_v58 = vadd.f32 %v10942_v26, %v14959_v27  ;;  %v9618_v32 = vpop.f32.mrb[221].mxu0  ;;  %v7640_v26 = vadd.f32 %v14948_v49, %v14894_v37 }
 0xa92   : > { %v9619_v25 = vadd.f32 %v14959_v27, %v9618_v32  ;;  %v10943_v0 = vpop.f32.mrb[222].mxu0 }
 0xa93   : > { %v10084_v52 = vsel %vm10065_vm6, %v9627_v58, %v9910_v54  ;;  %v9621_v63 = vpop.f32.mrb[223].mxu0  ;;  %v9630_v18 = vadd.f32 %v10943_v0, %v14959_v27  ;;  %v7642_v58 = vadd.f32 %v14948_v49, %v14901_v9 }
 0xa94   : > { %10149 = vst.msk [vmem:[%s14971_s25 + $0x90] sm:$0xff] %vm10130_vm7, %v10084_v52  ;;  %v10082_v55 = vsel %vm10065_vm6, %v9619_v25, %v9906_v10  ;;  %v9622_v44 = vadd.f32 %v14959_v27, %v9621_v63  ;;  %v15105_v60 = vpop.xlane.xlu0 %7582  ;;  %v7638_v10 = vadd.f32 %v14948_v49, %v14889_v53  ;;  %v7644_v53 = vadd.f32 %v14948_v49, %v14906_v38 }
 0xa95   : > { %10147 = vst.msk [vmem:[%s14971_s25 + $0x80] sm:$0xff] %vm10130_vm7, %v10082_v55  ;;  %v7646_v25 = vadd.f32 %v14948_v49, %v14913_v20  ;;  %v7648_v63 = vadd.f32 %v14948_v49, %v14918_v12 }
 0xa96   : > { %v15096_v48 = vpop.xlane.xlu1 %7579  ;;  %v10083_v8 = vsel %vm10065_vm6, %v9622_v44, %v9908_v29 }
 0xa97   : > { %10148 = vst.msk [vmem:[%s14971_s25 + $0x88] sm:$0xff] %vm10130_vm7, %v10083_v8 }
 0xa98   : > { %v9914_v31 = vpop.permute.xlu0 %9913 }
 0xa9a   : > { %v9912_v62 = vpop.permute.xlu1 %9911 }
 0xa9b   : > { %v10085_v22 = vsel %vm10065_vm6, %v9630_v18, %v9912_v62  ;;  %v7650_v18 = vadd.f32 %v14948_v49, %v14932_v15  ;;  %v7656_v15 = vadd.f32 %v14948_v49, %v14998_v47  ;;  %v7662_v47 = vadd.f32 %v14948_v49, %v15055_v1 }
 0xa9c   : > { %10150 = vst.msk [vmem:[%s14971_s25 + $0x98] sm:$0xff] %vm10130_vm7, %v10085_v22  ;;  %v7666_v1 = vadd.f32 %v14948_v49, %v15085_v56  ;;  %v7645_v56 = vadd.f32 %v14948_v49, %v14903_v42  ;;  %v7649_v42 = vadd.f32 %v14948_v49, %v14915_v21 }
 0xaa0   : > { %v10946_v30 = vpop.f32.mrb[224].mxu0 }
 0xaa1   : > { %v9634_v45 = vpop.f32.mrb[225].mxu0  ;;  %v9643_v0 = vadd.f32 %v10946_v30, %v14959_v27  ;;  %v7652_v30 = vadd.f32 %v14948_v49, %v14938_v50 }
 0xaa2   : > { %v9635_v17 = vadd.f32 %v14959_v27, %v9634_v45  ;;  %v15108_v59 = vpop.f32.mrb[226].mxu0  ;;  %v7654_v45 = vadd.f32 %v14948_v49, %v14963_v7  ;;  %v7660_v7 = vadd.f32 %v14948_v49, %v15033_v35 }
 0xaa3   : > { %v9637_v24 = vpop.f32.mrb[227].mxu0 }
 0xaa4   : > { %v10086_v41 = vsel %vm10065_vm6, %v9635_v17, %v9914_v31  ;;  %v9638_v55 = vadd.f32 %v14959_v27, %v9637_v24  ;;  %v15610_v17 = vld [vmem:[#allocation16_spill] sm:$0xff]  ;;  %v7658_v24 = vadd.f32 %v14948_v49, %v15008_v61  ;;  %v7664_v61 = vadd.f32 %v14948_v49, %v15062_v6 }
 0xaa5   : > { %10151 = vst.msk [vmem:[%s14971_s25 + $0xa0] sm:$0xff] %vm10130_vm7, %v10086_v41  ;;  %v7643_v6 = vadd.f32 %v14948_v49, %v14896_v16  ;;  %v7647_v16 = vadd.f32 %v14948_v49, %v14908_v23 }
 0xaa6   : > { %7600 = vadd.xlane.f32.xlu0 %v15608_v2 }
 0xaa8   : > { %7597 = vadd.xlane.f32.xlu1 %v15609_v19  ;;  %v7639_v19 = vadd.f32 %v14948_v49, %v14884_v43 }
 0xab0   : > { %v15115_v36 = vpop.f32.mrb[228].mxu0 }
 0xab1   : > { %v15117_v57 = vpop.f32.mrb[229].mxu0 }
 0xab2   : > { %v15119_v39 = vpop.f32.mrb[230].mxu0 }
 0xab3   : > { %v15121_v46 = vpop.f32.mrb[231].mxu0 }
 0xab9   : > { %9923 = vrot.lane.b32.xlu1 %v7637_v5, %s11750_s14  ;;  %v7641_v5 = vadd.f32 %v14948_v49, %v14891_v3  ;;  %v7668_v3 = vadd.f32 %v14948_v49, %v15105_v60 }
 0xabc   : > { %9925 = vrot.lane.b32.xlu0 %v7638_v10, %s11750_s14 }
 0xac0   : > { %9929 = vrot.lane.b32.xlu0 %v7640_v26, %s11750_s14  ;;  %v15132_v29 = vpop.f32.mrb[232].mxu0 }
 0xac1   : > { %v15136_v32 = vpop.f32.mrb[233].mxu0 }
 0xac2   : > { %v15138_v4 = vpop.f32.mrb[234].mxu0 }
 0xac3   : > { %v15140_v54 = vpop.f32.mrb[235].mxu0 }
 0xac4   : > { %9933 = vrot.lane.b32.xlu0 %v7642_v58, %s11750_s14 }
 0xac8   : > { %9937 = vrot.lane.b32.xlu0 %v7644_v53, %s11750_s14 }
 0xac9   : > { %v7589_v37 = vpop.xlane.xlu0 %7588 }
 0xaca   : > { %v7670_v58 = vadd.f32 %v14948_v49, %v7589_v37  ;;  %v9651_v37 = vadd.f32 %v14959_v27, %v15117_v57 }
 0xacb   : > { %v15148_v9 = vpop.xlane.xlu1 %7585 }
 0xacc   : > { %9941 = vrot.lane.b32.xlu0 %v7646_v25, %s11750_s14 }
 0xacd   : > { %v9918_v52 = vpop.permute.xlu0 %9917 }
 0xace   : > { %v10088_v38 = vsel %vm10065_vm6, %v9643_v0, %v9918_v52 }
 0xacf   : > { %10153 = vst.msk [vmem:[%s14971_s25 + $0xb0] sm:$0xff] %vm10130_vm7, %v10088_v38  ;;  %v9916_v44 = vpop.permute.xlu1 %9915  ;;  %v7651_v38 = vadd.f32 %v14948_v49, %v14935_v33  ;;  %v7657_v33 = vadd.f32 %v14948_v49, %v15004_v28  ;;  %v7663_v28 = vadd.f32 %v14948_v49, %v15057_v14  ;;  %v7669_v14 = vadd.f32 %v14948_v49, %v15148_v9 }
 0xad0   : > { %v10087_v8 = vsel %vm10065_vm6, %v9638_v55, %v9916_v44  ;;  %9945 = vrot.lane.b32.xlu0 %v7648_v63, %s11750_s14  ;;  %v15162_v20 = vpop.f32.mrb[236].mxu0  ;;  %v9646_v63 = vadd.f32 %v15108_v59, %v14959_v27  ;;  %v7653_v59 = vadd.f32 %v14948_v49, %v14945_v13  ;;  %v7659_v13 = vadd.f32 %v14948_v49, %v15031_v51 }
 0xad1   : > { %10152 = vst.msk [vmem:[%s14971_s25 + $0xa8] sm:$0xff] %vm10130_vm7, %v10087_v8  ;;  %v15166_v62 = vpop.f32.mrb[237].mxu0 }
 0xad2   : > { %v15168_v12 = vpop.f32.mrb[238].mxu0 }
 0xad3   : > { %v15170_v22 = vpop.f32.mrb[239].mxu0 }
 0xad4   : > { %9949 = vrot.lane.b32.xlu0 %v7650_v18, %s11750_s14  ;;  %v7655_v18 = vadd.f32 %v14948_v49, %v14989_v40  ;;  %v7661_v40 = vadd.f32 %v14948_v49, %v15041_v34  ;;  %v7667_v34 = vadd.f32 %v14948_v49, %v15096_v48 }
 0xad8   : > { %9953 = vrot.lane.b32.xlu0 %v7652_v30, %s11750_s14 }
 0xadc   : > { %9957 = vrot.lane.b32.xlu0 %v7654_v45, %s11750_s14 }
 0xadd   : > { %7603 = vadd.xlane.f32.xlu1 %v15610_v17 }
 0xae0   : > { %9961 = vrot.lane.b32.xlu0 %v7656_v15, %s11750_s14  ;;  %v15183_v31 = vpop.f32.mrb[240].mxu0 }
 0xae1   : > { %v15187_v50 = vpop.f32.mrb[241].mxu0 }
 0xae2   : > { %v15189_v41 = vpop.f32.mrb[242].mxu0 }
 0xae3   : > { %v15191_v2 = vpop.f32.mrb[243].mxu0 }
 0xae4   : > { %9965 = vrot.lane.b32.xlu0 %v7658_v24, %s11750_s14  ;;  %v7665_v24 = vadd.f32 %v14948_v49, %v15083_v11 }
 0xae8   : > { %9969 = vrot.lane.b32.xlu0 %v7660_v7, %s11750_s14 }
 0xaec   : > { %9973 = vrot.lane.b32.xlu0 %v7662_v47, %s11750_s14 }
 0xaee   : > { %9927 = vrot.lane.b32.xlu1 %v7639_v19, %s11750_s14 }
 0xaf0   : > { %9977 = vrot.lane.b32.xlu0 %v7664_v61, %s11750_s14  ;;  %v15208_v35 = vpop.f32.mrb[244].mxu0 }
 0xaf1   : > { %v15212_v10 = vpop.f32.mrb[245].mxu0 }
 0xaf2   : > { %9931 = vrot.lane.b32.xlu1 %v7641_v5, %s11750_s14  ;;  %v15215_v43 = vpop.f32.mrb[246].mxu0 }
 0xaf3   : > { %v15219_v26 = vpop.f32.mrb[247].mxu0 }
 0xaf4   : > { %9981 = vrot.lane.b32.xlu0 %v7666_v1, %s11750_s14 }
 0xaf6   : > { %9935 = vrot.lane.b32.xlu1 %v7643_v6, %s11750_s14 }
 0xaf8   : > { %9985 = vrot.lane.b32.xlu0 %v7668_v3, %s11750_s14 }
 0xafa   : > { %9939 = vrot.lane.b32.xlu1 %v7645_v56, %s11750_s14  ;;  %v9659_v56 = vadd.f32 %v15115_v36, %v14959_v27 }
 0xafc   : > { %9989 = vrot.lane.b32.xlu0 %v7670_v58, %s11750_s14 }
 0xafe   : > { %v7595_v53 = vpop.xlane.xlu0 %7594  ;;  %9943 = vrot.lane.b32.xlu1 %v7647_v16, %s11750_s14 }
 0xaff   : > { %v7672_v60 = vadd.f32 %v14948_v49, %v7595_v53  ;;  %v9654_v53 = vadd.f32 %v14959_v27, %v15121_v46  ;;  %v9675_v46 = vadd.f32 %v15132_v29, %v14959_v27 }
 0xb00   : > { %v7592_v25 = vpop.xlane.xlu1 %7591  ;;  %v15239_v0 = vpop.f32.mrb[248].mxu0 }
 0xb01   : > { %9993 = vrot.lane.b32.xlu0 %v7672_v60, %s11750_s14  ;;  %v15242_v23 = vpop.f32.mrb[249].mxu0  ;;  %v7671_v11 = vadd.f32 %v14948_v49, %v7592_v25  ;;  %v9667_v25 = vadd.f32 %v14959_v27, %v15136_v32 }
 0xb02   : > { %v9922_v52 = vpop.permute.xlu0 %9921  ;;  %9947 = vrot.lane.b32.xlu1 %v7649_v42, %s11750_s14  ;;  %v15248_v21 = vpop.f32.mrb[250].mxu0 }
 0xb03   : > { %v10090_v55 = vsel %vm10065_vm6, %v9651_v37, %v9922_v52  ;;  %v15254_v57 = vpop.f32.mrb[251].mxu0 }
 0xb04   : > { %10155 = vst.msk [vmem:[%s14971_s25 + $0xc0] sm:$0xff] %vm10130_vm7, %v10090_v55  ;;  %v9920_v44 = vpop.permute.xlu1 %9919 }
 0xb05   : > { %v10089_v8 = vsel %vm10065_vm6, %v9646_v63, %v9920_v44 }
 0xb06   : > { %10154 = vst.msk [vmem:[%s14971_s25 + $0xb8] sm:$0xff] %vm10130_vm7, %v10089_v8  ;;  %9951 = vrot.lane.b32.xlu1 %v7651_v38, %s11750_s14  ;;  %v9683_v38 = vadd.f32 %v14959_v27, %v15166_v62  ;;  %v9699_v62 = vadd.f32 %v14959_v27, %v15187_v50 }
 0xb0a   : > { %9955 = vrot.lane.b32.xlu1 %v7653_v59, %s11750_s14 }
 0xb0e   : > { %9959 = vrot.lane.b32.xlu1 %v7655_v18, %s11750_s14 }
 0xb10   : > { %v15268_v30 = vpop.f32.mrb[252].mxu0 }
 0xb11   : > { %v15270_v45 = vpop.f32.mrb[253].mxu0 }
 0xb12   : > { %9963 = vrot.lane.b32.xlu1 %v7657_v33, %s11750_s14  ;;  %v15273_v17 = vpop.f32.mrb[254].mxu0  ;;  %v9691_v33 = vadd.f32 %v15162_v20, %v14959_v27 }
 0xb13   : > { %v15277_v15 = vpop.f32.mrb[255].mxu0 }
 0xb16   : > { %9967 = vrot.lane.b32.xlu1 %v7659_v13, %s11750_s14 }
 0xb1a   : > { %9971 = vrot.lane.b32.xlu1 %v7661_v40, %s11750_s14 }
 0xb1e   : > { %9975 = vrot.lane.b32.xlu1 %v7663_v28, %s11750_s14 }
 0xb20   : > { %v15288_v7 = vpop.f32.mrb[0].mxu0 }
 0xb21   : > { %v15290_v51 = vpop.f32.mrb[1].mxu0 }
 0xb22   : > { %9979 = vrot.lane.b32.xlu1 %v7665_v24, %s11750_s14  ;;  %v15293_v47 = vpop.f32.mrb[2].mxu0 }
 0xb23   : > { %v15297_v19 = vpop.f32.mrb[3].mxu0 }
 0xb26   : > { %9983 = vrot.lane.b32.xlu1 %v7667_v34, %s11750_s14  ;;  %v9707_v34 = vadd.f32 %v15183_v31, %v14959_v27 }
 0xb2a   : > { %9987 = vrot.lane.b32.xlu1 %v7669_v14, %s11750_s14 }
 0xb2e   : > { %9991 = vrot.lane.b32.xlu1 %v7671_v11, %s11750_s14  ;;  %v9715_v11 = vadd.f32 %v14959_v27, %v15212_v10 }
 0xb30   : > { %v15305_v61 = vpop.f32.mrb[4].mxu0 }
 0xb31   : > { %v15307_v5 = vpop.f32.mrb[5].mxu0 }
 0xb32   : > { %v15309_v1 = vpop.f32.mrb[6].mxu0 }
 0xb33   : > { %v7601_v48 = vpop.xlane.xlu0 %7600  ;;  %v15312_v3 = vpop.f32.mrb[7].mxu0 }
 0xb34   : > { %v7674_v6 = vadd.f32 %v14948_v49, %v7601_v48 }
 0xb35   : > { %v7598_v9 = vpop.xlane.xlu1 %7597 }
 0xb36   : > { %v7673_v58 = vadd.f32 %v14948_v49, %v7598_v9  ;;  %9997 = vrot.lane.b32.xlu0 %v7674_v6, %s11750_s14  ;;  %v9723_v6 = vadd.f32 %v15208_v35, %v14959_v27 }
 0xb37   : > { %v9926_v16 = vpop.permute.xlu0 %9925 }
 0xb38   : > { %v10092_v60 = vsel %vm10065_vm6, %v9659_v56, %v9926_v16  ;;  %9995 = vrot.lane.b32.xlu1 %v7673_v58, %s11750_s14  ;;  %v9731_v56 = vadd.f32 %v14959_v27, %v15242_v23  ;;  %v9739_v16 = vadd.f32 %v15239_v0, %v14959_v27 }
 0xb39   : > { %10157 = vst.msk [vmem:[%s14971_s25 + $0xd0] sm:$0xff] %vm10130_vm7, %v10092_v60  ;;  %v9924_v42 = vpop.permute.xlu1 %9923  ;;  %v9747_v60 = vadd.f32 %v14959_v27, %v15270_v45 }
 0xb3a   : > { %v10091_v36 = vsel %vm10065_vm6, %v9654_v53, %v9924_v42 }
 0xb3b   : > { %10156 = vst.msk [vmem:[%s14971_s25 + $0xc8] sm:$0xff] %vm10130_vm7, %v10091_v36  ;;  %v9930_v37 = vpop.permute.xlu0 %9929 }
 0xb3c   : > { %v10094_v52 = vsel %vm10065_vm6, %v9667_v25, %v9930_v37  ;;  %v9755_v25 = vadd.f32 %v15268_v30, %v14959_v27  ;;  %v9763_v37 = vadd.f32 %v14959_v27, %v15290_v51  ;;  %v9662_v30 = vadd.f32 %v15119_v39, %v14959_v27 }
 0xb3d   : > { %10159 = vst.msk [vmem:[%s14971_s25 + $0xe0] sm:$0xff] %vm10130_vm7, %v10094_v52  ;;  %v9670_v39 = vadd.f32 %v14959_v27, %v15140_v54  ;;  %v9787_v54 = vadd.f32 %v15305_v61, %v14959_v27 }
 0xb3f   : > { %v9934_v63 = vpop.permute.xlu0 %9933 }
 0xb40   : > { %v10096_v55 = vsel %vm10065_vm6, %v9675_v46, %v9934_v63  ;;  %v15337_v32 = vpop.f32.mrb[8].mxu0 }
 0xb41   : > { %10161 = vst.msk [vmem:[%s14971_s25 + $0xf0] sm:$0xff] %vm10130_vm7, %v10096_v55  ;;  %v15341_v44 = vpop.f32.mrb[9].mxu0  ;;  %v9771_v55 = vadd.f32 %v15288_v7, %v14959_v27 }
 0xb42   : > { %v15343_v8 = vpop.f32.mrb[10].mxu0 }
 0xb43   : > { %v9938_v59 = vpop.permute.xlu0 %9937  ;;  %v15346_v29 = vpop.f32.mrb[11].mxu0 }
 0xb44   : > { %v10098_v18 = vsel %vm10065_vm6, %v9683_v38, %v9938_v59 }
 0xb45   : > { %10163 = vst.msk [vmem:[%s14971_s25 + $0x100] sm:$0xff] %vm10130_vm7, %v10098_v18  ;;  %v9779_v18 = vadd.f32 %v14959_v27, %v15307_v5 }
 0xb47   : > { %v9942_v13 = vpop.permute.xlu0 %9941 }
 0xb48   : > { %v10100_v40 = vsel %vm10065_vm6, %v9691_v33, %v9942_v13 }
 0xb49   : > { %10165 = vst.msk [vmem:[%s14971_s25 + $0x110] sm:$0xff] %vm10130_vm7, %v10100_v40 }
 0xb4b   : > { %v9946_v28 = vpop.permute.xlu0 %9945 }
 0xb4c   : > { %v10102_v24 = vsel %vm10065_vm6, %v9699_v62, %v9946_v28  ;;  %v9678_v62 = vadd.f32 %v15138_v4, %v14959_v27  ;;  %v9795_v4 = vadd.f32 %v14959_v27, %v15341_v44  ;;  %v9702_v44 = vadd.f32 %v14959_v27, %v15191_v2 }
 0xb4d   : > { %10167 = vst.msk [vmem:[%s14971_s25 + $0x120] sm:$0xff] %vm10130_vm7, %v10102_v24 }
 0xb4f   : > { %v9950_v14 = vpop.permute.xlu0 %9949 }
 0xb50   : > { %v10104_v20 = vsel %vm10065_vm6, %v9707_v34, %v9950_v14  ;;  %v9686_v14 = vadd.f32 %v14959_v27, %v15170_v22 }
 0xb51   : > { %10169 = vst.msk [vmem:[%s14971_s25 + $0x130] sm:$0xff] %vm10130_vm7, %v10104_v20 }
 0xb53   : > { %v9954_v48 = vpop.permute.xlu0 %9953 }
 0xb54   : > { %v10106_v50 = vsel %vm10065_vm6, %v9715_v11, %v9954_v48 }
 0xb55   : > { %10171 = vst.msk [vmem:[%s14971_s25 + $0x140] sm:$0xff] %vm10130_vm7, %v10106_v50  ;;  %v9694_v50 = vadd.f32 %v15168_v12, %v14959_v27  ;;  %v9710_v12 = vadd.f32 %v15189_v41, %v14959_v27 }
 0xb57   : > { %v9958_v9 = vpop.permute.xlu0 %9957 }
 0xb58   : > { %v10108_v31 = vsel %vm10065_vm6, %v9723_v6, %v9958_v9 }
 0xb59   : > { %10173 = vst.msk [vmem:[%s14971_s25 + $0x150] sm:$0xff] %vm10130_vm7, %v10108_v31 }
 0xb5b   : > { %v9962_v58 = vpop.permute.xlu0 %9961 }
 0xb5c   : > { %v10110_v10 = vsel %vm10065_vm6, %v9731_v56, %v9962_v58 }
 0xb5d   : > { %10175 = vst.msk [vmem:[%s14971_s25 + $0x160] sm:$0xff] %vm10130_vm7, %v10110_v10  ;;  %v9718_v10 = vadd.f32 %v14959_v27, %v15219_v26 }
 0xb5f   : > { %v9966_v53 = vpop.permute.xlu0 %9965 }
 0xb60   : > { %v10112_v35 = vsel %vm10065_vm6, %v9739_v16, %v9966_v53  ;;  %v9726_v53 = vadd.f32 %v15215_v43, %v14959_v27 }
 0xb61   : > { %10177 = vst.msk [vmem:[%s14971_s25 + $0x170] sm:$0xff] %vm10130_vm7, %v10112_v35 }
 0xb63   : > { %v9970_v42 = vpop.permute.xlu0 %9969 }
 0xb64   : > { %v10114_v23 = vsel %vm10065_vm6, %v9747_v60, %v9970_v42  ;;  %v9734_v60 = vadd.f32 %v14959_v27, %v15254_v57 }
 0xb65   : > { %10179 = vst.msk [vmem:[%s14971_s25 + $0x180] sm:$0xff] %vm10130_vm7, %v10114_v23  ;;  %v9742_v23 = vadd.f32 %v15248_v21, %v14959_v27 }
 0xb67   : > { %v9974_v36 = vpop.permute.xlu0 %9973 }
 0xb68   : > { %v10116_v0 = vsel %vm10065_vm6, %v9755_v25, %v9974_v36  ;;  %v9750_v36 = vadd.f32 %v14959_v27, %v15277_v15 }
 0xb69   : > { %10181 = vst.msk [vmem:[%s14971_s25 + $0x190] sm:$0xff] %vm10130_vm7, %v10116_v0 }
 0xb6a   : > { %v7604_v52 = vpop.xlane.xlu1 %7603 }
 0xb6b   : > { %v7675_v45 = vadd.f32 %v14948_v49, %v7604_v52  ;;  %v9978_v46 = vpop.permute.xlu0 %9977 }
 0xb6c   : > { %v10118_v63 = vsel %vm10065_vm6, %v9763_v37, %v9978_v46  ;;  %v9758_v37 = vadd.f32 %v15273_v17, %v14959_v27 }
 0xb6d   : > { %10183 = vst.msk [vmem:[%s14971_s25 + $0x1a0] sm:$0xff] %vm10130_vm7, %v10118_v63  ;;  %9999 = vrot.lane.b32.xlu1 %v7675_v45, %s11750_s14  ;;  %v9766_v45 = vadd.f32 %v14959_v27, %v15297_v19  ;;  %v9774_v63 = vadd.f32 %v15293_v47, %v14959_v27  ;;  %v9782_v19 = vadd.f32 %v14959_v27, %v15312_v3 }
 0xb6e   : > { %v9928_v38 = vpop.permute.xlu1 %9927  ;;  %v9798_v3 = vadd.f32 %v14959_v27, %v15346_v29 }
 0xb6f   : > { %v10093_v51 = vsel %vm10065_vm6, %v9662_v30, %v9928_v38  ;;  %v9982_v59 = vpop.permute.xlu0 %9981  ;;  %v9803_v30 = vadd.f32 %v15337_v32, %v14959_v27  ;;  %v9790_v32 = vadd.f32 %v15309_v1, %v14959_v27 }
 0xb70   : > { %10158 = vst.msk [vmem:[%s14971_s25 + $0xd8] sm:$0xff] %vm10130_vm7, %v10093_v51  ;;  %v10120_v49 = vsel %vm10065_vm6, %v9771_v55, %v9982_v59 }
 0xb71   : > { %10185 = vst.msk [vmem:[%s14971_s25 + $0x1b0] sm:$0xff] %vm10130_vm7, %v10120_v49 }
 0xb72   : > { %v9932_v33 = vpop.permute.xlu1 %9931 }
 0xb73   : > { %v10095_v7 = vsel %vm10065_vm6, %v9670_v39, %v9932_v33  ;;  %v9986_v13 = vpop.permute.xlu0 %9985 }
 0xb74   : > { %10160 = vst.msk [vmem:[%s14971_s25 + $0xe8] sm:$0xff] %vm10130_vm7, %v10095_v7  ;;  %v10122_v40 = vsel %vm10065_vm6, %v9779_v18, %v9986_v13  ;;  %v9806_v7 = vadd.f32 %v15343_v8, %v14959_v27 }
 0xb75   : > { %10187 = vst.msk [vmem:[%s14971_s25 + $0x1c0] sm:$0xff] %vm10130_vm7, %v10122_v40 }
 0xb76   : > { %v9936_v28 = vpop.permute.xlu1 %9935 }
 0xb77   : > { %v10097_v5 = vsel %vm10065_vm6, %v9678_v62, %v9936_v28  ;;  %v9990_v24 = vpop.permute.xlu0 %9989 }
 0xb78   : > { %10162 = vst.msk [vmem:[%s14971_s25 + $0xf8] sm:$0xff] %vm10130_vm7, %v10097_v5  ;;  %v10124_v34 = vsel %vm10065_vm6, %v9787_v54, %v9990_v24 }
 0xb79   : > { %10189 = vst.msk [vmem:[%s14971_s25 + $0x1d0] sm:$0xff] %vm10130_vm7, %v10124_v34 }
 0xb7a   : > { %v9940_v20 = vpop.permute.xlu1 %9939 }
 0xb7b   : > { %v10099_v61 = vsel %vm10065_vm6, %v9686_v14, %v9940_v20  ;;  %v9994_v11 = vpop.permute.xlu0 %9993 }
 0xb7c   : > { %10164 = vst.msk [vmem:[%s14971_s25 + $0x108] sm:$0xff] %vm10130_vm7, %v10099_v61  ;;  %v10126_v48 = vsel %vm10065_vm6, %v9795_v4, %v9994_v11 }
 0xb7d   : > { %10191 = vst.msk [vmem:[%s14971_s25 + $0x1e0] sm:$0xff] %vm10130_vm7, %v10126_v48 }
 0xb7e   : > { %v9944_v22 = vpop.permute.xlu1 %9943 }
 0xb7f   : > { %v10101_v6 = vsel %vm10065_vm6, %v9694_v50, %v9944_v22 }
 0xb80   : > { %10166 = vst.msk [vmem:[%s14971_s25 + $0x118] sm:$0xff] %vm10130_vm7, %v10101_v6 }
 0xb82   : > { %v9948_v9 = vpop.permute.xlu1 %9947 }
 0xb83   : > { %v10103_v31 = vsel %vm10065_vm6, %v9702_v44, %v9948_v9 }
 0xb84   : > { %10168 = vst.msk [vmem:[%s14971_s25 + $0x128] sm:$0xff] %vm10130_vm7, %v10103_v31 }
 0xb86   : > { %v9952_v56 = vpop.permute.xlu1 %9951 }
 0xb87   : > { %v10105_v58 = vsel %vm10065_vm6, %v9710_v12, %v9952_v56 }
 0xb88   : > { %10170 = vst.msk [vmem:[%s14971_s25 + $0x138] sm:$0xff] %vm10130_vm7, %v10105_v58 }
 0xb8a   : > { %v9956_v16 = vpop.permute.xlu1 %9955 }
 0xb8b   : > { %v10107_v2 = vsel %vm10065_vm6, %v9718_v10, %v9956_v16 }
 0xb8c   : > { %10172 = vst.msk [vmem:[%s14971_s25 + $0x148] sm:$0xff] %vm10130_vm7, %v10107_v2 }
 0xb8e   : > { %v9960_v35 = vpop.permute.xlu1 %9959 }
 0xb8f   : > { %v10109_v41 = vsel %vm10065_vm6, %v9726_v53, %v9960_v35 }
 0xb90   : > { %10174 = vst.msk [vmem:[%s14971_s25 + $0x158] sm:$0xff] %vm10130_vm7, %v10109_v41 }
 0xb92   : > { %v9964_v42 = vpop.permute.xlu1 %9963 }
 0xb93   : > { %v10111_v26 = vsel %vm10065_vm6, %v9734_v60, %v9964_v42 }
 0xb94   : > { %10176 = vst.msk [vmem:[%s14971_s25 + $0x168] sm:$0xff] %vm10130_vm7, %v10111_v26 }
 0xb96   : > { %v9968_v25 = vpop.permute.xlu1 %9967 }
 0xb97   : > { %v10113_v43 = vsel %vm10065_vm6, %v9742_v23, %v9968_v25 }
 0xb98   : > { %10178 = vst.msk [vmem:[%s14971_s25 + $0x178] sm:$0xff] %vm10130_vm7, %v10113_v43 }
 0xb9a   : > { %v9972_v0 = vpop.permute.xlu1 %9971 }
 0xb9b   : > { %v10115_v57 = vsel %vm10065_vm6, %v9750_v36, %v9972_v0 }
 0xb9c   : > { %10180 = vst.msk [vmem:[%s14971_s25 + $0x188] sm:$0xff] %vm10130_vm7, %v10115_v57 }
 0xb9e   : > { %v9976_v52 = vpop.permute.xlu1 %9975 }
 0xb9f   : > { %v10117_v21 = vsel %vm10065_vm6, %v9758_v37, %v9976_v52 }
 0xba0   : > { %10182 = vst.msk [vmem:[%s14971_s25 + $0x198] sm:$0xff] %vm10130_vm7, %v10117_v21 }
 0xba2   : > { %v9980_v15 = vpop.permute.xlu1 %9979 }
 0xba3   : > { %v10119_v46 = vsel %vm10065_vm6, %v9766_v45, %v9980_v15 }
 0xba4   : > { %10184 = vst.msk [vmem:[%s14971_s25 + $0x1a8] sm:$0xff] %vm10130_vm7, %v10119_v46 }
 0xba6   : > { %v9984_v17 = vpop.permute.xlu1 %9983 }
 0xba7   : > { %v10121_v55 = vsel %vm10065_vm6, %v9774_v63, %v9984_v17 }
 0xba8   : > { %10186 = vst.msk [vmem:[%s14971_s25 + $0x1b8] sm:$0xff] %vm10130_vm7, %v10121_v55  ;;  %v9998_v38 = vpop.permute.xlu0 %9997 }
 0xba9   : > { %v10128_v51 = vsel %vm10065_vm6, %v9803_v30, %v9998_v38 }
 0xbaa   : > { %10193 = vst.msk [vmem:[%s14971_s25 + $0x1f0] sm:$0xff] %vm10130_vm7, %v10128_v51  ;;  %v9988_v59 = vpop.permute.xlu1 %9987 }
 0xbab   : > { %v10123_v47 = vsel %vm10065_vm6, %v9782_v19, %v9988_v59 }
 0xbac   : > { %10188 = vst.msk [vmem:[%s14971_s25 + $0x1c8] sm:$0xff] %vm10130_vm7, %v10123_v47 }
 0xbae   : > { %v9992_v49 = vpop.permute.xlu1 %9991 }
 0xbaf   : > { %v10125_v39 = vsel %vm10065_vm6, %v9790_v32, %v9992_v49 }
 0xbb0   : > { %10190 = vst.msk [vmem:[%s14971_s25 + $0x1d8] sm:$0xff] %vm10130_vm7, %v10125_v39 }
 0xbb2   : > { %v9996_v18 = vpop.permute.xlu1 %9995 }
 0xbb3   : > { %v10127_v33 = vsel %vm10065_vm6, %v9798_v3, %v9996_v18 }
 0xbb4   : > { %10192 = vst.msk [vmem:[%s14971_s25 + $0x1e8] sm:$0xff] %vm10130_vm7, %v10127_v33 }
 0xbdf   : > { %v10000_v13 = vpop.permute.xlu1 %9999 }
 0xbe0   : > { %v10129_v40 = vsel %vm10065_vm6, %v9806_v7, %v10000_v13 }
 0xbe1   : > { %10194 = vst.msk [vmem:[%s14971_s25 + $0x1f8] sm:$0xff] %vm10130_vm7, %v10129_v40 }
 0xbe2 PF: > { %s26_s27 = sadd.s32 1, %s11743_s27  }
 0xbe3   : > { %p23_p3 = scmp.ge.s32.totalorder %s26_s27, 4  }
 0xbe5   :  { %25 = sbr.rel (!%p23_p3) target bundleno = 4 (0x4), region = 125 }
 0xbec   :  { %10217 = vsyncpa [#allocation4], 1 }
 0xbed   :  { %10219 = vsyncpa [#allocation4 + $0x1], 1 }

</bundles_post_ra>
